<compile_context>
chip_gen: v5e
topology: v5e:2x2
jax: 0.10.0
libtpu: 0.0.40
codegen_flags: <defaults>
</compile_context>

<pallas_src>
import functools

import jax
import jax.numpy as jnp
import numpy as np
from jax import lax
from jax.experimental import pallas as pl
from jax.experimental.pallas import tpu as pltpu


def _roll_lanes(v, offset, length):
    """out[..., q] = v[..., (q + offset) % length]  (in-register lane rotate, XLU).

    pltpu.roll needs a non-negative axis and shift, so the lane axis is passed
    explicitly and the shift is reduced mod `length`.  Circular wrap-around can
    only ever contaminate halo positions, which are zero-gated, masked or sliced
    off downstream, so rotate semantics are safe here.
    """
    if offset % length == 0:
        return v
    return pltpu.roll(v, shift=(-offset) % length, axis=v.ndim - 1)


def _encoder_block_kernel(x_ref, mask_ref, wdw_ref, pw_ref, pwb_ref,
                          w1_ref, c1b_ref, w2_ref, c2b_ref,
                          out_ref, xs_ref, as_ref, hs_ref,
                          *, NC, NHID, WP, PP):
    f32 = jnp.float32
    hi = jax.lax.Precision.HIGHEST
    x = x_ref[...]                                        # (NC, PP); halo lanes are 0

    # ---------------- stage 1: SpatialAttention ----------------
    # Depthwise 11x11 (pad 5, per-channel weights), factored dx-then-dy:
    #   z = sum_dy roll_dy( Wdw[dy-block] @ stack_dx(roll_dx(x)) )
    # 10 dx rolls + ONE block-diagonal MXU matmul + 10 dy rolls; no per-tap
    # weight broadcasts and no VPU FMAs in this stage.
    for i in range(11):                                   # dx = i - 5
        xs_ref[i * NC:(i + 1) * NC, :] = _roll_lanes(x, i - 5, PP)
    zall = jnp.dot(wdw_ref[...], xs_ref[...],
                   preferred_element_type=f32, precision=hi)      # (11*NC, PP)
    z = zall[5 * NC:6 * NC, :]                            # dy = 0 block (no roll)
    for j in range(11):                                   # dy = j - 5
        if j != 5:
            z = z + _roll_lanes(zall[j * NC:(j + 1) * NC, :], (j - 5) * WP, PP)

    # Pointwise 1x1 (+bias) on the MXU, then sigmoid gate.
    zp = jnp.dot(pw_ref[...], z, preferred_element_type=f32, precision=hi)
    a = jax.nn.sigmoid(zp + pwb_ref[...]) * x             # halo stays exactly zero

    # ---------------- stage 2: InvertedBottleneck ----------------
    # conv1 3x3 (C -> HID, pad 1): 9 rolled copies stacked -> one matmul, K = 9*NC.
    for t in range(9):
        off = (t // 3 - 1) * WP + (t % 3 - 1)
        as_ref[t * NC:(t + 1) * NC, :] = _roll_lanes(a, off, PP)
    h = jnp.dot(w1_ref[...], as_ref[...],
                preferred_element_type=f32, precision=hi) + c1b_ref[...]
    h = h * jax.nn.sigmoid(h)                             # SiLU
    h = h * mask_ref[...]                                 # re-zero halo == zero padding

    # conv2 3x3 (HID -> C, pad 1): 9 rolled copies stacked -> one matmul, K = 9*NHID.
    for t in range(9):
        off = (t // 3 - 1) * WP + (t % 3 - 1)
        hs_ref[t * NHID:(t + 1) * NHID, :] = _roll_lanes(h, off, PP)
    z2 = jnp.dot(w2_ref[...], hs_ref[...],
                 preferred_element_type=f32, precision=hi) + c2b_ref[...]

    # ---------------- residual ----------------
    out_ref[...] = x + z2                                 # lane-dense full-width store


def _pack_params(params, N, C, HID):
    """Block-diagonalise per image and flatten conv taps into the K dimension."""
    NC = N * C
    eyeN = jnp.eye(N, dtype=jnp.float32)
    eyeNC = jnp.eye(NC, dtype=jnp.float32)

    # Depthwise: Wdw[dy*NC + r, dx*NC + r] = dw_w[r % C, dy*11 + dx]
    dw = params["dw_w"].reshape(C, 11, 11).astype(jnp.float32)    # [c, dy, dx]
    dw_nc = jnp.tile(dw, (N, 1, 1))                               # [n*C+c, dy, dx]
    blk = jnp.transpose(dw_nc, (1, 2, 0))[..., None] * eyeNC      # [dy, dx, r, s]
    wdw = blk.transpose(0, 2, 1, 3).reshape(11 * NC, 11 * NC)     # [dy*NC+r, dx*NC+s]

    pw = jnp.kron(eyeN, params["pw_w"].astype(jnp.float32))       # (NC, NC)
    pwb = jnp.tile(params["pw_b"].astype(jnp.float32), (N, 1))    # (NC, 1)

    w1 = jnp.concatenate(
        [jnp.kron(eyeN, params["c1_w"][t].astype(jnp.float32)) for t in range(9)],
        axis=1)                                                   # (N*HID, 9*NC)
    c1b = jnp.tile(params["c1_b"].astype(jnp.float32), (N, 1))    # (N*HID, 1)
    w2 = jnp.concatenate(
        [jnp.kron(eyeN, params["c2_w"][t].astype(jnp.float32)) for t in range(9)],
        axis=1)                                                   # (NC, 9*N*HID)
    c2b = jnp.tile(params["c2_b"].astype(jnp.float32), (N, 1))    # (NC, 1)
    return wdw, pw, pwb, w1, c1b, w2, c2b


def encoder_block(x, params):
    """x: NCHW float32 [N, C, H, W]; returns NCHW float32 (EncoderBlock.forward)."""
    N, C, H, W = x.shape
    HID = params["c1_b"].shape[0]
    NC, NHID = N * C, N * HID

    # Halo-padded, lane-dense geometry (halo >= 5 for the 11x11 depthwise,
    # HP*WP a multiple of 128 so every live tensor occupies full lane tiles).
    XOFF = 8
    WP = W + 2 * XOFF                  # 32
    YOFF = 5
    HP = H + YOFF + 5                  # 26
    while (HP * WP) % 128:
        HP += 1                        # -> 28, PP = 896 = 7 lane tiles
    PP = HP * WP

    # One-off layout plumbing in XLA: zero-pad and pack batch into sublanes.
    xp = jnp.pad(x.astype(jnp.float32),
                 ((0, 0), (0, 0), (YOFF, HP - H - YOFF), (XOFF, WP - W - XOFF)))
    xf = xp.reshape(NC, PP)

    # Interior (non-halo) mask, precomputed once and passed in.
    mask = jnp.zeros((HP, WP), jnp.float32)
    mask = mask.at[YOFF:YOFF + H, XOFF:XOFF + W].set(1.0).reshape(1, PP)

    wdw, pw, pwb, w1, c1b, w2, c2b = _pack_params(params, N, C, HID)

    kernel = functools.partial(_encoder_block_kernel,
                               NC=NC, NHID=NHID, WP=WP, PP=PP)

    cost = pl.CostEstimate(
        flops=2 * PP * ((11 * NC) * (11 * NC) + NC * NC
                        + NHID * (9 * NC) + NC * (9 * NHID)),
        transcendentals=2 * PP * (NC + NHID),
        bytes_accessed=4 * (2 * NC * PP + (11 * NC) ** 2 + NC * NC
                            + NHID * 9 * NC + NC * 9 * NHID + PP),
    )

    def full(shape):
        return pl.BlockSpec(shape, lambda i, _s=shape: (0,) * len(_s))

    out_flat = pl.pallas_call(
        kernel,
        grid=(1,),   # both images packed into one program -> full vregs, no pipeline overhead
        out_shape=jax.ShapeDtypeStruct((NC, PP), jnp.float32),
        in_specs=[
            full((NC, PP)),             # x, batch packed into sublanes
            full((1, PP)),              # interior mask
            full((11 * NC, 11 * NC)),   # depthwise: block-diag, taps stacked
            full((NC, NC)),             # pointwise: block-diag per image
            full((NC, 1)),              # pointwise bias
            full((NHID, 9 * NC)),       # conv1: block-diag per image, 9 taps in K
            full((NHID, 1)),            # conv1 bias
            full((NC, 9 * NHID)),       # conv2: block-diag per image, 9 taps in K
            full((NC, 1)),              # conv2 bias
        ],
        out_specs=full((NC, PP)),
        scratch_shapes=[
            pltpu.VMEM((11 * NC, PP), jnp.float32),    # stacked dx-rolled x
            pltpu.VMEM((9 * NC, PP), jnp.float32),     # stacked 3x3 taps of a
            pltpu.VMEM((9 * NHID, PP), jnp.float32),   # stacked 3x3 taps of h
        ],
        cost_estimate=cost,
    )(xf, mask, wdw, pw, pwb, w1, c1b, w2, c2b)

    # Drop the halo, unpack batch, return NCHW.
    return out_flat.reshape(N, C, HP, WP)[:, :, YOFF:YOFF + H, XOFF:XOFF + W]


# ---------------- pure-JAX reference (for correctness check) ----------------
def _conv_nchw(x, w_oihw, b, padding, groups=1):
    y = lax.conv_general_dilated(
        x, w_oihw, window_strides=(1, 1),
        padding=((padding, padding), (padding, padding)),
        dimension_numbers=("NCHW", "OIHW", "NCHW"),
        feature_group_count=groups,
        precision=lax.Precision.HIGHEST)
    if b is not None:
        y = y + b.reshape(1, -1, 1, 1)
    return y


def encoder_block_reference(x, p):
    N, C, H, W = x.shape
    HID = p["c1_b"].shape[0]
    z = _conv_nchw(x, p["dw_w"].reshape(C, 1, 11, 11), None, 5, groups=C)
    z = _conv_nchw(z, p["pw_w"].reshape(C, C, 1, 1), p["pw_b"].reshape(C), 0)
    a = jax.nn.sigmoid(z) * x
    w1 = p["c1_w"].reshape(3, 3, HID, C).transpose(2, 3, 0, 1)      # OIHW
    h = _conv_nchw(a, w1, p["c1_b"].reshape(HID), 1)
    h = h * jax.nn.sigmoid(h)
    w2 = p["c2_w"].reshape(3, 3, C, HID).transpose(2, 3, 0, 1)      # OIHW
    z2 = _conv_nchw(h, w2, p["c2_b"].reshape(C), 1)
    return x + z2


if __name__ == "__main__":
    N, C, H, W = 2, 4, 16, 16
    hidden_ratio = 2
    HID = hidden_ratio * C

    key = jax.random.PRNGKey(0)
    ks = jax.random.split(key, 8)
    params = {
        # Kernel-friendly weight layouts (taps flattened, channel-major).
        "dw_w": 0.10 * jax.random.normal(ks[0], (C, 121), jnp.float32),     # [c, ky*11+kx]
        "pw_w": 0.30 * jax.random.normal(ks[1], (C, C), jnp.float32),       # [cout, cin]
        "pw_b": 0.10 * jax.random.normal(ks[2], (C, 1), jnp.float32),
        "c1_w": 0.20 * jax.random.normal(ks[3], (9, HID, C), jnp.float32),  # [ky*3+kx, cout, cin]
        "c1_b": 0.10 * jax.random.normal(ks[4], (HID, 1), jnp.float32),
        "c2_w": 0.20 * jax.random.normal(ks[5], (9, C, HID), jnp.float32),
        "c2_b": 0.10 * jax.random.normal(ks[6], (C, 1), jnp.float32),
    }
    # NCHW input, matching the PyTorch module's [2, 4, 16, 16].
    x = jax.random.normal(ks[7], (N, C, H, W), jnp.float32)

    out = jax.block_until_ready(jax.jit(encoder_block)(x, params))
    ref = jax.block_until_ready(encoder_block_reference(x, params))
    np.testing.assert_allclose(np.asarray(out), np.asarray(ref), rtol=2e-3, atol=2e-3)

    print("KERNEL_OK")
</pallas_src>

<mosaic_0001>
module attributes {stable_mosaic.version = 11 : i64} {
  func.func @_encoder_block_kernel(%arg0: i32, %arg1: memref<8x896xf32, #tpu.memory_space<vmem>>, %arg2: memref<1x896xf32, #tpu.memory_space<vmem>>, %arg3: memref<88x88xf32, #tpu.memory_space<vmem>>, %arg4: memref<8x8xf32, #tpu.memory_space<vmem>>, %arg5: memref<8x1xf32, #tpu.memory_space<vmem>>, %arg6: memref<16x72xf32, #tpu.memory_space<vmem>>, %arg7: memref<16x1xf32, #tpu.memory_space<vmem>>, %arg8: memref<8x144xf32, #tpu.memory_space<vmem>>, %arg9: memref<8x1xf32, #tpu.memory_space<vmem>>, %arg10: memref<8x896xf32, #tpu.memory_space<vmem>>, %arg11: memref<88x896xf32, #tpu.memory_space<vmem>>, %arg12: memref<72x896xf32, #tpu.memory_space<vmem>>, %arg13: memref<144x896xf32, #tpu.memory_space<vmem>>) attributes {dimension_semantics = [#tpu.dimension_semantics<arbitrary>], iteration_bounds = array<i64: 1>, scalar_prefetch = 0 : i64, scratch_operands = 3 : i64, tpu.core_type = #tpu.core_type<tc>, window_params = [{pipeline_mode = #tpu.pipeline_mode<synchronous>, transform_indices = @transform_0, window_bounds = array<i64: 8, 896>}, {pipeline_mode = #tpu.pipeline_mode<synchronous>, transform_indices = @transform_1, window_bounds = array<i64: 1, 896>}, {pipeline_mode = #tpu.pipeline_mode<synchronous>, transform_indices = @transform_2, window_bounds = array<i64: 88, 88>}, {pipeline_mode = #tpu.pipeline_mode<synchronous>, transform_indices = @transform_3, window_bounds = array<i64: 8, 8>}, {pipeline_mode = #tpu.pipeline_mode<synchronous>, transform_indices = @transform_4, window_bounds = array<i64: 8, 1>}, {pipeline_mode = #tpu.pipeline_mode<synchronous>, transform_indices = @transform_5, window_bounds = array<i64: 16, 72>}, {pipeline_mode = #tpu.pipeline_mode<synchronous>, transform_indices = @transform_6, window_bounds = array<i64: 16, 1>}, {pipeline_mode = #tpu.pipeline_mode<synchronous>, transform_indices = @transform_7, window_bounds = array<i64: 8, 144>}, {pipeline_mode = #tpu.pipeline_mode<synchronous>, transform_indices = @transform_8, window_bounds = array<i64: 8, 1>}, {pipeline_mode = #tpu.pipeline_mode<synchronous>, transform_indices = @transform_9, window_bounds = array<i64: 8, 896>}]} {
    %c0 = arith.constant 0 : index
    %c0_0 = arith.constant 0 : index
    %0 = vector.load %arg1[%c0, %c0_0] : memref<8x896xf32, #tpu.memory_space<vmem>>, vector<8x896xf32>
    %c5_i32 = arith.constant 5 : i32
    %1 = tpu.dynamic_rotate %0 by %c5_i32 dim 1 : vector<8x896xf32>, i32 -> vector<8x896xf32>
    %c0_1 = arith.constant 0 : index
    %c0_2 = arith.constant 0 : index
    %2 = vector.load %arg11[%c0_1, %c0_2] : memref<88x896xf32, #tpu.memory_space<vmem>>, vector<8x896xf32>
    tpu.vector_store %arg11[%c0_1, %c0_2], %1 {strides = array<i32>} : memref<88x896xf32, #tpu.memory_space<vmem>>, vector<8x896xf32>,
    %c4_i32 = arith.constant 4 : i32
    %3 = tpu.dynamic_rotate %0 by %c4_i32 dim 1 : vector<8x896xf32>, i32 -> vector<8x896xf32>
    %c8 = arith.constant 8 : index
    %c0_3 = arith.constant 0 : index
    %4 = vector.load %arg11[%c8, %c0_3] : memref<88x896xf32, #tpu.memory_space<vmem>>, vector<8x896xf32>
    tpu.vector_store %arg11[%c8, %c0_3], %3 {strides = array<i32>} : memref<88x896xf32, #tpu.memory_space<vmem>>, vector<8x896xf32>,
    %c3_i32 = arith.constant 3 : i32
    %5 = tpu.dynamic_rotate %0 by %c3_i32 dim 1 : vector<8x896xf32>, i32 -> vector<8x896xf32>
    %c16 = arith.constant 16 : index
    %c0_4 = arith.constant 0 : index
    %6 = vector.load %arg11[%c16, %c0_4] : memref<88x896xf32, #tpu.memory_space<vmem>>, vector<8x896xf32>
    tpu.vector_store %arg11[%c16, %c0_4], %5 {strides = array<i32>} : memref<88x896xf32, #tpu.memory_space<vmem>>, vector<8x896xf32>,
    %c2_i32 = arith.constant 2 : i32
    %7 = tpu.dynamic_rotate %0 by %c2_i32 dim 1 : vector<8x896xf32>, i32 -> vector<8x896xf32>
    %c24 = arith.constant 24 : index
    %c0_5 = arith.constant 0 : index
    %8 = vector.load %arg11[%c24, %c0_5] : memref<88x896xf32, #tpu.memory_space<vmem>>, vector<8x896xf32>
    tpu.vector_store %arg11[%c24, %c0_5], %7 {strides = array<i32>} : memref<88x896xf32, #tpu.memory_space<vmem>>, vector<8x896xf32>,
    %c1_i32 = arith.constant 1 : i32
    %9 = tpu.dynamic_rotate %0 by %c1_i32 dim 1 : vector<8x896xf32>, i32 -> vector<8x896xf32>
    %c32 = arith.constant 32 : index
    %c0_6 = arith.constant 0 : index
    %10 = vector.load %arg11[%c32, %c0_6] : memref<88x896xf32, #tpu.memory_space<vmem>>, vector<8x896xf32>
    tpu.vector_store %arg11[%c32, %c0_6], %9 {strides = array<i32>} : memref<88x896xf32, #tpu.memory_space<vmem>>, vector<8x896xf32>,
    %c40 = arith.constant 40 : index
    %c0_7 = arith.constant 0 : index
    %11 = vector.load %arg11[%c40, %c0_7] : memref<88x896xf32, #tpu.memory_space<vmem>>, vector<8x896xf32>
    tpu.vector_store %arg11[%c40, %c0_7], %0 {strides = array<i32>} : memref<88x896xf32, #tpu.memory_space<vmem>>, vector<8x896xf32>,
    %c895_i32 = arith.constant 895 : i32
    %12 = tpu.dynamic_rotate %0 by %c895_i32 dim 1 : vector<8x896xf32>, i32 -> vector<8x896xf32>
    %c48 = arith.constant 48 : index
    %c0_8 = arith.constant 0 : index
    %13 = vector.load %arg11[%c48, %c0_8] : memref<88x896xf32, #tpu.memory_space<vmem>>, vector<8x896xf32>
    tpu.vector_store %arg11[%c48, %c0_8], %12 {strides = array<i32>} : memref<88x896xf32, #tpu.memory_space<vmem>>, vector<8x896xf32>,
    %c894_i32 = arith.constant 894 : i32
    %14 = tpu.dynamic_rotate %0 by %c894_i32 dim 1 : vector<8x896xf32>, i32 -> vector<8x896xf32>
    %c56 = arith.constant 56 : index
    %c0_9 = arith.constant 0 : index
    %15 = vector.load %arg11[%c56, %c0_9] : memref<88x896xf32, #tpu.memory_space<vmem>>, vector<8x896xf32>
    tpu.vector_store %arg11[%c56, %c0_9], %14 {strides = array<i32>} : memref<88x896xf32, #tpu.memory_space<vmem>>, vector<8x896xf32>,
    %c893_i32 = arith.constant 893 : i32
    %16 = tpu.dynamic_rotate %0 by %c893_i32 dim 1 : vector<8x896xf32>, i32 -> vector<8x896xf32>
    %c64 = arith.constant 64 : index
    %c0_10 = arith.constant 0 : index
    %17 = vector.load %arg11[%c64, %c0_10] : memref<88x896xf32, #tpu.memory_space<vmem>>, vector<8x896xf32>
    tpu.vector_store %arg11[%c64, %c0_10], %16 {strides = array<i32>} : memref<88x896xf32, #tpu.memory_space<vmem>>, vector<8x896xf32>,
    %c892_i32 = arith.constant 892 : i32
    %18 = tpu.dynamic_rotate %0 by %c892_i32 dim 1 : vector<8x896xf32>, i32 -> vector<8x896xf32>
    %c72 = arith.constant 72 : index
    %c0_11 = arith.constant 0 : index
    %19 = vector.load %arg11[%c72, %c0_11] : memref<88x896xf32, #tpu.memory_space<vmem>>, vector<8x896xf32>
    tpu.vector_store %arg11[%c72, %c0_11], %18 {strides = array<i32>} : memref<88x896xf32, #tpu.memory_space<vmem>>, vector<8x896xf32>,
    %c891_i32 = arith.constant 891 : i32
    %20 = tpu.dynamic_rotate %0 by %c891_i32 dim 1 : vector<8x896xf32>, i32 -> vector<8x896xf32>
    %c80 = arith.constant 80 : index
    %c0_12 = arith.constant 0 : index
    %21 = vector.load %arg11[%c80, %c0_12] : memref<88x896xf32, #tpu.memory_space<vmem>>, vector<8x896xf32>
    tpu.vector_store %arg11[%c80, %c0_12], %20 {strides = array<i32>} : memref<88x896xf32, #tpu.memory_space<vmem>>, vector<8x896xf32>,
    %c0_13 = arith.constant 0 : index
    %c0_14 = arith.constant 0 : index
    %22 = vector.load %arg3[%c0_13, %c0_14] : memref<88x88xf32, #tpu.memory_space<vmem>>, vector<88x88xf32>
    %c0_15 = arith.constant 0 : index
    %c0_16 = arith.constant 0 : index
    %23 = vector.load %arg11[%c0_15, %c0_16] : memref<88x896xf32, #tpu.memory_space<vmem>>, vector<88x896xf32>
    %cst = arith.constant dense<0.000000e+00> : vector<88x896xf32>
    %24 = tpu.matmul %22, %23, %cst {dimension_numbers = #tpu.dot_dimension_numbers<[1], [0], [0], [1], [0, 0, 1, 1], [], []>, precision = #tpu.contract_precision<fp32>} : vector<88x88xf32>, vector<88x896xf32>, vector<88x896xf32> -> vector<88x896xf32>
    %25 = vector.extract_strided_slice %24 {offsets = [40, 0], sizes = [8, 896], strides = [1, 1]} : vector<88x896xf32> to vector<8x896xf32>
    %26 = vector.extract_strided_slice %24 {offsets = [0, 0], sizes = [8, 896], strides = [1, 1]} : vector<88x896xf32> to vector<8x896xf32>
    %c160_i32 = arith.constant 160 : i32
    %27 = tpu.dynamic_rotate %26 by %c160_i32 dim 1 : vector<8x896xf32>, i32 -> vector<8x896xf32>
    %28 = arith.addf %25, %27 : vector<8x896xf32>
    %29 = vector.extract_strided_slice %24 {offsets = [8, 0], sizes = [8, 896], strides = [1, 1]} : vector<88x896xf32> to vector<8x896xf32>
    %c128_i32 = arith.constant 128 : i32
    %30 = tpu.dynamic_rotate %29 by %c128_i32 dim 1 : vector<8x896xf32>, i32 -> vector<8x896xf32>
    %31 = arith.addf %28, %30 : vector<8x896xf32>
    %32 = vector.extract_strided_slice %24 {offsets = [16, 0], sizes = [8, 896], strides = [1, 1]} : vector<88x896xf32> to vector<8x896xf32>
    %c96_i32 = arith.constant 96 : i32
    %33 = tpu.dynamic_rotate %32 by %c96_i32 dim 1 : vector<8x896xf32>, i32 -> vector<8x896xf32>
    %34 = arith.addf %31, %33 : vector<8x896xf32>
    %35 = vector.extract_strided_slice %24 {offsets = [24, 0], sizes = [8, 896], strides = [1, 1]} : vector<88x896xf32> to vector<8x896xf32>
    %c64_i32 = arith.constant 64 : i32
    %36 = tpu.dynamic_rotate %35 by %c64_i32 dim 1 : vector<8x896xf32>, i32 -> vector<8x896xf32>
    %37 = arith.addf %34, %36 : vector<8x896xf32>
    %38 = vector.extract_strided_slice %24 {offsets = [32, 0], sizes = [8, 896], strides = [1, 1]} : vector<88x896xf32> to vector<8x896xf32>
    %c32_i32 = arith.constant 32 : i32
    %39 = tpu.dynamic_rotate %38 by %c32_i32 dim 1 : vector<8x896xf32>, i32 -> vector<8x896xf32>
    %40 = arith.addf %37, %39 : vector<8x896xf32>
    %41 = vector.extract_strided_slice %24 {offsets = [48, 0], sizes = [8, 896], strides = [1, 1]} : vector<88x896xf32> to vector<8x896xf32>
    %c864_i32 = arith.constant 864 : i32
    %42 = tpu.dynamic_rotate %41 by %c864_i32 dim 1 : vector<8x896xf32>, i32 -> vector<8x896xf32>
    %43 = arith.addf %40, %42 : vector<8x896xf32>
    %44 = vector.extract_strided_slice %24 {offsets = [56, 0], sizes = [8, 896], strides = [1, 1]} : vector<88x896xf32> to vector<8x896xf32>
    %c832_i32 = arith.constant 832 : i32
    %45 = tpu.dynamic_rotate %44 by %c832_i32 dim 1 : vector<8x896xf32>, i32 -> vector<8x896xf32>
    %46 = arith.addf %43, %45 : vector<8x896xf32>
    %47 = vector.extract_strided_slice %24 {offsets = [64, 0], sizes = [8, 896], strides = [1, 1]} : vector<88x896xf32> to vector<8x896xf32>
    %c800_i32 = arith.constant 800 : i32
    %48 = tpu.dynamic_rotate %47 by %c800_i32 dim 1 : vector<8x896xf32>, i32 -> vector<8x896xf32>
    %49 = arith.addf %46, %48 : vector<8x896xf32>
    %50 = vector.extract_strided_slice %24 {offsets = [72, 0], sizes = [8, 896], strides = [1, 1]} : vector<88x896xf32> to vector<8x896xf32>
    %c768_i32 = arith.constant 768 : i32
    %51 = tpu.dynamic_rotate %50 by %c768_i32 dim 1 : vector<8x896xf32>, i32 -> vector<8x896xf32>
    %52 = arith.addf %49, %51 : vector<8x896xf32>
    %53 = vector.extract_strided_slice %24 {offsets = [80, 0], sizes = [8, 896], strides = [1, 1]} : vector<88x896xf32> to vector<8x896xf32>
    %c736_i32 = arith.constant 736 : i32
    %54 = tpu.dynamic_rotate %53 by %c736_i32 dim 1 : vector<8x896xf32>, i32 -> vector<8x896xf32>
    %55 = arith.addf %52, %54 : vector<8x896xf32>
    %c0_17 = arith.constant 0 : index
    %c0_18 = arith.constant 0 : index
    %56 = vector.load %arg4[%c0_17, %c0_18] : memref<8x8xf32, #tpu.memory_space<vmem>>, vector<8x8xf32>
    %cst_19 = arith.constant dense<0.000000e+00> : vector<8x896xf32>
    %57 = tpu.matmul %56, %55, %cst_19 {dimension_numbers = #tpu.dot_dimension_numbers<[1], [0], [0], [1], [0, 0, 1, 1], [], []>, precision = #tpu.contract_precision<fp32>} : vector<8x8xf32>, vector<8x896xf32>, vector<8x896xf32> -> vector<8x896xf32>
    %c0_20 = arith.constant 0 : index
    %c0_21 = arith.constant 0 : index
    %58 = vector.load %arg5[%c0_20, %c0_21] : memref<8x1xf32, #tpu.memory_space<vmem>>, vector<8x1xf32>
    %59 = vector.broadcast %58 : vector<8x1xf32> to vector<8x896xf32>
    %60 = arith.addf %57, %59 : vector<8x896xf32>
    %61 = arith.negf %60 : vector<8x896xf32>
    %62 = math.exp %61 : vector<8x896xf32>
    %cst_22 = arith.constant 1.000000e+00 : f32
    %63 = vector.broadcast %cst_22 : f32 to vector<8x896xf32>
    %64 = arith.addf %63, %62 : vector<8x896xf32>
    %65 = arith.divf %63, %64 : vector<8x896xf32>
    %66 = arith.mulf %65, %0 : vector<8x896xf32>
    %c33_i32 = arith.constant 33 : i32
    %67 = tpu.dynamic_rotate %66 by %c33_i32 dim 1 : vector<8x896xf32>, i32 -> vector<8x896xf32>
    %c0_23 = arith.constant 0 : index
    %c0_24 = arith.constant 0 : index
    %68 = vector.load %arg12[%c0_23, %c0_24] : memref<72x896xf32, #tpu.memory_space<vmem>>, vector<8x896xf32>
    tpu.vector_store %arg12[%c0_23, %c0_24], %67 {strides = array<i32>} : memref<72x896xf32, #tpu.memory_space<vmem>>, vector<8x896xf32>,
    %c32_i32_25 = arith.constant 32 : i32
    %69 = tpu.dynamic_rotate %66 by %c32_i32_25 dim 1 : vector<8x896xf32>, i32 -> vector<8x896xf32>
    %c8_26 = arith.constant 8 : index
    %c0_27 = arith.constant 0 : index
    %70 = vector.load %arg12[%c8_26, %c0_27] : memref<72x896xf32, #tpu.memory_space<vmem>>, vector<8x896xf32>
    tpu.vector_store %arg12[%c8_26, %c0_27], %69 {strides = array<i32>} : memref<72x896xf32, #tpu.memory_space<vmem>>, vector<8x896xf32>,
    %c31_i32 = arith.constant 31 : i32
    %71 = tpu.dynamic_rotate %66 by %c31_i32 dim 1 : vector<8x896xf32>, i32 -> vector<8x896xf32>
    %c16_28 = arith.constant 16 : index
    %c0_29 = arith.constant 0 : index
    %72 = vector.load %arg12[%c16_28, %c0_29] : memref<72x896xf32, #tpu.memory_space<vmem>>, vector<8x896xf32>
    tpu.vector_store %arg12[%c16_28, %c0_29], %71 {strides = array<i32>} : memref<72x896xf32, #tpu.memory_space<vmem>>, vector<8x896xf32>,
    %c1_i32_30 = arith.constant 1 : i32
    %73 = tpu.dynamic_rotate %66 by %c1_i32_30 dim 1 : vector<8x896xf32>, i32 -> vector<8x896xf32>
    %c24_31 = arith.constant 24 : index
    %c0_32 = arith.constant 0 : index
    %74 = vector.load %arg12[%c24_31, %c0_32] : memref<72x896xf32, #tpu.memory_space<vmem>>, vector<8x896xf32>
    tpu.vector_store %arg12[%c24_31, %c0_32], %73 {strides = array<i32>} : memref<72x896xf32, #tpu.memory_space<vmem>>, vector<8x896xf32>,
    %c32_33 = arith.constant 32 : index
    %c0_34 = arith.constant 0 : index
    %75 = vector.load %arg12[%c32_33, %c0_34] : memref<72x896xf32, #tpu.memory_space<vmem>>, vector<8x896xf32>
    tpu.vector_store %arg12[%c32_33, %c0_34], %66 {strides = array<i32>} : memref<72x896xf32, #tpu.memory_space<vmem>>, vector<8x896xf32>,
    %c895_i32_35 = arith.constant 895 : i32
    %76 = tpu.dynamic_rotate %66 by %c895_i32_35 dim 1 : vector<8x896xf32>, i32 -> vector<8x896xf32>
    %c40_36 = arith.constant 40 : index
    %c0_37 = arith.constant 0 : index
    %77 = vector.load %arg12[%c40_36, %c0_37] : memref<72x896xf32, #tpu.memory_space<vmem>>, vector<8x896xf32>
    tpu.vector_store %arg12[%c40_36, %c0_37], %76 {strides = array<i32>} : memref<72x896xf32, #tpu.memory_space<vmem>>, vector<8x896xf32>,
    %c865_i32 = arith.constant 865 : i32
    %78 = tpu.dynamic_rotate %66 by %c865_i32 dim 1 : vector<8x896xf32>, i32 -> vector<8x896xf32>
    %c48_38 = arith.constant 48 : index
    %c0_39 = arith.constant 0 : index
    %79 = vector.load %arg12[%c48_38, %c0_39] : memref<72x896xf32, #tpu.memory_space<vmem>>, vector<8x896xf32>
    tpu.vector_store %arg12[%c48_38, %c0_39], %78 {strides = array<i32>} : memref<72x896xf32, #tpu.memory_space<vmem>>, vector<8x896xf32>,
    %c864_i32_40 = arith.constant 864 : i32
    %80 = tpu.dynamic_rotate %66 by %c864_i32_40 dim 1 : vector<8x896xf32>, i32 -> vector<8x896xf32>
    %c56_41 = arith.constant 56 : index
    %c0_42 = arith.constant 0 : index
    %81 = vector.load %arg12[%c56_41, %c0_42] : memref<72x896xf32, #tpu.memory_space<vmem>>, vector<8x896xf32>
    tpu.vector_store %arg12[%c56_41, %c0_42], %80 {strides = array<i32>} : memref<72x896xf32, #tpu.memory_space<vmem>>, vector<8x896xf32>,
    %c863_i32 = arith.constant 863 : i32
    %82 = tpu.dynamic_rotate %66 by %c863_i32 dim 1 : vector<8x896xf32>, i32 -> vector<8x896xf32>
    %c64_43 = arith.constant 64 : index
    %c0_44 = arith.constant 0 : index
    %83 = vector.load %arg12[%c64_43, %c0_44] : memref<72x896xf32, #tpu.memory_space<vmem>>, vector<8x896xf32>
    tpu.vector_store %arg12[%c64_43, %c0_44], %82 {strides = array<i32>} : memref<72x896xf32, #tpu.memory_space<vmem>>, vector<8x896xf32>,
    %c0_45 = arith.constant 0 : index
    %c0_46 = arith.constant 0 : index
    %84 = vector.load %arg6[%c0_45, %c0_46] : memref<16x72xf32, #tpu.memory_space<vmem>>, vector<16x72xf32>
    %c0_47 = arith.constant 0 : index
    %c0_48 = arith.constant 0 : index
    %85 = vector.load %arg12[%c0_47, %c0_48] : memref<72x896xf32, #tpu.memory_space<vmem>>, vector<72x896xf32>
    %cst_49 = arith.constant dense<0.000000e+00> : vector<16x896xf32>
    %86 = tpu.matmul %84, %85, %cst_49 {dimension_numbers = #tpu.dot_dimension_numbers<[1], [0], [0], [1], [0, 0, 1, 1], [], []>, precision = #tpu.contract_precision<fp32>} : vector<16x72xf32>, vector<72x896xf32>, vector<16x896xf32> -> vector<16x896xf32>
    %c0_50 = arith.constant 0 : index
    %c0_51 = arith.constant 0 : index
    %87 = vector.load %arg7[%c0_50, %c0_51] : memref<16x1xf32, #tpu.memory_space<vmem>>, vector<16x1xf32>
    %88 = vector.broadcast %87 : vector<16x1xf32> to vector<16x896xf32>
    %89 = arith.addf %86, %88 : vector<16x896xf32>
    %90 = arith.negf %89 : vector<16x896xf32>
    %91 = math.exp %90 : vector<16x896xf32>
    %cst_52 = arith.constant 1.000000e+00 : f32
    %92 = vector.broadcast %cst_52 : f32 to vector<16x896xf32>
    %93 = arith.addf %92, %91 : vector<16x896xf32>
    %94 = arith.divf %92, %93 : vector<16x896xf32>
    %95 = arith.mulf %89, %94 : vector<16x896xf32>
    %c0_53 = arith.constant 0 : index
    %c0_54 = arith.constant 0 : index
    %96 = vector.load %arg2[%c0_53, %c0_54] : memref<1x896xf32, #tpu.memory_space<vmem>>, vector<1x896xf32>
    %97 = vector.broadcast %96 : vector<1x896xf32> to vector<16x896xf32>
    %98 = arith.mulf %95, %97 : vector<16x896xf32>
    %c33_i32_55 = arith.constant 33 : i32
    %99 = tpu.dynamic_rotate %98 by %c33_i32_55 dim 1 : vector<16x896xf32>, i32 -> vector<16x896xf32>
    %c0_56 = arith.constant 0 : index
    %c0_57 = arith.constant 0 : index
    %100 = vector.load %arg13[%c0_56, %c0_57] : memref<144x896xf32, #tpu.memory_space<vmem>>, vector<16x896xf32>
    tpu.vector_store %arg13[%c0_56, %c0_57], %99 {strides = array<i32>} : memref<144x896xf32, #tpu.memory_space<vmem>>, vector<16x896xf32>,
    %c32_i32_58 = arith.constant 32 : i32
    %101 = tpu.dynamic_rotate %98 by %c32_i32_58 dim 1 : vector<16x896xf32>, i32 -> vector<16x896xf32>
    %c16_59 = arith.constant 16 : index
    %c0_60 = arith.constant 0 : index
    %102 = vector.load %arg13[%c16_59, %c0_60] : memref<144x896xf32, #tpu.memory_space<vmem>>, vector<16x896xf32>
    tpu.vector_store %arg13[%c16_59, %c0_60], %101 {strides = array<i32>} : memref<144x896xf32, #tpu.memory_space<vmem>>, vector<16x896xf32>,
    %c31_i32_61 = arith.constant 31 : i32
    %103 = tpu.dynamic_rotate %98 by %c31_i32_61 dim 1 : vector<16x896xf32>, i32 -> vector<16x896xf32>
    %c32_62 = arith.constant 32 : index
    %c0_63 = arith.constant 0 : index
    %104 = vector.load %arg13[%c32_62, %c0_63] : memref<144x896xf32, #tpu.memory_space<vmem>>, vector<16x896xf32>
    tpu.vector_store %arg13[%c32_62, %c0_63], %103 {strides = array<i32>} : memref<144x896xf32, #tpu.memory_space<vmem>>, vector<16x896xf32>,
    %c1_i32_64 = arith.constant 1 : i32
    %105 = tpu.dynamic_rotate %98 by %c1_i32_64 dim 1 : vector<16x896xf32>, i32 -> vector<16x896xf32>
    %c48_65 = arith.constant 48 : index
    %c0_66 = arith.constant 0 : index
    %106 = vector.load %arg13[%c48_65, %c0_66] : memref<144x896xf32, #tpu.memory_space<vmem>>, vector<16x896xf32>
    tpu.vector_store %arg13[%c48_65, %c0_66], %105 {strides = array<i32>} : memref<144x896xf32, #tpu.memory_space<vmem>>, vector<16x896xf32>,
    %c64_67 = arith.constant 64 : index
    %c0_68 = arith.constant 0 : index
    %107 = vector.load %arg13[%c64_67, %c0_68] : memref<144x896xf32, #tpu.memory_space<vmem>>, vector<16x896xf32>
    tpu.vector_store %arg13[%c64_67, %c0_68], %98 {strides = array<i32>} : memref<144x896xf32, #tpu.memory_space<vmem>>, vector<16x896xf32>,
    %c895_i32_69 = arith.constant 895 : i32
    %108 = tpu.dynamic_rotate %98 by %c895_i32_69 dim 1 : vector<16x896xf32>, i32 -> vector<16x896xf32>
    %c80_70 = arith.constant 80 : index
    %c0_71 = arith.constant 0 : index
    %109 = vector.load %arg13[%c80_70, %c0_71] : memref<144x896xf32, #tpu.memory_space<vmem>>, vector<16x896xf32>
    tpu.vector_store %arg13[%c80_70, %c0_71], %108 {strides = array<i32>} : memref<144x896xf32, #tpu.memory_space<vmem>>, vector<16x896xf32>,
    %c865_i32_72 = arith.constant 865 : i32
    %110 = tpu.dynamic_rotate %98 by %c865_i32_72 dim 1 : vector<16x896xf32>, i32 -> vector<16x896xf32>
    %c96 = arith.constant 96 : index
    %c0_73 = arith.constant 0 : index
    %111 = vector.load %arg13[%c96, %c0_73] : memref<144x896xf32, #tpu.memory_space<vmem>>, vector<16x896xf32>
    tpu.vector_store %arg13[%c96, %c0_73], %110 {strides = array<i32>} : memref<144x896xf32, #tpu.memory_space<vmem>>, vector<16x896xf32>,
    %c864_i32_74 = arith.constant 864 : i32
    %112 = tpu.dynamic_rotate %98 by %c864_i32_74 dim 1 : vector<16x896xf32>, i32 -> vector<16x896xf32>
    %c112 = arith.constant 112 : index
    %c0_75 = arith.constant 0 : index
    %113 = vector.load %arg13[%c112, %c0_75] : memref<144x896xf32, #tpu.memory_space<vmem>>, vector<16x896xf32>
    tpu.vector_store %arg13[%c112, %c0_75], %112 {strides = array<i32>} : memref<144x896xf32, #tpu.memory_space<vmem>>, vector<16x896xf32>,
    %c863_i32_76 = arith.constant 863 : i32
    %114 = tpu.dynamic_rotate %98 by %c863_i32_76 dim 1 : vector<16x896xf32>, i32 -> vector<16x896xf32>
    %c128 = arith.constant 128 : index
    %c0_77 = arith.constant 0 : index
    %115 = vector.load %arg13[%c128, %c0_77] : memref<144x896xf32, #tpu.memory_space<vmem>>, vector<16x896xf32>
    tpu.vector_store %arg13[%c128, %c0_77], %114 {strides = array<i32>} : memref<144x896xf32, #tpu.memory_space<vmem>>, vector<16x896xf32>,
    %c0_78 = arith.constant 0 : index
    %c0_79 = arith.constant 0 : index
    %116 = vector.load %arg8[%c0_78, %c0_79] : memref<8x144xf32, #tpu.memory_space<vmem>>, vector<8x144xf32>
    %c0_80 = arith.constant 0 : index
    %c0_81 = arith.constant 0 : index
    %117 = vector.load %arg13[%c0_80, %c0_81] : memref<144x896xf32, #tpu.memory_space<vmem>>, vector<144x896xf32>
    %cst_82 = arith.constant dense<0.000000e+00> : vector<8x896xf32>
    %118 = tpu.matmul %116, %117, %cst_82 {dimension_numbers = #tpu.dot_dimension_numbers<[1], [0], [0], [1], [0, 0, 1, 1], [], []>, precision = #tpu.contract_precision<fp32>} : vector<8x144xf32>, vector<144x896xf32>, vector<8x896xf32> -> vector<8x896xf32>
    %c0_83 = arith.constant 0 : index
    %c0_84 = arith.constant 0 : index
    %119 = vector.load %arg9[%c0_83, %c0_84] : memref<8x1xf32, #tpu.memory_space<vmem>>, vector<8x1xf32>
    %120 = vector.broadcast %119 : vector<8x1xf32> to vector<8x896xf32>
    %121 = arith.addf %118, %120 : vector<8x896xf32>
    %122 = arith.addf %0, %121 : vector<8x896xf32>
    %c0_85 = arith.constant 0 : index
    %c0_86 = arith.constant 0 : index
    %123 = vector.load %arg10[%c0_85, %c0_86] : memref<8x896xf32, #tpu.memory_space<vmem>>, vector<8x896xf32>
    tpu.vector_store %arg10[%c0_85, %c0_86], %122 {strides = array<i32>} : memref<8x896xf32, #tpu.memory_space<vmem>>, vector<8x896xf32>,
    return
  }
  func.func @transform_0(%arg0: i32) -> (i32, i32) {
    %c0_i32 = arith.constant 0 : i32
    %c0_i32_0 = arith.constant 0 : i32
    %c0_i32_1 = arith.constant 0 : i32
    return %c0_i32, %c0_i32_0 : i32, i32
  }
  func.func @transform_1(%arg0: i32) -> (i32, i32) {
    %c0_i32 = arith.constant 0 : i32
    %c0_i32_0 = arith.constant 0 : i32
    %c0_i32_1 = arith.constant 0 : i32
    return %c0_i32, %c0_i32_0 : i32, i32
  }
  func.func @transform_2(%arg0: i32) -> (i32, i32) {
    %c0_i32 = arith.constant 0 : i32
    %c0_i32_0 = arith.constant 0 : i32
    %c0_i32_1 = arith.constant 0 : i32
    return %c0_i32, %c0_i32_0 : i32, i32
  }
  func.func @transform_3(%arg0: i32) -> (i32, i32) {
    %c0_i32 = arith.constant 0 : i32
    %c0_i32_0 = arith.constant 0 : i32
    %c0_i32_1 = arith.constant 0 : i32
    return %c0_i32, %c0_i32_0 : i32, i32
  }
  func.func @transform_4(%arg0: i32) -> (i32, i32) {
    %c0_i32 = arith.constant 0 : i32
    %c0_i32_0 = arith.constant 0 : i32
    %c0_i32_1 = arith.constant 0 : i32
    return %c0_i32, %c0_i32_0 : i32, i32
  }
  func.func @transform_5(%arg0: i32) -> (i32, i32) {
    %c0_i32 = arith.constant 0 : i32
    %c0_i32_0 = arith.constant 0 : i32
    %c0_i32_1 = arith.constant 0 : i32
    return %c0_i32, %c0_i32_0 : i32, i32
  }
  func.func @transform_6(%arg0: i32) -> (i32, i32) {
    %c0_i32 = arith.constant 0 : i32
    %c0_i32_0 = arith.constant 0 : i32
    %c0_i32_1 = arith.constant 0 : i32
    return %c0_i32, %c0_i32_0 : i32, i32
  }
  func.func @transform_7(%arg0: i32) -> (i32, i32) {
    %c0_i32 = arith.constant 0 : i32
    %c0_i32_0 = arith.constant 0 : i32
    %c0_i32_1 = arith.constant 0 : i32
    return %c0_i32, %c0_i32_0 : i32, i32
  }
  func.func @transform_8(%arg0: i32) -> (i32, i32) {
    %c0_i32 = arith.constant 0 : i32
    %c0_i32_0 = arith.constant 0 : i32
    %c0_i32_1 = arith.constant 0 : i32
    return %c0_i32, %c0_i32_0 : i32, i32
  }
  func.func @transform_9(%arg0: i32) -> (i32, i32) {
    %c0_i32 = arith.constant 0 : i32
    %c0_i32_0 = arith.constant 0 : i32
    %c0_i32_1 = arith.constant 0 : i32
    return %c0_i32, %c0_i32_0 : i32, i32
  }
}

</mosaic_0001>

<bundles_post_ra>
// kernel: encoder_block.1
= control target key start
LH: loop header
LB: loop body
LE: loop exit
PB: predicated region body
PF: predicated region fallthrough
CT: control target
= control target key end

     0   :  { %s12836_s11 = smov 125   ;;  %s12837_s12 = smov 124   ;;  %v53_v9 = vlaneseq  ;;  %vm426_vm6 = vcmask 719872   ;;  %vm4810_vm12 = vcmask 64512   ;;  %s21477_s0 = inlined_call_operand.vmem [shape: f32[8,896], index: 0, kind: input, shape index: {}]   ;;  %s21478_s2 = inlined_call_operand.vmem [shape: f32[88,88], index: 2, kind: input, shape index: {}]   ;;  %s21479_s3 = inlined_call_operand.vmem [shape: f32[8,8], index: 3, kind: input, shape index: {}]   ;;  %s21480_s4 = inlined_call_operand.vmem [shape: f32[8,1], index: 4, kind: input, shape index: {}]   ;;  %s21481_s5 = inlined_call_operand.vmem [shape: f32[16,72], index: 5, kind: input, shape index: {}]   ;;  %s21482_s6 = inlined_call_operand.vmem [shape: f32[16,1], index: 6, kind: input, shape index: {}]   ;;  %s21483_s1 = inlined_call_operand.vmem [shape: f32[1,896], index: 1, kind: input, shape index: {}]   ;;  %s21484_s7 = inlined_call_operand.vmem [shape: f32[8,144], index: 7, kind: input, shape index: {}]   ;;  %s21485_s8 = inlined_call_operand.vmem [shape: f32[8,1], index: 8, kind: input, shape index: {}]   ;;  %s21486_s9 = inlined_call_operand.vmem [shape: f32[8,896], index: 9, kind: output, shape index: {}]  }
   0x1   :  { %v12907_v0 = vld [vmem:[%s21477_s0] sm:$0xff]  ;;  %s12838_s13 = smov 123   ;;  %v12918_v1 = vld [vmem:[%s21477_s0 + $0x8] sm:$0xff]  ;;  %s12839_s16 = smov 127   ;;  %v12935_v2 = vld [vmem:[%s21477_s0 + $0x30] sm:$0xff] }
   0x2   :  { %251 = vrot.lane.b32.xlu2 %v12907_v0, %s12836_s11  ;;  %280 = vrot.lane.b32.xlu1 %v12907_v0, %s12837_s12  ;;  %s12840_s17 = smov 126   ;;  %s12841_s20 = smov 1   ;;  %v34_v3 = vld [vmem:[%s21477_s0 + $0x10] sm:$0xff]  ;;  %v35_v4 = vld [vmem:[%s21477_s0 + $0x18] sm:$0xff]  ;;  %v13005_v10 = vand.u32 127, %v53_v9  ;;  %v13100_v38 = vand.u32 4294901760, %v12907_v0 }
   0x3   :  { %309 = vrot.lane.b32.xlu0 %v12907_v0, %s12838_s13  ;;  %s12842_s21 = smov 3   ;;  %s12843_s22 = smov 2   ;;  %v12996_v7 = vld [vmem:[%s21477_s0 + $0x20] sm:$0xff]  ;;  %v13050_v22 = vld [vmem:[%s21477_s0 + $0x28] sm:$0xff] }
   0x4   :  { %s12844_s23 = smov 4   ;;  %s12845_s26 = smov 5   ;;  %21897 = vst [vmem:[#allocation7_spill] sm:$0xff] %v13005_v10  ;;  %vm265_vm0 = vcmp.lt.s32.totalorder %v13005_v10, 125  ;;  %vm294_vm1 = vcmp.lt.s32.totalorder %v13005_v10, 124  ;;  %vm323_vm2 = vcmp.lt.s32.totalorder %v13005_v10, 123  ;;  %v13123_v45 = vsub.f32 %v12907_v0, %v13100_v38 }
   0x5   :  { %vm236_vm3 = vcmp.lt.s32.totalorder %v13005_v10, 126  ;;  %vm171_vm4 = vcmp.lt.s32.totalorder %v13005_v10, 1  ;;  %vm207_vm5 = vcmp.lt.s32.totalorder %v13005_v10, 127  ;;  %v338_v53 = vld [vmem:[%s21478_s2] sm:$0xff]  ;;  %vm142_vm7 = vcmp.lt.s32.totalorder %v13005_v10, 2  ;;  %s12850_s15 = smov 97  }
   0x6   :  { %v21489_v55 = vand.u32 4294901760, %v13123_v45  ;;  %v428_v57 = vsel %vm426_vm6, %v338_v53, 0  ;;  %vm84_vm8 = vcmp.lt.s32.totalorder %v13005_v10, 4  ;;  %vm113_vm9 = vcmp.lt.s32.totalorder %v13005_v10, 3  ;;  %s12851_s18 = smov 95   ;;  %s12852_s19 = smov 31  }
   0x7   :  { %vm55_vm10 = vcmp.lt.s32.totalorder %v13005_v10, 5 }
   0x8   :  { %v614_v61 = vsub.f32 %v13123_v45, %v21489_v55 }
   0xa   :  { %253 = vrot.lane.b32.xlu2 %v12918_v1, %s12836_s11  ;;  %282 = vrot.lane.b32.xlu1 %v12918_v1, %s12837_s12 }
   0xb   :  { %311 = vrot.lane.b32.xlu0 %v12918_v1, %s12838_s13 }
  0x12   :  { %193 = vrot.lane.b32.xlu2 %v12907_v0, %s12839_s16  ;;  %224 = vrot.lane.b32.xlu1 %v12918_v1, %s12840_s17 }
  0x13   :  { %222 = vrot.lane.b32.xlu0 %v12907_v0, %s12840_s17 }
  0x1a   :  { %169 = vrot.lane.b32.xlu2 %v12935_v2, %s12841_s20  ;;  %157 = vrot.lane.b32.xlu1 %v12907_v0, %s12841_s20 }
  0x1b   :  { %195 = vrot.lane.b32.xlu0 %v12918_v1, %s12839_s16 }
  0x22   :  { %99 = vrot.lane.b32.xlu2 %v12907_v0, %s12842_s21  ;;  %140 = vrot.lane.b32.xlu1 %v12935_v2, %s12843_s22 }
  0x23   :  { %128 = vrot.lane.b32.xlu0 %v12907_v0, %s12843_s22 }
  0x2a   :  { %82 = vrot.lane.b32.xlu2 %v12935_v2, %s12844_s23  ;;  %70 = vrot.lane.b32.xlu1 %v12907_v0, %s12844_s23 }
  0x2b   :  { %111 = vrot.lane.b32.xlu0 %v12935_v2, %s12842_s21 }
  0x32   :  { %313 = vrot.lane.b32.xlu2 %v34_v3, %s12838_s13  ;;  %51 = vrot.lane.b32.xlu1 %v12935_v2, %s12845_s26 }
  0x33   :  { %39 = vrot.lane.b32.xlu0 %v12907_v0, %s12845_s26 }
  0x3a   :  { %226 = vrot.lane.b32.xlu2 %v34_v3, %s12840_s17  ;;  %255 = vrot.lane.b32.xlu1 %v34_v3, %s12836_s11 }
  0x3b   :  { %284 = vrot.lane.b32.xlu0 %v34_v3, %s12837_s12 }
  0x42   :  { %130 = vrot.lane.b32.xlu2 %v12918_v1, %s12843_s22  ;;  %159 = vrot.lane.b32.xlu1 %v12918_v1, %s12841_s20 }
  0x43   :  { %197 = vrot.lane.b32.xlu0 %v34_v3, %s12839_s16 }
  0x4a   :  { %41 = vrot.lane.b32.xlu2 %v12918_v1, %s12845_s26  ;;  %72 = vrot.lane.b32.xlu1 %v12918_v1, %s12844_s23 }
  0x4b   :  { %101 = vrot.lane.b32.xlu0 %v12918_v1, %s12842_s21 }
  0x52   :  { %257 = vrot.lane.b32.xlu2 %v35_v4, %s12836_s11  ;;  %286 = vrot.lane.b32.xlu1 %v35_v4, %s12837_s12 }
  0x53   :  { %315 = vrot.lane.b32.xlu0 %v35_v4, %s12838_s13 }
  0x5a   :  { %161 = vrot.lane.b32.xlu2 %v34_v3, %s12841_s20  ;;  %199 = vrot.lane.b32.xlu1 %v35_v4, %s12839_s16 }
  0x5b   :  { %228 = vrot.lane.b32.xlu0 %v35_v4, %s12840_s17 }
  0x5c   :  { %v12986_v5 = vpop.permute.xlu2 %251 }
  0x5d   :  { %21895 = vst [vmem:[#allocation5_spill] sm:$0xff] %v12986_v5 }
  0x62   :  { %74 = vrot.lane.b32.xlu2 %v34_v3, %s12844_s23  ;;  %103 = vrot.lane.b32.xlu1 %v34_v3, %s12842_s21 }
  0x63   :  { %132 = vrot.lane.b32.xlu0 %v34_v3, %s12843_s22 }
  0x64   :  { %v12991_v6 = vpop.permute.xlu2 %253 }
  0x65   :  { %v271_v14 = vsel %vm265_vm0, %v12986_v5, %v12991_v6 }
  0x66   :  { %v13029_v15 = vand.u32 4294901760, %v271_v14 }
  0x68   :  { %v13058_v25 = vsub.f32 %v271_v14, %v13029_v15 }
  0x6a   :  { %288 = vrot.lane.b32.xlu2 %v12996_v7, %s12837_s12  ;;  %317 = vrot.lane.b32.xlu1 %v12996_v7, %s12838_s13  ;;  %v21492_v30 = vand.u32 4294901760, %v13058_v25 }
  0x6b   :  { %43 = vrot.lane.b32.xlu0 %v34_v3, %s12845_s26  ;;  %v13179_v3 = vand.u32 4294901760, %v428_v57 }
  0x6c   :  { %v13003_v8 = vpop.permute.xlu2 %193  ;;  %v596_v37 = vsub.f32 %v13058_v25, %v21492_v30 }
  0x6d   :  { %21896 = vst [vmem:[#allocation6_spill] sm:$0xff] %v13003_v8 }
  0x6e   :  { %v597_v44 = vand.u32 4294901760, %v596_v37 }
  0x72   :  { %201 = vrot.lane.b32.xlu2 %v12996_v7, %s12839_s16  ;;  %230 = vrot.lane.b32.xlu1 %v12996_v7, %s12840_s17 }
  0x73   :  { %259 = vrot.lane.b32.xlu0 %v12996_v7, %s12836_s11 }
  0x74   :  { %v13013_v11 = vpop.permute.xlu1 %280  ;;  %v13018_v13 = vpop.permute.xlu2 %169 }
  0x75   :  { %21898 = vst [vmem:[#allocation8_spill] sm:$0xff] %v13013_v11  ;;  %v13015_v12 = vpop.permute.xlu0 %309 }
  0x76   :  { %21899 = vst [vmem:[#allocation9_spill] sm:$0xff] %v13015_v12 }
  0x77   :  { %21900 = vst [vmem:[#allocation10_spill] sm:$0xff] %v13018_v13 }
  0x7a   :  { %105 = vrot.lane.b32.xlu2 %v35_v4, %s12842_s21  ;;  %134 = vrot.lane.b32.xlu1 %v35_v4, %s12843_s22 }
  0x7b   :  { %163 = vrot.lane.b32.xlu0 %v35_v4, %s12841_s20 }
  0x7c   :  { %v13031_v16 = vpop.permute.xlu1 %282  ;;  %v13052_v23 = vpop.permute.xlu2 %99 }
  0x7d   :  { %v300_v17 = vsel %vm294_vm1, %v13013_v11, %v13031_v16  ;;  %v13037_v18 = vpop.permute.xlu0 %311 }
  0x7e   :  { %v13039_v19 = vand.u32 4294901760, %v300_v17  ;;  %v329_v20 = vsel %vm323_vm2, %v13015_v12, %v13037_v18 }
  0x7f   :  { %v13045_v21 = vand.u32 4294901760, %v329_v20 }
  0x80   :  { %v13055_v24 = vsub.f32 %v300_v17, %v13039_v19 }
  0x81   :  { %466 = vmatpush.msra.mxu0 %v13045_v21  ;;  %792 = vmatpush.msra.mxu3 %v13045_v21  ;;  %v13063_v26 = vsub.f32 %v329_v20, %v13045_v21  ;;  %v615_v20 = vand.u32 4294901760, %v614_v61 }
  0x82   :  { %319 = vrot.lane.b32.xlu2 %v13050_v22, %s12838_s13  ;;  %45 = vrot.lane.b32.xlu1 %v35_v4, %s12845_s26  ;;  %v21493_v27 = vand.u32 4294901760, %v13055_v24 }
  0x83   :  { %76 = vrot.lane.b32.xlu0 %v35_v4, %s12844_s23  ;;  %468 = vmatpush.msra.mxu0 %v13039_v19  ;;  %v21495_v28 = vand.u32 4294901760, %v13063_v26 }
  0x84   :  { %699 = vmatpush.msra.mxu2 %v13063_v26  ;;  %794 = vmatpush.msra.mxu3 %v13039_v19  ;;  %v13075_v29 = vpop.permute.xlu1 %224  ;;  %v590_v34 = vsub.f32 %v13055_v24, %v21493_v27  ;;  %v13106_v40 = vpop.permute.xlu2 %82 }
  0x85   :  { %470 = vmatpush.msra.mxu0 %v13029_v15  ;;  %v13079_v31 = vpop.permute.xlu0 %222  ;;  %v584_v32 = vsub.f32 %v13063_v26, %v21495_v28  ;;  %21902 = vst [vmem:[#allocation12_spill] sm:$0xff] %v13106_v40 }
  0x86   :  { %21901 = vst [vmem:[#allocation11_spill] sm:$0xff] %v13079_v31  ;;  %702 = vmatpush.msra.mxu2 %v13055_v24  ;;  %796 = vmatpush.msra.mxu3 %v13029_v15  ;;  %v242_v33 = vsel %vm236_vm3, %v13079_v31, %v13075_v29  ;;  %v591_v41 = vand.u32 4294901760, %v590_v34  ;;  %v13206_v34 = vsub.f32 %v428_v57, %v13179_v3 }
  0x87   :  { %v13093_v35 = vand.u32 4294901760, %v242_v33  ;;  %v585_v36 = vand.u32 4294901760, %v584_v32 }
  0x88   :  { %705 = vmatpush.msra.mxu2 %v13058_v25  ;;  %21904 = vst [vmem:[#allocation14_spill] sm:$0xff] %v13206_v34 }
  0x89   :  { %472 = vmatpush.msra.mxu0 %v13093_v35  ;;  %586 = vmatpush.msra.mxu1 %v585_v36  ;;  %v13104_v39 = vsub.f32 %v242_v33, %v13093_v35  ;;  %v339_v33 = vld [vmem:[%s21478_s2 + $0x8] sm:$0xff] }
  0x8a   :  { %798 = vmatpush.msra.mxu3 %v13093_v35  ;;  %232 = vrot.lane.b32.xlu2 %v13050_v22, %s12840_s17 }
  0x8b   :  { %261 = vrot.lane.b32.xlu1 %v13050_v22, %s12836_s11  ;;  %290 = vrot.lane.b32.xlu0 %v13050_v22, %s12837_s12  ;;  %v21491_v42 = vand.u32 4294901760, %v13104_v39 }
  0x8c   :  { %592 = vmatpush.msra.mxu1 %v591_v41  ;;  %708 = vmatpush.msra.mxu2 %v13104_v39  ;;  %v13119_v43 = vpop.permute.xlu1 %157  ;;  %v13163_v59 = vpop.permute.xlu2 %313  ;;  %v431_v41 = vsel %vm426_vm6, %v339_v33, 0 }
  0x8d   :  { %v178_v46 = vsel %vm171_vm4, %v13018_v13, %v13119_v43  ;;  %v13129_v47 = vpop.permute.xlu0 %195  ;;  %v602_v48 = vsub.f32 %v13104_v39, %v21491_v42  ;;  %v328_v9 = vsel %vm323_vm2, %v13037_v18, %v13163_v59 }
  0x8e   :  { %v13134_v49 = vand.u32 4294901760, %v178_v46  ;;  %598 = vmatpush.msra.mxu1 %v597_v44  ;;  %v213_v50 = vsel %vm207_vm5, %v13003_v8, %v13129_v47  ;;  %v13208_v36 = vand.u32 4294901760, %v328_v9 }
  0x8f   :  { %v13140_v51 = vand.u32 4294901760, %v213_v50  ;;  %v603_v52 = vand.u32 4294901760, %v602_v48 }
  0x90   :  { %v13146_v54 = vsub.f32 %v178_v46, %v13134_v49  ;;  %v13237_v53 = vsub.f32 %v328_v9, %v13208_v36 }
  0x91   :  { %474 = vmatpush.msra.mxu0 %v13140_v51  ;;  %604 = vmatpush.msra.mxu1 %v603_v52  ;;  %v13151_v56 = vsub.f32 %v213_v50, %v13140_v51  ;;  %v13234_v52 = vand.u32 4294901760, %v13206_v34 }
  0x92   :  { %800 = vmatpush.msra.mxu3 %v13140_v51  ;;  %136 = vrot.lane.b32.xlu2 %v12996_v7, %s12843_s22  ;;  %v21488_v62 = vand.u32 4294901760, %v13146_v54  ;;  %v21497_v33 = vand.u32 4294901760, %v13237_v53 }
  0x93   :  { %165 = vrot.lane.b32.xlu1 %v12996_v7, %s12841_s20  ;;  %203 = vrot.lane.b32.xlu0 %v13050_v22, %s12839_s16  ;;  %v21490_v58 = vand.u32 4294901760, %v13151_v56  ;;  %21906 = vst [vmem:[#allocation16_spill] sm:$0xff] %v13234_v52 }
  0x94   :  { %476 = vmatpush.msra.mxu0 %v13100_v38  ;;  %711 = vmatpush.msra.mxu2 %v13151_v56  ;;  %v13167_v60 = vpop.permute.xlu1 %140  ;;  %v620_v32 = vsub.f32 %v13146_v54, %v21488_v62  ;;  %v1170_v42 = vsub.f32 %v13237_v53, %v21497_v33 }
  0x95   :  { %21903 = vst [vmem:[#allocation13_spill] sm:$0xff] %v13167_v60  ;;  %802 = vmatpush.msra.mxu3 %v13100_v38  ;;  %v13174_v63 = vpop.permute.xlu0 %128  ;;  %v608_v0 = vsub.f32 %v13151_v56, %v21490_v58 }
  0x96   :  { %v149_v4 = vsel %vm142_vm7, %v13167_v60, %v13174_v63  ;;  %478 = vmatpush.msra.mxu0 %v13134_v49  ;;  %714 = vmatpush.msra.mxu2 %v13123_v45  ;;  %v621_v46 = vand.u32 4294901760, %v620_v32  ;;  %v490_v32 = vsub.f32 %v13206_v34, %v13234_v52  ;;  %v1171_v33 = vand.u32 4294901760, %v1170_v42 }
  0x97   :  { %v13191_v14 = vand.u32 4294901760, %v149_v4  ;;  %804 = vmatpush.msra.mxu3 %v13134_v49  ;;  %v609_v17 = vand.u32 4294901760, %v608_v0  ;;  %v13245_v0 = vand.u32 4294901760, %v431_v41 }
  0x98   :  { %717 = vmatpush.msra.mxu2 %v13146_v54  ;;  %v13291_v58 = vand.u32 4294901760, %v490_v32 }
  0x99   :  { %480 = vmatpush.msra.mxu0 %v13191_v14  ;;  %610 = vmatpush.msra.mxu1 %v609_v17  ;;  %v13203_v18 = vsub.f32 %v149_v4, %v13191_v14 }
  0x9a   :  { %806 = vmatpush.msra.mxu3 %v13191_v14  ;;  %47 = vrot.lane.b32.xlu2 %v12996_v7, %s12845_s26  ;;  %21909 = vst [vmem:[#allocation19_spill] sm:$0xff] %v13291_v58 }
  0x9b   :  { %78 = vrot.lane.b32.xlu1 %v12996_v7, %s12844_s23  ;;  %107 = vrot.lane.b32.xlu0 %v12996_v7, %s12842_s21  ;;  %v21487_v37 = vand.u32 4294901760, %v13203_v18 }
  0x9c   :  { %616 = vmatpush.msra.mxu1 %v615_v20  ;;  %720 = vmatpush.msra.mxu2 %v13203_v18  ;;  %v13222_v44 = vpop.permute.xlu1 %70 }
  0x9d   :  { %v91_v48 = vsel %vm84_vm8, %v13106_v40, %v13222_v44  ;;  %v13228_v50 = vpop.permute.xlu0 %111  ;;  %v626_v7 = vsub.f32 %v13203_v18, %v21487_v37 }
  0x9e   :  { %21905 = vst [vmem:[#allocation15_spill] sm:$0xff] %v13228_v50  ;;  %v13239_v57 = vand.u32 4294901760, %v91_v48  ;;  %v120_v61 = vsel %vm113_vm9, %v13228_v50, %v13052_v23  ;;  %622 = vmatpush.msra.mxu1 %v621_v46  ;;  %v13263_v46 = vsub.f32 %v431_v41, %v13245_v0 }
  0x9f   :  { %v13247_v4 = vand.u32 4294901760, %v120_v61  ;;  %v627_v17 = vand.u32 4294901760, %v626_v7 }
  0xa0   :  { %v13250_v20 = vsub.f32 %v91_v48, %v13239_v57  ;;  %21907 = vst [vmem:[#allocation17_spill] sm:$0xff] %v13263_v46  ;;  %v340_v48 = vld [vmem:[%s21478_s2 + $0x10] sm:$0xff]  ;;  %v13297_v30 = vand.u32 4294901760, %v13263_v46 }
  0xa1   :  { %482 = vmatpush.msra.mxu0 %v13247_v4  ;;  %628 = vmatpush.msra.mxu1 %v627_v17  ;;  %v13254_v9 = vsub.f32 %v120_v61, %v13247_v4  ;;  %v434_v62 = vsel %vm426_vm6, %v340_v48, 0 }
  0xa2   :  { %808 = vmatpush.msra.mxu3 %v13247_v4  ;;  %263 = vrot.lane.b32.xlu2 %v12935_v2, %s12836_s11  ;;  %v21498_v61 = vand.u32 4294901760, %v13250_v20  ;;  %21910 = vst [vmem:[#allocation20_spill] sm:$0xff] %v13297_v30  ;;  %v13304_v28 = vand.u32 4294901760, %v434_v62  ;;  %s12846_s11 = smov 96  }
  0xa3   :  { %292 = vrot.lane.b32.xlu1 %v12935_v2, %s12837_s12  ;;  %321 = vrot.lane.b32.xlu0 %v12935_v2, %s12838_s13  ;;  %v21494_v7 = vand.u32 4294901760, %v13254_v9  ;;  %s12847_s12 = smov 64   ;;  %s12848_s13 = smov 32  }
  0xa4   :  { %484 = vmatpush.msra.mxu0 %v13239_v57  ;;  %723 = vmatpush.msra.mxu2 %v13254_v9  ;;  %v13276_v41 = vpop.permute.xlu1 %51  ;;  %v638_v48 = vsub.f32 %v13250_v20, %v21498_v61  ;;  %v21911_v61 = vand.u32 4294901760, %v13063_v26  ;;  %v13325_v50 = vsub.f32 %v434_v62, %v13304_v28 }
  0xa5   :  { %21908 = vst [vmem:[#allocation18_spill] sm:$0xff] %v13276_v41  ;;  %810 = vmatpush.msra.mxu3 %v13239_v57  ;;  %v13280_v17 = vpop.permute.xlu0 %39  ;;  %v632_v37 = vsub.f32 %v13254_v9, %v21494_v7 }
  0xa6   :  { %v62_v55 = vsel %vm55_vm10, %v13276_v41, %v13280_v17  ;;  %726 = vmatpush.msra.mxu2 %v13250_v20  ;;  %v13306_v41 = vpop.permute.xlu2 %226  ;;  %v13365_v13 = vand.u32 4294901760, %v13325_v50 }
  0xa7   :  { %v13299_v27 = vand.u32 4294901760, %v62_v55  ;;  %v633_v7 = vand.u32 4294901760, %v632_v37  ;;  %v498_v37 = vsub.f32 %v13263_v46, %v13297_v30  ;;  %v241_v42 = vsel %vm236_vm3, %v13075_v29, %v13306_v41  ;;  %v341_v29 = vld [vmem:[%s21478_s2 + $0x18] sm:$0xff] }
  0xa8   :  { %21914 = vst [vmem:[#allocation22_spill] sm:$0xff] %v13365_v13  ;;  %v437_v8 = vsel %vm426_vm6, %v341_v29, 0 }
  0xa9   :  { %486 = vmatpush.msra.mxu0 %v13299_v27  ;;  %634 = vmatpush.msra.mxu1 %v633_v7  ;;  %v13310_v32 = vsub.f32 %v62_v55, %v13299_v27  ;;  %v639_v55 = vand.u32 4294901760, %v638_v48  ;;  %v21913_v48 = vand.u32 4294901760, %v13055_v24 }
  0xaa   :  { %812 = vmatpush.msra.mxu3 %v13299_v27  ;;  %492 = vmatmul.f32.vlgmr.msra.gmra.mxu0 %v13291_v58 }
  0xab   :  { %816 = vmatmul.f32.vlgmr.msra.gmra.mxu3 %v13234_v52  ;;  %888 = vmatpush.msrb.mxu0 %v21911_v61  ;;  %v21501_v40 = vand.u32 4294901760, %v13310_v32 }
  0xac   :  { %1172 = vmatpush.msrb.mxu3 %v1171_v33  ;;  %167 = vrot.lane.b32.xlu2 %v13050_v22, %s12841_s20  ;;  %v13322_v7 = vpop.permute.xlu1 %255 }
  0xad   :  { %205 = vrot.lane.b32.xlu1 %v12935_v2, %s12839_s16  ;;  %234 = vrot.lane.b32.xlu0 %v12935_v2, %s12840_s17  ;;  %v270_v26 = vsel %vm265_vm0, %v12991_v6, %v13322_v7  ;;  %v13339_v33 = vpop.permute.xlu0 %284  ;;  %v644_v62 = vsub.f32 %v13310_v32, %v21501_v40  ;;  %v13354_v6 = vand.u32 4294901760, %v498_v37  ;;  %v21915_v37 = vand.u32 4294901760, %v13058_v25 }
  0xae   :  { %640 = vmatpush.msra.mxu1 %v639_v55  ;;  %729 = vmatpush.msra.mxu2 %v13310_v32  ;;  %v13348_v61 = vand.u32 4294901760, %v270_v26  ;;  %v299_v2 = vsel %vm294_vm1, %v13031_v16, %v13339_v33  ;;  %v13361_v55 = vand.u32 4294901760, %v241_v42 }
  0xaf   :  { %21912 = vst [vmem:[#allocation21_spill] sm:$0xff] %v13354_v6  ;;  %732 = vmatmul.f32.vlgmr.msra.gmra.mxu2 %v13206_v34  ;;  %892 = vmatpush.msrb.mxu0 %v21913_v48  ;;  %v13359_v40 = vand.u32 4294901760, %v299_v2  ;;  %v645_v60 = vand.u32 4294901760, %v644_v62  ;;  %v13378_v62 = vpop.permute.xlu2 %130  ;;  %v21916_v48 = vand.u32 4294901760, %v13104_v39  ;;  %v13396_v39 = vand.u32 4294901760, %v12918_v1 }
  0xb0   :  { %1052 = vmatpush.msrb.mxu2 %v13208_v36  ;;  %v13374_v24 = vsub.f32 %v270_v26, %v13348_v61  ;;  %v13387_v25 = vsub.f32 %v241_v42, %v13361_v55  ;;  %v506_v26 = vsub.f32 %v13325_v50, %v13365_v13 }
  0xb1   :  { %v13369_v16 = vsub.f32 %v299_v2, %v13359_v40  ;;  %896 = vmatpush.msrb.mxu0 %v21915_v37  ;;  %646 = vmatpush.msra.mxu1 %v645_v60  ;;  %v13384_v2 = vand.u32 4294901760, %v437_v8  ;;  %v21917_v37 = vand.u32 4294901760, %v13151_v56 }
  0xb2   :  { %1054 = vmatpush.msrb.mxu2 %v13359_v40  ;;  %500 = vmatmul.f32.gmra.mxu0 %v13354_v6 }
  0xb3   :  { %900 = vmatpush.msrb.mxu0 %v21916_v48  ;;  %648 = vmatmul.f32.vlgmr.msra.gmra.mxu1 %v13179_v3  ;;  %v21505_v29 = vand.u32 4294901760, %v13369_v16  ;;  %v21509_v48 = vand.u32 4294901760, %v13374_v24  ;;  %v13426_v11 = vsub.f32 %v437_v8, %v13384_v2  ;;  %v148_v8 = vsel %vm142_vm7, %v13174_v63, %v13378_v62 }
  0xb4   :  { %822 = vmatmul.f32.gmra.mxu3 %v13297_v30  ;;  %980 = vmatpush.msrb.mxu1 %v13045_v21  ;;  %v13391_v60 = vpop.permute.xlu1 %159  ;;  %v21921_v63 = vand.u32 4294901760, %v13203_v18 }
  0xb5   :  { %904 = vmatpush.msrb.mxu0 %v21917_v37  ;;  %80 = vrot.lane.b32.xlu2 %v13050_v22, %s12844_s23  ;;  %v13402_v42 = vpop.permute.xlu0 %197  ;;  %v1176_v21 = vsub.f32 %v13369_v16, %v21505_v29  ;;  %v21918_v37 = vand.u32 4294901760, %v13123_v45  ;;  %v177_v29 = vsel %vm171_vm4, %v13119_v43, %v13391_v60  ;;  %v13433_v45 = vand.u32 4294901760, %v506_v26 }
  0xb6   :  { %109 = vrot.lane.b32.xlu1 %v13050_v22, %s12842_s21  ;;  %138 = vrot.lane.b32.xlu0 %v13050_v22, %s12843_s22  ;;  %v212_v56 = vsel %vm207_vm5, %v13129_v47, %v13402_v42  ;;  %v342_v47 = vld [vmem:[%s21478_s2 + $0x20] sm:$0xff]  ;;  %v13438_v43 = vsub.f32 %v12918_v1, %v13396_v39  ;;  %v13450_v26 = vand.u32 4294901760, %v177_v29  ;;  %v1182_v1 = vsub.f32 %v13374_v24, %v21509_v48  ;;  %s12853_s21 = smov 33  }
  0xb7   :  { %1056 = vmatpush.msrb.mxu2 %v13348_v61  ;;  %908 = vmatpush.msrb.mxu0 %v21918_v37  ;;  %v13423_v31 = vand.u32 4294901760, %v212_v56  ;;  %v1177_v5 = vand.u32 4294901760, %v1176_v21  ;;  %21919 = vst [vmem:[#allocation23_spill] sm:$0xff] %v13433_v45  ;;  %v440_v37 = vsel %vm426_vm6, %v342_v47, 0 }
  0xb8   :  { %737 = vmatmul.f32.gmra.mxu2 %v13263_v46  ;;  %982 = vmatpush.msrb.mxu1 %v13039_v19  ;;  %v21920_v19 = vand.u32 4294901760, %v13146_v54  ;;  %v13462_v54 = vand.u32 4294901760, %v13426_v11  ;;  %v13483_v12 = vand.u32 4294901760, %v440_v37  ;;  %v13486_v30 = vsub.f32 %v177_v29, %v13450_v26 }
  0xb9   :  { %v13445_v21 = vsub.f32 %v212_v56, %v13423_v31  ;;  %1058 = vmatpush.msrb.mxu2 %v13361_v55  ;;  %1178 = vmatpush.msrb.mxu3 %v1177_v5  ;;  %v1183_v47 = vand.u32 4294901760, %v1182_v1 }
  0xba   :  { %912 = vmatpush.msrb.mxu0 %v21920_v19  ;;  %984 = vmatpush.msrb.mxu1 %v13029_v15  ;;  %21922 = vst [vmem:[#allocation24_spill] sm:$0xff] %v13462_v54  ;;  %v13464_v19 = vand.u32 4294901760, %v148_v8  ;;  %v21923_v15 = vand.u32 4294901760, %v13387_v25 }
  0xbb   :  { %1060 = vmatpush.msrb.mxu2 %v13423_v31  ;;  %v21515_v56 = vand.u32 4294901760, %v13445_v21  ;;  %508 = vmatmul.f32.gmra.mxu0 %v13433_v45 }
  0xbc   :  { %916 = vmatpush.msrb.mxu0 %v21921_v63  ;;  %986 = vmatpush.msrb.mxu1 %v13093_v35  ;;  %v13468_v5 = vpop.permute.xlu1 %72  ;;  %v1188_v18 = vsub.f32 %v13387_v25, %v21923_v15  ;;  %v13474_v63 = vpop.permute.xlu2 %41  ;;  %v21924_v15 = vand.u32 4294901760, %v13254_v9  ;;  %v13507_v29 = vsub.f32 %v148_v8, %v13464_v19 }
  0xbd   :  { %652 = vmatmul.f32.gmra.mxu1 %v13245_v0  ;;  %828 = vmatmul.f32.gmra.mxu3 %v13365_v13  ;;  %v13478_v48 = vpop.permute.xlu0 %101  ;;  %v1194_v35 = vsub.f32 %v13445_v21, %v21515_v56  ;;  %v90_v13 = vsel %vm84_vm8, %v13222_v44, %v13468_v5  ;;  %v61_v44 = vsel %vm55_vm10, %v13280_v17, %v13474_v63 }
  0xbe   :  { %920 = vmatpush.msrb.mxu0 %v21924_v15  ;;  %988 = vmatpush.msrb.mxu1 %v13140_v51  ;;  %v119_v56 = vsel %vm113_vm9, %v13052_v23, %v13478_v48  ;;  %v514_v51 = vsub.f32 %v13426_v11, %v13462_v54  ;;  %v1189_v23 = vand.u32 4294901760, %v1188_v18  ;;  %v21926_v15 = vand.u32 4294901760, %v13250_v20  ;;  %v343_v18 = vld [vmem:[%s21478_s2 + $0x28] sm:$0xff] }
  0xbf   :  { %49 = vrot.lane.b32.xlu0 %v13050_v22, %s12845_s26  ;;  %1062 = vmatpush.msrb.mxu2 %v13396_v39  ;;  %v13502_v9 = vand.u32 4294901760, %v119_v56  ;;  %v21925_v22 = vand.u32 4294901760, %v13438_v43  ;;  %v13520_v8 = vand.u32 4294901760, %v90_v13  ;;  %v1195_v46 = vand.u32 4294901760, %v1194_v35 }
  0xc0   :  { %1184 = vmatpush.msrb.mxu3 %v1183_v47  ;;  %742 = vmatmul.f32.gmra.mxu2 %v13325_v50  ;;  %v13526_v17 = vsub.f32 %v440_v37, %v13483_v12  ;;  %v21522_v20 = vand.u32 4294901760, %v13486_v30  ;;  %v13533_v47 = vand.u32 4294901760, %v61_v44  ;;  %v21521_v37 = vand.u32 4294901760, %v13507_v29 }
  0xc1   :  { %v1200_v1 = vsub.f32 %v13438_v43, %v21925_v22  ;;  %924 = vmatpush.msrb.mxu0 %v21926_v15  ;;  %990 = vmatpush.msrb.mxu1 %v13100_v38  ;;  %v13523_v52 = vsub.f32 %v119_v56, %v13502_v9  ;;  %v21928_v38 = vand.u32 4294901760, %v13310_v32  ;;  %v13538_v56 = vand.u32 4294901760, %v514_v51 }
  0xc2   :  { %21927 = vst [vmem:[#allocation25_spill] sm:$0xff] %v13526_v17  ;;  %1064 = vmatpush.msrb.mxu2 %v13450_v26  ;;  %1190 = vmatpush.msrb.mxu3 %v1189_v23  ;;  %v443_v23 = vsel %vm426_vm6, %v343_v18, 0  ;;  %v13546_v22 = vsub.f32 %v90_v13, %v13520_v8  ;;  %v1206_v51 = vsub.f32 %v13486_v30, %v21522_v20 }
  0xc3   :  { %928 = vmatpush.msrb.mxu0 %v21928_v38  ;;  %992 = vmatpush.msrb.mxu1 %v13134_v49  ;;  %21929 = vst [vmem:[#allocation26_spill] sm:$0xff] %v13538_v56  ;;  %v21520_v35 = vand.u32 4294901760, %v13523_v52  ;;  %v1201_v32 = vand.u32 4294901760, %v1200_v1  ;;  %v13550_v49 = vand.u32 4294901760, %v13526_v17  ;;  %v13558_v15 = vsub.f32 %v61_v44, %v13533_v47 }
  0xc4   :  { %1066 = vmatpush.msrb.mxu2 %v13464_v19  ;;  %1196 = vmatpush.msrb.mxu3 %v1195_v46  ;;  %v13562_v13 = vand.u32 4294901760, %v443_v23  ;;  %v1223_v1 = vand.u32 4294901760, %v13546_v22  ;;  %v1207_v18 = vand.u32 4294901760, %v1206_v51  ;;  %v21933_v51 = vand.u32 4294901760, %v13237_v53 }
  0xc5   :  { %1285 = vmatpush.msra.mxu0 %v13237_v53  ;;  %994 = vmatpush.msrb.mxu1 %v13191_v14  ;;  %21930 = vst [vmem:[#allocation27_spill] sm:$0xff] %v13550_v49  ;;  %v1212_v14 = vsub.f32 %v13507_v29, %v21521_v37  ;;  %v1218_v46 = vsub.f32 %v13523_v52, %v21520_v35 }
  0xc6   :  { %1068 = vmatpush.msrb.mxu2 %v13502_v9  ;;  %516 = vmatmul.f32.gmra.mxu0 %v13538_v56  ;;  %21931 = vst [vmem:[#allocation28_spill] sm:$0xff] %v13562_v13  ;;  %v522_v44 = vsub.f32 %v13526_v17, %v13550_v49  ;;  %v1224_v38 = vsub.f32 %v13546_v22, %v1223_v1 }
  0xc7   :  { %1288 = vmatpush.msra.mxu0 %v13369_v16  ;;  %656 = vmatmul.f32.gmra.mxu1 %v13304_v28  ;;  %v1213_v35 = vand.u32 4294901760, %v1212_v14  ;;  %v1219_v37 = vand.u32 4294901760, %v1218_v46  ;;  %v21936_v14 = vand.u32 4294901760, %v13558_v15 }
  0xc8   :  { %834 = vmatmul.f32.gmra.mxu3 %v13462_v54  ;;  %996 = vmatpush.msrb.mxu1 %v13247_v4  ;;  %v344_v4 = vld [vmem:[%s21478_s2 + $0x30] sm:$0xff] }
  0xc9   :  { %1070 = vmatpush.msrb.mxu2 %v13520_v8  ;;  %1202 = vmatpush.msrb.mxu3 %v1201_v32  ;;  %v13585_v32 = vsub.f32 %v443_v23, %v13562_v13  ;;  %v446_v20 = vsel %vm426_vm6, %v344_v4, 0  ;;  %v21935_v23 = vand.u32 4294901760, %v13369_v16  ;;  %v345_v16 = vld [vmem:[%s21478_s2 + $0x38] sm:$0xff] }
  0xca   :  { %1291 = vmatpush.msra.mxu0 %v13374_v24  ;;  %747 = vmatmul.f32.gmra.mxu2 %v13426_v11  ;;  %v13607_v46 = vand.u32 4294901760, %v446_v20 }
  0xcb   :  { %998 = vmatpush.msrb.mxu1 %v13239_v57  ;;  %1072 = vmatpush.msrb.mxu2 %v13533_v47  ;;  %21932 = vst [vmem:[#allocation29_spill] sm:$0xff] %v13585_v32  ;;  %v13592_v57 = vand.u32 4294901760, %v522_v44  ;;  %v13605_v53 = vand.u32 4294901760, %v13585_v32  ;;  %v21939_v44 = vand.u32 4294901760, %v13374_v24  ;;  %v21941_v24 = vand.u32 4294901760, %v13387_v25 }
  0xcc   :  { %1208 = vmatpush.msrb.mxu3 %v1207_v18  ;;  %1294 = vmatpush.msra.mxu0 %v13387_v25  ;;  %21938 = vst [vmem:[#allocation32_spill] sm:$0xff] %v13607_v46  ;;  %v13622_v18 = vsub.f32 %v446_v20, %v13607_v46  ;;  %v21945_v25 = vand.u32 4294901760, %v13438_v43 }
  0xcd   :  { %1000 = vmatpush.msrb.mxu1 %v13299_v27  ;;  %1474 = vmatpush.msra.mxu2 %v21933_v51  ;;  %21934 = vst [vmem:[#allocation30_spill] sm:$0xff] %v13592_v57  ;;  %v1230_v27 = vsub.f32 %v13558_v15, %v21936_v14  ;;  %v530_v4 = vsub.f32 %v13585_v32, %v13605_v53  ;;  %v21944_v14 = vand.u32 4294901760, %v13445_v21 }
  0xce   :  { %1214 = vmatpush.msrb.mxu3 %v1213_v35  ;;  %1297 = vmatpush.msra.mxu0 %v13445_v21  ;;  %21937 = vst [vmem:[#allocation31_spill] sm:$0xff] %v13605_v53  ;;  %v1225_v35 = vand.u32 4294901760, %v1224_v38  ;;  %v449_v38 = vsel %vm426_vm6, %v345_v16, 0  ;;  %v13636_v51 = vand.u32 4294901760, %v13622_v18 }
  0xcf   :  { %1378 = vmatpush.msra.mxu1 %v13208_v36  ;;  %1478 = vmatpush.msra.mxu2 %v21935_v23  ;;  %21940 = vst [vmem:[#allocation33_spill] sm:$0xff] %v13622_v18  ;;  %v13633_v20 = vand.u32 4294901760, %v530_v4  ;;  %v13638_v23 = vand.u32 4294901760, %v449_v38 }
  0xd0   :  { %1220 = vmatpush.msrb.mxu3 %v1219_v37  ;;  %1300 = vmatpush.msra.mxu0 %v13438_v43  ;;  %v1231_v37 = vand.u32 4294901760, %v1230_v27  ;;  %21943 = vst [vmem:[#allocation35_spill] sm:$0xff] %v13636_v51  ;;  %v538_v21 = vsub.f32 %v13622_v18, %v13636_v51  ;;  %v21947_v43 = vand.u32 4294901760, %v13486_v30 }
  0xd1   :  { %1380 = vmatpush.msra.mxu1 %v13359_v40  ;;  %524 = vmatmul.f32.gmra.mxu0 %v13592_v57  ;;  %21942 = vst [vmem:[#allocation34_spill] sm:$0xff] %v13633_v20  ;;  %v13656_v27 = vsub.f32 %v449_v38, %v13638_v23 }
  0xd2   :  { %660 = vmatmul.f32.gmra.mxu1 %v13384_v2  ;;  %840 = vmatmul.f32.gmra.mxu3 %v13550_v49 }
  0xd3   :  { %1482 = vmatpush.msra.mxu2 %v21939_v44  ;;  %1226 = vmatpush.msrb.mxu3 %v1225_v35  ;;  %21946 = vst [vmem:[#allocation36_spill] sm:$0xff] %v13656_v27  ;;  %v13668_v35 = vand.u32 4294901760, %v538_v21  ;;  %v13671_v16 = vand.u32 4294901760, %v13656_v27 }
  0xd4   :  { %1303 = vmatpush.msra.mxu0 %v13486_v30  ;;  %1382 = vmatpush.msra.mxu1 %v13348_v61  ;;  %v21951_v30 = vand.u32 4294901760, %v13507_v29 }
  0xd5   :  { %752 = vmatmul.f32.gmra.mxu2 %v13526_v17  ;;  %1232 = vmatpush.msrb.mxu3 %v1231_v37  ;;  %21948 = vst [vmem:[#allocation37_spill] sm:$0xff] %v13668_v35 }
  0xd6   :  { %1486 = vmatpush.msra.mxu2 %v21941_v24  ;;  %1306 = vmatpush.msra.mxu0 %v13507_v29  ;;  %21949 = vst [vmem:[#allocation38_spill] sm:$0xff] %v13671_v16  ;;  %v546_v29 = vsub.f32 %v13656_v27, %v13671_v16 }
  0xd7   :  { %1384 = vmatpush.msra.mxu1 %v13361_v55  ;;  %1566 = vmatpush.msra.mxu3 %v13208_v36  ;;  %v346_v36 = vld [vmem:[%s21478_s2 + $0x40] sm:$0xff] }
  0xd8   :  { %1490 = vmatpush.msra.mxu2 %v21944_v14  ;;  %1309 = vmatpush.msra.mxu0 %v13523_v52 }
  0xd9   :  { %1386 = vmatpush.msra.mxu1 %v13423_v31  ;;  %1568 = vmatpush.msra.mxu3 %v13359_v40  ;;  %v452_v40 = vsel %vm426_vm6, %v346_v36, 0 }
  0xda   :  { %1494 = vmatpush.msra.mxu2 %v21945_v25  ;;  %1312 = vmatpush.msra.mxu0 %v13546_v22  ;;  %v13673_v44 = vand.u32 4294901760, %v452_v40 }
  0xdb   :  { %1388 = vmatpush.msra.mxu1 %v13396_v39  ;;  %532 = vmatmul.f32.gmra.mxu0 %v13633_v20 }
  0xdc   :  { %664 = vmatmul.f32.gmra.mxu1 %v13483_v12  ;;  %846 = vmatmul.f32.gmra.mxu3 %v13605_v53  ;;  %21950 = vst [vmem:[#allocation39_spill] sm:$0xff] %v13673_v44  ;;  %v13690_v37 = vsub.f32 %v452_v40, %v13673_v44  ;;  %v13757_v40 = vpop.permute.xlu0 %315 }
  0xdd   :  { %1498 = vmatpush.msra.mxu2 %v21947_v43  ;;  %1570 = vmatpush.msra.mxu3 %v13348_v61  ;;  %v347_v61 = vld [vmem:[%s21478_s2 + $0x48] sm:$0xff]  ;;  %v13761_v43 = vpop.permute.xlu1 %286 }
  0xde   :  { %1315 = vmatpush.msra.mxu0 %v13558_v15  ;;  %1390 = vmatpush.msra.mxu1 %v13450_v26  ;;  %21953 = vst [vmem:[#allocation40_spill] sm:$0xff] %v13690_v37  ;;  %v13706_v22 = vand.u32 4294901760, %v13690_v37 }
  0xdf   :  { %757 = vmatmul.f32.gmra.mxu2 %v13585_v32  ;;  %1572 = vmatpush.msra.mxu3 %v13361_v55  ;;  %v21952_v55 = vand.u32 4294901760, %v13523_v52  ;;  %v21954_v52 = vand.u32 4294901760, %v13558_v15  ;;  %v348_v15 = vld [vmem:[%s21478_s2 + $0x50] sm:$0xff] }
  0xe0   :  { %1502 = vmatpush.msra.mxu2 %v21951_v30  ;;  %1392 = vmatpush.msra.mxu1 %v13464_v19  ;;  %21956 = vst [vmem:[#allocation42_spill] sm:$0xff] %v13706_v22  ;;  %v458_v38 = vsel %vm426_vm6, %v348_v15, 0  ;;  %v327_v30 = vsel %vm323_vm2, %v13163_v59, %v13757_v40 }
  0xe1   :  { %1574 = vmatpush.msra.mxu3 %v13423_v31  ;;  %v455_v31 = vsel %vm426_vm6, %v347_v61, 0  ;;  %v13732_v24 = vand.u32 4294901760, %v458_v38  ;;  %v298_v61 = vsel %vm294_vm1, %v13339_v33, %v13761_v43 }
  0xe2   :  { %1506 = vmatpush.msra.mxu2 %v21952_v55  ;;  %1394 = vmatpush.msra.mxu1 %v13502_v9  ;;  %v13772_v55 = vand.u32 4294901760, %v327_v30 }
  0xe3   :  { %1576 = vmatpush.msra.mxu3 %v13396_v39  ;;  %540 = vmatmul.f32.gmra.mxu0 %v13668_v35  ;;  %v13703_v39 = vand.u32 4294901760, %v546_v29  ;;  %v13738_v14 = vsub.f32 %v458_v38, %v13732_v24  ;;  %v13774_v29 = vpop.permute.xlu2 %257 }
  0xe4   :  { %1510 = vmatpush.msra.mxu2 %v1223_v1  ;;  %1396 = vmatpush.msra.mxu1 %v13520_v8  ;;  %v13708_v1 = vand.u32 4294901760, %v455_v31  ;;  %v13787_v59 = vsub.f32 %v327_v30, %v13772_v55  ;;  %v13789_v33 = vpop.permute.xlu0 %228 }
  0xe5   :  { %668 = vmatmul.f32.gmra.mxu1 %v13562_v13  ;;  %852 = vmatmul.f32.gmra.mxu3 %v13636_v51  ;;  %21955 = vst [vmem:[#allocation41_spill] sm:$0xff] %v13703_v39  ;;  %v13746_v36 = vand.u32 4294901760, %v13738_v14 }
  0xe6   :  { %1514 = vmatpush.msra.mxu2 %v21954_v52  ;;  %1578 = vmatpush.msra.mxu3 %v13450_v26  ;;  %21957 = vst [vmem:[#allocation43_spill] sm:$0xff] %v13708_v1  ;;  %v554_v26 = vsub.f32 %v13690_v37, %v13706_v22  ;;  %v13719_v4 = vsub.f32 %v455_v31, %v13708_v1  ;;  %v13781_v52 = vand.u32 4294901760, %v298_v61 }
  0xe7   :  { %1398 = vmatpush.msra.mxu1 %v13533_v47  ;;  %762 = vmatmul.f32.gmra.mxu2 %v13622_v18  ;;  %21961 = vst [vmem:[#allocation47_spill] sm:$0xff] %v13738_v14  ;;  %v570_v25 = vsub.f32 %v13738_v14, %v13746_v36  ;;  %v269_v31 = vsel %vm265_vm0, %v13322_v7, %v13774_v29 }
  0xe8   :  { %1580 = vmatpush.msra.mxu3 %v13464_v19  ;;  %21958 = vst [vmem:[#allocation44_spill] sm:$0xff] %v13719_v4  ;;  %v13727_v19 = vand.u32 4294901760, %v554_v26  ;;  %v13793_v15 = vand.u32 4294901760, %v269_v31  ;;  %v240_v7 = vsel %vm236_vm3, %v13306_v41, %v13789_v33  ;;  %v13800_v26 = vpop.permute.xlu1 %199 }
  0xe9   :  { %21963 = vst [vmem:[#allocation49_spill] sm:$0xff] %v13746_v36  ;;  %v13754_v21 = vand.u32 4294901760, %v570_v25  ;;  %v211_v38 = vsel %vm207_vm5, %v13402_v42, %v13800_v26  ;;  %v21533_v42 = vand.u32 4294901760, %v13787_v59 }
  0xea   :  { %1582 = vmatpush.msra.mxu3 %v13502_v9  ;;  %21959 = vst [vmem:[#allocation45_spill] sm:$0xff] %v13727_v19  ;;  %v13730_v9 = vand.u32 4294901760, %v13719_v4  ;;  %v13813_v41 = vand.u32 4294901760, %v211_v38 }
  0xeb   :  { %548 = vmatmul.f32.gmra.mxu0 %v13703_v39  ;;  %21964 = vst [vmem:[#allocation50_spill] sm:$0xff] %v13754_v21  ;;  %v13827_v25 = vpop.permute.xlu2 %161  ;;  %v1756_v30 = vsub.f32 %v13787_v59, %v21533_v42 }
  0xec   :  { %1584 = vmatpush.msra.mxu3 %v13520_v8  ;;  %21960 = vst [vmem:[#allocation46_spill] sm:$0xff] %v13730_v9  ;;  %v562_v8 = vsub.f32 %v13719_v4, %v13730_v9  ;;  %v176_v42 = vsel %vm171_vm4, %v13391_v60, %v13827_v25 }
  0xed   :  { %672 = vmatmul.f32.gmra.mxu1 %v13607_v46  ;;  %858 = vmatmul.f32.gmra.mxu3 %v13671_v16 }
  0xee   :  { %1586 = vmatpush.msra.mxu3 %v13533_v47  ;;  %v13743_v47 = vand.u32 4294901760, %v562_v8  ;;  %v13809_v8 = vand.u32 4294901760, %v240_v7 }
  0xef   :  { %767 = vmatmul.f32.gmra.mxu2 %v13656_v27 }
  0xf0   :  { %21962 = vst [vmem:[#allocation48_spill] sm:$0xff] %v13743_v47 }
  0xf3   :  { %556 = vmatmul.f32.gmra.mxu0 %v13727_v19 }
  0xf5   :  { %676 = vmatmul.f32.gmra.mxu1 %v13638_v23  ;;  %864 = vmatmul.f32.gmra.mxu3 %v13706_v22  ;;  %v13865_v22 = vsub.f32 %v211_v38, %v13813_v41  ;;  %v12816_v38 = vld [vmem:[%s21477_s0 + $0x10] sm:$0xff] }
  0xf7   :  { %772 = vmatmul.f32.gmra.mxu2 %v13690_v37  ;;  %v13890_v37 = vpop.permute.xlu2 %74 }
  0xfb   :  { %564 = vmatmul.f32.gmra.mxu0 %v13743_v47 }
  0xfd   :  { %680 = vmatmul.f32.gmra.mxu1 %v13673_v44  ;;  %870 = vmatmul.f32.gmra.mxu3 %v13730_v9 }
  0xff   :  { %777 = vmatmul.f32.gmra.mxu2 %v13719_v4 }
 0x103   :  { %572 = vmatmul.f32.gmra.mxu0 %v13754_v21 }
 0x105   :  { %684 = vmatmul.f32.gmra.mxu1 %v13708_v1  ;;  %876 = vmatmul.f32.gmra.mxu3 %v13746_v36  ;;  %v13836_v36 = vpop.permute.xlu0 %132 }
 0x107   :  { %782 = vmatmul.f32.gmra.mxu2 %v13738_v14  ;;  %v13860_v14 = vsub.f32 %v240_v7, %v13809_v8 }
 0x109   :  { %v21554_v4 = vand.u32 4294901760, %v13860_v14 }
 0x10b   :  { %930 = vmatmul.f32.vlgmr.msrb.gmra.mxu0 %v13179_v3  ;;  %v1774_v51 = vsub.f32 %v13860_v14, %v21554_v4 }
 0x10c   :  { %1638 = vmatpush.msrb.mxu0 %v13772_v55 }
 0x10d   :  { %688 = vmatmul.f32.gmra.mxu1 %v13732_v24  ;;  %1234 = vmatmul.f32.vlgmr.msrb.gmra.mxu3 %v13179_v3  ;;  %v13913_v18 = vpop.permute.xlu0 %43 }
 0x10e   :  { %1964 = vmatpush.msrb.mxu3 %v13772_v55  ;;  %1640 = vmatpush.msrb.mxu0 %v13781_v52  ;;  %21968 = vst [vmem:[#allocation53_spill] sm:$0xff] %v13913_v18 }
 0x10f   :  { %1078 = vmatmul.f32.vlgmr.msrb.gmra.mxu2 %v13291_v58  ;;  %v1757_v58 = vand.u32 4294901760, %v1756_v30 }
 0x110   :  { %1871 = vmatpush.msrb.mxu2 %v13787_v59  ;;  %1966 = vmatpush.msrb.mxu3 %v13781_v52 }
 0x111   :  { %1642 = vmatpush.msrb.mxu0 %v13793_v15 }
 0x112   :  { %1968 = vmatpush.msrb.mxu3 %v13793_v15 }
 0x113   :  { %934 = vmatmul.f32.gmra.mxu0 %v13245_v0 }
 0x114   :  { %1644 = vmatpush.msrb.mxu0 %v13809_v8  ;;  %1970 = vmatpush.msrb.mxu3 %v13809_v8 }
 0x115   :  { %1002 = vmatmul.f32.vlgmr.msrb.gmra.mxu1 %v13179_v3  ;;  %1238 = vmatmul.f32.gmra.mxu3 %v13245_v0 }
 0x116   :  { %1646 = vmatpush.msrb.mxu0 %v13813_v41  ;;  %1972 = vmatpush.msrb.mxu3 %v13813_v41 }
 0x117   :  { %1086 = vmatmul.f32.gmra.mxu2 %v13354_v6  ;;  %v13834_v6 = vsub.f32 %v298_v61, %v13781_v52  ;;  %v147_v61 = vsel %vm142_vm7, %v13378_v62, %v13836_v36  ;;  %1758 = vmatpush.msrb.mxu1 %v1757_v58  ;;  %v13867_v62 = vand.u32 4294901760, %v176_v42  ;;  %v13872_v58 = vpop.permute.xlu1 %103 }
 0x118   :  { %v118_v16 = vsel %vm113_vm9, %v13478_v48, %v13872_v58 }
 0x119   :  { %v21540_v9 = vand.u32 4294901760, %v13834_v6  ;;  %1874 = vmatpush.msrb.mxu2 %v13834_v6  ;;  %v13901_v48 = vsub.f32 %v176_v42, %v13867_v62  ;;  %v1775_v42 = vand.u32 4294901760, %v1774_v51 }
 0x11b   :  { %938 = vmatmul.f32.gmra.mxu0 %v13304_v28 }
 0x11d   :  { %1006 = vmatmul.f32.gmra.mxu1 %v13245_v0  ;;  %1242 = vmatmul.f32.gmra.mxu3 %v13304_v28 }
 0x11f   :  { %1094 = vmatmul.f32.gmra.mxu2 %v13433_v45  ;;  %v13841_v45 = vsub.f32 %v269_v31, %v13793_v15  ;;  %v1762_v31 = vsub.f32 %v13834_v6, %v21540_v9 }
 0x121   :  { %v21547_v60 = vand.u32 4294901760, %v13841_v45  ;;  %1877 = vmatpush.msrb.mxu2 %v13841_v45  ;;  %v1763_v9 = vand.u32 4294901760, %v1762_v31  ;;  %v89_v31 = vsel %vm84_vm8, %v13468_v5, %v13890_v37 }
 0x123   :  { %942 = vmatmul.f32.gmra.mxu0 %v13384_v2  ;;  %1880 = vmatpush.msrb.mxu2 %v13860_v14  ;;  %v1768_v7 = vsub.f32 %v13841_v45, %v21547_v60 }
 0x124   :  { %1764 = vmatpush.msrb.mxu1 %v1763_v9 }
 0x125   :  { %1010 = vmatmul.f32.gmra.mxu1 %v13304_v28  ;;  %1246 = vmatmul.f32.gmra.mxu3 %v13384_v2  ;;  %v1769_v60 = vand.u32 4294901760, %v1768_v7  ;;  %v21967_v7 = vand.u32 4294901760, %v13865_v22 }
 0x126   :  { %1883 = vmatpush.msrb.mxu2 %v13865_v22 }
 0x127   :  { %1102 = vmatmul.f32.gmra.mxu2 %v13538_v56  ;;  %v13854_v30 = vpop.f32.mrf.mxu0  ;;  %v13869_v56 = vand.u32 4294901760, %v147_v61  ;;  %v1780_v4 = vsub.f32 %v13865_v22, %v21967_v7  ;;  %v60_v7 = vsel %vm55_vm10, %v13474_v63, %v13913_v18  ;;  %1770 = vmatpush.msrb.mxu1 %v1769_v60  ;;  %v21972_v63 = vand.u32 4294901760, %v13901_v48 }
 0x128   :  { %21965 = vst [vmem:[#allocation51_spill] sm:$0xff] %v13854_v30  ;;  %v13881_v30 = vand.u32 4294901760, %v12816_v38 }
 0x129   :  { %v13919_v5 = vsub.f32 %v147_v61, %v13869_v56  ;;  %v1781_v51 = vand.u32 4294901760, %v1780_v4  ;;  %1776 = vmatpush.msrb.mxu1 %v1775_v42  ;;  %v13947_v4 = vand.u32 4294901760, %v60_v7 }
 0x12a   :  { %v13898_v27 = vsub.f32 %v12816_v38, %v13881_v30  ;;  %1648 = vmatpush.msrb.mxu0 %v13881_v30  ;;  %1974 = vmatpush.msrb.mxu3 %v13881_v30  ;;  %v13933_v38 = vand.u32 4294901760, %v89_v31 }
 0x12b   :  { %946 = vmatmul.f32.gmra.mxu0 %v13483_v12  ;;  %1782 = vmatpush.msrb.mxu1 %v1781_v51 }
 0x12c   :  { %1886 = vmatpush.msrb.mxu2 %v13898_v27  ;;  %1650 = vmatpush.msrb.mxu0 %v13867_v62  ;;  %v21971_v61 = vand.u32 4294901760, %v13898_v27  ;;  %v13961_v42 = vsub.f32 %v89_v31, %v13933_v38 }
 0x12d   :  { %1014 = vmatmul.f32.gmra.mxu1 %v13384_v2  ;;  %1250 = vmatmul.f32.gmra.mxu3 %v13483_v12 }
 0x12e   :  { %v13907_v53 = vpop.f32.mrf.mxu3  ;;  %1976 = vmatpush.msrb.mxu3 %v13867_v62  ;;  %v1786_v9 = vsub.f32 %v13898_v27, %v21971_v61  ;;  %1889 = vmatpush.msrb.mxu2 %v13901_v48 }
 0x12f   :  { %21966 = vst [vmem:[#allocation52_spill] sm:$0xff] %v13907_v53  ;;  %1110 = vmatmul.f32.gmra.mxu2 %v13592_v57  ;;  %v13922_v53 = vand.u32 4294901760, %v118_v16  ;;  %v13928_v49 = vpop.f32.mrf.mxu0  ;;  %1652 = vmatpush.msrb.mxu0 %v13869_v56 }
 0x130   :  { %21969 = vst [vmem:[#allocation54_spill] sm:$0xff] %v13928_v49  ;;  %v13930_v57 = vpop.f32.mrf.mxu1  ;;  %v1792_v49 = vsub.f32 %v13901_v48, %v21972_v63  ;;  %v1787_v18 = vand.u32 4294901760, %v1786_v9  ;;  %1978 = vmatpush.msrb.mxu3 %v13869_v56  ;;  %1892 = vmatpush.msrb.mxu2 %v13919_v5 }
 0x131   :  { %21970 = vst [vmem:[#allocation55_spill] sm:$0xff] %v13930_v57  ;;  %v21562_v57 = vand.u32 4294901760, %v13919_v5  ;;  %1654 = vmatpush.msrb.mxu0 %v13922_v53 }
 0x132   :  { %v13944_v60 = vpop.f32.mrf.mxu2  ;;  %v1793_v61 = vand.u32 4294901760, %v1792_v49  ;;  %1788 = vmatpush.msrb.mxu1 %v1787_v18  ;;  %1980 = vmatpush.msrb.mxu3 %v13922_v53 }
 0x133   :  { %21973 = vst [vmem:[#allocation56_spill] sm:$0xff] %v13944_v60  ;;  %950 = vmatmul.f32.gmra.mxu0 %v13562_v13  ;;  %v1798_v63 = vsub.f32 %v13919_v5, %v21562_v57  ;;  %v13956_v60 = vsub.f32 %v118_v16, %v13922_v53  ;;  %v13970_v16 = vsub.f32 %v60_v7, %v13947_v4  ;;  %v21566_v57 = vand.u32 4294901760, %v13961_v42 }
 0x134   :  { %1794 = vmatpush.msrb.mxu1 %v1793_v61  ;;  %1656 = vmatpush.msrb.mxu0 %v13933_v38 }
 0x135   :  { %1018 = vmatmul.f32.gmra.mxu1 %v13483_v12  ;;  %1254 = vmatmul.f32.gmra.mxu3 %v13562_v13  ;;  %v1799_v9 = vand.u32 4294901760, %v1798_v63  ;;  %v21563_v49 = vand.u32 4294901760, %v13956_v60  ;;  %v1810_v31 = vsub.f32 %v13961_v42, %v21566_v57  ;;  %v21567_v7 = vand.u32 4294901760, %v13970_v16 }
 0x136   :  { %1895 = vmatpush.msrb.mxu2 %v13956_v60  ;;  %1982 = vmatpush.msrb.mxu3 %v13933_v38 }
 0x137   :  { %1118 = vmatmul.f32.gmra.mxu2 %v13633_v20  ;;  %v13966_v51 = vpop.f32.mrf.mxu3  ;;  %v1804_v18 = vsub.f32 %v13956_v60, %v21563_v49  ;;  %1800 = vmatpush.msrb.mxu1 %v1799_v9  ;;  %v1811_v20 = vand.u32 4294901760, %v1810_v31  ;;  %v1816_v57 = vsub.f32 %v13970_v16, %v21567_v7 }
 0x138   :  { %21974 = vst [vmem:[#allocation57_spill] sm:$0xff] %v13966_v51  ;;  %v509_v63 = vpop.f32.mrf.mxu0  ;;  %1898 = vmatpush.msrb.mxu2 %v13961_v42  ;;  %1658 = vmatpush.msrb.mxu0 %v13947_v4 }
 0x139   :  { %v1805_v61 = vand.u32 4294901760, %v1804_v18  ;;  %v1817_v9 = vand.u32 4294901760, %v1816_v57  ;;  %1984 = vmatpush.msrb.mxu3 %v13947_v4 }
 0x13a   :  { %v13983_v51 = vpop.f32.mrf.mxu1  ;;  %1901 = vmatpush.msrb.mxu2 %v13970_v16 }
 0x13b   :  { %21975 = vst [vmem:[#allocation58_spill] sm:$0xff] %v13983_v51  ;;  %954 = vmatmul.f32.gmra.mxu0 %v13607_v46  ;;  %v13987_v49 = vpop.f32.mrf.mxu2  ;;  %1806 = vmatpush.msrb.mxu1 %v1805_v61 }
 0x13c   :  { %21976 = vst [vmem:[#allocation59_spill] sm:$0xff] %v13987_v49 }
 0x13d   :  { %1022 = vmatmul.f32.gmra.mxu1 %v13562_v13  ;;  %1258 = vmatmul.f32.gmra.mxu3 %v13607_v46 }
 0x13e   :  { %1812 = vmatpush.msrb.mxu1 %v1811_v20 }
 0x13f   :  { %1126 = vmatmul.f32.gmra.mxu2 %v13668_v35 }
 0x140   :  { %v829_v18 = vpop.f32.mrf.mxu3  ;;  %1818 = vmatpush.msrb.mxu1 %v1817_v9 }
 0x143   :  { %958 = vmatmul.f32.gmra.mxu0 %v13638_v23  ;;  %v743_v31 = vpop.f32.mrf.mxu2  ;;  %v517_v7 = vpop.f32.mrf.mxu0 }
 0x144   :  { %v657_v49 = vpop.f32.mrf.mxu1 }
 0x145   :  { %1026 = vmatmul.f32.gmra.mxu1 %v13607_v46  ;;  %1262 = vmatmul.f32.gmra.mxu3 %v13638_v23  ;;  %v658_v61 = vadd.f32 %v657_v49, %v509_v63 }
 0x147   :  { %1134 = vmatmul.f32.gmra.mxu2 %v13703_v39  ;;  %v744_v57 = vadd.f32 %v743_v31, %v658_v61 }
 0x149   :  { %v14003_v51 = vadd.f32 %v829_v18, %v744_v57 }
 0x14b   :  { %962 = vmatmul.f32.gmra.mxu0 %v13673_v44  ;;  %v835_v20 = vpop.f32.mrf.mxu3 }
 0x14d   :  { %1030 = vmatmul.f32.gmra.mxu1 %v13638_v23  ;;  %1266 = vmatmul.f32.gmra.mxu3 %v13673_v44  ;;  %v748_v35 = vpop.f32.mrf.mxu2 }
 0x14e   :  { %v525_v9 = vpop.f32.mrf.mxu0 }
 0x14f   :  { %1142 = vmatmul.f32.gmra.mxu2 %v13727_v19  ;;  %v661_v46 = vpop.f32.mrf.mxu1 }
 0x150   :  { %v662_v13 = vadd.f32 %v661_v46, %v517_v7 }
 0x152   :  { %v749_v32 = vadd.f32 %v748_v35, %v662_v13  ;;  %v14021_v35 = vpop.permute.xlu1 %317 }
 0x153   :  { %966 = vmatmul.f32.gmra.mxu0 %v13708_v1  ;;  %21977 = vst [vmem:[#allocation60_spill] sm:$0xff] %v14021_v35 }
 0x154   :  { %v14010_v49 = vadd.f32 %v835_v20, %v749_v32 }
 0x155   :  { %1034 = vmatmul.f32.gmra.mxu1 %v13673_v44  ;;  %1270 = vmatmul.f32.gmra.mxu3 %v13708_v1  ;;  %v841_v63 = vpop.f32.mrf.mxu3 }
 0x157   :  { %1150 = vmatmul.f32.gmra.mxu2 %v13743_v47  ;;  %v14023_v47 = vpop.permute.xlu2 %288 }
 0x158   :  { %v533_v18 = vpop.f32.mrf.mxu0  ;;  %v753_v31 = vpop.f32.mrf.mxu2  ;;  %21978 = vst [vmem:[#allocation61_spill] sm:$0xff] %v14023_v47 }
 0x159   :  { %v665_v61 = vpop.f32.mrf.mxu1 }
 0x15a   :  { %v666_v57 = vadd.f32 %v665_v61, %v525_v9  ;;  %v14029_v9 = vsel %vm323_vm2, %v13757_v40, %v14021_v35 }
 0x15b   :  { %970 = vmatmul.f32.gmra.mxu0 %v13732_v24  ;;  %v14043_v40 = vand.u32 4294901760, %v14029_v9 }
 0x15c   :  { %v754_v19 = vadd.f32 %v753_v31, %v666_v57  ;;  %v21981_v57 = vand.u32 4294901760, %v13834_v6 }
 0x15d   :  { %1038 = vmatmul.f32.gmra.mxu1 %v13708_v1  ;;  %1274 = vmatmul.f32.gmra.mxu3 %v13732_v24 }
 0x15e   :  { %v14018_v13 = vadd.f32 %v841_v63, %v754_v19  ;;  %v21979_v19 = vand.u32 4294901760, %v13787_v59  ;;  %v14038_v63 = vsel %vm294_vm1, %v13761_v43, %v14023_v47  ;;  %v21989_v47 = vld [vmem:[#allocation16_spill] sm:$0xff] }
 0x15f   :  { %1158 = vmatmul.f32.gmra.mxu2 %v13754_v21  ;;  %v847_v32 = vpop.f32.mrf.mxu3 }
 0x160   :  { %v541_v46 = vpop.f32.mrf.mxu0 }
 0x162   :  { %v669_v7 = vpop.f32.mrf.mxu1  ;;  %v758_v20 = vpop.f32.mrf.mxu2 }
 0x163   :  { %v670_v31 = vadd.f32 %v669_v7, %v533_v18  ;;  %1318 = vmatmul.f32.vlgmr.msra.gmra.mxu0 %v13206_v34  ;;  %v14045_v18 = vpop.permute.xlu0 %259  ;;  %v14059_v7 = vand.u32 4294901760, %v14038_v63 }
 0x164   :  { %2060 = vmatpush.msra.mxu0 %v21979_v19  ;;  %21980 = vst [vmem:[#allocation62_spill] sm:$0xff] %v14045_v18  ;;  %v14053_v59 = vsel %vm265_vm0, %v13774_v29, %v14045_v18  ;;  %v21984_v29 = vand.u32 4294901760, %v13860_v14  ;;  %v21986_v18 = vld [vmem:[#allocation17_spill] sm:$0xff]  ;;  %v14082_v14 = vpop.permute.xlu2 %201 }
 0x165   :  { %v759_v61 = vadd.f32 %v758_v20, %v670_v31  ;;  %1042 = vmatmul.f32.gmra.mxu1 %v13732_v24  ;;  %1588 = vmatmul.f32.vlgmr.msra.gmra.mxu3 %v13179_v3  ;;  %v21983_v20 = vand.u32 4294901760, %v13841_v45  ;;  %v14065_v6 = vand.u32 4294901760, %v14053_v59  ;;  %21988 = vst [vmem:[#allocation17_spill] sm:$0xff] %v14082_v14 }
 0x166   :  { %2064 = vmatpush.msra.mxu0 %v21981_v57 }
 0x167   :  { %v14055_v43 = vadd.f32 %v847_v32, %v759_v61  ;;  %1516 = vmatmul.f32.vlgmr.msra.gmra.mxu2 %v13179_v3  ;;  %v14070_v61 = vpop.permute.xlu1 %230 }
 0x168   :  { %2068 = vmatpush.msra.mxu0 %v21983_v20  ;;  %v549_v31 = vpop.f32.mrf.mxu0  ;;  %v853_v19 = vpop.f32.mrf.mxu3  ;;  %2224 = vmatpush.msra.mxu2 %v14043_v40  ;;  %21985 = vst [vmem:[#allocation64_spill] sm:$0xff] %v14070_v61  ;;  %v14077_v45 = vsel %vm236_vm3, %v13789_v33, %v14070_v61  ;;  %v21987_v20 = vand.u32 4294901760, %v13865_v22  ;;  %v21990_v22 = vand.u32 4294901760, %v13898_v27 }
 0x169   :  { %21982 = vst [vmem:[#allocation63_spill] sm:$0xff] %v14055_v43  ;;  %v14096_v33 = vand.u32 4294901760, %v14077_v45 }
 0x16a   :  { %v673_v57 = vpop.f32.mrf.mxu1  ;;  %2072 = vmatpush.msra.mxu0 %v21984_v29  ;;  %v763_v32 = vpop.f32.mrf.mxu2  ;;  %2226 = vmatpush.msra.mxu2 %v14059_v7 }
 0x16b   :  { %v674_v43 = vadd.f32 %v673_v57, %v541_v46  ;;  %1323 = vmatmul.f32.gmra.mxu0 %v21986_v18  ;;  %v14090_v46 = vsel %vm207_vm5, %v13800_v26, %v14082_v14 }
 0x16c   :  { %2076 = vmatpush.msra.mxu0 %v21987_v20  ;;  %2228 = vmatpush.msra.mxu2 %v14065_v6  ;;  %v14105_v20 = vand.u32 4294901760, %v14090_v46 }
 0x16d   :  { %v764_v29 = vadd.f32 %v763_v32, %v674_v43  ;;  %1402 = vmatmul.f32.vlgmr.msra.gmra.mxu1 %v21989_v47  ;;  %1592 = vmatmul.f32.gmra.mxu3 %v13245_v0  ;;  %v21991_v43 = vand.u32 4294901760, %v13901_v48 }
 0x16e   :  { %2152 = vmatpush.msra.mxu1 %v13772_v55  ;;  %2080 = vmatpush.msra.mxu0 %v21990_v22  ;;  %v21992_v55 = vand.u32 4294901760, %v13919_v5  ;;  %v21994_v22 = vld [vmem:[#allocation20_spill] sm:$0xff] }
 0x16f   :  { %v14098_v57 = vadd.f32 %v853_v19, %v764_v29  ;;  %1520 = vmatmul.f32.gmra.mxu2 %v13245_v0 }
 0x170   :  { %2154 = vmatpush.msra.mxu1 %v13781_v52  ;;  %2084 = vmatpush.msra.mxu0 %v21991_v43  ;;  %v557_v32 = vpop.f32.mrf.mxu0  ;;  %v859_v26 = vpop.f32.mrf.mxu3  ;;  %v21993_v52 = vand.u32 4294901760, %v13956_v60 }
 0x171   :  { %2230 = vmatpush.msra.mxu2 %v14096_v33 }
 0x172   :  { %2156 = vmatpush.msra.mxu1 %v13793_v15  ;;  %v677_v27 = vpop.f32.mrf.mxu1  ;;  %2088 = vmatpush.msra.mxu0 %v21992_v55  ;;  %v768_v19 = vpop.f32.mrf.mxu2  ;;  %v21995_v15 = vand.u32 4294901760, %v13961_v42 }
 0x173   :  { %v678_v29 = vadd.f32 %v677_v27, %v549_v31  ;;  %1328 = vmatmul.f32.gmra.mxu0 %v13325_v50  ;;  %2232 = vmatpush.msra.mxu2 %v14105_v20 }
 0x174   :  { %2158 = vmatpush.msra.mxu1 %v13809_v8  ;;  %2092 = vmatpush.msra.mxu0 %v21993_v52  ;;  %v21996_v8 = vand.u32 4294901760, %v13970_v16  ;;  %v14137_v16 = vpop.permute.xlu0 %163  ;;  %v14153_v52 = vsub.f32 %v14053_v59, %v14065_v6 }
 0x175   :  { %v769_v48 = vadd.f32 %v768_v19, %v678_v29  ;;  %1408 = vmatmul.f32.gmra.mxu1 %v21994_v22  ;;  %1596 = vmatmul.f32.gmra.mxu3 %v13304_v28  ;;  %21998 = vst [vmem:[#allocation20_spill] sm:$0xff] %v14137_v16  ;;  %v14148_v19 = vpop.permute.xlu1 %134 }
 0x176   :  { %2160 = vmatpush.msra.mxu1 %v13813_v41  ;;  %2096 = vmatpush.msra.mxu0 %v21995_v15  ;;  %v14132_v41 = vsub.f32 %v14029_v9, %v14043_v40  ;;  %v14145_v9 = vsub.f32 %v14038_v63, %v14059_v7  ;;  %22000 = vst [vmem:[#allocation65_spill] sm:$0xff] %v14148_v19 }
 0x177   :  { %v14121_v5 = vadd.f32 %v859_v26, %v769_v48  ;;  %1524 = vmatmul.f32.gmra.mxu2 %v13304_v28  ;;  %v14162_v63 = vsub.f32 %v14077_v45, %v14096_v33  ;;  %v14176_v45 = vsub.f32 %v14090_v46, %v14105_v20 }
 0x178   :  { %2162 = vmatpush.msra.mxu1 %v13881_v30  ;;  %2100 = vmatpush.msra.mxu0 %v21996_v8  ;;  %v565_v60 = vpop.f32.mrf.mxu0  ;;  %v865_v31 = vpop.f32.mrf.mxu3  ;;  %v21997_v30 = vld [vmem:[#allocation22_spill] sm:$0xff]  ;;  %v21583_v26 = vand.u32 4294901760, %v14132_v41  ;;  %v21582_v59 = vand.u32 4294901760, %v14145_v9 }
 0x17a   :  { %2164 = vmatpush.msra.mxu1 %v13867_v62  ;;  %v681_v43 = vpop.f32.mrf.mxu1  ;;  %v773_v27 = vpop.f32.mrf.mxu2 }
 0x17b   :  { %v682_v55 = vadd.f32 %v681_v43, %v557_v32  ;;  %1333 = vmatmul.f32.gmra.mxu0 %v13426_v11  ;;  %v2348_v43 = vsub.f32 %v14145_v9, %v21582_v59 }
 0x17c   :  { %2166 = vmatpush.msra.mxu1 %v13869_v56 }
 0x17d   :  { %v774_v42 = vadd.f32 %v773_v27, %v682_v55  ;;  %1414 = vmatmul.f32.gmra.mxu1 %v21997_v30  ;;  %1600 = vmatmul.f32.gmra.mxu3 %v13384_v2  ;;  %v21584_v27 = vand.u32 4294901760, %v14153_v52 }
 0x17e   :  { %2168 = vmatpush.msra.mxu1 %v13922_v53 }
 0x17f   :  { %v14139_v62 = vadd.f32 %v865_v31, %v774_v42  ;;  %1528 = vmatmul.f32.gmra.mxu2 %v13384_v2 }
 0x180   :  { %2170 = vmatpush.msra.mxu1 %v13933_v38  ;;  %v573_v56 = vpop.f32.mrf.mxu0  ;;  %v871_v32 = vpop.f32.mrf.mxu3  ;;  %v175_v38 = vsel %vm171_vm4, %v13827_v25, %v14137_v16  ;;  %v2342_v25 = vsub.f32 %v14132_v41, %v21583_v26 }
 0x181   :  { %21999 = vst [vmem:[#allocation22_spill] sm:$0xff] %v14139_v62  ;;  %v14178_v8 = vand.u32 4294901760, %v175_v38 }
 0x182   :  { %2172 = vmatpush.msra.mxu1 %v13947_v4  ;;  %v685_v53 = vpop.f32.mrf.mxu1  ;;  %v778_v29 = vpop.f32.mrf.mxu2  ;;  %v146_v4 = vsel %vm142_vm7, %v13836_v36, %v14148_v19  ;;  %v2343_v31 = vand.u32 4294901760, %v2342_v25  ;;  %v22008_v19 = vld [vmem:[#allocation53_spill] sm:$0xff] }
 0x183   :  { %v686_v48 = vadd.f32 %v685_v53, %v565_v60  ;;  %1338 = vmatmul.f32.gmra.mxu0 %v13526_v17  ;;  %v14180_v60 = vpop.permute.xlu2 %105  ;;  %v14189_v55 = vand.u32 4294901760, %v146_v4  ;;  %v14197_v53 = vpop.permute.xlu0 %76  ;;  %v14204_v25 = vsub.f32 %v175_v38, %v14178_v8 }
 0x184   :  { %22001 = vst [vmem:[#allocation66_spill] sm:$0xff] %v14180_v60  ;;  %2344 = vmatpush.msra.mxu3 %v2343_v31  ;;  %v88_v59 = vsel %vm84_vm8, %v13890_v37, %v14197_v53  ;;  %v12817_v31 = vld [vmem:[%s21477_s0 + $0x18] sm:$0xff] }
 0x185   :  { %v779_v15 = vadd.f32 %v778_v29, %v686_v48  ;;  %1420 = vmatmul.f32.gmra.mxu1 %v13462_v54  ;;  %1604 = vmatmul.f32.gmra.mxu3 %v13483_v12  ;;  %22004 = vst [vmem:[#allocation69_spill] sm:$0xff] %v14197_v53  ;;  %v2349_v29 = vand.u32 4294901760, %v2348_v43  ;;  %v2354_v48 = vsub.f32 %v14153_v52, %v21584_v27  ;;  %v14213_v43 = vand.u32 4294901760, %v12817_v31  ;;  %v22010_v37 = vld [vmem:[#allocation28_spill] sm:$0xff] }
 0x187   :  { %v14182_v36 = vadd.f32 %v871_v32, %v779_v15  ;;  %1532 = vmatmul.f32.gmra.mxu2 %v13483_v12  ;;  %v117_v32 = vsel %vm113_vm9, %v13872_v58, %v14180_v60  ;;  %v22006_v15 = vld [vmem:[#allocation29_spill] sm:$0xff]  ;;  %2350 = vmatpush.msra.mxu3 %v2349_v29  ;;  %v2355_v38 = vand.u32 4294901760, %v2354_v48  ;;  %v14225_v60 = vsub.f32 %v146_v4, %v14189_v55  ;;  %v22009_v48 = vld [vmem:[#allocation27_spill] sm:$0xff] }
 0x188   :  { %v14191_v42 = vpop.f32.mrf.mxu0  ;;  %v877_v46 = vpop.f32.mrf.mxu3  ;;  %v14222_v53 = vand.u32 4294901760, %v117_v32  ;;  %2234 = vmatpush.msra.mxu2 %v14213_v43  ;;  %v14235_v29 = vand.u32 4294901760, %v88_v59  ;;  %v22011_v4 = vand.u32 4294901760, %v14176_v45 }
 0x189   :  { %22002 = vst [vmem:[#allocation67_spill] sm:$0xff] %v14182_v36  ;;  %v14215_v36 = vpop.permute.xlu1 %45  ;;  %2356 = vmatpush.msra.mxu3 %v2355_v38 }
 0x18a   :  { %22003 = vst [vmem:[#allocation68_spill] sm:$0xff] %v14191_v42  ;;  %v689_v26 = vpop.f32.mrf.mxu1  ;;  %v783_v58 = vpop.f32.mrf.mxu2  ;;  %v22007_v42 = vand.u32 4294901760, %v14162_v63  ;;  %v2366_v14 = vsub.f32 %v14176_v45, %v22011_v4  ;;  %2236 = vmatpush.msra.mxu2 %v14178_v8 }
 0x18b   :  { %22005 = vst [vmem:[#allocation70_spill] sm:$0xff] %v14215_v36  ;;  %v690_v27 = vadd.f32 %v689_v26, %v573_v56  ;;  %1343 = vmatmul.f32.gmra.mxu0 %v22006_v15  ;;  %v59_v56 = vsel %vm55_vm10, %v22008_v19, %v14215_v36  ;;  %v14233_v26 = vsub.f32 %v12817_v31, %v14213_v43  ;;  %v22021_v15 = vld [vmem:[#allocation40_spill] sm:$0xff] }
 0x18c   :  { %v2360_v62 = vsub.f32 %v14162_v63, %v22007_v42  ;;  %v14244_v36 = vand.u32 4294901760, %v59_v56  ;;  %2238 = vmatpush.msra.mxu2 %v14189_v55 }
 0x18d   :  { %v784_v42 = vadd.f32 %v783_v58, %v690_v27  ;;  %1426 = vmatmul.f32.gmra.mxu1 %v22009_v48  ;;  %1608 = vmatmul.f32.gmra.mxu3 %v22010_v37  ;;  %v21592_v19 = vand.u32 4294901760, %v14233_v26  ;;  %v2367_v27 = vand.u32 4294901760, %v2366_v14  ;;  %v21595_v58 = vand.u32 4294901760, %v14204_v25 }
 0x18e   :  { %v2361_v16 = vand.u32 4294901760, %v2360_v62  ;;  %v14251_v62 = vsub.f32 %v117_v32, %v14222_v53  ;;  %v21597_v32 = vand.u32 4294901760, %v14225_v60  ;;  %2240 = vmatpush.msra.mxu2 %v14222_v53 }
 0x18f   :  { %v14246_v31 = vadd.f32 %v877_v46, %v784_v42  ;;  %1536 = vmatmul.f32.gmra.mxu2 %v22010_v37  ;;  %v2372_v38 = vsub.f32 %v14233_v26, %v21592_v19  ;;  %v14260_v46 = vsub.f32 %v88_v59, %v14235_v29  ;;  %v2378_v14 = vsub.f32 %v14204_v25, %v21595_v58  ;;  %v22020_v37 = vld [vmem:[#allocation35_spill] sm:$0xff] }
 0x190   :  { %v14253_v61 = vpop.f32.mrf.mxu0  ;;  %v1235_v4 = vpop.f32.mrf.mxu3  ;;  %2362 = vmatpush.msra.mxu3 %v2361_v16  ;;  %v14270_v19 = vsub.f32 %v59_v56, %v14244_v36  ;;  %v2384_v58 = vsub.f32 %v14225_v60, %v21597_v32  ;;  %2242 = vmatpush.msra.mxu2 %v14235_v29 }
 0x191   :  { %22012 = vst [vmem:[#allocation53_spill] sm:$0xff] %v14246_v31  ;;  %v2373_v16 = vand.u32 4294901760, %v2372_v38  ;;  %v2379_v10 = vand.u32 4294901760, %v2378_v14  ;;  %v22017_v38 = vld [vmem:[#allocation32_spill] sm:$0xff]  ;;  %v21604_v35 = vand.u32 4294901760, %v14260_v46 }
 0x192   :  { %22013 = vst [vmem:[#allocation71_spill] sm:$0xff] %v14253_v61  ;;  %v14266_v42 = vpop.f32.mrf.mxu1  ;;  %v1079_v31 = vpop.f32.mrf.mxu2  ;;  %2368 = vmatpush.msra.mxu3 %v2367_v27  ;;  %v22015_v61 = vld [vmem:[#allocation33_spill] sm:$0xff]  ;;  %v22016_v27 = vld [vmem:[#allocation31_spill] sm:$0xff]  ;;  %v2385_v56 = vand.u32 4294901760, %v2384_v58  ;;  %2244 = vmatpush.msra.mxu2 %v14244_v36  ;;  %v21606_v14 = vand.u32 4294901760, %v14270_v19 }
 0x193   :  { %22014 = vst [vmem:[#allocation72_spill] sm:$0xff] %v14266_v42  ;;  %1348 = vmatmul.f32.gmra.mxu0 %v22015_v61  ;;  %v14273_v59 = vadd.f32 %v1235_v4, %v1079_v31  ;;  %v21600_v42 = vand.u32 4294901760, %v14251_v62  ;;  %v2396_v4 = vsub.f32 %v14260_v46, %v21604_v35 }
 0x194   :  { %2374 = vmatpush.msra.mxu3 %v2373_v16 }
 0x195   :  { %1432 = vmatmul.f32.gmra.mxu1 %v22016_v27  ;;  %1612 = vmatmul.f32.gmra.mxu3 %v22017_v38  ;;  %v2390_v31 = vsub.f32 %v14251_v62, %v21600_v42  ;;  %v2397_v21 = vand.u32 4294901760, %v2396_v4 }
 0x196   :  { %2380 = vmatpush.msra.mxu3 %v2379_v10  ;;  %v2402_v10 = vsub.f32 %v14270_v19, %v21606_v14 }
 0x197   :  { %1540 = vmatmul.f32.gmra.mxu2 %v22017_v38  ;;  %v2391_v58 = vand.u32 4294901760, %v2390_v31  ;;  %v22019_v38 = vld [vmem:[#allocation36_spill] sm:$0xff] }
 0x198   :  { %v939_v16 = vpop.f32.mrf.mxu0  ;;  %v1239_v32 = vpop.f32.mrf.mxu3  ;;  %2386 = vmatpush.msra.mxu3 %v2385_v56  ;;  %v2403_v35 = vand.u32 4294901760, %v2402_v10 }
 0x199   :  { %v940_v4 = vadd.f32 %v939_v16, %v14003_v51 }
 0x19a   :  { %v14295_v42 = vpop.f32.mrf.mxu1  ;;  %v1087_v39 = vpop.f32.mrf.mxu2  ;;  %2392 = vmatpush.msra.mxu3 %v2391_v58 }
 0x19b   :  { %22018 = vst [vmem:[#allocation73_spill] sm:$0xff] %v14295_v42  ;;  %1353 = vmatmul.f32.gmra.mxu0 %v22019_v38  ;;  %v14298_v61 = vadd.f32 %v1239_v32, %v1087_v39  ;;  %v22022_v32 = vld [vmem:[#allocation38_spill] sm:$0xff] }
 0x19c   :  { %2398 = vmatpush.msra.mxu3 %v2397_v21 }
 0x19d   :  { %1438 = vmatmul.f32.gmra.mxu1 %v22020_v37  ;;  %1616 = vmatmul.f32.gmra.mxu3 %v13638_v23 }
 0x19e   :  { %2404 = vmatpush.msra.mxu3 %v2403_v35 }
 0x19f   :  { %1544 = vmatmul.f32.gmra.mxu2 %v13638_v23 }
 0x1a0   :  { %v943_v56 = vpop.f32.mrf.mxu0  ;;  %v1243_v31 = vpop.f32.mrf.mxu3 }
 0x1a1   :  { %v944_v51 = vadd.f32 %v943_v56, %v14010_v49 }
 0x1a2   :  { %v1011_v14 = vpop.f32.mrf.mxu1  ;;  %v1095_v42 = vpop.f32.mrf.mxu2 }
 0x1a3   :  { %v1012_v58 = vadd.f32 %v1011_v14, %v940_v4  ;;  %1358 = vmatmul.f32.gmra.mxu0 %v22021_v15  ;;  %v14305_v39 = vadd.f32 %v1243_v31, %v1095_v42  ;;  %v22023_v4 = vld [vmem:[#allocation44_spill] sm:$0xff]  ;;  %v22024_v31 = vld [vmem:[#allocation42_spill] sm:$0xff] }
 0x1a5   :  { %1444 = vmatmul.f32.gmra.mxu1 %v22022_v32  ;;  %1620 = vmatmul.f32.gmra.mxu3 %v13673_v44 }
 0x1a6   :  { %4598 = vrot.lane.b32.xlu0 %v1012_v58, %s12846_s11 }
 0x1a7   :  { %1548 = vmatmul.f32.gmra.mxu2 %v13673_v44 }
 0x1a8   :  { %v947_v21 = vpop.f32.mrf.mxu0  ;;  %v1247_v35 = vpop.f32.mrf.mxu3 }
 0x1a9   :  { %v948_v49 = vadd.f32 %v947_v21, %v14018_v13  ;;  %v22029_v21 = vld [vmem:[#allocation19_spill] sm:$0xff] }
 0x1aa   :  { %v1015_v16 = vpop.f32.mrf.mxu1  ;;  %v1103_v10 = vpop.f32.mrf.mxu2 }
 0x1ab   :  { %v1016_v14 = vadd.f32 %v1015_v16, %v944_v51  ;;  %1363 = vmatmul.f32.gmra.mxu0 %v22023_v4  ;;  %v14313_v42 = vadd.f32 %v1247_v35, %v1103_v10  ;;  %v22026_v4 = vld [vmem:[#allocation47_spill] sm:$0xff]  ;;  %v22027_v10 = vld [vmem:[#allocation46_spill] sm:$0xff] }
 0x1ad   :  { %1450 = vmatmul.f32.gmra.mxu1 %v22024_v31  ;;  %1624 = vmatmul.f32.gmra.mxu3 %v13708_v1 }
 0x1ae   :  { %4627 = vrot.lane.b32.xlu2 %v1016_v14, %s12847_s12 }
 0x1af   :  { %1552 = vmatmul.f32.gmra.mxu2 %v13708_v1 }
 0x1b0   :  { %v14319_v58 = vpop.f32.mrf.mxu0  ;;  %v1251_v44 = vpop.f32.mrf.mxu3 }
 0x1b1   :  { %22025 = vst [vmem:[#allocation74_spill] sm:$0xff] %v14319_v58 }
 0x1b2   :  { %v1019_v56 = vpop.f32.mrf.mxu1  ;;  %v1111_v51 = vpop.f32.mrf.mxu2 }
 0x1b3   :  { %v1020_v16 = vadd.f32 %v1019_v56, %v948_v49  ;;  %1368 = vmatmul.f32.gmra.mxu0 %v22026_v4  ;;  %v14323_v35 = vadd.f32 %v1251_v44, %v1111_v51  ;;  %v22030_v44 = vld [vmem:[#allocation49_spill] sm:$0xff]  ;;  %v22031_v56 = vand.u32 4294901760, %v14132_v41 }
 0x1b5   :  { %1456 = vmatmul.f32.gmra.mxu1 %v22027_v10  ;;  %1628 = vmatmul.f32.gmra.mxu3 %v13732_v24 }
 0x1b6   :  { %4656 = vrot.lane.b32.xlu1 %v1020_v16, %s12848_s13 }
 0x1b7   :  { %1556 = vmatmul.f32.gmra.mxu2 %v13732_v24 }
 0x1b8   :  { %v955_v14 = vpop.f32.mrf.mxu0  ;;  %v1255_v58 = vpop.f32.mrf.mxu3 }
 0x1b9   :  { %v956_v16 = vadd.f32 %v955_v14, %v14098_v57  ;;  %v22035_v57 = vand.u32 4294901760, %v14162_v63  ;;  %v22038_v14 = vand.u32 4294901760, %v14233_v26 }
 0x1ba   :  { %v14329_v1 = vpop.f32.mrf.mxu1  ;;  %v1119_v13 = vpop.f32.mrf.mxu2 }
 0x1bb   :  { %22028 = vst [vmem:[#allocation75_spill] sm:$0xff] %v14329_v1  ;;  %1664 = vmatmul.f32.vlgmr.msrb.gmra.mxu0 %v22029_v21  ;;  %v14332_v49 = vadd.f32 %v1255_v58, %v1119_v13  ;;  %v22032_v13 = vand.u32 4294901760, %v14145_v9  ;;  %v22034_v21 = vld [vmem:[#allocation21_spill] sm:$0xff] }
 0x1bc   :  { %2457 = vmatpush.msrb.mxu0 %v14132_v41 }
 0x1bd   :  { %1462 = vmatmul.f32.gmra.mxu1 %v22030_v44  ;;  %1988 = vmatmul.f32.vlgmr.msrb.gmra.mxu3 %v21989_v47 }
 0x1be   :  { %2738 = vmatpush.msrb.mxu3 %v14043_v40  ;;  %2460 = vmatpush.msrb.mxu0 %v14145_v9  ;;  %v22037_v9 = vand.u32 4294901760, %v14176_v45 }
 0x1bf   :  { %1904 = vmatmul.f32.vlgmr.msrb.gmra.mxu2 %v13206_v34 }
 0x1c0   :  { %2646 = vmatpush.msrb.mxu2 %v22031_v56  ;;  %2740 = vmatpush.msrb.mxu3 %v14059_v7  ;;  %v959_v51 = vpop.f32.mrf.mxu0  ;;  %v1259_v58 = vpop.f32.mrf.mxu3  ;;  %v22033_v56 = vand.u32 4294901760, %v14153_v52 }
 0x1c1   :  { %2463 = vmatpush.msrb.mxu0 %v14153_v52 }
 0x1c2   :  { %2650 = vmatpush.msrb.mxu2 %v22032_v13  ;;  %2742 = vmatpush.msrb.mxu3 %v14065_v6  ;;  %v1027_v1 = vpop.f32.mrf.mxu1  ;;  %v1127_v47 = vpop.f32.mrf.mxu2  ;;  %v22046_v13 = vld [vmem:[#allocation26_spill] sm:$0xff] }
 0x1c3   :  { %2466 = vmatpush.msrb.mxu0 %v14162_v63  ;;  %v14349_v34 = vadd.f32 %v1259_v58, %v1127_v47  ;;  %v1028_v41 = vadd.f32 %v1027_v1, %v956_v16  ;;  %v960_v58 = vadd.f32 %v959_v51, %v14121_v5  ;;  %v22040_v16 = vld [vmem:[#allocation23_spill] sm:$0xff] }
 0x1c4   :  { %2654 = vmatpush.msrb.mxu2 %v22033_v56  ;;  %2744 = vmatpush.msrb.mxu3 %v14096_v33  ;;  %v22050_v56 = vld [vmem:[#allocation30_spill] sm:$0xff] }
 0x1c5   :  { %1672 = vmatmul.f32.gmra.mxu0 %v22034_v21  ;;  %1820 = vmatmul.f32.vlgmr.msrb.gmra.mxu1 %v13179_v3 }
 0x1c6   :  { %1994 = vmatmul.f32.gmra.mxu3 %v21994_v22  ;;  %2469 = vmatpush.msrb.mxu0 %v14176_v45 }
 0x1c7   :  { %2550 = vmatpush.msrb.mxu1 %v14043_v40  ;;  %2658 = vmatpush.msrb.mxu2 %v22035_v57 }
 0x1c8   :  { %2746 = vmatpush.msrb.mxu3 %v14105_v20  ;;  %4684 = vrot.lane.b32.xlu0 %v1028_v41, %s12846_s11  ;;  %v14363_v1 = vpop.f32.mrf.mxu0  ;;  %v1263_v47 = vpop.f32.mrf.mxu3 }
 0x1c9   :  { %22036 = vst [vmem:[#allocation76_spill] sm:$0xff] %v14363_v1  ;;  %1909 = vmatmul.f32.gmra.mxu2 %v21986_v18  ;;  %2472 = vmatpush.msrb.mxu0 %v14233_v26  ;;  %v22075_v1 = vld [vmem:[#allocation19_spill] sm:$0xff] }
 0x1ca   :  { %2552 = vmatpush.msrb.mxu1 %v14059_v7  ;;  %2662 = vmatpush.msrb.mxu2 %v22037_v9  ;;  %v1031_v40 = vpop.f32.mrf.mxu1  ;;  %v1135_v52 = vpop.f32.mrf.mxu2  ;;  %v22039_v7 = vand.u32 4294901760, %v14204_v25 }
 0x1cb   :  { %2748 = vmatpush.msrb.mxu3 %v14213_v43  ;;  %2475 = vmatpush.msrb.mxu0 %v14204_v25  ;;  %v14372_v63 = vadd.f32 %v1263_v47, %v1135_v52  ;;  %v1032_v45 = vadd.f32 %v1031_v40, %v960_v58  ;;  %v22052_v40 = vld [vmem:[#allocation34_spill] sm:$0xff] }
 0x1cc   :  { %2554 = vmatpush.msrb.mxu1 %v14065_v6  ;;  %2666 = vmatpush.msrb.mxu2 %v22038_v14 }
 0x1cd   :  { %2750 = vmatpush.msrb.mxu3 %v14178_v8  ;;  %2478 = vmatpush.msrb.mxu0 %v14225_v60 }
 0x1ce   :  { %2556 = vmatpush.msrb.mxu1 %v14096_v33  ;;  %2670 = vmatpush.msrb.mxu2 %v22039_v7  ;;  %v22042_v33 = vand.u32 4294901760, %v14225_v60  ;;  %v22045_v60 = vand.u32 4294901760, %v14260_v46  ;;  %v22053_v7 = vld [vmem:[#allocation29_spill] sm:$0xff] }
 0x1cf   :  { %2752 = vmatpush.msrb.mxu3 %v14189_v55  ;;  %1680 = vmatmul.f32.gmra.mxu0 %v22040_v16 }
 0x1d0   :  { %1824 = vmatmul.f32.gmra.mxu1 %v13245_v0  ;;  %2000 = vmatmul.f32.gmra.mxu3 %v21997_v30  ;;  %v14387_v6 = vpop.f32.mrf.mxu0  ;;  %v1267_v5 = vpop.f32.mrf.mxu3 }
 0x1d1   :  { %22041 = vst [vmem:[#allocation77_spill] sm:$0xff] %v14387_v6  ;;  %2481 = vmatpush.msrb.mxu0 %v14251_v62  ;;  %2558 = vmatpush.msrb.mxu1 %v14105_v20  ;;  %v22044_v20 = vand.u32 4294901760, %v14251_v62  ;;  %v22048_v62 = vand.u32 4294901760, %v14270_v19 }
 0x1d2   :  { %2674 = vmatpush.msrb.mxu2 %v22042_v33  ;;  %2754 = vmatpush.msrb.mxu3 %v14222_v53  ;;  %v14394_v25 = vpop.f32.mrf.mxu1  ;;  %v1143_v26 = vpop.f32.mrf.mxu2 }
 0x1d3   :  { %22043 = vst [vmem:[#allocation78_spill] sm:$0xff] %v14394_v25  ;;  %4712 = vrot.lane.b32.xlu2 %v1032_v45, %s12847_s12  ;;  %1914 = vmatmul.f32.gmra.mxu2 %v13325_v50  ;;  %v14398_v51 = vadd.f32 %v1267_v5, %v1143_v26  ;;  %v22055_v26 = vld [vmem:[#allocation37_spill] sm:$0xff]  ;;  %v14492_v25 = vpop.permute.xlu1 %261 }
 0x1d4   :  { %2484 = vmatpush.msrb.mxu0 %v14260_v46  ;;  %2560 = vmatpush.msrb.mxu1 %v14213_v43 }
 0x1d5   :  { %2678 = vmatpush.msrb.mxu2 %v22044_v20  ;;  %2756 = vmatpush.msrb.mxu3 %v14235_v29 }
 0x1d6   :  { %2487 = vmatpush.msrb.mxu0 %v14270_v19  ;;  %2562 = vmatpush.msrb.mxu1 %v14178_v8 }
 0x1d7   :  { %2682 = vmatpush.msrb.mxu2 %v22045_v60  ;;  %2758 = vmatpush.msrb.mxu3 %v14244_v36 }
 0x1d8   :  { %2564 = vmatpush.msrb.mxu1 %v14189_v55  ;;  %1688 = vmatmul.f32.gmra.mxu0 %v22046_v13  ;;  %v14412_v41 = vpop.f32.mrf.mxu0  ;;  %v1271_v43 = vpop.f32.mrf.mxu3 }
 0x1d9   :  { %22047 = vst [vmem:[#allocation79_spill] sm:$0xff] %v14412_v41  ;;  %2686 = vmatpush.msrb.mxu2 %v22048_v62  ;;  %1828 = vmatmul.f32.gmra.mxu1 %v13304_v28  ;;  %v22056_v62 = vld [vmem:[#allocation28_spill] sm:$0xff] }
 0x1da   :  { %2006 = vmatmul.f32.gmra.mxu3 %v13462_v54  ;;  %2566 = vmatpush.msrb.mxu1 %v14222_v53  ;;  %v14419_v8 = vpop.f32.mrf.mxu1  ;;  %v1151_v46 = vpop.f32.mrf.mxu2 }
 0x1db   :  { %22049 = vst [vmem:[#allocation80_spill] sm:$0xff] %v14419_v8  ;;  %1919 = vmatmul.f32.gmra.mxu2 %v13426_v11  ;;  %v14422_v55 = vadd.f32 %v1271_v43, %v1151_v46 }
 0x1dc   :  { %2568 = vmatpush.msrb.mxu1 %v14235_v29 }
 0x1de   :  { %2570 = vmatpush.msrb.mxu1 %v14244_v36 }
 0x1e0   :  { %1696 = vmatmul.f32.gmra.mxu0 %v22050_v56  ;;  %v1319_v19 = vpop.f32.mrf.mxu0  ;;  %v1275_v57 = vpop.f32.mrf.mxu3 }
 0x1e1   :  { %1832 = vmatmul.f32.gmra.mxu1 %v13384_v2  ;;  %v1320_v36 = vadd.f32 %v1319_v19, %v14273_v59  ;;  %v22057_v19 = vld [vmem:[#allocation33_spill] sm:$0xff] }
 0x1e2   :  { %2012 = vmatmul.f32.gmra.mxu3 %v22009_v48  ;;  %v14429_v53 = vpop.f32.mrf.mxu1  ;;  %v1159_v47 = vpop.f32.mrf.mxu2 }
 0x1e3   :  { %22051 = vst [vmem:[#allocation81_spill] sm:$0xff] %v14429_v53  ;;  %1924 = vmatmul.f32.gmra.mxu2 %v13526_v17  ;;  %v14432_v9 = vadd.f32 %v1275_v57, %v1159_v47  ;;  %v22066_v53 = vld [vmem:[#allocation44_spill] sm:$0xff] }
 0x1e8   :  { %1704 = vmatmul.f32.gmra.mxu0 %v22052_v40  ;;  %v1324_v29 = vpop.f32.mrf.mxu0  ;;  %v1589_v52 = vpop.f32.mrf.mxu3 }
 0x1e9   :  { %1836 = vmatmul.f32.gmra.mxu1 %v13483_v12  ;;  %v1325_v43 = vadd.f32 %v1324_v29, %v14298_v61 }
 0x1ea   :  { %2018 = vmatmul.f32.gmra.mxu3 %v22016_v27  ;;  %v1403_v14 = vpop.f32.mrf.mxu1  ;;  %v1517_v58 = vpop.f32.mrf.mxu2 }
 0x1eb   :  { %1929 = vmatmul.f32.gmra.mxu2 %v22053_v7  ;;  %v1404_v45 = vadd.f32 %v1403_v14, %v1320_v36 }
 0x1ed   :  { %v1518_v5 = vadd.f32 %v1517_v58, %v1404_v45 }
 0x1ef   :  { %v14439_v33 = vadd.f32 %v1589_v52, %v1518_v5  ;;  %v22059_v52 = vld [vmem:[#allocation41_spill] sm:$0xff]  ;;  %v22060_v5 = vld [vmem:[#allocation32_spill] sm:$0xff] }
 0x1f0   :  { %1712 = vmatmul.f32.gmra.mxu0 %v22055_v26  ;;  %v1329_v20 = vpop.f32.mrf.mxu0  ;;  %v1593_v60 = vpop.f32.mrf.mxu3 }
 0x1f1   :  { %22054 = vst [vmem:[#allocation82_spill] sm:$0xff] %v14439_v33  ;;  %1840 = vmatmul.f32.gmra.mxu1 %v22056_v62  ;;  %v1330_v45 = vadd.f32 %v1329_v20, %v14305_v39 }
 0x1f2   :  { %2024 = vmatmul.f32.gmra.mxu3 %v22020_v37  ;;  %v1409_v59 = vpop.f32.mrf.mxu1  ;;  %v1521_v46 = vpop.f32.mrf.mxu2 }
 0x1f3   :  { %1934 = vmatmul.f32.gmra.mxu2 %v22057_v19  ;;  %v1410_v57 = vadd.f32 %v1409_v59, %v1325_v43 }
 0x1f5   :  { %v1522_v47 = vadd.f32 %v1521_v46, %v1410_v57 }
 0x1f7   :  { %v14446_v36 = vadd.f32 %v1593_v60, %v1522_v47  ;;  %v22062_v60 = vld [vmem:[#allocation45_spill] sm:$0xff] }
 0x1f8   :  { %1720 = vmatmul.f32.gmra.mxu0 %v22059_v52  ;;  %v1334_v14 = vpop.f32.mrf.mxu0  ;;  %v1597_v58 = vpop.f32.mrf.mxu3 }
 0x1f9   :  { %22058 = vst [vmem:[#allocation28_spill] sm:$0xff] %v14446_v36  ;;  %1844 = vmatmul.f32.gmra.mxu1 %v22060_v5  ;;  %v1335_v57 = vadd.f32 %v1334_v14, %v14313_v42 }
 0x1fa   :  { %2030 = vmatmul.f32.gmra.mxu3 %v22022_v32  ;;  %v1415_v61 = vpop.f32.mrf.mxu1  ;;  %v1525_v29 = vpop.f32.mrf.mxu2 }
 0x1fb   :  { %1939 = vmatmul.f32.gmra.mxu2 %v22019_v38  ;;  %v1416_v8 = vadd.f32 %v1415_v61, %v1330_v45  ;;  %v22065_v61 = vld [vmem:[#allocation39_spill] sm:$0xff] }
 0x1fd   :  { %v1526_v6 = vadd.f32 %v1525_v29, %v1416_v8 }
 0x1ff   :  { %v14453_v43 = vadd.f32 %v1597_v58, %v1526_v6  ;;  %v22064_v6 = vld [vmem:[#allocation48_spill] sm:$0xff] }
 0x200   :  { %1728 = vmatmul.f32.gmra.mxu0 %v22062_v60  ;;  %v1339_v59 = vpop.f32.mrf.mxu0  ;;  %v1601_v46 = vpop.f32.mrf.mxu3 }
 0x201   :  { %22061 = vst [vmem:[#allocation41_spill] sm:$0xff] %v14453_v43  ;;  %1848 = vmatmul.f32.gmra.mxu1 %v13638_v23  ;;  %v1340_v58 = vadd.f32 %v1339_v59, %v14323_v35  ;;  %v22069_v59 = vld [vmem:[#allocation43_spill] sm:$0xff] }
 0x202   :  { %2036 = vmatmul.f32.gmra.mxu3 %v22024_v31  ;;  %v1421_v39 = vpop.f32.mrf.mxu1  ;;  %v1529_v20 = vpop.f32.mrf.mxu2 }
 0x203   :  { %1944 = vmatmul.f32.gmra.mxu2 %v22021_v15  ;;  %v1422_v47 = vadd.f32 %v1421_v39, %v1335_v57  ;;  %v14470_v39 = vpop.permute.xlu2 %319 }
 0x205   :  { %v1530_v36 = vadd.f32 %v1529_v20, %v1422_v47 }
 0x207   :  { %v14460_v45 = vadd.f32 %v1601_v46, %v1530_v36  ;;  %v22068_v36 = vld [vmem:[#allocation50_spill] sm:$0xff] }
 0x208   :  { %1736 = vmatmul.f32.gmra.mxu0 %v22064_v6  ;;  %v1344_v8 = vpop.f32.mrf.mxu0  ;;  %v1605_v42 = vpop.f32.mrf.mxu3 }
 0x209   :  { %22063 = vst [vmem:[#allocation32_spill] sm:$0xff] %v14460_v45  ;;  %1852 = vmatmul.f32.gmra.mxu1 %v22065_v61  ;;  %v1345_v35 = vadd.f32 %v1344_v8, %v14332_v49  ;;  %v22070_v45 = vld [vmem:[#allocation60_spill] sm:$0xff]  ;;  %v22072_v49 = vld [vmem:[#allocation61_spill] sm:$0xff] }
 0x20a   :  { %2042 = vmatmul.f32.gmra.mxu3 %v22027_v10  ;;  %v1427_v14 = vpop.f32.mrf.mxu1  ;;  %v1533_v29 = vpop.f32.mrf.mxu2 }
 0x20b   :  { %1949 = vmatmul.f32.gmra.mxu2 %v22066_v53  ;;  %v1428_v41 = vadd.f32 %v1427_v14, %v1340_v58 }
 0x20d   :  { %v1534_v33 = vadd.f32 %v1533_v29, %v1428_v41  ;;  %v325_v41 = vsel %vm323_vm2, %v22070_v45, %v14470_v39 }
 0x20e   :  { %v14482_v29 = vand.u32 4294901760, %v325_v41 }
 0x20f   :  { %v14467_v57 = vadd.f32 %v1605_v42, %v1534_v33  ;;  %v14480_v42 = vpop.permute.xlu0 %290 }
 0x210   :  { %1744 = vmatmul.f32.gmra.mxu0 %v22068_v36  ;;  %v1349_v46 = vpop.f32.mrf.mxu0  ;;  %v1609_v20 = vpop.f32.mrf.mxu3  ;;  %v14488_v8 = vsel %vm294_vm1, %v22072_v49, %v14480_v42 }
 0x211   :  { %22067 = vst [vmem:[#allocation45_spill] sm:$0xff] %v14467_v57  ;;  %1856 = vmatmul.f32.gmra.mxu1 %v22069_v59 }
 0x212   :  { %2048 = vmatmul.f32.gmra.mxu3 %v22030_v44  ;;  %v1433_v47 = vpop.f32.mrf.mxu1  ;;  %v1537_v43 = vpop.f32.mrf.mxu2 }
 0x213   :  { %1954 = vmatmul.f32.gmra.mxu2 %v22026_v4  ;;  %v1434_v33 = vadd.f32 %v1433_v47, %v1345_v35  ;;  %v22074_v35 = vld [vmem:[#allocation62_spill] sm:$0xff]  ;;  %v1350_v47 = vadd.f32 %v1349_v46, %v14349_v34  ;;  %v14513_v34 = vpop.permute.xlu2 %232 }
 0x215   :  { %v1538_v14 = vadd.f32 %v1537_v43, %v1434_v33  ;;  %v14499_v43 = vsel %vm265_vm0, %v22074_v35, %v14492_v25 }
 0x216   :  { %v14516_v46 = vand.u32 4294901760, %v14499_v43 }
 0x217   :  { %v14490_v57 = vadd.f32 %v1609_v20, %v1538_v14  ;;  %v14505_v20 = vsub.f32 %v325_v41, %v14482_v29  ;;  %v14508_v14 = vand.u32 4294901760, %v14488_v8  ;;  %v22076_v41 = vld [vmem:[#allocation64_spill] sm:$0xff] }
 0x218   :  { %2102 = vmatmul.f32.vlgmr.msra.gmra.mxu0 %v13179_v3  ;;  %v1354_v45 = vpop.f32.mrf.mxu0  ;;  %v1613_v33 = vpop.f32.mrf.mxu3  ;;  %v14524_v44 = vsel %vm236_vm3, %v22076_v41, %v14513_v34 }
 0x219   :  { %22073 = vst [vmem:[#allocation48_spill] sm:$0xff] %v14490_v57  ;;  %1860 = vmatmul.f32.gmra.mxu1 %v13732_v24  ;;  %2810 = vmatpush.msra.mxu0 %v14482_v29  ;;  %v14538_v31 = vand.u32 4294901760, %v14524_v44 }
 0x21a   :  { %2406 = vmatmul.f32.vlgmr.msra.gmra.mxu3 %v13179_v3  ;;  %v1439_v49 = vpop.f32.mrf.mxu1  ;;  %v1541_v57 = vpop.f32.mrf.mxu2 }
 0x21b   :  { %2250 = vmatmul.f32.vlgmr.msra.gmra.mxu2 %v22075_v1  ;;  %v1440_v35 = vadd.f32 %v1439_v49, %v1350_v47  ;;  %3136 = vmatpush.msra.mxu3 %v14482_v29  ;;  %v14527_v47 = vpop.permute.xlu0 %203  ;;  %v22077_v49 = vld [vmem:[#allocation17_spill] sm:$0xff] }
 0x21c   :  { %3043 = vmatpush.msra.mxu2 %v14505_v20  ;;  %2812 = vmatpush.msra.mxu0 %v14508_v14  ;;  %v14534_v1 = vsel %vm207_vm5, %v22077_v49, %v14527_v47 }
 0x21d   :  { %v1542_v10 = vadd.f32 %v1541_v57, %v1440_v35  ;;  %3138 = vmatpush.msra.mxu3 %v14508_v14  ;;  %v1355_v35 = vadd.f32 %v1354_v45, %v14372_v63  ;;  %v14545_v53 = vand.u32 4294901760, %v14534_v1 }
 0x21e   :  { %2814 = vmatpush.msra.mxu0 %v14516_v46 }
 0x21f   :  { %v1614_v4 = vadd.f32 %v1613_v33, %v1542_v10  ;;  %3140 = vmatpush.msra.mxu3 %v14516_v46 }
 0x220   :  { %2106 = vmatmul.f32.gmra.mxu0 %v13245_v0  ;;  %v1359_v57 = vpop.f32.mrf.mxu0  ;;  %v1617_v41 = vpop.f32.mrf.mxu3 }
 0x221   :  { %2174 = vmatmul.f32.vlgmr.msra.gmra.mxu1 %v13179_v3  ;;  %4686 = vrot.lane.b32.xlu1 %v1614_v4, %s12846_s11  ;;  %v1360_v32 = vadd.f32 %v1359_v57, %v14398_v51 }
 0x222   :  { %2410 = vmatmul.f32.gmra.mxu3 %v13245_v0  ;;  %v1445_v10 = vpop.f32.mrf.mxu1  ;;  %v1545_v33 = vpop.f32.mrf.mxu2  ;;  %2816 = vmatpush.msra.mxu0 %v14538_v31 }
 0x223   :  { %2258 = vmatmul.f32.gmra.mxu2 %v22034_v21  ;;  %v1446_v49 = vadd.f32 %v1445_v10, %v1355_v35  ;;  %3142 = vmatpush.msra.mxu3 %v14538_v31  ;;  %v14562_v21 = vpop.permute.xlu1 %165 }
 0x224   :  { %2818 = vmatpush.msra.mxu0 %v14545_v53  ;;  %22079 = vst [vmem:[#allocation61_spill] sm:$0xff] %v14562_v21 }
 0x225   :  { %v1546_v63 = vadd.f32 %v1545_v33, %v1446_v49  ;;  %3144 = vmatpush.msra.mxu3 %v14545_v53  ;;  %v21622_v49 = vand.u32 4294901760, %v14505_v20 }
 0x227   :  { %v1618_v4 = vadd.f32 %v1617_v41, %v1546_v63  ;;  %v2928_v57 = vsub.f32 %v14505_v20, %v21622_v49 }
 0x228   :  { %2110 = vmatmul.f32.gmra.mxu0 %v13304_v28  ;;  %v1364_v45 = vpop.f32.mrf.mxu0  ;;  %v1621_v15 = vpop.f32.mrf.mxu3 }
 0x229   :  { %2178 = vmatmul.f32.gmra.mxu1 %v13245_v0  ;;  %4714 = vrot.lane.b32.xlu0 %v1618_v4, %s12847_s12  ;;  %v14570_v4 = vsub.f32 %v14488_v8, %v14508_v14  ;;  %v2929_v49 = vand.u32 4294901760, %v2928_v57  ;;  %v14584_v8 = vsub.f32 %v14499_v43, %v14516_v46  ;;  %v14598_v43 = vsub.f32 %v14524_v44, %v14538_v31  ;;  %v12818_v44 = vld [vmem:[%s21477_s0 + $0x20] sm:$0xff] }
 0x22a   :  { %2414 = vmatmul.f32.gmra.mxu3 %v13304_v28  ;;  %v1451_v35 = vpop.f32.mrf.mxu1  ;;  %v1549_v10 = vpop.f32.mrf.mxu2 }
 0x22b   :  { %2266 = vmatmul.f32.gmra.mxu2 %v22040_v16  ;;  %v1452_v33 = vadd.f32 %v1451_v35, %v1360_v32  ;;  %v14572_v16 = vpop.permute.xlu2 %136  ;;  %v1365_v32 = vadd.f32 %v1364_v45, %v14422_v55  ;;  %v22081_v35 = vld [vmem:[#allocation20_spill] sm:$0xff]  ;;  %v21625_v55 = vand.u32 4294901760, %v14570_v4  ;;  %2930 = vmatpush.msra.mxu1 %v2929_v49  ;;  %v21627_v37 = vand.u32 4294901760, %v14584_v8 }
 0x22c   :  { %22080 = vst [vmem:[#allocation62_spill] sm:$0xff] %v14572_v16  ;;  %3046 = vmatpush.msra.mxu2 %v14570_v4 }
 0x22d   :  { %v1550_v41 = vadd.f32 %v1549_v10, %v1452_v33  ;;  %v174_v10 = vsel %vm171_vm4, %v22081_v35, %v14562_v21  ;;  %v2934_v57 = vsub.f32 %v14570_v4, %v21625_v55  ;;  %v2940_v49 = vsub.f32 %v14584_v8, %v21627_v37  ;;  %v22085_v37 = vld [vmem:[#allocation66_spill] sm:$0xff] }
 0x22e   :  { %3049 = vmatpush.msra.mxu2 %v14584_v8  ;;  %v14614_v55 = vand.u32 4294901760, %v12818_v44 }
 0x22f   :  { %v14560_v63 = vadd.f32 %v1621_v15, %v1550_v41  ;;  %v2941_v19 = vand.u32 4294901760, %v2940_v49 }
 0x230   :  { %2114 = vmatmul.f32.gmra.mxu0 %v13384_v2  ;;  %v1369_v51 = vpop.f32.mrf.mxu0  ;;  %v1625_v15 = vpop.f32.mrf.mxu3  ;;  %3052 = vmatpush.msra.mxu2 %v14598_v43  ;;  %v14629_v48 = vsub.f32 %v12818_v44, %v14614_v55  ;;  %v22087_v44 = vld [vmem:[#allocation69_spill] sm:$0xff] }
 0x231   :  { %22078 = vst [vmem:[#allocation60_spill] sm:$0xff] %v14560_v63  ;;  %2182 = vmatmul.f32.gmra.mxu1 %v13304_v28  ;;  %v22082_v63 = vld [vmem:[#allocation65_spill] sm:$0xff]  ;;  %2820 = vmatpush.msra.mxu0 %v14614_v55 }
 0x232   :  { %2418 = vmatmul.f32.gmra.mxu3 %v13384_v2  ;;  %v1457_v33 = vpop.f32.mrf.mxu1  ;;  %v1553_v41 = vpop.f32.mrf.mxu2  ;;  %v145_v35 = vsel %vm142_vm7, %v22082_v63, %v14572_v16  ;;  %v14609_v63 = vsub.f32 %v14534_v1, %v14545_v53 }
 0x233   :  { %2274 = vmatmul.f32.gmra.mxu2 %v22046_v13  ;;  %v1458_v45 = vadd.f32 %v1457_v33, %v1365_v32  ;;  %v14601_v13 = vand.u32 4294901760, %v174_v10  ;;  %v2935_v33 = vand.u32 4294901760, %v2934_v57  ;;  %v14616_v38 = vand.u32 4294901760, %v145_v35  ;;  %3146 = vmatpush.msra.mxu3 %v14614_v55 }
 0x234   :  { %v21630_v57 = vand.u32 4294901760, %v14598_v43  ;;  %v21635_v7 = vand.u32 4294901760, %v14609_v63  ;;  %3055 = vmatpush.msra.mxu2 %v14609_v63 }
 0x235   :  { %v1554_v32 = vadd.f32 %v1553_v41, %v1458_v45  ;;  %v14618_v41 = vpop.permute.xlu0 %107  ;;  %2936 = vmatpush.msra.mxu1 %v2935_v33  ;;  %2822 = vmatpush.msra.mxu0 %v14601_v13 }
 0x236   :  { %22083 = vst [vmem:[#allocation64_spill] sm:$0xff] %v14618_v41  ;;  %v116_v1 = vsel %vm113_vm9, %v22085_v37, %v14618_v41  ;;  %v2946_v37 = vsub.f32 %v14598_v43, %v21630_v57  ;;  %v2952_v49 = vsub.f32 %v14609_v63, %v21635_v7  ;;  %v14656_v7 = vpop.permute.xlu2 %47  ;;  %3058 = vmatpush.msra.mxu2 %v14629_v48 }
 0x237   :  { %v14620_v45 = vadd.f32 %v1625_v15, %v1554_v32  ;;  %v1370_v15 = vadd.f32 %v1369_v51, %v14432_v9  ;;  %2942 = vmatpush.msra.mxu1 %v2941_v19  ;;  %v14645_v9 = vsub.f32 %v174_v10, %v14601_v13  ;;  %v21640_v51 = vand.u32 4294901760, %v14629_v48  ;;  %3148 = vmatpush.msra.mxu3 %v14601_v13 }
 0x238   :  { %2118 = vmatmul.f32.gmra.mxu0 %v13483_v12  ;;  %v1665_v27 = vpop.f32.mrf.mxu0  ;;  %v1629_v32 = vpop.f32.mrf.mxu3  ;;  %v14652_v41 = vand.u32 4294901760, %v116_v1  ;;  %v2947_v54 = vand.u32 4294901760, %v2946_v37  ;;  %v2953_v10 = vand.u32 4294901760, %v2952_v49 }
 0x239   :  { %22084 = vst [vmem:[#allocation17_spill] sm:$0xff] %v14620_v45  ;;  %2186 = vmatmul.f32.gmra.mxu1 %v13384_v2  ;;  %v14638_v45 = vpop.permute.xlu1 %78  ;;  %3061 = vmatpush.msra.mxu2 %v14645_v9 }
 0x23a   :  { %22086 = vst [vmem:[#allocation20_spill] sm:$0xff] %v14638_v45  ;;  %2422 = vmatmul.f32.gmra.mxu3 %v13483_v12  ;;  %v1463_v33 = vpop.f32.mrf.mxu1  ;;  %v87_v57 = vsel %vm84_vm8, %v22087_v44, %v14638_v45  ;;  %v1557_v19 = vpop.f32.mrf.mxu2  ;;  %v2958_v44 = vsub.f32 %v14629_v48, %v21640_v51  ;;  %v14664_v45 = vsub.f32 %v145_v35, %v14616_v38 }
 0x23b   :  { %2282 = vmatmul.f32.gmra.mxu2 %v22050_v56  ;;  %v1464_v16 = vadd.f32 %v1463_v33, %v1370_v15  ;;  %v21642_v15 = vand.u32 4294901760, %v14645_v9  ;;  %v22088_v33 = vld [vmem:[#allocation70_spill] sm:$0xff]  ;;  %2948 = vmatpush.msra.mxu1 %v2947_v54  ;;  %v14672_v17 = vand.u32 4294901760, %v87_v57 }
 0x23c   :  { %v58_v37 = vsel %vm55_vm10, %v22088_v33, %v14656_v7  ;;  %v2959_v49 = vand.u32 4294901760, %v2958_v44  ;;  %v21643_v51 = vand.u32 4294901760, %v14664_v45  ;;  %2824 = vmatpush.msra.mxu0 %v14616_v38  ;;  %3064 = vmatpush.msra.mxu2 %v14664_v45  ;;  %v14691_v44 = vsub.f32 %v116_v1, %v14652_v41 }
 0x23d   :  { %v1558_v56 = vadd.f32 %v1557_v19, %v1464_v16  ;;  %v2964_v35 = vsub.f32 %v14645_v9, %v21642_v15  ;;  %2954 = vmatpush.msra.mxu1 %v2953_v10  ;;  %v14683_v54 = vand.u32 4294901760, %v58_v37  ;;  %3150 = vmatpush.msra.mxu3 %v14616_v38 }
 0x23e   :  { %v2970_v19 = vsub.f32 %v14664_v45, %v21643_v51  ;;  %v21644_v15 = vand.u32 4294901760, %v14691_v44  ;;  %2826 = vmatpush.msra.mxu0 %v14652_v41  ;;  %3067 = vmatpush.msra.mxu2 %v14691_v44 }
 0x23f   :  { %v14680_v21 = vadd.f32 %v1629_v32, %v1558_v56  ;;  %v2965_v16 = vand.u32 4294901760, %v2964_v35  ;;  %2960 = vmatpush.msra.mxu1 %v2959_v49  ;;  %v14697_v35 = vsub.f32 %v87_v57, %v14672_v17  ;;  %v14707_v49 = vsub.f32 %v58_v37, %v14683_v54  ;;  %3152 = vmatpush.msra.mxu3 %v14652_v41 }
 0x240   :  { %2122 = vmatmul.f32.gmra.mxu0 %v22056_v62  ;;  %v1989_v56 = vpop.f32.mrf.mxu3  ;;  %v2971_v33 = vand.u32 4294901760, %v2970_v19 }
 0x241   :  { %22089 = vst [vmem:[#allocation65_spill] sm:$0xff] %v14680_v21  ;;  %2190 = vmatmul.f32.gmra.mxu1 %v13483_v12  ;;  %v2976_v21 = vsub.f32 %v14691_v44, %v21644_v15  ;;  %v21646_v57 = vand.u32 4294901760, %v14697_v35  ;;  %2828 = vmatpush.msra.mxu0 %v14672_v17 }
 0x242   :  { %2426 = vmatmul.f32.gmra.mxu3 %v22056_v62  ;;  %v1673_v32 = vpop.f32.mrf.mxu0  ;;  %v1821_v10 = vpop.f32.mrf.mxu1  ;;  %2966 = vmatpush.msra.mxu1 %v2965_v16 }
 0x243   :  { %2290 = vmatmul.f32.gmra.mxu2 %v22052_v40  ;;  %v1822_v1 = vadd.f32 %v1821_v10, %v1665_v27  ;;  %v1905_v51 = vpop.f32.mrf.mxu2  ;;  %v2977_v27 = vand.u32 4294901760, %v2976_v21  ;;  %v2982_v16 = vsub.f32 %v14697_v35, %v21646_v57  ;;  %v21645_v10 = vand.u32 4294901760, %v14707_v49  ;;  %3154 = vmatpush.msra.mxu3 %v14672_v17 }
 0x244   :  { %2972 = vmatpush.msra.mxu1 %v2971_v33  ;;  %3070 = vmatpush.msra.mxu2 %v14697_v35 }
 0x245   :  { %v1906_v19 = vadd.f32 %v1905_v51, %v1822_v1  ;;  %2830 = vmatpush.msra.mxu0 %v14683_v54  ;;  %v2983_v51 = vand.u32 4294901760, %v2982_v16  ;;  %v2988_v21 = vsub.f32 %v14707_v49, %v21645_v10  ;;  %3156 = vmatpush.msra.mxu3 %v14683_v54 }
 0x246   :  { %2978 = vmatpush.msra.mxu1 %v2977_v27  ;;  %3073 = vmatpush.msra.mxu2 %v14707_v49 }
 0x247   :  { %v14717_v15 = vadd.f32 %v1989_v56, %v1906_v19  ;;  %v2989_v56 = vand.u32 4294901760, %v2988_v21 }
 0x248   :  { %2126 = vmatmul.f32.gmra.mxu0 %v22060_v5  ;;  %2984 = vmatpush.msra.mxu1 %v2983_v51 }
 0x249   :  { %22090 = vst [vmem:[#allocation66_spill] sm:$0xff] %v14717_v15  ;;  %2194 = vmatmul.f32.gmra.mxu1 %v22056_v62  ;;  %v1995_v37 = vpop.f32.mrf.mxu3 }
 0x24a   :  { %2430 = vmatmul.f32.gmra.mxu3 %v22060_v5  ;;  %2990 = vmatpush.msra.mxu1 %v2989_v56 }
 0x24b   :  { %2298 = vmatmul.f32.gmra.mxu2 %v22055_v26 }
 0x24c   :  { %v1681_v33 = vpop.f32.mrf.mxu0  ;;  %v1910_v1 = vpop.f32.mrf.mxu2 }
 0x24d   :  { %v1825_v19 = vpop.f32.mrf.mxu1 }
 0x24e   :  { %v1826_v27 = vadd.f32 %v1825_v19, %v1673_v32 }
 0x250   :  { %v1911_v16 = vadd.f32 %v1910_v1, %v1826_v27  ;;  %2130 = vmatmul.f32.gmra.mxu0 %v13638_v23 }
 0x251   :  { %2198 = vmatmul.f32.gmra.mxu1 %v22060_v5 }
 0x252   :  { %2434 = vmatmul.f32.gmra.mxu3 %v13638_v23  ;;  %v14733_v10 = vadd.f32 %v1995_v37, %v1911_v16 }
 0x253   :  { %2306 = vmatmul.f32.gmra.mxu2 %v22059_v52  ;;  %v2001_v51 = vpop.f32.mrf.mxu3 }
 0x254   :  { %22091 = vst [vmem:[#allocation69_spill] sm:$0xff] %v14733_v10 }
 0x255   :  { %v1689_v21 = vpop.f32.mrf.mxu0 }
 0x256   :  { %v1829_v57 = vpop.f32.mrf.mxu1  ;;  %v1915_v15 = vpop.f32.mrf.mxu2 }
 0x257   :  { %v1830_v26 = vadd.f32 %v1829_v57, %v1681_v33 }
 0x258   :  { %2134 = vmatmul.f32.gmra.mxu0 %v22065_v61 }
 0x259   :  { %v1916_v56 = vadd.f32 %v1915_v15, %v1830_v26  ;;  %2202 = vmatmul.f32.gmra.mxu1 %v13638_v23 }
 0x25a   :  { %2438 = vmatmul.f32.gmra.mxu3 %v22065_v61 }
 0x25b   :  { %v14739_v32 = vadd.f32 %v2001_v51, %v1916_v56  ;;  %2314 = vmatmul.f32.gmra.mxu2 %v22062_v60 }
 0x25d   :  { %22092 = vst [vmem:[#allocation70_spill] sm:$0xff] %v14739_v32  ;;  %v1697_v37 = vpop.f32.mrf.mxu0  ;;  %v2007_v1 = vpop.f32.mrf.mxu3 }
 0x25e   :  { %v1833_v19 = vpop.f32.mrf.mxu1  ;;  %v1920_v27 = vpop.f32.mrf.mxu2 }
 0x25f   :  { %v1834_v16 = vadd.f32 %v1833_v19, %v1689_v21  ;;  %v14750_v21 = vpop.permute.xlu0 %321 }
 0x260   :  { %2138 = vmatmul.f32.gmra.mxu0 %v22069_v59  ;;  %22094 = vst [vmem:[#allocation84_spill] sm:$0xff] %v14750_v21 }
 0x261   :  { %v1921_v10 = vadd.f32 %v1920_v27, %v1834_v16  ;;  %2206 = vmatmul.f32.gmra.mxu1 %v22065_v61 }
 0x262   :  { %2442 = vmatmul.f32.gmra.mxu3 %v22069_v59 }
 0x263   :  { %v14745_v26 = vadd.f32 %v2007_v1, %v1921_v10  ;;  %2322 = vmatmul.f32.gmra.mxu2 %v22064_v6  ;;  %v14756_v10 = vpop.permute.xlu1 %292 }
 0x264   :  { %22096 = vst [vmem:[#allocation86_spill] sm:$0xff] %v14756_v10 }
 0x265   :  { %22093 = vst [vmem:[#allocation83_spill] sm:$0xff] %v14745_v26  ;;  %v1705_v15 = vpop.f32.mrf.mxu0  ;;  %v2013_v57 = vpop.f32.mrf.mxu3 }
 0x266   :  { %v1837_v33 = vpop.f32.mrf.mxu1  ;;  %v1925_v51 = vpop.f32.mrf.mxu2 }
 0x267   :  { %v1838_v56 = vadd.f32 %v1837_v33, %v1697_v37  ;;  %v14762_v37 = vsel %vm323_vm2, %v14470_v39, %v14750_v21  ;;  %v22143_v21 = vld [vmem:[#allocation35_spill] sm:$0xff] }
 0x268   :  { %2142 = vmatmul.f32.gmra.mxu0 %v13732_v24  ;;  %v14777_v39 = vand.u32 4294901760, %v14762_v37 }
 0x269   :  { %v1926_v32 = vadd.f32 %v1925_v51, %v1838_v56  ;;  %2210 = vmatmul.f32.gmra.mxu1 %v22069_v59  ;;  %v22097_v51 = vld [vmem:[#allocation14_spill] sm:$0xff]  ;;  %v22098_v56 = vand.u32 4294901760, %v14505_v20  ;;  %v22101_v20 = vand.u32 4294901760, %v14570_v4 }
 0x26a   :  { %2446 = vmatmul.f32.gmra.mxu3 %v13732_v24 }
 0x26b   :  { %v14753_v19 = vadd.f32 %v2013_v57, %v1926_v32  ;;  %2330 = vmatmul.f32.gmra.mxu2 %v22068_v36  ;;  %v14769_v32 = vsel %vm294_vm1, %v14480_v42, %v14756_v10  ;;  %v22106_v10 = vld [vmem:[#allocation16_spill] sm:$0xff] }
 0x26d   :  { %22095 = vst [vmem:[#allocation85_spill] sm:$0xff] %v14753_v19  ;;  %v1713_v1 = vpop.f32.mrf.mxu0  ;;  %v2019_v27 = vpop.f32.mrf.mxu3 }
 0x26e   :  { %v1841_v16 = vpop.f32.mrf.mxu1  ;;  %v1930_v26 = vpop.f32.mrf.mxu2 }
 0x26f   :  { %v1842_v33 = vadd.f32 %v1841_v16, %v1705_v15  ;;  %v14774_v19 = vpop.permute.xlu2 %263  ;;  %v14794_v16 = vpop.permute.xlu0 %234 }
 0x270   :  { %2490 = vmatmul.f32.vlgmr.msrb.gmra.mxu0 %v22097_v51  ;;  %22099 = vst [vmem:[#allocation14_spill] sm:$0xff] %v14774_v19  ;;  %v14784_v15 = vsel %vm265_vm0, %v14492_v25, %v14774_v19  ;;  %v14807_v4 = vsel %vm236_vm3, %v14513_v34, %v14794_v16  ;;  %v22104_v19 = vand.u32 4294901760, %v14598_v43  ;;  %v22107_v34 = vand.u32 4294901760, %v14609_v63 }
 0x271   :  { %v1931_v57 = vadd.f32 %v1930_v26, %v1842_v33  ;;  %2214 = vmatmul.f32.gmra.mxu1 %v13732_v24  ;;  %3232 = vmatpush.msrb.mxu0 %v22098_v56  ;;  %v14792_v26 = vand.u32 4294901760, %v14769_v32  ;;  %22102 = vst [vmem:[#allocation88_spill] sm:$0xff] %v14794_v16  ;;  %v22103_v33 = vand.u32 4294901760, %v14584_v8  ;;  %v14811_v8 = vpop.permute.xlu1 %205  ;;  %v14825_v43 = vand.u32 4294901760, %v14807_v4  ;;  %v22138_v16 = vld [vmem:[#allocation31_spill] sm:$0xff] }
 0x272   :  { %2760 = vmatmul.f32.vlgmr.msrb.gmra.mxu3 %v13179_v3  ;;  %22105 = vst [vmem:[#allocation89_spill] sm:$0xff] %v14811_v8  ;;  %v22110_v63 = vand.u32 4294901760, %v14645_v9  ;;  %v22112_v9 = vand.u32 4294901760, %v14691_v44 }
 0x273   :  { %v14786_v42 = vadd.f32 %v2019_v27, %v1931_v57  ;;  %2688 = vmatmul.f32.vlgmr.msrb.gmra.mxu2 %v13179_v3  ;;  %3236 = vmatpush.msrb.mxu0 %v22101_v20  ;;  %v14800_v27 = vand.u32 4294901760, %v14784_v15 }
 0x274   :  { %3396 = vmatpush.msrb.mxu2 %v14777_v39 }
 0x275   :  { %22100 = vst [vmem:[#allocation87_spill] sm:$0xff] %v14786_v42  ;;  %3240 = vmatpush.msrb.mxu0 %v22103_v33  ;;  %v1721_v56 = vpop.f32.mrf.mxu0  ;;  %v2025_v25 = vpop.f32.mrf.mxu3  ;;  %v14819_v33 = vsel %vm207_vm5, %v14527_v47, %v14811_v8  ;;  %v22109_v47 = vand.u32 4294901760, %v14629_v48 }
 0x276   :  { %v1845_v57 = vpop.f32.mrf.mxu1  ;;  %v1935_v42 = vpop.f32.mrf.mxu2  ;;  %3398 = vmatpush.msrb.mxu2 %v14792_v26 }
 0x277   :  { %v1846_v20 = vadd.f32 %v1845_v57, %v1713_v1  ;;  %3244 = vmatpush.msrb.mxu0 %v22104_v19  ;;  %v14835_v1 = vand.u32 4294901760, %v14819_v33 }
 0x278   :  { %2495 = vmatmul.f32.gmra.mxu0 %v21986_v18  ;;  %3400 = vmatpush.msrb.mxu2 %v14800_v27 }
 0x279   :  { %v1936_v36 = vadd.f32 %v1935_v42, %v1846_v20  ;;  %2574 = vmatmul.f32.vlgmr.msrb.gmra.mxu1 %v22106_v10  ;;  %3248 = vmatpush.msrb.mxu0 %v22107_v34 }
 0x27a   :  { %2764 = vmatmul.f32.gmra.mxu3 %v13245_v0  ;;  %3324 = vmatpush.msrb.mxu1 %v14482_v29 }
 0x27b   :  { %v14829_v19 = vadd.f32 %v2025_v25, %v1936_v36  ;;  %2692 = vmatmul.f32.gmra.mxu2 %v13245_v0  ;;  %3252 = vmatpush.msrb.mxu0 %v22109_v47  ;;  %v22111_v25 = vand.u32 4294901760, %v14664_v45  ;;  %v22114_v45 = vand.u32 4294901760, %v14697_v35  ;;  %v14864_v35 = vpop.permute.xlu2 %167 }
 0x27c   :  { %3326 = vmatpush.msrb.mxu1 %v14508_v14  ;;  %3402 = vmatpush.msrb.mxu2 %v14825_v43  ;;  %22116 = vst [vmem:[#allocation91_spill] sm:$0xff] %v14864_v35 }
 0x27d   :  { %22108 = vst [vmem:[#allocation16_spill] sm:$0xff] %v14829_v19  ;;  %3256 = vmatpush.msrb.mxu0 %v22110_v63  ;;  %v1729_v42 = vpop.f32.mrf.mxu0  ;;  %v2031_v57 = vpop.f32.mrf.mxu3 }
 0x27e   :  { %3328 = vmatpush.msrb.mxu1 %v14516_v46  ;;  %v1849_v36 = vpop.f32.mrf.mxu1  ;;  %v1940_v29 = vpop.f32.mrf.mxu2  ;;  %3404 = vmatpush.msrb.mxu2 %v14835_v1 }
 0x27f   :  { %v1850_v48 = vadd.f32 %v1849_v36, %v1721_v56  ;;  %3260 = vmatpush.msrb.mxu0 %v22111_v25  ;;  %v22120_v25 = vld [vmem:[#allocation25_spill] sm:$0xff] }
 0x280   :  { %3330 = vmatpush.msrb.mxu1 %v14538_v31  ;;  %2500 = vmatmul.f32.gmra.mxu0 %v13325_v50  ;;  %v22115_v31 = vand.u32 4294901760, %v14707_v49 }
 0x281   :  { %v1941_v14 = vadd.f32 %v1940_v29, %v1850_v48  ;;  %2580 = vmatmul.f32.gmra.mxu1 %v21994_v22  ;;  %3264 = vmatpush.msrb.mxu0 %v22112_v9  ;;  %v14886_v29 = vsub.f32 %v14784_v15, %v14800_v27  ;;  %v22119_v48 = vld [vmem:[#allocation61_spill] sm:$0xff] }
 0x282   :  { %2768 = vmatmul.f32.gmra.mxu3 %v13304_v28  ;;  %3332 = vmatpush.msrb.mxu1 %v14545_v53 }
 0x283   :  { %v14852_v46 = vadd.f32 %v2031_v57, %v1941_v14  ;;  %2696 = vmatmul.f32.gmra.mxu2 %v13304_v28  ;;  %3268 = vmatpush.msrb.mxu0 %v22114_v45  ;;  %v22121_v14 = vld [vmem:[#allocation24_spill] sm:$0xff] }
 0x284   :  { %3334 = vmatpush.msrb.mxu1 %v14614_v55  ;;  %v14868_v55 = vsub.f32 %v14762_v37, %v14777_v39 }
 0x285   :  { %22113 = vst [vmem:[#allocation90_spill] sm:$0xff] %v14852_v46  ;;  %3272 = vmatpush.msrb.mxu0 %v22115_v31  ;;  %v1737_v56 = vpop.f32.mrf.mxu0  ;;  %v2037_v20 = vpop.f32.mrf.mxu3  ;;  %v22122_v31 = vld [vmem:[#allocation62_spill] sm:$0xff] }
 0x286   :  { %3336 = vmatpush.msrb.mxu1 %v14601_v13  ;;  %v1853_v44 = vpop.f32.mrf.mxu1  ;;  %v1945_v34 = vpop.f32.mrf.mxu2  ;;  %v21652_v37 = vand.u32 4294901760, %v14868_v55 }
 0x287   :  { %v1854_v47 = vadd.f32 %v1853_v44, %v1729_v42  ;;  %v14880_v42 = vsub.f32 %v14769_v32, %v14792_v26  ;;  %v14916_v44 = vsub.f32 %v14819_v33, %v14835_v1 }
 0x288   :  { %3338 = vmatpush.msrb.mxu1 %v14616_v38  ;;  %2505 = vmatmul.f32.gmra.mxu0 %v13426_v11  ;;  %v14875_v38 = vpop.permute.xlu0 %138  ;;  %v3514_v15 = vsub.f32 %v14868_v55, %v21652_v37  ;;  %v22130_v37 = vld [vmem:[#allocation29_spill] sm:$0xff] }
 0x289   :  { %v1946_v53 = vadd.f32 %v1945_v34, %v1854_v47  ;;  %2586 = vmatmul.f32.gmra.mxu1 %v21997_v30  ;;  %22118 = vst [vmem:[#allocation93_spill] sm:$0xff] %v14875_v38  ;;  %v21651_v9 = vand.u32 4294901760, %v14880_v42  ;;  %v14918_v34 = vpop.permute.xlu1 %109 }
 0x28a   :  { %2772 = vmatmul.f32.gmra.mxu3 %v13384_v2  ;;  %3340 = vmatpush.msrb.mxu1 %v14652_v41  ;;  %22125 = vst [vmem:[#allocation24_spill] sm:$0xff] %v14918_v34  ;;  %v3515_v47 = vand.u32 4294901760, %v3514_v15 }
 0x28b   :  { %v14872_v13 = vadd.f32 %v2037_v20, %v1946_v53  ;;  %2700 = vmatmul.f32.gmra.mxu2 %v13384_v2  ;;  %v3520_v53 = vsub.f32 %v14880_v42, %v21651_v9 }
 0x28c   :  { %3342 = vmatpush.msrb.mxu1 %v14672_v17  ;;  %v173_v17 = vsel %vm171_vm4, %v22119_v48, %v14864_v35  ;;  %3516 = vmatpush.msrb.mxu3 %v3515_v47  ;;  %v12819_v47 = vld [vmem:[%s21477_s0 + $0x28] sm:$0xff] }
 0x28d   :  { %22117 = vst [vmem:[#allocation92_spill] sm:$0xff] %v14872_v13  ;;  %v1745_v49 = vpop.f32.mrf.mxu0  ;;  %v2043_v63 = vpop.f32.mrf.mxu3  ;;  %v14903_v45 = vand.u32 4294901760, %v173_v17  ;;  %v3521_v15 = vand.u32 4294901760, %v3520_v53  ;;  %v14946_v53 = vand.u32 4294901760, %v12819_v47 }
 0x28e   :  { %3344 = vmatpush.msrb.mxu1 %v14683_v54  ;;  %v1857_v57 = vpop.f32.mrf.mxu1  ;;  %v1950_v41 = vpop.f32.mrf.mxu2  ;;  %v14896_v54 = vsub.f32 %v14807_v4, %v14825_v43 }
 0x28f   :  { %v1858_v36 = vadd.f32 %v1857_v57, %v1737_v56  ;;  %v144_v56 = vsel %vm142_vm7, %v22122_v31, %v14875_v38  ;;  %v14912_v4 = vpop.permute.xlu2 %80  ;;  %v21653_v57 = vand.u32 4294901760, %v14886_v29  ;;  %3522 = vmatpush.msrb.mxu3 %v3521_v15  ;;  %3406 = vmatpush.msrb.mxu2 %v14946_v53  ;;  %v14964_v38 = vsub.f32 %v12819_v47, %v14946_v53 }
 0x290   :  { %2510 = vmatmul.f32.gmra.mxu0 %v22120_v25  ;;  %22124 = vst [vmem:[#allocation25_spill] sm:$0xff] %v14912_v4  ;;  %v22131_v46 = vand.u32 4294901760, %v14896_v54 }
 0x291   :  { %v1951_v32 = vadd.f32 %v1950_v41, %v1858_v36  ;;  %2592 = vmatmul.f32.gmra.mxu1 %v22121_v14  ;;  %v3526_v9 = vsub.f32 %v14886_v29, %v21653_v57  ;;  %v14950_v57 = vpop.permute.xlu0 %49  ;;  %3408 = vmatpush.msrb.mxu2 %v14903_v45 }
 0x292   :  { %2776 = vmatmul.f32.gmra.mxu3 %v13483_v12 }
 0x293   :  { %v14909_v20 = vadd.f32 %v2043_v63, %v1951_v32  ;;  %2704 = vmatmul.f32.gmra.mxu2 %v13483_v12  ;;  %v22126_v63 = vld [vmem:[#allocation64_spill] sm:$0xff]  ;;  %v14930_v32 = vand.u32 4294901760, %v144_v56 }
 0x294   :  { %v115_v41 = vsel %vm113_vm9, %v22126_v63, %v14918_v34  ;;  %v22128_v63 = vld [vmem:[#allocation20_spill] sm:$0xff]  ;;  %22129 = vst [vmem:[#allocation64_spill] sm:$0xff] %v14950_v57  ;;  %v3532_v34 = vsub.f32 %v14896_v54, %v22131_v46 }
 0x295   :  { %22123 = vst [vmem:[#allocation61_spill] sm:$0xff] %v14909_v20  ;;  %v14928_v36 = vpop.f32.mrf.mxu0  ;;  %v2049_v48 = vpop.f32.mrf.mxu3  ;;  %v14937_v20 = vsub.f32 %v173_v17, %v14903_v45  ;;  %v14948_v19 = vand.u32 4294901760, %v115_v41  ;;  %v3527_v17 = vand.u32 4294901760, %v3526_v9  ;;  %v14969_v15 = vsub.f32 %v144_v56, %v14930_v32  ;;  %3410 = vmatpush.msrb.mxu2 %v14930_v32 }
 0x296   :  { %22127 = vst [vmem:[#allocation62_spill] sm:$0xff] %v14928_v36  ;;  %v1861_v33 = vpop.f32.mrf.mxu1  ;;  %v1955_v31 = vpop.f32.mrf.mxu2  ;;  %v86_v36 = vsel %vm84_vm8, %v22128_v63, %v14912_v4  ;;  %v22132_v4 = vld [vmem:[#allocation27_spill] sm:$0xff]  ;;  %v3533_v46 = vand.u32 4294901760, %v3532_v34 }
 0x297   :  { %v1862_v13 = vadd.f32 %v1861_v33, %v1745_v49  ;;  %v21659_v49 = vand.u32 4294901760, %v14916_v44  ;;  %v57_v33 = vsel %vm55_vm10, %v14656_v7, %v14950_v57  ;;  %v14966_v9 = vand.u32 4294901760, %v86_v36  ;;  %3528 = vmatpush.msrb.mxu3 %v3527_v17  ;;  %3412 = vmatpush.msrb.mxu2 %v14948_v19 }
 0x298   :  { %2515 = vmatmul.f32.gmra.mxu0 %v22130_v37  ;;  %v14980_v47 = vsub.f32 %v115_v41, %v14948_v19  ;;  %v14982_v57 = vand.u32 4294901760, %v57_v33  ;;  %v21662_v34 = vand.u32 4294901760, %v14937_v20 }
 0x299   :  { %v1956_v63 = vadd.f32 %v1955_v31, %v1862_v13  ;;  %2598 = vmatmul.f32.gmra.mxu1 %v22132_v4  ;;  %v3538_v7 = vsub.f32 %v14916_v44, %v21659_v49  ;;  %v21660_v31 = vand.u32 4294901760, %v14964_v38  ;;  %3534 = vmatpush.msrb.mxu3 %v3533_v46  ;;  %v14992_v17 = vsub.f32 %v86_v36, %v14966_v9  ;;  %v22137_v36 = vld [vmem:[#allocation33_spill] sm:$0xff] }
 0x29a   :  { %2780 = vmatmul.f32.gmra.mxu3 %v22056_v62  ;;  %3414 = vmatpush.msrb.mxu2 %v14966_v9 }
 0x29b   :  { %v14975_v13 = vadd.f32 %v2049_v48, %v1956_v63  ;;  %2708 = vmatmul.f32.gmra.mxu2 %v22056_v62  ;;  %v3539_v56 = vand.u32 4294901760, %v3538_v7  ;;  %v3544_v48 = vsub.f32 %v14964_v38, %v21660_v31  ;;  %v3550_v7 = vsub.f32 %v14937_v20, %v21662_v34 }
 0x29c   :  { %v15004_v31 = vsub.f32 %v57_v33, %v14982_v57  ;;  %v21664_v34 = vand.u32 4294901760, %v14980_v47  ;;  %3416 = vmatpush.msrb.mxu2 %v14982_v57 }
 0x29d   :  { %22133 = vst [vmem:[#allocation20_spill] sm:$0xff] %v14975_v13  ;;  %v14986_v35 = vpop.f32.mrf.mxu0  ;;  %v2407_v49 = vpop.f32.mrf.mxu3  ;;  %3540 = vmatpush.msrb.mxu3 %v3539_v56  ;;  %v3545_v46 = vand.u32 4294901760, %v3544_v48  ;;  %v3551_v8 = vand.u32 4294901760, %v3550_v7  ;;  %v21666_v56 = vand.u32 4294901760, %v14992_v17 }
 0x29e   :  { %22134 = vst [vmem:[#allocation29_spill] sm:$0xff] %v14986_v35  ;;  %v14994_v41 = vpop.f32.mrf.mxu1  ;;  %v2251_v63 = vpop.f32.mrf.mxu2  ;;  %v21665_v35 = vand.u32 4294901760, %v14969_v15  ;;  %v3562_v33 = vsub.f32 %v14980_v47, %v21664_v34 }
 0x29f   :  { %22135 = vst [vmem:[#allocation27_spill] sm:$0xff] %v14994_v41  ;;  %v15001_v13 = vadd.f32 %v2407_v49, %v2251_v63  ;;  %3546 = vmatpush.msrb.mxu3 %v3545_v46  ;;  %v3568_v63 = vsub.f32 %v14992_v17, %v21666_v56  ;;  %v22142_v56 = vld [vmem:[#allocation36_spill] sm:$0xff] }
 0x2a0   :  { %2520 = vmatmul.f32.gmra.mxu0 %v22137_v36  ;;  %v3556_v41 = vsub.f32 %v14969_v15, %v21665_v35  ;;  %v3563_v48 = vand.u32 4294901760, %v3562_v33 }
 0x2a1   :  { %22136 = vst [vmem:[#allocation94_spill] sm:$0xff] %v15001_v13  ;;  %2604 = vmatmul.f32.gmra.mxu1 %v22138_v16  ;;  %3552 = vmatpush.msrb.mxu3 %v3551_v8  ;;  %v3569_v13 = vand.u32 4294901760, %v3568_v63 }
 0x2a2   :  { %2784 = vmatmul.f32.gmra.mxu3 %v22060_v5  ;;  %v3557_v49 = vand.u32 4294901760, %v3556_v41  ;;  %v21669_v41 = vand.u32 4294901760, %v15004_v31 }
 0x2a3   :  { %2712 = vmatmul.f32.gmra.mxu2 %v22060_v5 }
 0x2a4   :  { %3558 = vmatpush.msrb.mxu3 %v3557_v49  ;;  %v3574_v8 = vsub.f32 %v15004_v31, %v21669_v41 }
 0x2a5   :  { %v15025_v7 = vpop.f32.mrf.mxu0  ;;  %v2411_v46 = vpop.f32.mrf.mxu3 }
 0x2a6   :  { %22139 = vst [vmem:[#allocation95_spill] sm:$0xff] %v15025_v7  ;;  %v15027_v34 = vpop.f32.mrf.mxu1  ;;  %v2259_v35 = vpop.f32.mrf.mxu2  ;;  %3564 = vmatpush.msrb.mxu3 %v3563_v48  ;;  %v3575_v58 = vand.u32 4294901760, %v3574_v8  ;;  %v22147_v48 = vld [vmem:[#allocation40_spill] sm:$0xff] }
 0x2a7   :  { %22140 = vst [vmem:[#allocation96_spill] sm:$0xff] %v15027_v34  ;;  %v15032_v33 = vadd.f32 %v2411_v46, %v2259_v35  ;;  %v22148_v46 = vld [vmem:[#allocation38_spill] sm:$0xff] }
 0x2a8   :  { %2525 = vmatmul.f32.gmra.mxu0 %v22142_v56  ;;  %3570 = vmatpush.msrb.mxu3 %v3569_v13 }
 0x2a9   :  { %22141 = vst [vmem:[#allocation97_spill] sm:$0xff] %v15032_v33  ;;  %2610 = vmatmul.f32.gmra.mxu1 %v22143_v21 }
 0x2aa   :  { %2788 = vmatmul.f32.gmra.mxu3 %v13638_v23 }
 0x2ab   :  { %2716 = vmatmul.f32.gmra.mxu2 %v13638_v23  ;;  %3576 = vmatpush.msrb.mxu3 %v3575_v58 }
 0x2ad   :  { %v15038_v49 = vpop.f32.mrf.mxu0  ;;  %v2415_v63 = vpop.f32.mrf.mxu3 }
 0x2ae   :  { %22144 = vst [vmem:[#allocation98_spill] sm:$0xff] %v15038_v49  ;;  %v15040_v34 = vpop.f32.mrf.mxu1  ;;  %v2267_v41 = vpop.f32.mrf.mxu2 }
 0x2af   :  { %22145 = vst [vmem:[#allocation99_spill] sm:$0xff] %v15040_v34  ;;  %v15042_v35 = vadd.f32 %v2415_v63, %v2267_v41  ;;  %v22152_v34 = vld [vmem:[#allocation44_spill] sm:$0xff]  ;;  %v22153_v41 = vld [vmem:[#allocation42_spill] sm:$0xff] }
 0x2b0   :  { %2530 = vmatmul.f32.gmra.mxu0 %v22147_v48 }
 0x2b1   :  { %22146 = vst [vmem:[#allocation100_spill] sm:$0xff] %v15042_v35  ;;  %2616 = vmatmul.f32.gmra.mxu1 %v22148_v46 }
 0x2b2   :  { %2792 = vmatmul.f32.gmra.mxu3 %v22065_v61 }
 0x2b3   :  { %2720 = vmatmul.f32.gmra.mxu2 %v22065_v61 }
 0x2b5   :  { %v15048_v13 = vpop.f32.mrf.mxu0  ;;  %v2419_v8 = vpop.f32.mrf.mxu3 }
 0x2b6   :  { %22149 = vst [vmem:[#allocation101_spill] sm:$0xff] %v15048_v13  ;;  %v15050_v58 = vpop.f32.mrf.mxu1  ;;  %v2275_v33 = vpop.f32.mrf.mxu2 }
 0x2b7   :  { %22150 = vst [vmem:[#allocation102_spill] sm:$0xff] %v15050_v58  ;;  %v15052_v7 = vadd.f32 %v2419_v8, %v2275_v33  ;;  %v22157_v58 = vld [vmem:[#allocation47_spill] sm:$0xff]  ;;  %v22158_v33 = vld [vmem:[#allocation46_spill] sm:$0xff] }
 0x2b8   :  { %2535 = vmatmul.f32.gmra.mxu0 %v22152_v34 }
 0x2b9   :  { %22151 = vst [vmem:[#allocation103_spill] sm:$0xff] %v15052_v7  ;;  %2622 = vmatmul.f32.gmra.mxu1 %v22153_v41 }
 0x2ba   :  { %2796 = vmatmul.f32.gmra.mxu3 %v22069_v59 }
 0x2bb   :  { %2724 = vmatmul.f32.gmra.mxu2 %v22069_v59 }
 0x2bd   :  { %v15058_v63 = vpop.f32.mrf.mxu0  ;;  %v2423_v35 = vpop.f32.mrf.mxu3 }
 0x2be   :  { %22154 = vst [vmem:[#allocation104_spill] sm:$0xff] %v15058_v63  ;;  %v15060_v49 = vpop.f32.mrf.mxu1  ;;  %v2283_v13 = vpop.f32.mrf.mxu2 }
 0x2bf   :  { %22155 = vst [vmem:[#allocation105_spill] sm:$0xff] %v15060_v49  ;;  %v15062_v61 = vadd.f32 %v2423_v35, %v2283_v13  ;;  %v22162_v49 = vld [vmem:[#allocation19_spill] sm:$0xff]  ;;  %v22163_v35 = vld [vmem:[#allocation49_spill] sm:$0xff]  ;;  %v22164_v13 = vand.u32 4294901760, %v14868_v55 }
 0x2c0   :  { %2540 = vmatmul.f32.gmra.mxu0 %v22157_v58 }
 0x2c1   :  { %22156 = vst [vmem:[#allocation106_spill] sm:$0xff] %v15062_v61  ;;  %2628 = vmatmul.f32.gmra.mxu1 %v22158_v33 }
 0x2c2   :  { %2800 = vmatmul.f32.gmra.mxu3 %v13732_v24 }
 0x2c3   :  { %2728 = vmatmul.f32.gmra.mxu2 %v13732_v24 }
 0x2c5   :  { %v15068_v8 = vpop.f32.mrf.mxu0  ;;  %v2427_v7 = vpop.f32.mrf.mxu3 }
 0x2c6   :  { %22159 = vst [vmem:[#allocation107_spill] sm:$0xff] %v15068_v8  ;;  %v15070_v59 = vpop.f32.mrf.mxu1  ;;  %v2291_v63 = vpop.f32.mrf.mxu2 }
 0x2c7   :  { %22160 = vst [vmem:[#allocation108_spill] sm:$0xff] %v15070_v59  ;;  %v15072_v34 = vadd.f32 %v2427_v7, %v2291_v63 }
 0x2c8   :  { %2836 = vmatmul.f32.vlgmr.msra.gmra.mxu0 %v22162_v49 }
 0x2c9   :  { %22161 = vst [vmem:[#allocation109_spill] sm:$0xff] %v15072_v34  ;;  %2634 = vmatmul.f32.gmra.mxu1 %v22163_v35  ;;  %3629 = vmatpush.msra.mxu0 %v14868_v55  ;;  %v22166_v34 = vand.u32 4294901760, %v14880_v42  ;;  %v22169_v55 = vand.u32 4294901760, %v14886_v29 }
 0x2ca   :  { %3160 = vmatmul.f32.vlgmr.msra.gmra.mxu3 %v22106_v10 }
 0x2cb   :  { %3910 = vmatpush.msra.mxu3 %v14777_v39  ;;  %3076 = vmatmul.f32.vlgmr.msra.gmra.mxu2 %v22097_v51 }
 0x2cc   :  { %3632 = vmatpush.msra.mxu0 %v14880_v42  ;;  %3818 = vmatpush.msra.mxu2 %v22164_v13  ;;  %v22170_v13 = vld [vmem:[#allocation21_spill] sm:$0xff] }
 0x2cd   :  { %3912 = vmatpush.msra.mxu3 %v14792_v26  ;;  %v15084_v7 = vpop.f32.mrf.mxu0  ;;  %v2431_v63 = vpop.f32.mrf.mxu3 }
 0x2ce   :  { %22165 = vst [vmem:[#allocation110_spill] sm:$0xff] %v15084_v7  ;;  %3635 = vmatpush.msra.mxu0 %v14886_v29  ;;  %3822 = vmatpush.msra.mxu2 %v22166_v34  ;;  %v15089_v59 = vpop.f32.mrf.mxu1  ;;  %v2299_v61 = vpop.f32.mrf.mxu2  ;;  %v22173_v34 = vand.u32 4294901760, %v14916_v44 }
 0x2cf   :  { %22167 = vst [vmem:[#allocation111_spill] sm:$0xff] %v15089_v59  ;;  %3914 = vmatpush.msra.mxu3 %v14800_v27  ;;  %v15092_v8 = vadd.f32 %v2431_v63, %v2299_v61  ;;  %v22171_v61 = vand.u32 4294901760, %v14896_v54  ;;  %v22231_v59 = vld [vmem:[#allocation11_spill] sm:$0xff] }
 0x2d0   :  { %3638 = vmatpush.msra.mxu0 %v14896_v54  ;;  %3826 = vmatpush.msra.mxu2 %v22169_v55  ;;  %v22176_v55 = vand.u32 4294901760, %v14964_v38 }
 0x2d1   :  { %22168 = vst [vmem:[#allocation112_spill] sm:$0xff] %v15092_v8  ;;  %3916 = vmatpush.msra.mxu3 %v14825_v43  ;;  %2844 = vmatmul.f32.gmra.mxu0 %v22170_v13  ;;  %v22222_v8 = vld [vmem:[#allocation86_spill] sm:$0xff] }
 0x2d2   :  { %2992 = vmatmul.f32.vlgmr.msra.gmra.mxu1 %v13179_v3  ;;  %3166 = vmatmul.f32.gmra.mxu3 %v21994_v22 }
 0x2d3   :  { %3641 = vmatpush.msra.mxu0 %v14916_v44  ;;  %3722 = vmatpush.msra.mxu1 %v14777_v39  ;;  %v22178_v44 = vld [vmem:[#allocation23_spill] sm:$0xff] }
 0x2d4   :  { %3830 = vmatpush.msra.mxu2 %v22171_v61  ;;  %3918 = vmatpush.msra.mxu3 %v14835_v1 }
 0x2d5   :  { %3081 = vmatmul.f32.gmra.mxu2 %v21986_v18  ;;  %3644 = vmatpush.msra.mxu0 %v14964_v38  ;;  %v15108_v42 = vpop.f32.mrf.mxu0  ;;  %v2435_v29 = vpop.f32.mrf.mxu3 }
 0x2d6   :  { %22172 = vst [vmem:[#allocation113_spill] sm:$0xff] %v15108_v42  ;;  %3724 = vmatpush.msra.mxu1 %v14792_v26  ;;  %3834 = vmatpush.msra.mxu2 %v22173_v34  ;;  %v15113_v63 = vpop.f32.mrf.mxu1  ;;  %v2307_v39 = vpop.f32.mrf.mxu2  ;;  %v22177_v26 = vand.u32 4294901760, %v14937_v20  ;;  %v22185_v34 = vld [vmem:[#allocation26_spill] sm:$0xff] }
 0x2d7   :  { %22174 = vst [vmem:[#allocation114_spill] sm:$0xff] %v15113_v63  ;;  %3920 = vmatpush.msra.mxu3 %v14946_v53  ;;  %3647 = vmatpush.msra.mxu0 %v14937_v20  ;;  %v15117_v54 = vadd.f32 %v2435_v29, %v2307_v39  ;;  %v22232_v63 = vld [vmem:[#allocation88_spill] sm:$0xff] }
 0x2d8   :  { %3726 = vmatpush.msra.mxu1 %v14800_v27  ;;  %3838 = vmatpush.msra.mxu2 %v22176_v55 }
 0x2d9   :  { %22175 = vst [vmem:[#allocation115_spill] sm:$0xff] %v15117_v54  ;;  %3922 = vmatpush.msra.mxu3 %v14903_v45  ;;  %3650 = vmatpush.msra.mxu0 %v14969_v15 }
 0x2da   :  { %3728 = vmatpush.msra.mxu1 %v14825_v43  ;;  %3842 = vmatpush.msra.mxu2 %v22177_v26  ;;  %v22180_v43 = vand.u32 4294901760, %v14969_v15  ;;  %v22184_v15 = vand.u32 4294901760, %v14992_v17 }
 0x2db   :  { %3924 = vmatpush.msra.mxu3 %v14930_v32  ;;  %2852 = vmatmul.f32.gmra.mxu0 %v22178_v44 }
 0x2dc   :  { %2996 = vmatmul.f32.gmra.mxu1 %v13245_v0  ;;  %3172 = vmatmul.f32.gmra.mxu3 %v21997_v30 }
 0x2dd   :  { %3653 = vmatpush.msra.mxu0 %v14980_v47  ;;  %3730 = vmatpush.msra.mxu1 %v14835_v1  ;;  %v15133_v27 = vpop.f32.mrf.mxu0  ;;  %v2439_v38 = vpop.f32.mrf.mxu3  ;;  %v22183_v1 = vand.u32 4294901760, %v14980_v47 }
 0x2de   :  { %22179 = vst [vmem:[#allocation116_spill] sm:$0xff] %v15133_v27  ;;  %3846 = vmatpush.msra.mxu2 %v22180_v43  ;;  %3926 = vmatpush.msra.mxu3 %v14948_v19  ;;  %v15138_v20 = vpop.f32.mrf.mxu1  ;;  %v2315_v61 = vpop.f32.mrf.mxu2 }
 0x2df   :  { %22181 = vst [vmem:[#allocation117_spill] sm:$0xff] %v15138_v20  ;;  %3086 = vmatmul.f32.gmra.mxu2 %v13325_v50  ;;  %3656 = vmatpush.msra.mxu0 %v14992_v17  ;;  %v15142_v29 = vadd.f32 %v2439_v38, %v2315_v61  ;;  %v22223_v20 = vld [vmem:[#allocation50_spill] sm:$0xff] }
 0x2e0   :  { %3732 = vmatpush.msra.mxu1 %v14946_v53  ;;  %3850 = vmatpush.msra.mxu2 %v22183_v1  ;;  %v22186_v53 = vand.u32 4294901760, %v15004_v31  ;;  %v22199_v1 = vld [vmem:[#allocation37_spill] sm:$0xff] }
 0x2e1   :  { %22182 = vst [vmem:[#allocation118_spill] sm:$0xff] %v15142_v29  ;;  %3928 = vmatpush.msra.mxu3 %v14966_v9  ;;  %3659 = vmatpush.msra.mxu0 %v15004_v31 }
 0x2e2   :  { %3734 = vmatpush.msra.mxu1 %v14903_v45  ;;  %3854 = vmatpush.msra.mxu2 %v22184_v15 }
 0x2e3   :  { %3930 = vmatpush.msra.mxu3 %v14982_v57  ;;  %2860 = vmatmul.f32.gmra.mxu0 %v22185_v34 }
 0x2e4   :  { %3736 = vmatpush.msra.mxu1 %v14930_v32  ;;  %3858 = vmatpush.msra.mxu2 %v22186_v53  ;;  %v22190_v32 = vld [vmem:[#allocation30_spill] sm:$0xff] }
 0x2e5   :  { %3000 = vmatmul.f32.gmra.mxu1 %v13304_v28  ;;  %3178 = vmatmul.f32.gmra.mxu3 %v22121_v14  ;;  %v15159_v47 = vpop.f32.mrf.mxu0  ;;  %v2443_v39 = vpop.f32.mrf.mxu3 }
 0x2e6   :  { %22187 = vst [vmem:[#allocation26_spill] sm:$0xff] %v15159_v47  ;;  %3738 = vmatpush.msra.mxu1 %v14948_v19  ;;  %v15162_v45 = vpop.f32.mrf.mxu1  ;;  %v2323_v17 = vpop.f32.mrf.mxu2 }
 0x2e7   :  { %22188 = vst [vmem:[#allocation119_spill] sm:$0xff] %v15162_v45  ;;  %3091 = vmatmul.f32.gmra.mxu2 %v13426_v11  ;;  %v15165_v55 = vadd.f32 %v2443_v39, %v2323_v17 }
 0x2e8   :  { %3740 = vmatpush.msra.mxu1 %v14966_v9 }
 0x2e9   :  { %22189 = vst [vmem:[#allocation120_spill] sm:$0xff] %v15165_v55 }
 0x2ea   :  { %3742 = vmatpush.msra.mxu1 %v14982_v57 }
 0x2eb   :  { %2868 = vmatmul.f32.gmra.mxu0 %v22190_v32 }
 0x2ed   :  { %3004 = vmatmul.f32.gmra.mxu1 %v13384_v2  ;;  %3184 = vmatmul.f32.gmra.mxu3 %v22132_v4  ;;  %v15172_v31 = vpop.f32.mrf.mxu0  ;;  %v15174_v19 = vpop.f32.mrf.mxu3 }
 0x2ee   :  { %22191 = vst [vmem:[#allocation30_spill] sm:$0xff] %v15172_v31  ;;  %v15176_v26 = vpop.f32.mrf.mxu1  ;;  %v15178_v38 = vpop.f32.mrf.mxu2 }
 0x2ef   :  { %22192 = vst [vmem:[#allocation121_spill] sm:$0xff] %v15174_v19  ;;  %3096 = vmatmul.f32.gmra.mxu2 %v22120_v25 }
 0x2f0   :  { %22193 = vst [vmem:[#allocation122_spill] sm:$0xff] %v15176_v26 }
 0x2f1   :  { %22194 = vst [vmem:[#allocation123_spill] sm:$0xff] %v15178_v38  ;;  %v22240_v38 = vld [vmem:[#allocation91_spill] sm:$0xff] }
 0x2f3   :  { %2876 = vmatmul.f32.gmra.mxu0 %v22052_v40 }
 0x2f5   :  { %3008 = vmatmul.f32.gmra.mxu1 %v13483_v12  ;;  %3190 = vmatmul.f32.gmra.mxu3 %v22138_v16  ;;  %v15184_v57 = vpop.f32.mrf.mxu0  ;;  %v15186_v9 = vpop.f32.mrf.mxu3  ;;  %v22253_v16 = vld [vmem:[#allocation25_spill] sm:$0xff] }
 0x2f6   :  { %22195 = vst [vmem:[#allocation124_spill] sm:$0xff] %v15184_v57  ;;  %v15188_v43 = vpop.f32.mrf.mxu1  ;;  %v15190_v61 = vpop.f32.mrf.mxu2 }
 0x2f7   :  { %22196 = vst [vmem:[#allocation125_spill] sm:$0xff] %v15186_v9  ;;  %3101 = vmatmul.f32.gmra.mxu2 %v22130_v37 }
 0x2f8   :  { %22197 = vst [vmem:[#allocation126_spill] sm:$0xff] %v15188_v43 }
 0x2f9   :  { %22198 = vst [vmem:[#allocation127_spill] sm:$0xff] %v15190_v61  ;;  %v22212_v61 = vld [vmem:[#allocation39_spill] sm:$0xff] }
 0x2fb   :  { %2884 = vmatmul.f32.gmra.mxu0 %v22199_v1 }
 0x2fd   :  { %3012 = vmatmul.f32.gmra.mxu1 %v22056_v62  ;;  %3196 = vmatmul.f32.gmra.mxu3 %v22143_v21  ;;  %v15196_v15 = vpop.f32.mrf.mxu0  ;;  %v15198_v53 = vpop.f32.mrf.mxu3  ;;  %v22255_v21 = vld [vmem:[#allocation18_spill] sm:$0xff] }
 0x2fe   :  { %22200 = vst [vmem:[#allocation128_spill] sm:$0xff] %v15196_v15  ;;  %v15200_v39 = vpop.f32.mrf.mxu1  ;;  %v15202_v17 = vpop.f32.mrf.mxu2 }
 0x2ff   :  { %22201 = vst [vmem:[#allocation129_spill] sm:$0xff] %v15198_v53  ;;  %3106 = vmatmul.f32.gmra.mxu2 %v22137_v36 }
 0x300   :  { %22202 = vst [vmem:[#allocation130_spill] sm:$0xff] %v15200_v39 }
 0x301   :  { %22203 = vst [vmem:[#allocation131_spill] sm:$0xff] %v15202_v17 }
 0x303   :  { %2892 = vmatmul.f32.gmra.mxu0 %v22059_v52 }
 0x305   :  { %3016 = vmatmul.f32.gmra.mxu1 %v22060_v5  ;;  %3202 = vmatmul.f32.gmra.mxu3 %v22148_v46  ;;  %v15208_v57 = vpop.f32.mrf.mxu0  ;;  %v15210_v55 = vpop.f32.mrf.mxu3 }
 0x306   :  { %22204 = vst [vmem:[#allocation132_spill] sm:$0xff] %v15208_v57  ;;  %v15212_v45 = vpop.f32.mrf.mxu1  ;;  %v15214_v27 = vpop.f32.mrf.mxu2 }
 0x307   :  { %22205 = vst [vmem:[#allocation133_spill] sm:$0xff] %v15210_v55  ;;  %3111 = vmatmul.f32.gmra.mxu2 %v22142_v56  ;;  %v22252_v56 = vld [vmem:[#allocation12_spill] sm:$0xff] }
 0x308   :  { %22206 = vst [vmem:[#allocation134_spill] sm:$0xff] %v15212_v45  ;;  %v22221_v45 = vld [vmem:[#allocation8_spill] sm:$0xff] }
 0x309   :  { %22207 = vst [vmem:[#allocation135_spill] sm:$0xff] %v15214_v27  ;;  %v301_v15 = vsel %vm294_vm1, %v22222_v8, %v22221_v45 }
 0x30b   :  { %2900 = vmatmul.f32.gmra.mxu0 %v22062_v60 }
 0x30d   :  { %3020 = vmatmul.f32.gmra.mxu1 %v13638_v23  ;;  %3208 = vmatmul.f32.gmra.mxu3 %v22153_v41  ;;  %v15220_v53 = vpop.f32.mrf.mxu0  ;;  %v15222_v17 = vpop.f32.mrf.mxu3 }
 0x30e   :  { %22208 = vst [vmem:[#allocation136_spill] sm:$0xff] %v15220_v53  ;;  %v15224_v39 = vpop.f32.mrf.mxu1  ;;  %v15226_v9 = vpop.f32.mrf.mxu2 }
 0x30f   :  { %22209 = vst [vmem:[#allocation137_spill] sm:$0xff] %v15222_v17  ;;  %3116 = vmatmul.f32.gmra.mxu2 %v22147_v48  ;;  %v22217_v17 = vld [vmem:[#allocation44_spill] sm:$0xff] }
 0x310   :  { %22210 = vst [vmem:[#allocation138_spill] sm:$0xff] %v15224_v39  ;;  %v22218_v39 = vld [vmem:[#allocation9_spill] sm:$0xff] }
 0x311   :  { %22211 = vst [vmem:[#allocation139_spill] sm:$0xff] %v15226_v9  ;;  %v22219_v9 = vld [vmem:[#allocation84_spill] sm:$0xff] }
 0x312   :  { %v330_v27 = vsel %vm323_vm2, %v22219_v9, %v22218_v39  ;;  %v22227_v9 = vld [vmem:[#allocation5_spill] sm:$0xff]  ;;  %v22228_v39 = vld [vmem:[#allocation14_spill] sm:$0xff] }
 0x313   :  { %2908 = vmatmul.f32.gmra.mxu0 %v22064_v6  ;;  %v272_v29 = vsel %vm265_vm0, %v22228_v39, %v22227_v9  ;;  %v22233_v9 = vld [vmem:[#allocation6_spill] sm:$0xff]  ;;  %v22234_v39 = vld [vmem:[#allocation89_spill] sm:$0xff] }
 0x315   :  { %3024 = vmatmul.f32.gmra.mxu1 %v22212_v61  ;;  %3214 = vmatmul.f32.gmra.mxu3 %v22158_v33  ;;  %v15232_v43 = vpop.f32.mrf.mxu0  ;;  %v15234_v57 = vpop.f32.mrf.mxu3  ;;  %v22244_v33 = vld [vmem:[#allocation93_spill] sm:$0xff] }
 0x316   :  { %22213 = vst [vmem:[#allocation39_spill] sm:$0xff] %v15232_v43  ;;  %v15236_v31 = vpop.f32.mrf.mxu1  ;;  %v15238_v55 = vpop.f32.mrf.mxu2  ;;  %v15250_v43 = vand.u32 4294901760, %v330_v27 }
 0x317   :  { %22214 = vst [vmem:[#allocation140_spill] sm:$0xff] %v15234_v57  ;;  %3121 = vmatmul.f32.gmra.mxu2 %v22217_v17  ;;  %v15252_v57 = vand.u32 4294901760, %v301_v15 }
 0x318   :  { %22215 = vst [vmem:[#allocation141_spill] sm:$0xff] %v15236_v31  ;;  %v22224_v31 = vld [vmem:[#allocation43_spill] sm:$0xff]  ;;  %v15270_v42 = vsub.f32 %v330_v27, %v15250_v43 }
 0x319   :  { %22216 = vst [vmem:[#allocation142_spill] sm:$0xff] %v15238_v55  ;;  %v15279_v7 = vsub.f32 %v301_v15, %v15252_v57 }
 0x31b   :  { %2916 = vmatmul.f32.gmra.mxu0 %v22223_v20  ;;  %v22242_v47 = vand.u32 4294901760, %v15279_v7 }
 0x31d   :  { %3028 = vmatmul.f32.gmra.mxu1 %v22224_v31  ;;  %3220 = vmatmul.f32.gmra.mxu3 %v22163_v35  ;;  %v15256_v55 = vpop.f32.mrf.mxu0  ;;  %v15258_v54 = vpop.f32.mrf.mxu3  ;;  %v22246_v35 = vld [vmem:[#allocation24_spill] sm:$0xff] }
 0x31e   :  { %22225 = vst [vmem:[#allocation9_spill] sm:$0xff] %v15256_v55  ;;  %v15264_v8 = vpop.f32.mrf.mxu1  ;;  %v15266_v45 = vpop.f32.mrf.mxu2  ;;  %v243_v55 = vsel %vm236_vm3, %v22232_v63, %v22231_v59 }
 0x31f   :  { %22226 = vst [vmem:[#allocation84_spill] sm:$0xff] %v15258_v54  ;;  %3126 = vmatmul.f32.gmra.mxu2 %v22157_v58  ;;  %v15276_v54 = vand.u32 4294901760, %v272_v29 }
 0x320   :  { %22229 = vst [vmem:[#allocation8_spill] sm:$0xff] %v15264_v8  ;;  %v15285_v8 = vand.u32 4294901760, %v243_v55 }
 0x321   :  { %22230 = vst [vmem:[#allocation86_spill] sm:$0xff] %v15266_v45  ;;  %v214_v45 = vsel %vm207_vm5, %v22234_v39, %v22233_v9  ;;  %v15295_v63 = vsub.f32 %v272_v29, %v15276_v54 }
 0x322   :  { %v15300_v39 = vand.u32 4294901760, %v214_v45  ;;  %v15315_v9 = vsub.f32 %v243_v55, %v15285_v8  ;;  %v4106_v55 = vsub.f32 %v15279_v7, %v22242_v47 }
 0x323   :  { %3274 = vmatmul.f32.vlgmr.msrb.gmra.mxu0 %v13179_v3 }
 0x324   :  { %3982 = vmatpush.msrb.mxu0 %v15250_v43 }
 0x325   :  { %3032 = vmatmul.f32.gmra.mxu1 %v13732_v24  ;;  %3578 = vmatmul.f32.vlgmr.msrb.gmra.mxu3 %v13179_v3  ;;  %v15292_v59 = vpop.f32.mrf.mxu0  ;;  %v15297_v15 = vpop.f32.mrf.mxu3 }
 0x326   :  { %22235 = vst [vmem:[#allocation50_spill] sm:$0xff] %v15292_v59  ;;  %4308 = vmatpush.msrb.mxu3 %v15250_v43  ;;  %3984 = vmatpush.msrb.mxu0 %v15252_v57  ;;  %v15304_v27 = vpop.f32.mrf.mxu1  ;;  %v15306_v19 = vpop.f32.mrf.mxu2  ;;  %v12820_v59 = vld [vmem:[%s21477_s0 + $0x30] sm:$0xff] }
 0x327   :  { %22236 = vst [vmem:[#allocation43_spill] sm:$0xff] %v15297_v15  ;;  %v15311_v29 = vand.u32 4294901760, %v12820_v59  ;;  %3422 = vmatmul.f32.vlgmr.msrb.gmra.mxu2 %v22162_v49  ;;  %v22239_v15 = vld [vmem:[#allocation10_spill] sm:$0xff]  ;;  %v22243_v49 = vld [vmem:[#allocation13_spill] sm:$0xff] }
 0x328   :  { %22237 = vst [vmem:[#allocation5_spill] sm:$0xff] %v15304_v27  ;;  %v172_v26 = vsel %vm171_vm4, %v22240_v38, %v22239_v15  ;;  %4215 = vmatpush.msrb.mxu2 %v15270_v42  ;;  %4310 = vmatpush.msrb.mxu3 %v15252_v57  ;;  %v143_v38 = vsel %vm142_vm7, %v22244_v33, %v22243_v49  ;;  %v22245_v33 = vld [vmem:[#allocation15_spill] sm:$0xff] }
 0x329   :  { %22238 = vst [vmem:[#allocation14_spill] sm:$0xff] %v15306_v19  ;;  %v22241_v19 = vand.u32 4294901760, %v15270_v42  ;;  %3986 = vmatpush.msrb.mxu0 %v15276_v54  ;;  %v15338_v15 = vsub.f32 %v214_v45, %v15300_v39  ;;  %v15343_v58 = vand.u32 4294901760, %v172_v26  ;;  %v114_v45 = vsel %vm113_vm9, %v22246_v35, %v22245_v33  ;;  %v22256_v33 = vld [vmem:[#allocation64_spill] sm:$0xff] }
 0x32a   :  { %4218 = vmatpush.msrb.mxu2 %v15279_v7  ;;  %4312 = vmatpush.msrb.mxu3 %v15276_v54  ;;  %v15353_v41 = vand.u32 4294901760, %v143_v38 }
 0x32b   :  { %v4100_v27 = vsub.f32 %v15270_v42, %v22241_v19  ;;  %v15341_v19 = vsub.f32 %v12820_v59, %v15311_v29  ;;  %3988 = vmatpush.msrb.mxu0 %v15285_v8  ;;  %v22247_v59 = vand.u32 4294901760, %v15295_v63 }
 0x32c   :  { %4221 = vmatpush.msrb.mxu2 %v15295_v63  ;;  %4314 = vmatpush.msrb.mxu3 %v15285_v8 }
 0x32d   :  { %v4101_v49 = vand.u32 4294901760, %v4100_v27  ;;  %3278 = vmatmul.f32.gmra.mxu0 %v13245_v0  ;;  %3346 = vmatmul.f32.vlgmr.msrb.gmra.mxu1 %v13179_v3  ;;  %v4112_v47 = vsub.f32 %v15295_v63, %v22247_v59  ;;  %v15360_v17 = vpop.f32.mrf.mxu0  ;;  %v15362_v46 = vpop.f32.mrf.mxu3  ;;  %v4107_v27 = vand.u32 4294901760, %v4106_v55  ;;  %v85_v59 = vsel %vm84_vm8, %v22253_v16, %v22252_v56 }
 0x32e   :  { %22248 = vst [vmem:[#allocation11_spill] sm:$0xff] %v15360_v17  ;;  %3990 = vmatpush.msrb.mxu0 %v15300_v39  ;;  %v15365_v48 = vpop.f32.mrf.mxu1  ;;  %v15367_v35 = vpop.f32.mrf.mxu2  ;;  %4224 = vmatpush.msrb.mxu2 %v15315_v9  ;;  %v56_v16 = vsel %vm55_vm10, %v22256_v33, %v22255_v21  ;;  %v22258_v21 = vand.u32 4294901760, %v15341_v19 }
 0x32f   :  { %22249 = vst [vmem:[#allocation88_spill] sm:$0xff] %v15362_v46  ;;  %4102 = vmatpush.msrb.mxu1 %v4101_v49  ;;  %4316 = vmatpush.msrb.mxu3 %v15300_v39  ;;  %v22254_v49 = vand.u32 4294901760, %v15315_v9  ;;  %v15381_v46 = vsub.f32 %v172_v26, %v15343_v58  ;;  %v4113_v56 = vand.u32 4294901760, %v4112_v47  ;;  %v15395_v26 = vand.u32 4294901760, %v85_v59 }
 0x330   :  { %22250 = vst [vmem:[#allocation6_spill] sm:$0xff] %v15365_v48  ;;  %3992 = vmatpush.msrb.mxu0 %v15311_v29  ;;  %4227 = vmatpush.msrb.mxu2 %v15338_v15  ;;  %v4130_v33 = vsub.f32 %v15341_v19, %v22258_v21  ;;  %v15407_v53 = vand.u32 4294901760, %v56_v16 }
 0x331   :  { %22251 = vst [vmem:[#allocation89_spill] sm:$0xff] %v15367_v35  ;;  %v4118_v55 = vsub.f32 %v15315_v9, %v22254_v49  ;;  %v15383_v35 = vand.u32 4294901760, %v114_v45  ;;  %4108 = vmatpush.msrb.mxu1 %v4107_v27  ;;  %4318 = vmatpush.msrb.mxu3 %v15311_v29  ;;  %v15393_v49 = vsub.f32 %v143_v38, %v15353_v41  ;;  %v22257_v27 = vand.u32 4294901760, %v15338_v15 }
 0x332   :  { %3430 = vmatmul.f32.gmra.mxu2 %v22170_v13  ;;  %3994 = vmatpush.msrb.mxu0 %v15343_v58  ;;  %v4131_v38 = vand.u32 4294901760, %v4130_v33  ;;  %v15423_v13 = vsub.f32 %v85_v59, %v15395_v26 }
 0x333   :  { %v4124_v48 = vsub.f32 %v15338_v15, %v22257_v27  ;;  %4114 = vmatpush.msrb.mxu1 %v4113_v56  ;;  %4230 = vmatpush.msrb.mxu2 %v15341_v19  ;;  %v4119_v47 = vand.u32 4294901760, %v4118_v55  ;;  %v15412_v17 = vsub.f32 %v114_v45, %v15383_v35  ;;  %v22264_v33 = vand.u32 4294901760, %v15393_v49 }
 0x334   :  { %4320 = vmatpush.msrb.mxu3 %v15343_v58  ;;  %3996 = vmatpush.msrb.mxu0 %v15353_v41 }
 0x335   :  { %3582 = vmatmul.f32.gmra.mxu3 %v13245_v0  ;;  %4120 = vmatpush.msrb.mxu1 %v4119_v47  ;;  %v15415_v27 = vpop.f32.mrf.mxu0  ;;  %v15418_v21 = vpop.f32.mrf.mxu3  ;;  %v4125_v55 = vand.u32 4294901760, %v4124_v48  ;;  %v22263_v47 = vand.u32 4294901760, %v15381_v46  ;;  %v15436_v48 = vsub.f32 %v56_v16, %v15407_v53  ;;  %v21686_v59 = vand.u32 4294901760, %v15412_v17 }
 0x336   :  { %22259 = vst [vmem:[#allocation10_spill] sm:$0xff] %v15415_v27  ;;  %4233 = vmatpush.msrb.mxu2 %v15381_v46  ;;  %4322 = vmatpush.msrb.mxu3 %v15353_v41  ;;  %v15425_v45 = vpop.f32.mrf.mxu1  ;;  %v15427_v36 = vpop.f32.mrf.mxu2  ;;  %v4142_v27 = vsub.f32 %v15393_v49, %v22264_v33 }
 0x337   :  { %22260 = vst [vmem:[#allocation91_spill] sm:$0xff] %v15418_v21  ;;  %3282 = vmatmul.f32.gmra.mxu0 %v13304_v28  ;;  %3350 = vmatmul.f32.gmra.mxu1 %v13245_v0  ;;  %v4136_v56 = vsub.f32 %v15381_v46, %v22263_v47  ;;  %v21687_v33 = vand.u32 4294901760, %v15436_v48 }
 0x338   :  { %22261 = vst [vmem:[#allocation13_spill] sm:$0xff] %v15425_v45  ;;  %3998 = vmatpush.msrb.mxu0 %v15383_v35  ;;  %4126 = vmatpush.msrb.mxu1 %v4125_v55  ;;  %v4148_v55 = vsub.f32 %v15412_v17, %v21686_v59 }
 0x339   :  { %22262 = vst [vmem:[#allocation93_spill] sm:$0xff] %v15427_v36  ;;  %4236 = vmatpush.msrb.mxu2 %v15393_v49  ;;  %4324 = vmatpush.msrb.mxu3 %v15383_v35  ;;  %v4137_v16 = vand.u32 4294901760, %v4136_v56  ;;  %v22267_v56 = vand.u32 4294901760, %v15423_v13 }
 0x33a   :  { %4000 = vmatpush.msrb.mxu0 %v15395_v26  ;;  %4132 = vmatpush.msrb.mxu1 %v4131_v38  ;;  %v4143_v38 = vand.u32 4294901760, %v4142_v27  ;;  %v4149_v27 = vand.u32 4294901760, %v4148_v55 }
 0x33b   :  { %4239 = vmatpush.msrb.mxu2 %v15412_v17  ;;  %4326 = vmatpush.msrb.mxu3 %v15395_v26  ;;  %v4154_v36 = vsub.f32 %v15423_v13, %v22267_v56 }
 0x33c   :  { %3438 = vmatmul.f32.gmra.mxu2 %v22178_v44  ;;  %4002 = vmatpush.msrb.mxu0 %v15407_v53 }
 0x33d   :  { %4138 = vmatpush.msrb.mxu1 %v4137_v16  ;;  %4242 = vmatpush.msrb.mxu2 %v15423_v13  ;;  %v15455_v47 = vpop.f32.mrf.mxu0  ;;  %v15457_v21 = vpop.f32.mrf.mxu3  ;;  %v4160_v16 = vsub.f32 %v15436_v48, %v21687_v33  ;;  %v4155_v56 = vand.u32 4294901760, %v4154_v36 }
 0x33e   :  { %22265 = vst [vmem:[#allocation15_spill] sm:$0xff] %v15455_v47  ;;  %4328 = vmatpush.msrb.mxu3 %v15407_v53  ;;  %v15463_v45 = vpop.f32.mrf.mxu1  ;;  %v15465_v44 = vpop.f32.mrf.mxu2 }
 0x33f   :  { %22266 = vst [vmem:[#allocation24_spill] sm:$0xff] %v15457_v21  ;;  %3586 = vmatmul.f32.gmra.mxu3 %v13304_v28  ;;  %4144 = vmatpush.msrb.mxu1 %v4143_v38  ;;  %v4161_v59 = vand.u32 4294901760, %v4160_v16 }
 0x340   :  { %22268 = vst [vmem:[#allocation12_spill] sm:$0xff] %v15463_v45  ;;  %4245 = vmatpush.msrb.mxu2 %v15436_v48  ;;  %3286 = vmatmul.f32.gmra.mxu0 %v13384_v2 }
 0x341   :  { %22269 = vst [vmem:[#allocation25_spill] sm:$0xff] %v15465_v44  ;;  %3354 = vmatmul.f32.gmra.mxu1 %v13304_v28 }
 0x342   :  { %4150 = vmatpush.msrb.mxu1 %v4149_v27 }
 0x344   :  { %4156 = vmatpush.msrb.mxu1 %v4155_v56  ;;  %3446 = vmatmul.f32.gmra.mxu2 %v22185_v34 }
 0x345   :  { %v15475_v21 = vpop.f32.mrf.mxu0  ;;  %v15477_v38 = vpop.f32.mrf.mxu3 }
 0x346   :  { %22270 = vst [vmem:[#allocation18_spill] sm:$0xff] %v15475_v21  ;;  %4162 = vmatpush.msrb.mxu1 %v4161_v59  ;;  %v15479_v44 = vpop.f32.mrf.mxu1  ;;  %v15481_v55 = vpop.f32.mrf.mxu2 }
 0x347   :  { %22271 = vst [vmem:[#allocation64_spill] sm:$0xff] %v15477_v38  ;;  %3590 = vmatmul.f32.gmra.mxu3 %v13384_v2 }
 0x348   :  { %22272 = vst [vmem:[#allocation143_spill] sm:$0xff] %v15479_v44  ;;  %3290 = vmatmul.f32.gmra.mxu0 %v13483_v12 }
 0x349   :  { %22273 = vst [vmem:[#allocation144_spill] sm:$0xff] %v15481_v55  ;;  %3358 = vmatmul.f32.gmra.mxu1 %v13384_v2 }
 0x34c   :  { %3454 = vmatmul.f32.gmra.mxu2 %v22190_v32 }
 0x34d   :  { %v15487_v36 = vpop.f32.mrf.mxu3 }
 0x34e   :  { %22274 = vst [vmem:[#allocation145_spill] sm:$0xff] %v15487_v36  ;;  %v2845_v27 = vpop.f32.mrf.mxu0  ;;  %v15489_v16 = vpop.f32.mrf.mxu2 }
 0x34f   :  { %22275 = vst [vmem:[#allocation146_spill] sm:$0xff] %v15489_v16  ;;  %3594 = vmatmul.f32.gmra.mxu3 %v13483_v12  ;;  %v15492_v59 = vpop.f32.mrf.mxu1 }
 0x350   :  { %22276 = vst [vmem:[#allocation147_spill] sm:$0xff] %v15492_v59  ;;  %3294 = vmatmul.f32.gmra.mxu0 %v22056_v62 }
 0x351   :  { %3362 = vmatmul.f32.gmra.mxu1 %v13483_v12 }
 0x354   :  { %3462 = vmatmul.f32.gmra.mxu2 %v22052_v40 }
 0x355   :  { %v15497_v56 = vpop.f32.mrf.mxu3 }
 0x356   :  { %22277 = vst [vmem:[#allocation148_spill] sm:$0xff] %v15497_v56 }
 0x357   :  { %3598 = vmatmul.f32.gmra.mxu3 %v22056_v62 }
 0x358   :  { %3298 = vmatmul.f32.gmra.mxu0 %v22060_v5  ;;  %v2853_v33 = vpop.f32.mrf.mxu0  ;;  %v3082_v45 = vpop.f32.mrf.mxu2 }
 0x359   :  { %3366 = vmatmul.f32.gmra.mxu1 %v22056_v62  ;;  %v2997_v36 = vpop.f32.mrf.mxu1 }
 0x35a   :  { %v2998_v16 = vadd.f32 %v2997_v36, %v2845_v27 }
 0x35c   :  { %3470 = vmatmul.f32.gmra.mxu2 %v22199_v1  ;;  %v15503_v59 = vadd.f32 %v3082_v45, %v2998_v16 }
 0x35e   :  { %22278 = vst [vmem:[#allocation149_spill] sm:$0xff] %v15503_v59 }
 0x35f   :  { %3602 = vmatmul.f32.gmra.mxu3 %v22060_v5  ;;  %v3173_v21 = vpop.f32.mrf.mxu3 }
 0x360   :  { %3302 = vmatmul.f32.gmra.mxu0 %v13638_v23  ;;  %v2861_v56 = vpop.f32.mrf.mxu0 }
 0x361   :  { %3370 = vmatmul.f32.gmra.mxu1 %v22060_v5 }
 0x362   :  { %v3001_v38 = vpop.f32.mrf.mxu1  ;;  %v3087_v55 = vpop.f32.mrf.mxu2 }
 0x363   :  { %v3002_v44 = vadd.f32 %v3001_v38, %v2853_v33 }
 0x364   :  { %3478 = vmatmul.f32.gmra.mxu2 %v22059_v52 }
 0x365   :  { %v3088_v47 = vadd.f32 %v3087_v55, %v3002_v44 }
 0x367   :  { %3606 = vmatmul.f32.gmra.mxu3 %v13638_v23  ;;  %v15510_v36 = vadd.f32 %v3173_v21, %v3088_v47 }
 0x368   :  { %3306 = vmatmul.f32.gmra.mxu0 %v22212_v61  ;;  %v2869_v45 = vpop.f32.mrf.mxu0  ;;  %v3179_v27 = vpop.f32.mrf.mxu3 }
 0x369   :  { %22279 = vst [vmem:[#allocation150_spill] sm:$0xff] %v15510_v36  ;;  %3374 = vmatmul.f32.gmra.mxu1 %v13638_v23 }
 0x36a   :  { %v3005_v16 = vpop.f32.mrf.mxu1  ;;  %v3092_v59 = vpop.f32.mrf.mxu2 }
 0x36b   :  { %v3006_v1 = vadd.f32 %v3005_v16, %v2861_v56 }
 0x36c   :  { %3486 = vmatmul.f32.gmra.mxu2 %v22062_v60 }
 0x36d   :  { %v3093_v40 = vadd.f32 %v3092_v59, %v3006_v1 }
 0x36f   :  { %3610 = vmatmul.f32.gmra.mxu3 %v22212_v61  ;;  %v15516_v33 = vadd.f32 %v3179_v27, %v3093_v40 }
 0x370   :  { %3310 = vmatmul.f32.gmra.mxu0 %v22224_v31  ;;  %v2877_v44 = vpop.f32.mrf.mxu0  ;;  %v3185_v21 = vpop.f32.mrf.mxu3 }
 0x371   :  { %22280 = vst [vmem:[#allocation151_spill] sm:$0xff] %v15516_v33  ;;  %3378 = vmatmul.f32.gmra.mxu1 %v22212_v61 }
 0x372   :  { %v3009_v47 = vpop.f32.mrf.mxu1  ;;  %v3097_v38 = vpop.f32.mrf.mxu2 }
 0x373   :  { %v3010_v55 = vadd.f32 %v3009_v47, %v2869_v45  ;;  %v22282_v47 = vand.u32 4294901760, %v15270_v42 }
 0x374   :  { %3494 = vmatmul.f32.gmra.mxu2 %v22064_v6 }
 0x375   :  { %v3098_v36 = vadd.f32 %v3097_v38, %v3010_v55 }
 0x377   :  { %3614 = vmatmul.f32.gmra.mxu3 %v22224_v31  ;;  %v15522_v56 = vadd.f32 %v3185_v21, %v3098_v36 }
 0x378   :  { %3314 = vmatmul.f32.gmra.mxu0 %v13732_v24  ;;  %v2885_v40 = vpop.f32.mrf.mxu0  ;;  %v3191_v1 = vpop.f32.mrf.mxu3 }
 0x379   :  { %3382 = vmatmul.f32.gmra.mxu1 %v22224_v31 }
 0x37a   :  { %v3013_v59 = vpop.f32.mrf.mxu1  ;;  %v3102_v27 = vpop.f32.mrf.mxu2 }
 0x37b   :  { %v3014_v16 = vadd.f32 %v3013_v59, %v2877_v44  ;;  %v22283_v44 = vand.u32 4294901760, %v15279_v7  ;;  %v22286_v7 = vand.u32 4294901760, %v15338_v15 }
 0x37c   :  { %3502 = vmatmul.f32.gmra.mxu2 %v22223_v20 }
 0x37d   :  { %v3103_v33 = vadd.f32 %v3102_v27, %v3014_v16  ;;  %v22285_v27 = vand.u32 4294901760, %v15315_v9 }
 0x37f   :  { %3618 = vmatmul.f32.gmra.mxu3 %v13732_v24  ;;  %v15528_v45 = vadd.f32 %v3191_v1, %v3103_v33  ;;  %v22284_v33 = vand.u32 4294901760, %v15295_v63 }
 0x380   :  { %3662 = vmatmul.f32.vlgmr.msra.gmra.mxu0 %v22097_v51  ;;  %v2893_v36 = vpop.f32.mrf.mxu0  ;;  %v3197_v21 = vpop.f32.mrf.mxu3 }
 0x381   :  { %22281 = vst [vmem:[#allocation152_spill] sm:$0xff] %v15528_v45  ;;  %3386 = vmatmul.f32.gmra.mxu1 %v13732_v24  ;;  %4404 = vmatpush.msra.mxu0 %v22282_v47 }
 0x382   :  { %v3017_v38 = vpop.f32.mrf.mxu1  ;;  %v3107_v55 = vpop.f32.mrf.mxu2 }
 0x383   :  { %4408 = vmatpush.msra.mxu0 %v22283_v44  ;;  %v3018_v59 = vadd.f32 %v3017_v38, %v2885_v40  ;;  %v22287_v38 = vand.u32 4294901760, %v15341_v19 }
 0x384   :  { %3860 = vmatmul.f32.vlgmr.msra.gmra.mxu2 %v13179_v3 }
 0x385   :  { %4412 = vmatpush.msra.mxu0 %v22284_v33  ;;  %v3108_v1 = vadd.f32 %v3107_v55, %v3018_v59 }
 0x387   :  { %3932 = vmatmul.f32.vlgmr.msra.gmra.mxu3 %v13179_v3  ;;  %4416 = vmatpush.msra.mxu0 %v22285_v27  ;;  %v15542_v16 = vadd.f32 %v3197_v21, %v3108_v1  ;;  %v22288_v21 = vand.u32 4294901760, %v15381_v46  ;;  %v22290_v46 = vand.u32 4294901760, %v15412_v17 }
 0x388   :  { %3667 = vmatmul.f32.gmra.mxu0 %v21986_v18  ;;  %v2901_v42 = vpop.f32.mrf.mxu0  ;;  %v3203_v47 = vpop.f32.mrf.mxu3 }
 0x389   :  { %3746 = vmatmul.f32.vlgmr.msra.gmra.mxu1 %v22106_v10  ;;  %4420 = vmatpush.msra.mxu0 %v22286_v7 }
 0x38a   :  { %4496 = vmatpush.msra.mxu1 %v15250_v43  ;;  %v3021_v63 = vpop.f32.mrf.mxu1  ;;  %v3112_v40 = vpop.f32.mrf.mxu2  ;;  %v22289_v43 = vand.u32 4294901760, %v15393_v49  ;;  %v22291_v49 = vand.u32 4294901760, %v15423_v13 }
 0x38b   :  { %4424 = vmatpush.msra.mxu0 %v22287_v38  ;;  %v3022_v9 = vadd.f32 %v3021_v63, %v2893_v36 }
 0x38c   :  { %4498 = vmatpush.msra.mxu1 %v15252_v57  ;;  %3864 = vmatmul.f32.gmra.mxu2 %v13245_v0 }
 0x38d   :  { %4428 = vmatpush.msra.mxu0 %v22288_v21  ;;  %v3113_v55 = vadd.f32 %v3112_v40, %v3022_v9  ;;  %v22297_v9 = vld [vmem:[#allocation33_spill] sm:$0xff]  ;;  %v22298_v21 = vld [vmem:[#allocation31_spill] sm:$0xff] }
 0x38e   :  { %4500 = vmatpush.msra.mxu1 %v15276_v54 }
 0x38f   :  { %3936 = vmatmul.f32.gmra.mxu3 %v13245_v0  ;;  %4432 = vmatpush.msra.mxu0 %v22289_v43  ;;  %v15559_v15 = vadd.f32 %v3203_v47, %v3113_v55 }
 0x390   :  { %4502 = vmatpush.msra.mxu1 %v15285_v8  ;;  %3672 = vmatmul.f32.gmra.mxu0 %v13325_v50  ;;  %v2909_v57 = vpop.f32.mrf.mxu0  ;;  %v3209_v19 = vpop.f32.mrf.mxu3  ;;  %v22292_v8 = vand.u32 4294901760, %v15436_v48 }
 0x391   :  { %3752 = vmatmul.f32.gmra.mxu1 %v21994_v22  ;;  %4436 = vmatpush.msra.mxu0 %v22290_v46 }
 0x392   :  { %4504 = vmatpush.msra.mxu1 %v15300_v39  ;;  %v3025_v54 = vpop.f32.mrf.mxu1  ;;  %v3117_v36 = vpop.f32.mrf.mxu2 }
 0x393   :  { %4440 = vmatpush.msra.mxu0 %v22291_v49  ;;  %v3026_v44 = vadd.f32 %v3025_v54, %v2901_v42  ;;  %v22301_v54 = vld [vmem:[#allocation35_spill] sm:$0xff] }
 0x394   :  { %4506 = vmatpush.msra.mxu1 %v15311_v29  ;;  %3868 = vmatmul.f32.gmra.mxu2 %v13304_v28 }
 0x395   :  { %4444 = vmatpush.msra.mxu0 %v22292_v8  ;;  %v3118_v59 = vadd.f32 %v3117_v36, %v3026_v44 }
 0x396   :  { %4508 = vmatpush.msra.mxu1 %v15343_v58 }
 0x397   :  { %3940 = vmatmul.f32.gmra.mxu3 %v13304_v28  ;;  %v15575_v17 = vadd.f32 %v3209_v19, %v3118_v59  ;;  %v22300_v19 = vld [vmem:[#allocation36_spill] sm:$0xff] }
 0x398   :  { %4510 = vmatpush.msra.mxu1 %v15353_v41  ;;  %3677 = vmatmul.f32.gmra.mxu0 %v13426_v11  ;;  %v2917_v13 = vpop.f32.mrf.mxu0  ;;  %v3215_v39 = vpop.f32.mrf.mxu3  ;;  %v22303_v59 = vld [vmem:[#allocation40_spill] sm:$0xff] }
 0x399   :  { %3758 = vmatmul.f32.gmra.mxu1 %v21997_v30 }
 0x39a   :  { %4512 = vmatpush.msra.mxu1 %v15383_v35  ;;  %v3029_v29 = vpop.f32.mrf.mxu1  ;;  %v3122_v48 = vpop.f32.mrf.mxu2 }
 0x39b   :  { %v3030_v33 = vadd.f32 %v3029_v29, %v2909_v57 }
 0x39c   :  { %4514 = vmatpush.msra.mxu1 %v15395_v26  ;;  %3872 = vmatmul.f32.gmra.mxu2 %v13384_v2 }
 0x39d   :  { %v3123_v58 = vadd.f32 %v3122_v48, %v3030_v33 }
 0x39e   :  { %4516 = vmatpush.msra.mxu1 %v15407_v53 }
 0x39f   :  { %3944 = vmatmul.f32.gmra.mxu3 %v13384_v2  ;;  %v15585_v41 = vadd.f32 %v3215_v39, %v3123_v58 }
 0x3a0   :  { %3682 = vmatmul.f32.gmra.mxu0 %v22120_v25  ;;  %v15588_v1 = vpop.f32.mrf.mxu0  ;;  %v3221_v26 = vpop.f32.mrf.mxu3 }
 0x3a1   :  { %22293 = vst [vmem:[#allocation153_spill] sm:$0xff] %v15585_v41  ;;  %3764 = vmatmul.f32.gmra.mxu1 %v22121_v14  ;;  %v22314_v41 = vld [vmem:[#allocation19_spill] sm:$0xff] }
 0x3a2   :  { %22294 = vst [vmem:[#allocation154_spill] sm:$0xff] %v15588_v1  ;;  %v3033_v35 = vpop.f32.mrf.mxu1  ;;  %v3127_v27 = vpop.f32.mrf.mxu2 }
 0x3a3   :  { %v3034_v42 = vadd.f32 %v3033_v35, %v2917_v13  ;;  %v22304_v13 = vld [vmem:[#allocation38_spill] sm:$0xff]  ;;  %v22306_v35 = vld [vmem:[#allocation44_spill] sm:$0xff] }
 0x3a4   :  { %3876 = vmatmul.f32.gmra.mxu2 %v13483_v12 }
 0x3a5   :  { %v3128_v47 = vadd.f32 %v3127_v27, %v3034_v42  ;;  %v22307_v27 = vld [vmem:[#allocation42_spill] sm:$0xff] }
 0x3a7   :  { %3948 = vmatmul.f32.gmra.mxu3 %v13483_v12  ;;  %v15593_v53 = vadd.f32 %v3221_v26, %v3128_v47 }
 0x3a8   :  { %3687 = vmatmul.f32.gmra.mxu0 %v22130_v37  ;;  %v15604_v38 = vpop.f32.mrf.mxu3 }
 0x3a9   :  { %3770 = vmatmul.f32.gmra.mxu1 %v22132_v4 }
 0x3aa   :  { %v15597_v7 = vpop.f32.mrf.mxu0  ;;  %v15599_v63 = vpop.f32.mrf.mxu1 }
 0x3ab   :  { %22295 = vst [vmem:[#allocation155_spill] sm:$0xff] %v15597_v7  ;;  %v15601_v40 = vpop.f32.mrf.mxu2 }
 0x3ac   :  { %22296 = vst [vmem:[#allocation156_spill] sm:$0xff] %v15599_v63  ;;  %3880 = vmatmul.f32.gmra.mxu2 %v22056_v62 }
 0x3af   :  { %3952 = vmatmul.f32.gmra.mxu3 %v22056_v62 }
 0x3b0   :  { %3692 = vmatmul.f32.gmra.mxu0 %v22297_v9 }
 0x3b1   :  { %3776 = vmatmul.f32.gmra.mxu1 %v22298_v21 }
 0x3b4   :  { %3884 = vmatmul.f32.gmra.mxu2 %v22060_v5  ;;  %v15610_v55 = vpop.f32.mrf.mxu0  ;;  %v15612_v43 = vpop.f32.mrf.mxu1 }
 0x3b5   :  { %22299 = vst [vmem:[#allocation33_spill] sm:$0xff] %v15612_v43  ;;  %v3431_v57 = vpop.f32.mrf.mxu2 }
 0x3b7   :  { %3956 = vmatmul.f32.gmra.mxu3 %v22060_v5 }
 0x3b8   :  { %3697 = vmatmul.f32.gmra.mxu0 %v22300_v19  ;;  %v3583_v46 = vpop.f32.mrf.mxu3 }
 0x3b9   :  { %3782 = vmatmul.f32.gmra.mxu1 %v22301_v54  ;;  %v15617_v36 = vadd.f32 %v3583_v46, %v3431_v57 }
 0x3bb   :  { %22302 = vst [vmem:[#allocation31_spill] sm:$0xff] %v15617_v36 }
 0x3bc   :  { %3888 = vmatmul.f32.gmra.mxu2 %v13638_v23 }
 0x3bd   :  { %v15620_v49 = vpop.f32.mrf.mxu0 }
 0x3be   :  { %v15622_v44 = vpop.f32.mrf.mxu1 }
 0x3bf   :  { %3960 = vmatmul.f32.gmra.mxu3 %v13638_v23  ;;  %v3439_v8 = vpop.f32.mrf.mxu2 }
 0x3c0   :  { %3702 = vmatmul.f32.gmra.mxu0 %v22303_v59 }
 0x3c1   :  { %3788 = vmatmul.f32.gmra.mxu1 %v22304_v13 }
 0x3c2   :  { %v3587_v39 = vpop.f32.mrf.mxu3 }
 0x3c3   :  { %v15627_v29 = vadd.f32 %v3587_v39, %v3439_v8  ;;  %v22311_v8 = vld [vmem:[#allocation47_spill] sm:$0xff]  ;;  %v22312_v39 = vld [vmem:[#allocation46_spill] sm:$0xff] }
 0x3c4   :  { %3892 = vmatmul.f32.gmra.mxu2 %v22212_v61 }
 0x3c5   :  { %22305 = vst [vmem:[#allocation36_spill] sm:$0xff] %v15627_v29  ;;  %v15630_v48 = vpop.f32.mrf.mxu0 }
 0x3c6   :  { %v15632_v33 = vpop.f32.mrf.mxu1 }
 0x3c7   :  { %3964 = vmatmul.f32.gmra.mxu3 %v22212_v61  ;;  %v3447_v58 = vpop.f32.mrf.mxu2 }
 0x3c8   :  { %3707 = vmatmul.f32.gmra.mxu0 %v22306_v35 }
 0x3c9   :  { %3794 = vmatmul.f32.gmra.mxu1 %v22307_v27 }
 0x3ca   :  { %v3591_v42 = vpop.f32.mrf.mxu3 }
 0x3cb   :  { %v15637_v26 = vadd.f32 %v3591_v42, %v3447_v58 }
 0x3cc   :  { %3896 = vmatmul.f32.gmra.mxu2 %v22224_v31 }
 0x3cd   :  { %22308 = vst [vmem:[#allocation35_spill] sm:$0xff] %v15637_v26  ;;  %v15640_v47 = vpop.f32.mrf.mxu0 }
 0x3ce   :  { %22309 = vst [vmem:[#allocation40_spill] sm:$0xff] %v15640_v47  ;;  %v15642_v57 = vpop.f32.mrf.mxu1  ;;  %v22315_v47 = vld [vmem:[#allocation49_spill] sm:$0xff] }
 0x3cf   :  { %22310 = vst [vmem:[#allocation38_spill] sm:$0xff] %v15642_v57  ;;  %3968 = vmatmul.f32.gmra.mxu3 %v22224_v31  ;;  %v3455_v46 = vpop.f32.mrf.mxu2 }
 0x3d0   :  { %3712 = vmatmul.f32.gmra.mxu0 %v22311_v8 }
 0x3d1   :  { %3800 = vmatmul.f32.gmra.mxu1 %v22312_v39 }
 0x3d2   :  { %v3595_v43 = vpop.f32.mrf.mxu3 }
 0x3d3   :  { %v15647_v7 = vadd.f32 %v3595_v43, %v3455_v46 }
 0x3d4   :  { %3900 = vmatmul.f32.gmra.mxu2 %v13732_v24 }
 0x3d5   :  { %v15650_v58 = vpop.f32.mrf.mxu0 }
 0x3d6   :  { %v15652_v42 = vpop.f32.mrf.mxu1 }
 0x3d7   :  { %22313 = vst [vmem:[#allocation44_spill] sm:$0xff] %v15652_v42  ;;  %3972 = vmatmul.f32.gmra.mxu3 %v13732_v24  ;;  %v3463_v36 = vpop.f32.mrf.mxu2  ;;  %v22317_v42 = vld [vmem:[#allocation21_spill] sm:$0xff] }
 0x3d8   :  { %4008 = vmatmul.f32.vlgmr.msrb.gmra.mxu0 %v22314_v41 }
 0x3d9   :  { %3806 = vmatmul.f32.gmra.mxu1 %v22315_v47 }
 0x3da   :  { %v3599_v45 = vpop.f32.mrf.mxu3 }
 0x3db   :  { %v15657_v29 = vadd.f32 %v3599_v45, %v3463_v36 }
 0x3dc   :  { %4248 = vmatmul.f32.vlgmr.msrb.gmra.mxu2 %v22097_v51 }
 0x3dd   :  { %22316 = vst [vmem:[#allocation42_spill] sm:$0xff] %v15657_v29  ;;  %v15660_v43 = vpop.f32.mrf.mxu0  ;;  %v22318_v29 = vld [vmem:[#allocation23_spill] sm:$0xff] }
 0x3de   :  { %v15662_v46 = vpop.f32.mrf.mxu1 }
 0x3df   :  { %4332 = vmatmul.f32.vlgmr.msrb.gmra.mxu3 %v22106_v10  ;;  %v3471_v63 = vpop.f32.mrf.mxu2 }
 0x3e0   :  { %4016 = vmatmul.f32.gmra.mxu0 %v22317_v42 }
 0x3e1   :  { %4164 = vmatmul.f32.vlgmr.msrb.gmra.mxu1 %v13179_v3 }
 0x3e2   :  { %v3603_v57 = vpop.f32.mrf.mxu3 }
 0x3e3   :  { %v15667_v41 = vadd.f32 %v3603_v57, %v3471_v63 }
 0x3e4   :  { %4253 = vmatmul.f32.gmra.mxu2 %v21986_v18 }
 0x3e5   :  { %v15670_v45 = vpop.f32.mrf.mxu0 }
 0x3e6   :  { %v15672_v36 = vpop.f32.mrf.mxu1 }
 0x3e7   :  { %4338 = vmatmul.f32.gmra.mxu3 %v21994_v22  ;;  %v3479_v51 = vpop.f32.mrf.mxu2 }
 0x3e8   :  { %4024 = vmatmul.f32.gmra.mxu0 %v22318_v29 }
 0x3e9   :  { %4168 = vmatmul.f32.gmra.mxu1 %v13245_v0 }
 0x3ea   :  { %v3607_v10 = vpop.f32.mrf.mxu3 }
 0x3eb   :  { %v15677_v42 = vadd.f32 %v3607_v10, %v3479_v51 }
 0x3ec   :  { %4258 = vmatmul.f32.gmra.mxu2 %v13325_v50 }
 0x3ed   :  { %v15680_v63 = vpop.f32.mrf.mxu0 }
 0x3ee   :  { %22319 = vst [vmem:[#allocation47_spill] sm:$0xff] %v15680_v63  ;;  %v15682_v57 = vpop.f32.mrf.mxu1  ;;  %v22326_v63 = vld [vmem:[#allocation37_spill] sm:$0xff] }
 0x3ef   :  { %4344 = vmatmul.f32.gmra.mxu3 %v21997_v30  ;;  %v3487_v18 = vpop.f32.mrf.mxu2 }
 0x3f0   :  { %4032 = vmatmul.f32.gmra.mxu0 %v22185_v34 }
 0x3f1   :  { %4172 = vmatmul.f32.gmra.mxu1 %v13304_v28 }
 0x3f2   :  { %v3611_v22 = vpop.f32.mrf.mxu3 }
 0x3f3   :  { %v15687_v29 = vadd.f32 %v3611_v22, %v3487_v18  ;;  %v22324_v22 = vld [vmem:[#allocation34_spill] sm:$0xff] }
 0x3f4   :  { %4263 = vmatmul.f32.gmra.mxu2 %v13426_v11 }
 0x3f5   :  { %22320 = vst [vmem:[#allocation46_spill] sm:$0xff] %v15687_v29  ;;  %v15690_v51 = vpop.f32.mrf.mxu0 }
 0x3f6   :  { %v15692_v10 = vpop.f32.mrf.mxu1 }
 0x3f7   :  { %22321 = vst [vmem:[#allocation19_spill] sm:$0xff] %v15692_v10  ;;  %4350 = vmatmul.f32.gmra.mxu3 %v22121_v14  ;;  %v15695_v50 = vpop.f32.mrf.mxu2  ;;  %v3580_v14 = vadd.f32 %v15604_v38, %v15601_v40 }
 0x3f8   :  { %22322 = vst [vmem:[#allocation49_spill] sm:$0xff] %v15695_v50  ;;  %4040 = vmatmul.f32.gmra.mxu0 %v22190_v32 }
 0x3f9   :  { %4176 = vmatmul.f32.gmra.mxu1 %v13384_v2 }
 0x3fa   :  { %v15699_v30 = vpop.f32.mrf.mxu3 }
 0x3fb   :  { %22323 = vst [vmem:[#allocation21_spill] sm:$0xff] %v15699_v30 }
 0x3fc   :  { %4268 = vmatmul.f32.gmra.mxu2 %v22120_v25 }
 0x3fd   :  { %v3663_v34 = vpop.f32.mrf.mxu0 }
 0x3fe   :  { %v15702_v18 = vpop.f32.mrf.mxu1  ;;  %v3664_v30 = vadd.f32 %v3663_v34, %v3580_v14 }
 0x3ff   :  { %4356 = vmatmul.f32.gmra.mxu3 %v22132_v4  ;;  %v15705_v11 = vpop.f32.mrf.mxu2 }
 0x400   :  { %4048 = vmatmul.f32.gmra.mxu0 %v22324_v22 }
 0x401   :  { %4180 = vmatmul.f32.gmra.mxu1 %v13483_v12 }
 0x402   :  { %v15711_v32 = vpop.f32.mrf.mxu3 }
 0x404   :  { %4273 = vmatmul.f32.gmra.mxu2 %v22130_v37 }
 0x405   :  { %v15714_v25 = vpop.f32.mrf.mxu0 }
 0x406   :  { %22325 = vst [vmem:[#allocation23_spill] sm:$0xff] %v15714_v25  ;;  %v3747_v50 = vpop.f32.mrf.mxu1 }
 0x407   :  { %v3748_v10 = vadd.f32 %v3747_v50, %v3664_v30  ;;  %4362 = vmatmul.f32.gmra.mxu3 %v22298_v21  ;;  %v3861_v4 = vpop.f32.mrf.mxu2 }
 0x408   :  { %4056 = vmatmul.f32.gmra.mxu0 %v22326_v63 }
 0x409   :  { %v3862_v22 = vadd.f32 %v3861_v4, %v3748_v10  ;;  %4184 = vmatmul.f32.gmra.mxu1 %v22056_v62 }
 0x40a   :  { %v3933_v40 = vpop.f32.mrf.mxu3 }
 0x40b   :  { %v3934_v38 = vadd.f32 %v3933_v40, %v3862_v22 }
 0x40c   :  { %4278 = vmatmul.f32.gmra.mxu2 %v22297_v9 }
 0x40d   :  { %4572 = vrot.lane.b32.xlu1 %v3934_v38, %s12848_s13  ;;  %v15721_v37 = vpop.f32.mrf.mxu0 }
 0x40e   :  { %22327 = vst [vmem:[#allocation34_spill] sm:$0xff] %v15721_v37  ;;  %v15723_v34 = vpop.f32.mrf.mxu1 }
 0x40f   :  { %22328 = vst [vmem:[#allocation37_spill] sm:$0xff] %v15723_v34  ;;  %4368 = vmatmul.f32.gmra.mxu3 %v22301_v54 }
 0x410   :  { %4064 = vmatmul.f32.gmra.mxu0 %v22059_v52 }
 0x411   :  { %4188 = vmatmul.f32.gmra.mxu1 %v22060_v5 }
 0x414   :  { %4283 = vmatmul.f32.gmra.mxu2 %v22300_v19 }
 0x415   :  { %v15729_v21 = vpop.f32.mrf.mxu0 }
 0x416   :  { %22329 = vst [vmem:[#allocation157_spill] sm:$0xff] %v15729_v21  ;;  %v15731_v63 = vpop.f32.mrf.mxu1 }
 0x417   :  { %22330 = vst [vmem:[#allocation158_spill] sm:$0xff] %v15731_v63  ;;  %4374 = vmatmul.f32.gmra.mxu3 %v22304_v13 }
 0x418   :  { %4072 = vmatmul.f32.gmra.mxu0 %v22062_v60 }
 0x419   :  { %4192 = vmatmul.f32.gmra.mxu1 %v13638_v23 }
 0x41c   :  { %4288 = vmatmul.f32.gmra.mxu2 %v22303_v59 }
 0x41d   :  { %v15737_v9 = vpop.f32.mrf.mxu0 }
 0x41e   :  { %v15739_v54 = vpop.f32.mrf.mxu1 }
 0x41f   :  { %22331 = vst [vmem:[#allocation159_spill] sm:$0xff] %v15739_v54  ;;  %4380 = vmatmul.f32.gmra.mxu3 %v22307_v27  ;;  %v15770_v27 = vpop.f32.mrf.mxu2 }
 0x420   :  { %4080 = vmatmul.f32.gmra.mxu0 %v22064_v6  ;;  %22336 = vst [vmem:[#allocation164_spill] sm:$0xff] %v15770_v27 }
 0x421   :  { %4196 = vmatmul.f32.gmra.mxu1 %v22212_v61 }
 0x424   :  { %4293 = vmatmul.f32.gmra.mxu2 %v22306_v35 }
 0x425   :  { %v15745_v52 = vpop.f32.mrf.mxu0 }
 0x426   :  { %22332 = vst [vmem:[#allocation160_spill] sm:$0xff] %v15745_v52  ;;  %v15747_v19 = vpop.f32.mrf.mxu1 }
 0x427   :  { %22333 = vst [vmem:[#allocation161_spill] sm:$0xff] %v15747_v19  ;;  %4386 = vmatmul.f32.gmra.mxu3 %v22312_v39 }
 0x428   :  { %4088 = vmatmul.f32.gmra.mxu0 %v22223_v20 }
 0x429   :  { %4200 = vmatmul.f32.gmra.mxu1 %v22224_v31 }
 0x42c   :  { %4298 = vmatmul.f32.gmra.mxu2 %v22311_v8 }
 0x42d   :  { %v15753_v60 = vpop.f32.mrf.mxu0 }
 0x42e   :  { %v15755_v59 = vpop.f32.mrf.mxu1 }
 0x42f   :  { %22334 = vst [vmem:[#allocation162_spill] sm:$0xff] %v15755_v59  ;;  %4392 = vmatmul.f32.gmra.mxu3 %v22315_v47  ;;  %v15774_v47 = vpop.f32.mrf.mxu3 }
 0x430   :  { %4446 = vmatmul.f32.vlgmr.msra.gmra.mxu0 %v13179_v3  ;;  %22337 = vst [vmem:[#allocation165_spill] sm:$0xff] %v15774_v47 }
 0x431   :  { %4204 = vmatmul.f32.gmra.mxu1 %v13732_v24 }
 0x435   :  { %v15760_v6 = vpop.f32.mrf.mxu0 }
 0x436   :  { %v15762_v13 = vpop.f32.mrf.mxu1 }
 0x437   :  { %v15786_v50 = vpop.f32.mrf.mxu3 }
 0x438   :  { %4450 = vmatmul.f32.gmra.mxu0 %v13245_v0  ;;  %22341 = vst [vmem:[#allocation169_spill] sm:$0xff] %v15786_v50 }
 0x439   :  { %4518 = vmatmul.f32.vlgmr.msra.gmra.mxu1 %v13179_v3  ;;  %v15782_v3 = vpop.f32.mrf.mxu2 }
 0x43a   :  { %22340 = vst [vmem:[#allocation168_spill] sm:$0xff] %v15782_v3 }
 0x43d   :  { %v15766_v20 = vpop.f32.mrf.mxu0 }
 0x43e   :  { %22335 = vst [vmem:[#allocation163_spill] sm:$0xff] %v15766_v20  ;;  %v15768_v35 = vpop.f32.mrf.mxu1 }
 0x43f   :  { %v15796_v22 = vpop.f32.mrf.mxu3 }
 0x440   :  { %4454 = vmatmul.f32.gmra.mxu0 %v13304_v28  ;;  %22344 = vst [vmem:[#allocation172_spill] sm:$0xff] %v15796_v22 }
 0x441   :  { %4522 = vmatmul.f32.gmra.mxu1 %v13245_v0  ;;  %v15792_v0 = vpop.f32.mrf.mxu2 }
 0x442   :  { %22343 = vst [vmem:[#allocation171_spill] sm:$0xff] %v15792_v0 }
 0x445   :  { %v15776_v8 = vpop.f32.mrf.mxu0 }
 0x446   :  { %22338 = vst [vmem:[#allocation166_spill] sm:$0xff] %v15776_v8  ;;  %v15778_v39 = vpop.f32.mrf.mxu1 }
 0x447   :  { %22339 = vst [vmem:[#allocation167_spill] sm:$0xff] %v15778_v39 }
 0x448   :  { %4458 = vmatmul.f32.gmra.mxu0 %v13384_v2 }
 0x449   :  { %4526 = vmatmul.f32.gmra.mxu1 %v13304_v28  ;;  %v15802_v40 = vpop.f32.mrf.mxu2 }
 0x44a   :  { %22346 = vst [vmem:[#allocation174_spill] sm:$0xff] %v15802_v40 }
 0x44d   :  { %v15784_v10 = vpop.f32.mrf.mxu0 }
 0x44e   :  { %v15788_v30 = vpop.f32.mrf.mxu1 }
 0x44f   :  { %22342 = vst [vmem:[#allocation170_spill] sm:$0xff] %v15788_v30 }
 0x450   :  { %4462 = vmatmul.f32.gmra.mxu0 %v13483_v12 }
 0x451   :  { %4530 = vmatmul.f32.gmra.mxu1 %v13384_v2  ;;  %v15806_v2 = vpop.f32.mrf.mxu3  ;;  %v15810_v34 = vpop.f32.mrf.mxu2 }
 0x452   :  { %22347 = vst [vmem:[#allocation175_spill] sm:$0xff] %v15806_v2 }
 0x453   :  { %22349 = vst [vmem:[#allocation177_spill] sm:$0xff] %v15810_v34 }
 0x455   :  { %v4009_v14 = vpop.f32.mrf.mxu0 }
 0x456   :  { %v15794_v4 = vpop.f32.mrf.mxu1 }
 0x458   :  { %4466 = vmatmul.f32.gmra.mxu0 %v22056_v62 }
 0x459   :  { %4534 = vmatmul.f32.gmra.mxu1 %v13483_v12  ;;  %v15814_v12 = vpop.f32.mrf.mxu3 }
 0x45a   :  { %22350 = vst [vmem:[#allocation178_spill] sm:$0xff] %v15814_v12 }
 0x45d   :  { %v15800_v28 = vpop.f32.mrf.mxu0 }
 0x45e   :  { %22345 = vst [vmem:[#allocation173_spill] sm:$0xff] %v15800_v28  ;;  %v4165_v38 = vpop.f32.mrf.mxu1 }
 0x45f   :  { %v4166_v28 = vadd.f32 %v4165_v38, %v4009_v14 }
 0x460   :  { %4470 = vmatmul.f32.gmra.mxu0 %v22060_v5 }
 0x461   :  { %4538 = vmatmul.f32.gmra.mxu1 %v22056_v62  ;;  %v15818_v62 = vpop.f32.mrf.mxu2  ;;  %v15820_v52 = vpop.f32.mrf.mxu3 }
 0x465   :  { %v4025_v47 = vpop.f32.mrf.mxu0 }
 0x466   :  { %v15808_v27 = vpop.f32.mrf.mxu1 }
 0x467   :  { %22348 = vst [vmem:[#allocation176_spill] sm:$0xff] %v15808_v27 }
 0x468   :  { %4474 = vmatmul.f32.gmra.mxu0 %v13638_v23 }
 0x469   :  { %4542 = vmatmul.f32.gmra.mxu1 %v22060_v5  ;;  %v15824_v34 = vpop.f32.mrf.mxu2  ;;  %v15828_v50 = vpop.f32.mrf.mxu3 }
 0x46d   :  { %v4033_v59 = vpop.f32.mrf.mxu0 }
 0x46e   :  { %v4173_v25 = vpop.f32.mrf.mxu1 }
 0x470   :  { %4478 = vmatmul.f32.gmra.mxu0 %v22212_v61 }
 0x471   :  { %4546 = vmatmul.f32.gmra.mxu1 %v13638_v23  ;;  %v15834_v3 = vpop.f32.mrf.mxu2 }
 0x472   :  { %22353 = vst [vmem:[#allocation181_spill] sm:$0xff] %v15834_v3 }
 0x475   :  { %v4041_v30 = vpop.f32.mrf.mxu0 }
 0x476   :  { %v4177_v8 = vpop.f32.mrf.mxu1 }
 0x478   :  { %4482 = vmatmul.f32.gmra.mxu0 %v22224_v31 }
 0x479   :  { %4550 = vmatmul.f32.gmra.mxu1 %v22212_v61  ;;  %v15839_v61 = vpop.f32.mrf.mxu3  ;;  %v15845_v63 = vpop.f32.mrf.mxu2 }
 0x47a   :  { %22355 = vst [vmem:[#allocation183_spill] sm:$0xff] %v15839_v61 }
 0x47b   :  { %22358 = vst [vmem:[#allocation186_spill] sm:$0xff] %v15845_v63 }
 0x47d   :  { %v15826_v5 = vpop.f32.mrf.mxu0 }
 0x47e   :  { %22351 = vst [vmem:[#allocation179_spill] sm:$0xff] %v15826_v5  ;;  %v4181_v12 = vpop.f32.mrf.mxu1 }
 0x480   :  { %4486 = vmatmul.f32.gmra.mxu0 %v13732_v24 }
 0x481   :  { %4554 = vmatmul.f32.gmra.mxu1 %v22224_v31  ;;  %v15847_v0 = vpop.f32.mrf.mxu3 }
 0x482   :  { %22359 = vst [vmem:[#allocation187_spill] sm:$0xff] %v15847_v0 }
 0x485   :  { %v15832_v23 = vpop.f32.mrf.mxu0 }
 0x486   :  { %22352 = vst [vmem:[#allocation180_spill] sm:$0xff] %v15832_v23  ;;  %v15836_v22 = vpop.f32.mrf.mxu1  ;;  %v15853_v23 = vpop.f32.mrf.mxu2 }
 0x487   :  { %22354 = vst [vmem:[#allocation182_spill] sm:$0xff] %v15836_v22 }
 0x489   :  { %4558 = vmatmul.f32.gmra.mxu1 %v13732_v24  ;;  %v15857_v22 = vpop.f32.mrf.mxu3 }
 0x48d   :  { %v15841_v2 = vpop.f32.mrf.mxu0 }
 0x48e   :  { %22356 = vst [vmem:[#allocation184_spill] sm:$0xff] %v15841_v2  ;;  %v15843_v5 = vpop.f32.mrf.mxu1  ;;  %v4249_v61 = vpop.f32.mrf.mxu2 }
 0x48f   :  { %22357 = vst [vmem:[#allocation185_spill] sm:$0xff] %v15843_v5 }
 0x491   :  { %v4333_v63 = vpop.f32.mrf.mxu3 }
 0x495   :  { %v15849_v37 = vpop.f32.mrf.mxu0 }
 0x496   :  { %22360 = vst [vmem:[#allocation188_spill] sm:$0xff] %v15849_v37  ;;  %v15851_v31 = vpop.f32.mrf.mxu1  ;;  %v15865_v3 = vpop.f32.mrf.mxu2 }
 0x497   :  { %22361 = vst [vmem:[#allocation189_spill] sm:$0xff] %v15851_v31  ;;  %v4250_v31 = vadd.f32 %v4249_v61, %v4166_v28  ;;  %v4178_v28 = vadd.f32 %v4177_v8, %v4033_v59 }
 0x498   :  { %22365 = vst [vmem:[#allocation193_spill] sm:$0xff] %v15865_v3 }
 0x499   :  { %v15869_v40 = vpop.f32.mrf.mxu3 }
 0x49a   :  { %22366 = vst [vmem:[#allocation194_spill] sm:$0xff] %v15869_v40 }
 0x49d   :  { %v15855_v27 = vpop.f32.mrf.mxu0 }
 0x49e   :  { %22362 = vst [vmem:[#allocation190_spill] sm:$0xff] %v15855_v27  ;;  %v15859_v24 = vpop.f32.mrf.mxu1  ;;  %v4334_v27 = vadd.f32 %v4333_v63, %v4250_v31  ;;  %v4259_v21 = vpop.f32.mrf.mxu2 }
 0x49f   :  { %22363 = vst [vmem:[#allocation191_spill] sm:$0xff] %v15859_v24 }
 0x4a1   :  { %v4345_v26 = vpop.f32.mrf.mxu3 }
 0x4a5   :  { %v15861_v2 = vpop.f32.mrf.mxu0 }
 0x4a6   :  { %v15863_v5 = vpop.f32.mrf.mxu1  ;;  %v4264_v1 = vpop.f32.mrf.mxu2 }
 0x4a7   :  { %22364 = vst [vmem:[#allocation192_spill] sm:$0xff] %v15863_v5  ;;  %v4174_v5 = vadd.f32 %v4173_v25, %v4025_v47  ;;  %v22369_v25 = vld [vmem:[#allocation22_spill] sm:$0xff]  ;;  %v22370_v47 = vld [vmem:[#allocation76_spill] sm:$0xff] }
 0x4a9   :  { %v4260_v3 = vadd.f32 %v4259_v21, %v4174_v5  ;;  %v4351_v40 = vpop.f32.mrf.mxu3  ;;  %v22371_v21 = vld [vmem:[#allocation78_spill] sm:$0xff] }
 0x4ab   :  { %v4346_v20 = vadd.f32 %v4345_v26, %v4260_v3  ;;  %v22372_v3 = vld [vmem:[#allocation20_spill] sm:$0xff] }
 0x4ad   :  { %v4447_v0 = vpop.f32.mrf.mxu0 }
 0x4ae   :  { %v15867_v37 = vpop.f32.mrf.mxu1  ;;  %v4448_v54 = vadd.f32 %v4447_v0, %v4334_v27  ;;  %v4265_v27 = vadd.f32 %v4264_v1, %v4178_v28  ;;  %v22374_v28 = vld [vmem:[#allocation122_spill] sm:$0xff] }
 0x4b5   :  { %v15871_v39 = vpop.f32.mrf.mxu0 }
 0x4b6   :  { %22367 = vst [vmem:[#allocation195_spill] sm:$0xff] %v15871_v39  ;;  %v4519_v24 = vpop.f32.mrf.mxu1  ;;  %v964_v39 = vadd.f32 %v22370_v47, %v22369_v25  ;;  %v22382_v25 = vld [vmem:[#allocation121_spill] sm:$0xff] }
 0x4b7   :  { %v4520_v19 = vadd.f32 %v4519_v24, %v4448_v54  ;;  %v4352_v54 = vadd.f32 %v4351_v40, %v4265_v27  ;;  %v4182_v24 = vadd.f32 %v4181_v12, %v4041_v30  ;;  %v22373_v40 = vld [vmem:[#allocation26_spill] sm:$0xff] }
 0x4b8   :  { %v1036_v5 = vadd.f32 %v22371_v21, %v964_v39  ;;  %v2144_v30 = vadd.f32 %v22373_v40, %v22372_v3  ;;  %v22376_v39 = vld [vmem:[#allocation51_spill] sm:$0xff]  ;;  %v22383_v21 = vld [vmem:[#allocation41_spill] sm:$0xff]  ;;  %v22388_v40 = vld [vmem:[#allocation16_spill] sm:$0xff] }
 0x4b9   :  { %4574 = vrot.lane.b32.xlu2 %v4520_v19, %s12848_s13  ;;  %v4269_v19 = vpop.f32.mrf.mxu2 }
 0x4ba   :  { %v4270_v26 = vadd.f32 %v4269_v19, %v4182_v24  ;;  %v22380_v24 = vld [vmem:[#allocation60_spill] sm:$0xff]  ;;  %v22381_v19 = vld [vmem:[#allocation123_spill] sm:$0xff] }
 0x4bb   :  { %v2448_v47 = vadd.f32 %v22382_v25, %v22381_v19  ;;  %v22396_v19 = vld [vmem:[#allocation64_spill] sm:$0xff] }
 0x4bd   :  { %v4455_v14 = vpop.f32.mrf.mxu0 }
 0x4be   :  { %v15874_v38 = vpop.f32.mrf.mxu1  ;;  %v4456_v61 = vadd.f32 %v4455_v14, %v4346_v20  ;;  %v4357_v20 = vpop.f32.mrf.mxu3 }
 0x4bf   :  { %22368 = vst [vmem:[#allocation196_spill] sm:$0xff] %v15874_v38  ;;  %v4358_v8 = vadd.f32 %v4357_v20, %v4270_v26 }
 0x4c5   :  { %v4459_v31 = vpop.f32.mrf.mxu0 }
 0x4c6   :  { %v4527_v63 = vpop.f32.mrf.mxu1  ;;  %v4460_v29 = vadd.f32 %v4459_v31, %v4352_v54  ;;  %v22379_v54 = vld [vmem:[#allocation32_spill] sm:$0xff] }
 0x4c7   :  { %v4528_v0 = vadd.f32 %v4527_v63, %v4456_v61  ;;  %v2216_v61 = vadd.f32 %v22374_v28, %v2144_v30  ;;  %v22389_v30 = vld [vmem:[#allocation107_spill] sm:$0xff] }
 0x4c9   :  { %4610 = vrot.lane.b32.xlu1 %v4528_v0, %s12846_s11  ;;  %v22378_v0 = vld [vmem:[#allocation56_spill] sm:$0xff] }
 0x4cd   :  { %v4463_v1 = vpop.f32.mrf.mxu0 }
 0x4ce   :  { %v4531_v38 = vpop.f32.mrf.mxu1  ;;  %v4464_v12 = vadd.f32 %v4463_v1, %v4358_v8  ;;  %v22386_v1 = vld [vmem:[#allocation90_spill] sm:$0xff] }
 0x4cf   :  { %v4532_v59 = vadd.f32 %v4531_v38, %v4460_v29  ;;  %v22375_v29 = vld [vmem:[#allocation65_spill] sm:$0xff]  ;;  %v22377_v38 = vld [vmem:[#allocation55_spill] sm:$0xff]  ;;  %v22387_v8 = vld [vmem:[#allocation110_spill] sm:$0xff] }
 0x4d0   :  { %v650_v27 = vadd.f32 %v22377_v38, %v22376_v39  ;;  %v2132_v3 = vadd.f32 %v22387_v8, %v22386_v1  ;;  %v22393_v38 = vld [vmem:[#allocation111_spill] sm:$0xff]  ;;  %v22401_v1 = vld [vmem:[#allocation92_spill] sm:$0xff]  ;;  %v22402_v8 = vld [vmem:[#allocation113_spill] sm:$0xff] }
 0x4d1   :  { %4740 = vrot.lane.b32.xlu1 %v1036_v5, %s12848_s13  ;;  %4639 = vrot.lane.b32.xlu0 %v4532_v59, %s12847_s12  ;;  %v22384_v5 = vld [vmem:[#allocation52_spill] sm:$0xff] }
 0x4d2   :  { %v734_v31 = vadd.f32 %v22378_v0, %v650_v27  ;;  %v22385_v59 = vld [vmem:[#allocation68_spill] sm:$0xff]  ;;  %v22394_v0 = vld [vmem:[#allocation143_spill] sm:$0xff] }
 0x4d4   :  { %v818_v26 = vadd.f32 %v22384_v5, %v734_v31  ;;  %v22395_v31 = vld [vmem:[#allocation144_spill] sm:$0xff]  ;;  %v15920_v5 = vpop.f32.mrf.mxu2 }
 0x4d6   :  { %v4535_v14 = vpop.f32.mrf.mxu1  ;;  %v932_v20 = vadd.f32 %v22385_v59, %v818_v26  ;;  %v22399_v26 = vld [vmem:[#allocation85_spill] sm:$0xff] }
 0x4d7   :  { %v4536_v63 = vadd.f32 %v4535_v14, %v4464_v12  ;;  %v2128_v12 = vadd.f32 %v22389_v30, %v22388_v40  ;;  %v22390_v14 = vld [vmem:[#allocation15_spill] sm:$0xff]  ;;  %v22400_v59 = vld [vmem:[#allocation101_spill] sm:$0xff]  ;;  %v22403_v40 = vld [vmem:[#allocation118_spill] sm:$0xff] }
 0x4d8   :  { %v2542_v28 = vadd.f32 %v22390_v14, %v2448_v47  ;;  %v22397_v47 = vld [vmem:[#allocation82_spill] sm:$0xff]  ;;  %v22404_v30 = vld [vmem:[#allocation11_spill] sm:$0xff] }
 0x4d9   :  { %4779 = vrot.lane.b32.xlu1 %v2216_v61, %s12846_s11  ;;  %4668 = vrot.lane.b32.xlu2 %v4536_v63, %s12848_s13  ;;  %v22391_v61 = vld [vmem:[#allocation72_spill] sm:$0xff]  ;;  %v2200_v27 = vadd.f32 %v22393_v38, %v2128_v12  ;;  %v2532_v12 = vadd.f32 %v22404_v30, %v22403_v40  ;;  %v22405_v14 = vld [vmem:[#allocation83_spill] sm:$0xff]  ;;  %v15933_v38 = vpop.f32.mrf.mxu3  ;;  %v22417_v40 = vld [vmem:[#allocation89_spill] sm:$0xff] }
 0x4da   :  { %4777 = vrot.lane.b32.xlu0 %v22375_v29, %s12846_s11  ;;  %v1004_v63 = vadd.f32 %v22391_v61, %v932_v20  ;;  %v22392_v29 = vld [vmem:[#allocation114_spill] sm:$0xff]  ;;  %v2120_v20 = vadd.f32 %v22400_v59, %v22399_v26  ;;  %v15940_v59 = vpop.f32.mrf.mxu0 }
 0x4db   :  { %v2204_v39 = vadd.f32 %v22392_v29, %v2132_v3  ;;  %v2136_v3 = vadd.f32 %v22402_v8, %v22401_v1  ;;  %v22408_v29 = vld [vmem:[#allocation50_spill] sm:$0xff]  ;;  %22414 = vst [vmem:[#allocation22_spill] sm:$0xff] %v15940_v59  ;;  %v22416_v8 = vld [vmem:[#allocation93_spill] sm:$0xff] }
 0x4dc   :  { %v15949_v30 = vpop.f32.mrf.mxu2  ;;  %v22438_v59 = vld [vmem:[#allocation141_spill] sm:$0xff] }
 0x4de   :  { %v15944_v1 = vpop.f32.mrf.mxu1 }
 0x4df   :  { %22415 = vst [vmem:[#allocation76_spill] sm:$0xff] %v15944_v1 }
 0x4e1   :  { %4629 = vrot.lane.b32.xlu1 %v22379_v54, %s12847_s12  ;;  %4742 = vrot.lane.b32.xlu2 %v22380_v24, %s12848_s13  ;;  %v2636_v54 = vadd.f32 %v22394_v0, %v2542_v28  ;;  %v22406_v28 = vld [vmem:[#allocation98_spill] sm:$0xff]  ;;  %v15962_v1 = vpop.f32.mrf.mxu3 }
 0x4e2   :  { %4600 = vrot.lane.b32.xlu0 %v22383_v21, %s12846_s11  ;;  %v22398_v21 = vld [vmem:[#allocation45_spill] sm:$0xff]  ;;  %v2116_v61 = vadd.f32 %v22406_v28, %v22405_v14  ;;  %v22419_v14 = vld [vmem:[#allocation95_spill] sm:$0xff] }
 0x4e3   :  { %v2730_v24 = vadd.f32 %v22395_v31, %v2636_v54  ;;  %v22410_v54 = vld [vmem:[#allocation117_spill] sm:$0xff] }
 0x4e4   :  { %v2208_v31 = vadd.f32 %v22410_v54, %v2136_v3  ;;  %v22424_v54 = vld [vmem:[#allocation99_spill] sm:$0xff] }
 0x4e5   :  { %v2802_v25 = vadd.f32 %v22396_v19, %v2730_v24  ;;  %v22411_v24 = vld [vmem:[#allocation13_spill] sm:$0xff] }
 0x4e6   :  { %v2624_v19 = vadd.f32 %v22411_v24, %v2532_v12  ;;  %v22418_v12 = vld [vmem:[#allocation70_spill] sm:$0xff] }
 0x4e7   :  { %v2112_v28 = vadd.f32 %v22419_v14, %v22418_v12  ;;  %v22425_v24 = vld [vmem:[#allocation134_spill] sm:$0xff]  ;;  %v15966_v12 = vpop.f32.mrf.mxu0  ;;  %v22429_v14 = vld [vmem:[#allocation135_spill] sm:$0xff] }
 0x4e9   :  { %4716 = vrot.lane.b32.xlu1 %v2204_v39, %s12847_s12  ;;  %4562 = vrot.lane.b32.xlu2 %v1004_v63, %s12848_s13  ;;  %v22407_v63 = vld [vmem:[#allocation115_spill] sm:$0xff] }
 0x4ea   :  { %4688 = vrot.lane.b32.xlu0 %v2200_v27, %s12846_s11  ;;  %v2527_v39 = vadd.f32 %v22408_v29, %v22407_v63  ;;  %v22409_v27 = vld [vmem:[#allocation105_spill] sm:$0xff]  ;;  %v22421_v63 = vld [vmem:[#allocation128_spill] sm:$0xff] }
 0x4eb   :  { %v2192_v0 = vadd.f32 %v22409_v27, %v2120_v20  ;;  %v2722_v20 = vadd.f32 %v22416_v8, %v2624_v19  ;;  %v22423_v27 = vld [vmem:[#allocation9_spill] sm:$0xff]  ;;  %v22427_v19 = vld [vmem:[#allocation91_spill] sm:$0xff] }
 0x4ed   :  { %v2794_v8 = vadd.f32 %v22427_v19, %v2722_v20  ;;  %v22432_v20 = vld [vmem:[#allocation62_spill] sm:$0xff]  ;;  %v22436_v19 = vld [vmem:[#allocation43_spill] sm:$0xff] }
 0x4f1   :  { %4564 = vrot.lane.b32.xlu1 %v22397_v47, %s12848_s13  ;;  %4658 = vrot.lane.b32.xlu2 %v22398_v21, %s12848_s13  ;;  %v22413_v21 = vld [vmem:[#allocation6_spill] sm:$0xff] }
 0x4f2   :  { %4781 = vrot.lane.b32.xlu0 %v2802_v25, %s12846_s11  ;;  %v22412_v25 = vld [vmem:[#allocation102_spill] sm:$0xff]  ;;  %v2618_v26 = vadd.f32 %v22413_v21, %v2527_v39  ;;  %v22422_v39 = vld [vmem:[#allocation112_spill] sm:$0xff] }
 0x4f3   :  { %v2188_v47 = vadd.f32 %v22412_v25, %v2116_v61  ;;  %v22420_v61 = vld [vmem:[#allocation100_spill] sm:$0xff] }
 0x4f4   :  { %v2718_v3 = vadd.f32 %v22417_v40, %v2618_v26  ;;  %v2502_v29 = vadd.f32 %v22421_v63, %v22420_v61  ;;  %v22428_v26 = vld [vmem:[#allocation88_spill] sm:$0xff]  ;;  %v22430_v61 = vld [vmem:[#allocation14_spill] sm:$0xff] }
 0x4f6   :  { %v2588_v25 = vadd.f32 %v22425_v24, %v2502_v29  ;;  %v2790_v40 = vadd.f32 %v22428_v26, %v2718_v3  ;;  %v15971_v29 = vpop.f32.mrf.mxu1  ;;  %v22433_v3 = vld [vmem:[#allocation106_spill] sm:$0xff]  ;;  %v15977_v24 = vpop.f32.mrf.mxu2  ;;  %v22437_v26 = vld [vmem:[#allocation27_spill] sm:$0xff] }
 0x4f9   :  { %4660 = vrot.lane.b32.xlu1 %v2192_v0, %s12848_s13  ;;  %4744 = vrot.lane.b32.xlu2 %v2208_v31, %s12848_s13  ;;  %v2522_v0 = vadd.f32 %v22423_v27, %v22422_v39  ;;  %v2184_v31 = vadd.f32 %v22424_v54, %v2112_v28  ;;  %v2698_v28 = vadd.f32 %v22429_v14, %v2588_v25  ;;  %v22431_v39 = vld [vmem:[#allocation66_spill] sm:$0xff] }
 0x4fa   :  { %4631 = vrot.lane.b32.xlu0 %v2188_v47, %s12847_s12  ;;  %v22426_v47 = vld [vmem:[#allocation5_spill] sm:$0xff]  ;;  %v2104_v27 = vadd.f32 %v22432_v20, %v22431_v39  ;;  %v22439_v14 = vld [vmem:[#allocation142_spill] sm:$0xff]  ;;  %v15989_v39 = vpop.f32.mrf.mxu0 }
 0x4fb   :  { %v2612_v21 = vadd.f32 %v22426_v47, %v2522_v0  ;;  %v22434_v0 = vld [vmem:[#allocation136_spill] sm:$0xff]  ;;  %v22435_v47 = vld [vmem:[#allocation133_spill] sm:$0xff]  ;;  %v22440_v20 = vld [vmem:[#allocation94_spill] sm:$0xff] }
 0x4fc   :  { %v2512_v54 = vadd.f32 %v22434_v0, %v22433_v3  ;;  %v22443_v0 = vld [vmem:[#allocation132_spill] sm:$0xff] }
 0x4fd   :  { %v2714_v63 = vadd.f32 %v22430_v61, %v2612_v21  ;;  %v15985_v21 = vpop.f32.mrf.mxu3 }
 0x4fe   :  { %v2600_v25 = vadd.f32 %v22438_v59, %v2512_v54  ;;  %v3300_v59 = vadd.f32 %v15650_v58, %v15542_v16  ;;  %v3316_v54 = vadd.f32 %v15690_v51, %v15593_v53  ;;  %v22447_v16 = vld [vmem:[#allocation127_spill] sm:$0xff] }
 0x4ff   :  { %v22448_v58 = vld [vmem:[#allocation139_spill] sm:$0xff] }
 0x500   :  { %v2706_v61 = vadd.f32 %v22439_v14, %v2600_v25  ;;  %v3388_v25 = vadd.f32 %v15702_v18, %v3316_v54  ;;  %v22446_v14 = vld [vmem:[#allocation140_spill] sm:$0xff] }
 0x501   :  { %4746 = vrot.lane.b32.xlu1 %v2794_v8, %s12848_s13  ;;  %4602 = vrot.lane.b32.xlu2 %v2184_v31, %s12846_s11  ;;  %v2770_v31 = vadd.f32 %v22435_v47, %v2698_v28  ;;  %v2786_v8 = vadd.f32 %v22436_v19, %v2714_v63  ;;  %v22441_v28 = vld [vmem:[#allocation30_spill] sm:$0xff]  ;;  %v22442_v63 = vld [vmem:[#allocation103_spill] sm:$0xff]  ;;  %v15999_v47 = vpop.f32.mrf.mxu1 }
 0x502   :  { %4718 = vrot.lane.b32.xlu0 %v2790_v40, %s12847_s12  ;;  %v2176_v40 = vadd.f32 %v22437_v26, %v2104_v27  ;;  %v2492_v3 = vadd.f32 %v22441_v28, %v22440_v20  ;;  %v2507_v27 = vadd.f32 %v22443_v0, %v22442_v63  ;;  %v2778_v20 = vadd.f32 %v22446_v14, %v2706_v61  ;;  %v16006_v28 = vpop.f32.mrf.mxu2  ;;  %v16017_v18 = vpop.f32.mrf.mxu0  ;;  %v22449_v61 = vld [vmem:[#allocation125_spill] sm:$0xff] }
 0x503   :  { %v22450_v0 = vld [vmem:[#allocation137_spill] sm:$0xff] }
 0x509   :  { %4604 = vrot.lane.b32.xlu1 %v2770_v31, %s12846_s11  ;;  %4690 = vrot.lane.b32.xlu2 %v2786_v8, %s12846_s11  ;;  %v22444_v31 = vld [vmem:[#allocation126_spill] sm:$0xff]  ;;  %v16022_v54 = vpop.f32.mrf.mxu1 }
 0x50a   :  { %4566 = vrot.lane.b32.xlu0 %v2176_v40, %s12848_s13  ;;  %v2576_v19 = vadd.f32 %v22444_v31, %v2492_v3  ;;  %v22445_v8 = vld [vmem:[#allocation138_spill] sm:$0xff]  ;;  %v3372_v40 = vadd.f32 %v15662_v46, %v3300_v59  ;;  %v16013_v3 = vpop.f32.mrf.mxu3  ;;  %v3308_v46 = vadd.f32 %v15670_v45, %v15575_v17  ;;  %v3620_v31 = vadd.f32 %v15711_v32, %v15705_v11  ;;  %v16031_v17 = vpop.permute.xlu2 %4627  ;;  %v22451_v45 = vld [vmem:[#allocation151_spill] sm:$0xff] }
 0x50b   :  { %v2594_v26 = vadd.f32 %v22445_v8, %v2507_v27  ;;  %v3288_v8 = vadd.f32 %v15620_v49, %v22451_v45  ;;  %v22452_v32 = vld [vmem:[#allocation150_spill] sm:$0xff] }
 0x50c   :  { %v2690_v53 = vadd.f32 %v22447_v16, %v2576_v19  ;;  %v3380_v59 = vadd.f32 %v15682_v57, %v3308_v46  ;;  %v16028_v19 = vpop.f32.mrf.mxu2  ;;  %v3304_v57 = vadd.f32 %v15660_v43, %v15559_v15  ;;  %v3714_v11 = vadd.f32 %v15784_v10, %v3620_v31  ;;  %v22457_v45 = vld [vmem:[#allocation46_spill] sm:$0xff] }
 0x50d   :  { %v2702_v51 = vadd.f32 %v22448_v58, %v2594_v26  ;;  %v3699_v26 = vadd.f32 %v15760_v6, %v15677_v42  ;;  %v16052_v6 = vpop.f32.mrf.mxu0  ;;  %v3684_v31 = vadd.f32 %v15737_v9, %v15647_v7 }
 0x50e   :  { %v2762_v63 = vadd.f32 %v22449_v61, %v2690_v53  ;;  %v3376_v49 = vadd.f32 %v15672_v36, %v3304_v57  ;;  %v3808_v15 = vadd.f32 %v15794_v4, %v3714_v11  ;;  %v22455_v61 = vld [vmem:[#allocation146_spill] sm:$0xff] }
 0x50f   :  { %v2774_v27 = vadd.f32 %v22450_v0, %v2702_v51  ;;  %v3790_v16 = vadd.f32 %v15768_v35, %v3699_v26  ;;  %v22454_v35 = vld [vmem:[#allocation147_spill] sm:$0xff]  ;;  %v22459_v11 = vld [vmem:[#allocation154_spill] sm:$0xff] }
 0x511   :  { %4692 = vrot.lane.b32.xlu1 %v3372_v40, %s12846_s11  ;;  %4783 = vrot.lane.b32.xlu2 %v3388_v25, %s12846_s11  ;;  %v3284_v40 = vadd.f32 %v15610_v55, %v22452_v32  ;;  %v3694_v25 = vadd.f32 %v15753_v60, %v15667_v41  ;;  %v16056_v55 = vpop.f32.mrf.mxu1  ;;  %v3890_v36 = vadd.f32 %v15824_v34, %v3790_v16 }
 0x512   :  { %4662 = vrot.lane.b32.xlu0 %v2778_v20, %s12848_s13  ;;  %v16044_v14 = vpop.f32.mrf.mxu3  ;;  %v3360_v20 = vadd.f32 %v15632_v33, %v3288_v8  ;;  %v16059_v33 = vpop.permute.xlu1 %4656  ;;  %v4206_v60 = vadd.f32 %v15867_v37, %v15861_v2  ;;  %v22458_v8 = vld [vmem:[#allocation163_spill] sm:$0xff] }
 0x513   :  { %v3356_v43 = vadd.f32 %v15622_v44, %v3284_v40  ;;  %v3784_v42 = vadd.f32 %v15762_v13, %v3694_v25  ;;  %v16061_v41 = vpop.permute.xlu2 %4712  ;;  %v3902_v44 = vadd.f32 %v15853_v23, %v3808_v15  ;;  %v22453_v13 = vld [vmem:[#allocation18_spill] sm:$0xff]  ;;  %v3962_v58 = vadd.f32 %v15828_v50, %v3890_v36  ;;  %v16076_v37 = vpop.permute.xlu0 %4598  ;;  %v22460_v40 = vld [vmem:[#allocation35_spill] sm:$0xff]  ;;  %v22461_v25 = vld [vmem:[#allocation157_spill] sm:$0xff] }
 0x514   :  { %v2994_v10 = vadd.f32 %v22454_v35, %v22453_v13  ;;  %v4299_v53 = vpop.f32.mrf.mxu2  ;;  %v3704_v57 = vadd.f32 %v22458_v8, %v22457_v45  ;;  %v22463_v15 = vld [vmem:[#allocation161_spill] sm:$0xff]  ;;  %v22467_v13 = vld [vmem:[#allocation174_spill] sm:$0xff]  ;;  %v22478_v8 = vld [vmem:[#allocation7_spill] sm:$0xff] }
 0x515   :  { %v3886_v4 = vadd.f32 %v15818_v62, %v3784_v42  ;;  %v3974_v51 = vadd.f32 %v15857_v22, %v3902_v44  ;;  %v4300_v46 = vadd.f32 %v4299_v53, %v4206_v60  ;;  %v4487_v2 = vpop.f32.mrf.mxu0  ;;  %v22456_v22 = vld [vmem:[#allocation145_spill] sm:$0xff]  ;;  %v22464_v42 = vld [vmem:[#allocation167_spill] sm:$0xff]  ;;  %vm4576_vm11 = vcmp.lt.s32.totalorder %v22478_v8, 32 }
 0x516   :  { %v3796_v36 = vadd.f32 %v22464_v42, %v3704_v57  ;;  %v22466_v60 = vld [vmem:[#allocation159_spill] sm:$0xff]  ;;  %v22469_v53 = vld [vmem:[#allocation173_spill] sm:$0xff]  ;;  %v22479_v57 = vld [vmem:[#allocation158_spill] sm:$0xff]  ;;  %vm4612_vm13 = vcmp.lt.s32.totalorder %v22478_v8, 96  ;;  %vm4641_vm14 = vcmp.lt.s32.totalorder %v22478_v8, 64 }
 0x517   :  { %v3958_v34 = vadd.f32 %v15820_v52, %v3886_v4  ;;  %v3292_v52 = vadd.f32 %v15630_v48, %v15522_v56  ;;  %v22465_v56 = vld [vmem:[#allocation156_spill] sm:$0xff] }
 0x519   :  { %4568 = vrot.lane.b32.xlu1 %v2762_v63, %s12848_s13  ;;  %4633 = vrot.lane.b32.xlu2 %v2774_v27, %s12847_s12  ;;  %v3078_v63 = vadd.f32 %v22455_v61, %v2994_v10  ;;  %v22468_v10 = vld [vmem:[#allocation181_spill] sm:$0xff]  ;;  %v22471_v61 = vld [vmem:[#allocation188_spill] sm:$0xff] }
 0x51a   :  { %4748 = vrot.lane.b32.xlu0 %v3380_v59, %s12848_s13  ;;  %v4393_v0 = vpop.f32.mrf.mxu3  ;;  %v16079_v62 = vpop.permute.xlu1 %4686  ;;  %v3894_v4 = vadd.f32 %v22468_v10, %v3796_v36  ;;  %v22484_v36 = vld [vmem:[#allocation63_spill] sm:$0xff] }
 0x51b   :  { %v4394_v50 = vadd.f32 %v4393_v0, %v4300_v46  ;;  %v16081_v23 = vpop.permute.xlu2 %4574  ;;  %v3162_v27 = vadd.f32 %v22456_v22, %v3078_v63  ;;  %v4559_v59 = vpop.f32.mrf.mxu1  ;;  %v22472_v63 = vld [vmem:[#allocation191_spill] sm:$0xff] }
 0x51c   :  { %v16100_v9 = vpop.permute.xlu0 %4684 }
 0x51d   :  { %v4488_v26 = vadd.f32 %v4487_v2, %v4394_v50  ;;  %v3276_v32 = vadd.f32 %v22459_v11, %v3162_v27  ;;  %v22473_v2 = vld [vmem:[#allocation36_spill] sm:$0xff]  ;;  %v22474_v50 = vld [vmem:[#allocation34_spill] sm:$0xff]  ;;  %v22475_v27 = vld [vmem:[#allocation171_spill] sm:$0xff] }
 0x51e   :  { %v3674_v22 = vadd.f32 %v22474_v50, %v22473_v2  ;;  %v22480_v11 = vld [vmem:[#allocation175_spill] sm:$0xff] }
 0x51f   :  { %v4560_v44 = vadd.f32 %v4559_v59, %v4488_v26  ;;  %v3348_v48 = vadd.f32 %v22465_v56, %v3276_v32 }
 0x520   :  { %v3760_v26 = vadd.f32 %v22479_v57, %v3674_v22  ;;  %v22494_v57 = vld [vmem:[#allocation59_spill] sm:$0xff] }
 0x521   :  { %4635 = vrot.lane.b32.xlu1 %v3360_v20, %s12847_s12  ;;  %4720 = vrot.lane.b32.xlu2 %v3376_v49, %s12847_s12  ;;  %v3679_v20 = vadd.f32 %v22461_v25, %v22460_v40  ;;  %v22462_v49 = vld [vmem:[#allocation38_spill] sm:$0xff]  ;;  %v22481_v40 = vld [vmem:[#allocation183_spill] sm:$0xff] }
 0x522   :  { %4606 = vrot.lane.b32.xlu0 %v3356_v43, %s12846_s11  ;;  %v3364_v16 = vadd.f32 %v22462_v49, %v3292_v52  ;;  %v3772_v43 = vadd.f32 %v22463_v15, %v3684_v31  ;;  %v16107_v46 = vpop.permute.xlu1 %4572  ;;  %v22476_v52 = vld [vmem:[#allocation184_spill] sm:$0xff]  ;;  %v22477_v31 = vld [vmem:[#allocation189_spill] sm:$0xff]  ;;  %v3966_v25 = vadd.f32 %v22481_v40, %v3894_v4 }
 0x523   :  { %v3766_v7 = vadd.f32 %v22466_v60, %v3679_v20  ;;  %v4194_v45 = vadd.f32 %v22477_v31, %v22476_v52  ;;  %v22482_v20 = vld [vmem:[#allocation193_spill] sm:$0xff]  ;;  %v22483_v15 = vld [vmem:[#allocation172_spill] sm:$0xff]  ;;  %v22487_v60 = vld [vmem:[#allocation58_spill] sm:$0xff] }
 0x524   :  { %v3878_v35 = vadd.f32 %v22467_v13, %v3772_v43  ;;  %v16132_v13 = vpop.permute.xlu0 %4714  ;;  %v22496_v40 = vld [vmem:[#allocation196_spill] sm:$0xff] }
 0x525   :  { %v3874_v59 = vadd.f32 %v22475_v27, %v3766_v7  ;;  %v4285_v42 = vadd.f32 %v15977_v24, %v4194_v45  ;;  %v22489_v24 = vld [vmem:[#allocation75_spill] sm:$0xff]  ;;  %v4803_v27 = vld [vmem:[%s21479_s3] sm:$0xff] }
 0x526   :  { %v3950_v32 = vadd.f32 %v22480_v11, %v3878_v35  ;;  %v22488_v35 = vld [vmem:[#allocation168_spill] sm:$0xff] }
 0x527   :  { %v3946_v43 = vadd.f32 %v22483_v15, %v3874_v59  ;;  %v3870_v10 = vadd.f32 %v22488_v35, %v3760_v26  ;;  %v4376_v22 = vadd.f32 %v15985_v21, %v4285_v42  ;;  %v22493_v59 = vld [vmem:[#allocation195_spill] sm:$0xff]  ;;  %v22495_v26 = vld [vmem:[#allocation169_spill] sm:$0xff] }
 0x529   :  { %4722 = vrot.lane.b32.xlu1 %v3962_v58, %s12847_s12  ;;  %4785 = vrot.lane.b32.xlu2 %v3974_v51, %s12846_s11  ;;  %v22470_v58 = vld [vmem:[#allocation176_spill] sm:$0xff]  ;;  %v3942_v11 = vadd.f32 %v22495_v26, %v3870_v10  ;;  %v22499_v10 = vld [vmem:[#allocation73_spill] sm:$0xff] }
 0x52a   :  { %4694 = vrot.lane.b32.xlu0 %v3958_v34, %s12846_s11  ;;  %v4170_v51 = vadd.f32 %v22470_v58, %v22469_v53  ;;  %v4198_v34 = vadd.f32 %v22472_v63, %v22471_v61  ;;  %v22490_v53 = vld [vmem:[#allocation194_spill] sm:$0xff]  ;;  %v22492_v61 = vld [vmem:[#allocation185_spill] sm:$0xff] }
 0x52c   :  { %v4255_v49 = vadd.f32 %v22482_v20, %v4170_v51  ;;  %v22491_v51 = vld [vmem:[#allocation180_spill] sm:$0xff] }
 0x52d   :  { %v4190_v63 = vadd.f32 %v22492_v61, %v22491_v51 }
 0x52e   :  { %v4340_v58 = vadd.f32 %v22490_v53, %v4255_v49  ;;  %v4812_v49 = vsel %vm4810_vm12, %v4803_v27, 0 }
 0x52f   :  { %v4280_v21 = vadd.f32 %v15949_v30, %v4190_v63  ;;  %v16171_v30 = vand.u32 4294901760, %v4812_v49 }
 0x530   :  { %v4452_v52 = vadd.f32 %v22493_v59, %v4340_v58 }
 0x531   :  { %4787 = vrot.lane.b32.xlu1 %v4560_v44, %s12846_s11  ;;  %4664 = vrot.lane.b32.xlu2 %v3364_v16, %s12848_s13  ;;  %v4290_v16 = vadd.f32 %v16006_v28, %v4198_v34  ;;  %v22485_v44 = vld [vmem:[#allocation74_spill] sm:$0xff]  ;;  %v4577_v28 = vsel %vm4576_vm11, %v16107_v46, %v16081_v23  ;;  %v16198_v58 = vsub.f32 %v4812_v49, %v16171_v30 }
 0x532   :  { %4570 = vrot.lane.b32.xlu0 %v3348_v48, %s12848_s13  ;;  %v952_v56 = vadd.f32 %v22485_v44, %v22484_v36  ;;  %v22486_v48 = vld [vmem:[#allocation54_spill] sm:$0xff]  ;;  %v22498_v44 = vld [vmem:[#allocation71_spill] sm:$0xff] }
 0x533   :  { %v16111_v0 = vpop.permute.xlu2 %4668  ;;  %v654_v7 = vadd.f32 %v22487_v60, %v22486_v48  ;;  %v4382_v34 = vadd.f32 %v16013_v3, %v4290_v16 }
 0x534   :  { %v1024_v4 = vadd.f32 %v22489_v24, %v952_v56  ;;  %v4676_v24 = vsel %vm4576_vm11, %v16111_v0, %v16059_v33 }
 0x535   :  { %v4480_v31 = vadd.f32 %v16017_v18, %v4382_v34  ;;  %v739_v3 = vadd.f32 %v22494_v57, %v654_v7  ;;  %v4731_v34 = vsel %vm4641_vm14, %v16061_v41, %v16132_v13  ;;  %v22502_v57 = vld [vmem:[#allocation79_spill] sm:$0xff] }
 0x536   :  { %v4584_v45 = vadd.f32 %v4577_v28, %v1024_v4  ;;  %v22500_v4 = vld [vmem:[#allocation48_spill] sm:$0xff] }
 0x537   :  { %v4552_v20 = vadd.f32 %v16022_v54, %v4480_v31 }
 0x539   :  { %4666 = vrot.lane.b32.xlu1 %v3950_v32, %s12848_s13  ;;  %4750 = vrot.lane.b32.xlu2 %v3966_v25, %s12848_s13  ;;  %v4476_v32 = vadd.f32 %v15989_v39, %v4376_v22  ;;  %v4524_v25 = vadd.f32 %v22496_v40, %v4452_v52  ;;  %v22497_v39 = vld [vmem:[#allocation57_spill] sm:$0xff]  ;;  %v16211_v22 = vand.u32 4294901760, %v16198_v58 }
 0x53a   :  { %4637 = vrot.lane.b32.xlu0 %v3946_v43, %s12847_s12  ;;  %v824_v43 = vadd.f32 %v22497_v39, %v739_v3  ;;  %v22503_v40 = vld [vmem:[#allocation81_spill] sm:$0xff] }
 0x53b   :  { %v16145_v2 = vpop.permute.xlu1 %4610  ;;  %v16147_v50 = vpop.permute.xlu2 %4742  ;;  %v4548_v16 = vadd.f32 %v15999_v47, %v4476_v32  ;;  %v4591_v15 = vadd.f32 %v4584_v45, %v4524_v25  ;;  %v4370_v47 = vadd.f32 %v15962_v1, %v4280_v21  ;;  %v22501_v45 = vld [vmem:[#allocation53_spill] sm:$0xff]  ;;  %v4834_v21 = vsub.f32 %v16198_v58, %v16211_v22 }
 0x53c   :  { %v4619_v18 = vsel %vm4612_vm13, %v16145_v2, %v16076_v37  ;;  %v936_v56 = vadd.f32 %v22498_v44, %v824_v43  ;;  %v972_v3 = vadd.f32 %v22502_v57, %v22501_v45  ;;  %v4804_v32 = vld [vmem:[%s21480_s4] sm:$0xff]  ;;  %v22509_v57 = vld [vmem:[#allocation119_spill] sm:$0xff] }
 0x53d   :  { %v4620_v54 = vadd.f32 %v4619_v18, %v4591_v15  ;;  %v4472_v7 = vadd.f32 %v15966_v12, %v4370_v47  ;;  %v16237_v15 = vand.u32 4294901760, %v4834_v21 }
 0x53e   :  { %v1008_v28 = vadd.f32 %v22499_v10, %v936_v56  ;;  %v1044_v25 = vadd.f32 %v22503_v40, %v972_v3 }
 0x53f   :  { %v4544_v12 = vadd.f32 %v15971_v29, %v4472_v7 }
 0x541   :  { %4752 = vrot.lane.b32.xlu1 %v4552_v20, %s12848_s13  ;;  %4608 = vrot.lane.b32.xlu2 %v3942_v11, %s12846_s11  ;;  %v12849_v11 = vmov 0   ;;  %v22504_v20 = vld [vmem:[#allocation17_spill] sm:$0xff] }
 0x542   :  { %4724 = vrot.lane.b32.xlu0 %v4548_v16, %s12847_s12  ;;  %12730 = vset.pattern.permute.xlu1 %v12849_v11 }
 0x543   :  { %v16175_v42 = vpop.permute.xlu1 %4740  ;;  %v16177_v36 = vpop.permute.xlu0 %4639  ;;  %12729 = vset.pattern.permute.xlu0 %v12849_v11  ;;  %12731 = vset.pattern.permute.xlu2 %v12849_v11  ;;  %v22510_v11 = vld [vmem:[#allocation108_spill] sm:$0xff] }
 0x544   :  { %v4648_v48 = vsel %vm4641_vm14, %v16177_v36, %v16031_v17  ;;  %v16184_v60 = vpop.permute.xlu2 %4562  ;;  %v4759_v59 = vsel %vm4576_vm11, %v16175_v42, %v16147_v50 }
 0x545   :  { %v4649_v35 = vadd.f32 %v4648_v48, %v4620_v54  ;;  %v4583_v1 = vsel %vm4576_vm11, %v16081_v23, %v16184_v60  ;;  %v4703_v23 = vsel %vm4612_vm13, %v16100_v9, %v16079_v62 }
 0x546   :  { %v4585_v53 = vadd.f32 %v4583_v1, %v22500_v4 }
 0x547   :  { %v4677_v51 = vadd.f32 %v4676_v24, %v4649_v35 }
 0x548   :  { %v4592_v61 = vadd.f32 %v4585_v53, %v1008_v28 }
 0x549   :  { %v4705_v63 = vadd.f32 %v4703_v23, %v4677_v51  ;;  %4696 = vrot.lane.b32.xlu2 %v4544_v12, %s12846_s11  ;;  %v22505_v23 = vld [vmem:[#allocation61_spill] sm:$0xff] }
 0x54a   :  { %4807 = vperm.xlu0 %12729, %v4804_v32  }
 0x54b   :  { %v16213_v27 = vpop.permute.xlu1 %4779  ;;  %v4733_v29 = vadd.f32 %v4731_v34, %v4705_v63 }
 0x54c   :  { %v16219_v52 = vpop.permute.xlu0 %4777  ;;  %v16221_v31 = vpop.permute.xlu2 %4658 }
 0x54d   :  { %v4761_v26 = vadd.f32 %v4759_v59, %v4733_v29  ;;  %v4793_v16 = vsel %vm4612_vm13, %v16219_v52, %v16213_v27  ;;  %v4675_v28 = vsel %vm4576_vm11, %v16059_v33, %v16221_v31  ;;  %v22507_v29 = vld [vmem:[#allocation87_spill] sm:$0xff]  ;;  %v22508_v59 = vld [vmem:[#allocation104_spill] sm:$0xff] }
 0x54f   :  { %v4768_v49 = vadd.f32 %v4761_v26, %v22504_v20 }
 0x551   :  { %v4796_v18 = vadd.f32 %v4793_v16, %v4768_v49  ;;  %4775 = vrot.lane.b32.xlu2 %v1044_v25, %s12846_s11 }
 0x553   :  { %v4829_v39 = vand.u32 4294901760, %v4796_v18  ;;  %v4630_v43 = vpop.permute.xlu1 %4629 }
 0x554   :  { %v4601_v47 = vpop.permute.xlu0 %4600  ;;  %v16239_v54 = vpop.permute.xlu2 %4744  ;;  %v4647_v7 = vsel %vm4641_vm14, %v16031_v17, %v4630_v43 }
 0x555   :  { %v4856_v44 = vsub.f32 %v4796_v18, %v4829_v39  ;;  %v4618_v56 = vsel %vm4612_vm13, %v16076_v37, %v4601_v47  ;;  %4830 = vmatpush.msra.mxu2 %v4829_v39  ;;  %v4758_v45 = vsel %vm4576_vm11, %v16147_v50, %v16239_v54  ;;  %v22511_v18 = vld [vmem:[#allocation28_spill] sm:$0xff] }
 0x556   :  { %v4621_v48 = vadd.f32 %v4618_v56, %v4592_v61  ;;  %4836 = vmatmul.f32.vlgmr.msra.gmra.mxu2 %v16237_v15  ;;  %v22506_v61 = vld [vmem:[#allocation116_spill] sm:$0xff] }
 0x557   :  { %4883 = vmatpush.msrb.mxu2 %v4856_v44  ;;  %v4857_v35 = vand.u32 4294901760, %v4856_v44  ;;  %v2140_v63 = vadd.f32 %v22506_v61, %v22505_v23 }
 0x558   :  { %v4650_v1 = vadd.f32 %v4647_v7, %v4621_v48 }
 0x559   :  { %4932 = vmatpush.msra.mxu2 %v4857_v35  ;;  %v4858_v10 = vsub.f32 %v4856_v44, %v4857_v35  ;;  %v2212_v3 = vadd.f32 %v22509_v57, %v2140_v63 }
 0x55a   :  { %v4678_v53 = vadd.f32 %v4675_v28, %v4650_v1  ;;  %v22512_v28 = vld [vmem:[#allocation120_spill] sm:$0xff] }
 0x55b   :  { %v16252_v24 = vpop.permute.xlu1 %4716  ;;  %v4859_v37 = vand.u32 4294901760, %v4858_v10 }
 0x55c   :  { %v4689_v4 = vpop.permute.xlu0 %4688  ;;  %v16254_v12 = vpop.permute.xlu2 %4602  ;;  %v4730_v33 = vsel %vm4641_vm14, %v16132_v13, %v16252_v24 }
 0x55d   :  { %v4702_v17 = vsel %vm4612_vm13, %v16079_v62, %v4689_v4  ;;  %4860 = vmatpush.msra.mxu3 %v4859_v37  ;;  %v2124_v62 = vadd.f32 %v22508_v59, %v22507_v29  ;;  %v22513_v37 = vld [vmem:[#allocation10_spill] sm:$0xff] }
 0x55e   :  { %v4706_v51 = vadd.f32 %v4702_v17, %v4678_v53  ;;  %4862 = vmatmul.f32.vlgmr.msra.gmra.mxu3 %v16171_v30  ;;  %4886 = vmatmul.f32.vlgmr.msrb.gmra.mxu2 %v16198_v58  ;;  %v2537_v53 = vadd.f32 %v22513_v37, %v22512_v28  ;;  %v22523_v28 = vld [vmem:[#allocation84_spill] sm:$0xff] }
 0x55f   :  { %4906 = vmatpush.msrb.mxu3 %v4829_v39  ;;  %v2196_v32 = vadd.f32 %v22510_v11, %v2124_v62 }
 0x560   :  { %v4734_v34 = vadd.f32 %v4730_v33, %v4706_v51  ;;  %v22514_v33 = vld [vmem:[#allocation12_spill] sm:$0xff] }
 0x561   :  { %4954 = vmatpush.msra.mxu3 %v4829_v39  ;;  %v2630_v23 = vadd.f32 %v22514_v33, %v2537_v53 }
 0x562   :  { %v4762_v26 = vadd.f32 %v4758_v45, %v4734_v34  ;;  %v22516_v34 = vld [vmem:[#allocation39_spill] sm:$0xff]  ;;  %v22517_v45 = vld [vmem:[#allocation8_spill] sm:$0xff] }
 0x563   :  { %v4565_v13 = vpop.permute.xlu1 %4564 }
 0x564   :  { %v4582_v21 = vsel %vm4576_vm11, %v16184_v60, %v4565_v13  ;;  %v4782_v40 = vpop.permute.xlu0 %4781  ;;  %v4769_v25 = vadd.f32 %v4762_v26, %v2212_v3  ;;  %v16278_v20 = vpop.permute.xlu2 %4690  ;;  %v4617_v60 = vsel %vm4612_vm13, %v4601_v47, %v16254_v12  ;;  %v22518_v3 = vld [vmem:[#allocation25_spill] sm:$0xff] }
 0x565   :  { %v4586_v49 = vadd.f32 %v4582_v21, %v2196_v32  ;;  %v4792_v16 = vsel %vm4612_vm13, %v16213_v27, %v4782_v40  ;;  %v4701_v59 = vsel %vm4612_vm13, %v4689_v4, %v16278_v20 }
 0x566   :  { %v4797_v50 = vadd.f32 %v4792_v16, %v4769_v25  ;;  %4910 = vmatmul.f32.vlgmr.msrb.gmra.mxu3 %v16211_v22  ;;  %4934 = vmatmul.f32.vlgmr.msra.gmra.mxu2 %v16171_v30 }
 0x567   :  { %v4593_v39 = vadd.f32 %v4586_v49, %v22511_v18  ;;  %v22519_v49 = vld [vmem:[#allocation86_spill] sm:$0xff] }
 0x568   :  { %v4975_v44 = vand.u32 4294901760, %v4797_v50 }
 0x569   :  { %v4622_v35 = vadd.f32 %v4617_v60, %v4593_v39 }
 0x56a   :  { %v5002_v56 = vsub.f32 %v4797_v50, %v4975_v44  ;;  %4976 = vmatpush.msrb.mxu2 %v4975_v44  ;;  %v22520_v50 = vld [vmem:[#allocation24_spill] sm:$0xff] }
 0x56b   :  { %v16289_v48 = vpop.permute.xlu1 %4660 }
 0x56c   :  { %v4632_v7 = vpop.permute.xlu0 %4631  ;;  %5029 = vmatpush.msra.mxu2 %v5002_v56  ;;  %v16291_v27 = vpop.permute.xlu2 %4783  ;;  %v5003_v1 = vand.u32 4294901760, %v5002_v56  ;;  %v4674_v51 = vsel %vm4576_vm11, %v16221_v31, %v16289_v48  ;;  %v2726_v31 = vadd.f32 %v22518_v3, %v2630_v23 }
 0x56d   :  { %v4646_v10 = vsel %vm4641_vm14, %v4630_v43, %v4632_v7  ;;  %v22515_v43 = vld [vmem:[#allocation109_spill] sm:$0xff] }
 0x56e   :  { %v4651_v17 = vadd.f32 %v4646_v10, %v4622_v35  ;;  %4956 = vmatmul.f32.vlgmr.msra.gmra.mxu3 %v16171_v30  ;;  %4982 = vmatmul.f32.vlgmr.msrb.gmra.mxu2 %v16237_v15  ;;  %v5004_v47 = vsub.f32 %v5002_v56, %v5003_v1  ;;  %v2517_v29 = vadd.f32 %v22516_v34, %v22515_v43  ;;  %v22521_v35 = vld [vmem:[#allocation69_spill] sm:$0xff] }
 0x56f   :  { %5078 = vmatpush.msrb.mxu2 %v5003_v1  ;;  %v2798_v18 = vadd.f32 %v22520_v50, %v2726_v31  ;;  %v22522_v1 = vld [vmem:[#allocation29_spill] sm:$0xff] }
 0x570   :  { %v4679_v61 = vadd.f32 %v4674_v51, %v4651_v17  ;;  %v5005_v63 = vand.u32 4294901760, %v5004_v47  ;;  %v2606_v57 = vadd.f32 %v22517_v45, %v2517_v29  ;;  %v2108_v10 = vadd.f32 %v22522_v1, %v22521_v35  ;;  %v22524_v47 = vld [vmem:[#allocation96_spill] sm:$0xff] }
 0x571   :  { %v22526_v29 = vld [vmem:[#allocation124_spill] sm:$0xff] }
 0x572   :  { %5006 = vmatpush.msrb.mxu3 %v5005_v63  ;;  %v4707_v11 = vadd.f32 %v4701_v59, %v4679_v61  ;;  %v2710_v16 = vadd.f32 %v22519_v49, %v2606_v57  ;;  %v2180_v51 = vadd.f32 %v22524_v47, %v2108_v10  ;;  %v22531_v35 = vld [vmem:[#allocation44_spill] sm:$0xff] }
 0x573   :  { %v16309_v62 = vpop.permute.xlu1 %4746 }
 0x574   :  { %5052 = vmatpush.msra.mxu3 %v4975_v44  ;;  %v4719_v26 = vpop.permute.xlu0 %4718  ;;  %v16313_v32 = vpop.permute.xlu2 %4633  ;;  %v4757_v4 = vsel %vm4576_vm11, %v16239_v54, %v16309_v62  ;;  %v2782_v37 = vadd.f32 %v22523_v28, %v2710_v16 }
 0x575   :  { %v4729_v21 = vsel %vm4641_vm14, %v16252_v24, %v4719_v26  ;;  %v4791_v24 = vsel %vm4612_vm13, %v4782_v40, %v16291_v27  ;;  %v4645_v45 = vsel %vm4641_vm14, %v4632_v7, %v16313_v32 }
 0x576   :  { %v4735_v25 = vadd.f32 %v4729_v21, %v4707_v11  ;;  %5008 = vmatmul.f32.vlgmr.msrb.gmra.mxu3 %v16171_v30  ;;  %5032 = vmatmul.f32.vlgmr.msra.gmra.mxu2 %v16198_v58  ;;  %v22527_v21 = vld [vmem:[#allocation130_spill] sm:$0xff] }
 0x577   :  { %5100 = vmatpush.msrb.mxu3 %v4975_v44 }
 0x578   :  { %v4763_v39 = vadd.f32 %v4757_v4, %v4735_v25 }
 0x57a   :  { %v4770_v56 = vadd.f32 %v4763_v39, %v2798_v18  ;;  %v22528_v18 = vld [vmem:[#allocation131_spill] sm:$0xff] }
 0x57b   :  { %v16329_v60 = vpop.permute.xlu1 %4604 }
 0x57c   :  { %v4567_v53 = vpop.permute.xlu0 %4566  ;;  %v16334_v54 = vpop.permute.xlu2 %4720  ;;  %v4798_v44 = vadd.f32 %v4791_v24, %v4770_v56  ;;  %v4616_v63 = vsel %vm4612_vm13, %v16254_v12, %v16329_v60  ;;  %v22529_v56 = vld [vmem:[#allocation152_spill] sm:$0xff] }
 0x57d   :  { %v4581_v17 = vsel %vm4576_vm11, %v4565_v13, %v4567_v53  ;;  %v22525_v13 = vld [vmem:[#allocation97_spill] sm:$0xff]  ;;  %v4728_v10 = vsel %vm4641_vm14, %v4719_v26, %v16334_v54 }
 0x57e   :  { %v4587_v33 = vadd.f32 %v4581_v17, %v2782_v37  ;;  %5056 = vmatmul.f32.vlgmr.msra.gmra.mxu3 %v16211_v22  ;;  %5080 = vmatmul.f32.vlgmr.msrb.gmra.mxu2 %v16171_v30  ;;  %v5121_v40 = vand.u32 4294901760, %v4798_v44  ;;  %v2497_v59 = vadd.f32 %v22526_v29, %v22525_v13  ;;  %v22532_v37 = vld [vmem:[#allocation153_spill] sm:$0xff] }
 0x580   :  { %v4594_v23 = vadd.f32 %v4587_v33, %v2180_v51  ;;  %5122 = vmatpush.msra.mxu2 %v5121_v40  ;;  %v5148_v61 = vsub.f32 %v4798_v44, %v5121_v40  ;;  %v2582_v25 = vadd.f32 %v22527_v21, %v2497_v59  ;;  %v22533_v44 = vld [vmem:[#allocation47_spill] sm:$0xff]  ;;  %v22534_v33 = vld [vmem:[#allocation129_spill] sm:$0xff] }
 0x582   :  { %5175 = vmatpush.msrb.mxu2 %v5148_v61  ;;  %v4623_v43 = vadd.f32 %v4616_v63, %v4594_v23  ;;  %v5149_v34 = vand.u32 4294901760, %v5148_v61  ;;  %v2694_v39 = vadd.f32 %v22528_v18, %v2582_v25  ;;  %v22539_v18 = vld [vmem:[#allocation179_spill] sm:$0xff] }
 0x583   :  { %v16350_v57 = vpop.permute.xlu1 %4692 }
 0x584   :  { %v4663_v3 = vpop.permute.xlu0 %4662  ;;  %v4652_v31 = vadd.f32 %v4645_v45, %v4623_v43  ;;  %v5150_v11 = vsub.f32 %v5148_v61, %v5149_v34  ;;  %v16356_v49 = vpop.permute.xlu2 %4785  ;;  %v4700_v7 = vsel %vm4612_vm13, %v16278_v20, %v16350_v57  ;;  %v3312_v20 = vadd.f32 %v22533_v44, %v22532_v37  ;;  %v22535_v43 = vld [vmem:[#allocation19_spill] sm:$0xff] }
 0x585   :  { %v4673_v12 = vsel %vm4576_vm11, %v16289_v48, %v4663_v3  ;;  %v22530_v48 = vld [vmem:[#allocation40_spill] sm:$0xff]  ;;  %v2766_v23 = vadd.f32 %v22534_v33, %v2694_v39  ;;  %v4790_v59 = vsel %vm4612_vm13, %v16291_v27, %v16356_v49  ;;  %v22540_v39 = vld [vmem:[#allocation182_spill] sm:$0xff] }
 0x586   :  { %v4680_v4 = vadd.f32 %v4673_v12, %v4652_v31  ;;  %5102 = vmatmul.f32.vlgmr.msrb.gmra.mxu3 %v16171_v30  ;;  %5128 = vmatmul.f32.vlgmr.msra.gmra.mxu2 %v16237_v15  ;;  %v5151_v16 = vand.u32 4294901760, %v5150_v11  ;;  %v3296_v24 = vadd.f32 %v22530_v48, %v22529_v56  ;;  %v3384_v26 = vadd.f32 %v22535_v43, %v3312_v20  ;;  %v22537_v11 = vld [vmem:[#allocation21_spill] sm:$0xff]  ;;  %v22544_v20 = vld [vmem:[#allocation31_spill] sm:$0xff] }
 0x587   :  { %5224 = vmatpush.msra.mxu2 %v5149_v34  ;;  %v4186_v56 = vadd.f32 %v22540_v39, %v22539_v18  ;;  %v22552_v18 = vld [vmem:[#allocation164_spill] sm:$0xff] }
 0x588   :  { %v4708_v50 = vadd.f32 %v4700_v7, %v4680_v4  ;;  %5152 = vmatpush.msra.mxu3 %v5151_v16  ;;  %v3368_v1 = vadd.f32 %v22531_v35, %v3296_v24  ;;  %v22538_v7 = vld [vmem:[#allocation166_spill] sm:$0xff]  ;;  %v22542_v35 = vld [vmem:[#allocation160_spill] sm:$0xff] }
 0x589   :  { %v22541_v24 = vld [vmem:[#allocation42_spill] sm:$0xff]  ;;  %v4275_v43 = vadd.f32 %v15920_v5, %v4186_v56 }
 0x58a   :  { %5198 = vmatpush.msrb.mxu3 %v5121_v40  ;;  %v4736_v51 = vadd.f32 %v4728_v10, %v4708_v50  ;;  %v22543_v10 = vld [vmem:[#allocation170_spill] sm:$0xff] }
 0x58b   :  { %v16371_v28 = vpop.permute.xlu1 %4568 }
 0x58c   :  { %v4580_v17 = vsel %vm4576_vm11, %v4567_v53, %v16371_v28  ;;  %v4749_v47 = vpop.permute.xlu0 %4748  ;;  %v16385_v53 = vpop.permute.xlu2 %4664 }
 0x58d   :  { %v4588_v61 = vadd.f32 %v4580_v17, %v3368_v1  ;;  %v4756_v63 = vsel %vm4576_vm11, %v16309_v62, %v4749_v47  ;;  %v22536_v62 = vld [vmem:[#allocation49_spill] sm:$0xff]  ;;  %v3689_v1 = vadd.f32 %v22542_v35, %v22541_v24  ;;  %v22545_v17 = vld [vmem:[#allocation23_spill] sm:$0xff]  ;;  %v4672_v33 = vsel %vm4576_vm11, %v4663_v3, %v16385_v53  ;;  %v22548_v3 = vld [vmem:[#allocation186_spill] sm:$0xff] }
 0x58e   :  { %v4764_v34 = vadd.f32 %v4756_v63, %v4736_v51  ;;  %5154 = vmatmul.f32.vlgmr.msra.gmra.mxu3 %v16171_v30  ;;  %5178 = vmatmul.f32.vlgmr.msrb.gmra.mxu2 %v16198_v58  ;;  %v3616_v21 = vadd.f32 %v22537_v11, %v22536_v62  ;;  %v3669_v51 = vadd.f32 %v22545_v17, %v22544_v20  ;;  %v22555_v35 = vld [vmem:[#allocation155_spill] sm:$0xff] }
 0x58f   :  { %5246 = vmatpush.msra.mxu3 %v5121_v40  ;;  %v4595_v13 = vadd.f32 %v4588_v61, %v2766_v23  ;;  %v22546_v61 = vld [vmem:[#allocation162_spill] sm:$0xff] }
 0x590   :  { %v4771_v29 = vadd.f32 %v4764_v34, %v3384_v26  ;;  %v3709_v50 = vadd.f32 %v22538_v7, %v3616_v21  ;;  %v3778_v63 = vadd.f32 %v22546_v61, %v3689_v1  ;;  %v22549_v21 = vld [vmem:[#allocation177_spill] sm:$0xff] }
 0x592   :  { %v4799_v45 = vadd.f32 %v4790_v59, %v4771_v29  ;;  %v3802_v37 = vadd.f32 %v22543_v10, %v3709_v50  ;;  %v22547_v59 = vld [vmem:[#allocation37_spill] sm:$0xff] }
 0x593   :  { %v16391_v31 = vpop.permute.xlu1 %4635 }
 0x594   :  { %v16395_v25 = vpop.permute.xlu0 %4606  ;;  %v5267_v12 = vand.u32 4294901760, %v4799_v45  ;;  %v4644_v27 = vsel %vm4641_vm14, %v16313_v32, %v16391_v31  ;;  %v16414_v32 = vpop.permute.xlu2 %4750  ;;  %v3898_v62 = vadd.f32 %v22548_v3, %v3802_v37  ;;  %v22557_v37 = vld [vmem:[#allocation76_spill] sm:$0xff] }
 0x595   :  { %v4615_v40 = vsel %vm4612_vm13, %v16329_v60, %v16395_v25  ;;  %v4755_v50 = vsel %vm4576_vm11, %v4749_v47, %v16414_v32 }
 0x596   :  { %v4624_v4 = vadd.f32 %v4615_v40, %v4595_v13  ;;  %5268 = vmatpush.msrb.mxu2 %v5267_v12  ;;  %5392 = vmatpush.msrb.mxu1 %v5267_v12  ;;  %v5294_v16 = vsub.f32 %v4799_v45, %v5267_v12  ;;  %v3754_v45 = vadd.f32 %v22547_v59, %v3669_v51 }
 0x597   :  { %5202 = vmatmul.f32.vlgmr.msrb.gmra.mxu3 %v16211_v22  ;;  %5226 = vmatmul.f32.vlgmr.msra.gmra.mxu2 %v16171_v30  ;;  %v3882_v40 = vadd.f32 %v22549_v21, %v3778_v63  ;;  %v22560_v21 = vld [vmem:[#allocation190_spill] sm:$0xff] }
 0x598   :  { %v4653_v48 = vadd.f32 %v4644_v27, %v4624_v4  ;;  %5321 = vmatpush.msra.mxu2 %v5294_v16  ;;  %v5295_v60 = vand.u32 4294901760, %v5294_v16  ;;  %5394 = vmatmul.f32.vlgmr.msrb.gmra.mxu1 %v16171_v30  ;;  %v4364_v4 = vadd.f32 %v15933_v38, %v4275_v43  ;;  %v22551_v27 = vld [vmem:[#allocation148_spill] sm:$0xff]  ;;  %v3866_v39 = vadd.f32 %v22552_v18, %v3754_v45  ;;  %v22556_v38 = vld [vmem:[#allocation178_spill] sm:$0xff] }
 0x59a   :  { %5370 = vmatpush.msrb.mxu0 %v5295_v60  ;;  %v5296_v44 = vsub.f32 %v5294_v16, %v5295_v60  ;;  %v4681_v34 = vadd.f32 %v4672_v33, %v4653_v48  ;;  %v22550_v16 = vld [vmem:[#allocation149_spill] sm:$0xff]  ;;  %v22554_v48 = vld [vmem:[#allocation22_spill] sm:$0xff] }
 0x59b   :  { %v16421_v23 = vpop.permute.xlu1 %4722  ;;  %5372 = vmatmul.f32.vlgmr.msrb.gmra.mxu0 %v16171_v30  ;;  %v3168_v7 = vadd.f32 %v22551_v27, %v22550_v16  ;;  %v4468_v60 = vadd.f32 %v22554_v48, %v4364_v4  ;;  %v22558_v33 = vld [vmem:[#allocation33_spill] sm:$0xff] }
 0x59c   :  { %v16426_v26 = vpop.permute.xlu0 %4694  ;;  %v5297_v13 = vand.u32 4294901760, %v5296_v44  ;;  %v4727_v5 = vsel %vm4641_vm14, %v16334_v54, %v16421_v23  ;;  %v22553_v54 = vld [vmem:[#allocation187_spill] sm:$0xff]  ;;  %v4609_v20 = vpop.permute.xlu2 %4608 }
 0x59d   :  { %v4699_v29 = vsel %vm4612_vm13, %v16350_v57, %v16426_v26  ;;  %v3970_v56 = vadd.f32 %v22553_v54, %v3898_v62  ;;  %v3280_v1 = vadd.f32 %v22555_v35, %v3168_v7  ;;  %v4540_v44 = vadd.f32 %v22557_v37, %v4468_v60 }
 0x59e   :  { %v4709_v11 = vadd.f32 %v4699_v29, %v4681_v34  ;;  %5298 = vmatpush.msrb.mxu3 %v5297_v13  ;;  %v22559_v34 = vld [vmem:[#allocation165_spill] sm:$0xff] }
 0x59f   :  { %5248 = vmatmul.f32.vlgmr.msra.gmra.mxu3 %v16171_v30  ;;  %5274 = vmatmul.f32.vlgmr.msrb.gmra.mxu2 %v16237_v15  ;;  %v3352_v61 = vadd.f32 %v22558_v33, %v3280_v1  ;;  %v3938_v13 = vadd.f32 %v22559_v34, %v3866_v39 }
 0x5a0   :  { %v4737_v57 = vadd.f32 %v4727_v5, %v4709_v11  ;;  %5344 = vmatpush.msra.mxu3 %v5267_v12  ;;  %v3954_v12 = vadd.f32 %v22556_v38, %v3882_v40  ;;  %v22561_v40 = vld [vmem:[#allocation192_spill] sm:$0xff] }
 0x5a1   :  { %v4202_v4 = vadd.f32 %v22561_v40, %v22560_v21 }
 0x5a2   :  { %v4765_v24 = vadd.f32 %v4755_v50, %v4737_v57 }
 0x5a3   :  { %v16451_v10 = vpop.permute.xlu1 %4787 }
 0x5a4   :  { %v4772_v17 = vadd.f32 %v4765_v24, %v3970_v56  ;;  %v4789_v47 = vsel %vm4612_vm13, %v16356_v49, %v16451_v10  ;;  %v4571_v51 = vpop.permute.xlu0 %4570 }
 0x5a5   :  { %v4578_v63 = vsel %vm4576_vm11, %v4571_v51, %v16107_v46  ;;  %v4579_v43 = vsel %vm4576_vm11, %v16371_v28, %v4571_v51  ;;  %v4613_v46 = vsel %vm4612_vm13, %v4609_v20, %v16145_v2  ;;  %v4614_v28 = vsel %vm4612_vm13, %v16395_v25, %v4609_v20  ;;  %v4697_v25 = vpop.permute.xlu2 %4696  ;;  %v22563_v20 = vld [vmem:[#allocation77_spill] sm:$0xff] }
 0x5a6   :  { %v4800_v29 = vadd.f32 %v4789_v47, %v4772_v17  ;;  %v4589_v59 = vadd.f32 %v4579_v43, %v3954_v12  ;;  %v4590_v45 = vadd.f32 %v4578_v63, %v4540_v44  ;;  %v4698_v35 = vsel %vm4612_vm13, %v16426_v26, %v4697_v25  ;;  %v22562_v26 = vld [vmem:[#allocation67_spill] sm:$0xff] }
 0x5a7   :  { %5300 = vmatmul.f32.vlgmr.msrb.gmra.mxu3 %v16171_v30  ;;  %5324 = vmatmul.f32.vlgmr.msra.gmra.mxu2 %v16198_v58  ;;  %v968_v17 = vadd.f32 %v22563_v20, %v22562_v26 }
 0x5a8   :  { %v5413_v49 = vand.u32 4294901760, %v4800_v29  ;;  %v4596_v3 = vadd.f32 %v4589_v59, %v3352_v61  ;;  %v4597_v62 = vadd.f32 %v4590_v45, %v3938_v13 }
 0x5aa   :  { %v5440_v11 = vsub.f32 %v4800_v29, %v5413_v49  ;;  %5414 = vmatpush.msrb.mxu2 %v5413_v49  ;;  %5490 = vmatpush.msra.mxu1 %v5413_v49  ;;  %v4625_v16 = vadd.f32 %v4614_v28, %v4596_v3  ;;  %v4626_v27 = vadd.f32 %v4613_v46, %v4597_v62 }
 0x5ab   :  { %v4667_v5 = vpop.permute.xlu1 %4666  ;;  %5494 = vmatmul.f32.vlgmr.msra.gmra.mxu1 %v16211_v22 }
 0x5ac   :  { %v4638_v57 = vpop.permute.xlu0 %4637  ;;  %5467 = vmatpush.msra.mxu0 %v5440_v11  ;;  %v5441_v7 = vand.u32 4294901760, %v5440_v11  ;;  %v4670_v56 = vsel %vm4576_vm11, %v4667_v5, %v16111_v0  ;;  %v4671_v48 = vsel %vm4576_vm11, %v16385_v53, %v4667_v5  ;;  %v4704_v0 = vsel %vm4612_vm13, %v4697_v25, %v16100_v9 }
 0x5ad   :  { %v4642_v50 = vsel %vm4641_vm14, %v4638_v57, %v16177_v36  ;;  %v4643_v2 = vsel %vm4641_vm14, %v16391_v31, %v4638_v57  ;;  %5470 = vmatmul.f32.vlgmr.msra.gmra.mxu0 %v16198_v58  ;;  %v4295_v36 = vadd.f32 %v16028_v19, %v4202_v4  ;;  %v4776_v63 = vpop.permute.xlu2 %4775 }
 0x5ae   :  { %v4654_v18 = vadd.f32 %v4643_v2, %v4625_v16  ;;  %v4655_v39 = vadd.f32 %v4642_v50, %v4626_v27  ;;  %5516 = vmatpush.msra.mxu2 %v5441_v7  ;;  %v5442_v54 = vsub.f32 %v5440_v11, %v5441_v7 }
 0x5af   :  { %5348 = vmatmul.f32.vlgmr.msra.gmra.mxu3 %v16211_v22  ;;  %5420 = vmatmul.f32.vlgmr.msrb.gmra.mxu2 %v16237_v15  ;;  %v4388_v53 = vadd.f32 %v16044_v14, %v4295_v36 }
 0x5b0   :  { %v4682_v31 = vadd.f32 %v4671_v48, %v4654_v18  ;;  %v4683_v60 = vadd.f32 %v4670_v56, %v4655_v39  ;;  %v5443_v24 = vand.u32 4294901760, %v5442_v54 }
 0x5b1   :  { %v4484_v9 = vadd.f32 %v16052_v6, %v4388_v53 }
 0x5b2   :  { %5444 = vmatpush.msrb.mxu3 %v5443_v24  ;;  %v4710_v12 = vadd.f32 %v4698_v35, %v4682_v31  ;;  %v4711_v37 = vadd.f32 %v4704_v0, %v4683_v60 }
 0x5b3   :  { %v4753_v1 = vpop.permute.xlu1 %4752  ;;  %v4556_v61 = vadd.f32 %v16056_v55, %v4484_v9 }
 0x5b4   :  { %5538 = vmatpush.msra.mxu3 %v5413_v49  ;;  %v4725_v38 = vpop.permute.xlu0 %4724  ;;  %v4754_v14 = vsel %vm4576_vm11, %v16414_v32, %v4753_v1  ;;  %v4760_v33 = vsel %vm4576_vm11, %v4753_v1, %v16175_v42  ;;  %v4794_v32 = vsel %vm4612_vm13, %v4776_v63, %v16219_v52  ;;  %v4795_v42 = vsel %vm4612_vm13, %v16451_v10, %v4776_v63 }
 0x5b5   :  { %v4726_v19 = vsel %vm4641_vm14, %v16421_v23, %v4725_v38  ;;  %v4732_v44 = vsel %vm4641_vm14, %v4725_v38, %v16061_v41  ;;  %v22564_v41 = vld [vmem:[#allocation80_spill] sm:$0xff] }
 0x5b6   :  { %v4738_v47 = vadd.f32 %v4726_v19, %v4710_v12  ;;  %v4739_v51 = vadd.f32 %v4732_v44, %v4711_v37  ;;  %v1040_v23 = vadd.f32 %v22564_v41, %v968_v17 }
 0x5b7   :  { %5446 = vmatmul.f32.vlgmr.msrb.gmra.mxu3 %v16171_v30  ;;  %5518 = vmatmul.f32.vlgmr.msra.gmra.mxu2 %v16171_v30 }
 0x5b8   :  { %v4766_v6 = vadd.f32 %v4754_v14, %v4738_v47  ;;  %v4767_v43 = vadd.f32 %v4760_v33, %v4739_v51  ;;  %v12821_v33 = vld [vmem:[%s21477_s0] sm:$0xff] }
 0x5ba   :  { %v4773_v34 = vadd.f32 %v4766_v6, %v4556_v61  ;;  %v4774_v13 = vadd.f32 %v4767_v43, %v1040_v23 }
 0x5bc   :  { %v4801_v29 = vadd.f32 %v4795_v42, %v4773_v34  ;;  %v4802_v59 = vadd.f32 %v4794_v32, %v4774_v13  ;;  %v16539_v21 = vpop.permute.xlu0 %4807 }
 0x5be   :  { %v5559_v45 = vand.u32 4294901760, %v4801_v29  ;;  %v5705_v49 = vand.u32 4294901760, %v4802_v59 }
 0x5bf   :  { %5540 = vmatmul.f32.vlgmr.msra.gmra.mxu3 %v16171_v30 }
 0x5c0   :  { %5560 = vmatpush.msrb.mxu0 %v5559_v45  ;;  %5636 = vmatpush.msrb.mxu3 %v5559_v45  ;;  %v5586_v55 = vsub.f32 %v4801_v29, %v5559_v45  ;;  %v5732_v3 = vsub.f32 %v4802_v59, %v5705_v49 }
 0x5c1   :  { %5566 = vmatmul.f32.vlgmr.msrb.gmra.mxu0 %v16237_v15 }
 0x5c2   :  { %5613 = vmatpush.msrb.mxu2 %v5586_v55  ;;  %v5587_v62 = vand.u32 4294901760, %v5586_v55  ;;  %v5733_v11 = vand.u32 4294901760, %v5732_v3 }
 0x5c3   :  { %5616 = vmatmul.f32.vlgmr.msrb.gmra.mxu2 %v16198_v58 }
 0x5c4   :  { %5706 = vmatpush.msra.mxu2 %v5705_v49  ;;  %5662 = vmatpush.msra.mxu0 %v5587_v62  ;;  %v5588_v52 = vsub.f32 %v5586_v55, %v5587_v62  ;;  %v5734_v10 = vsub.f32 %v5732_v3, %v5733_v11 }
 0x5c6   :  { %5808 = vmatpush.msrb.mxu2 %v5733_v11  ;;  %5759 = vmatpush.msrb.mxu0 %v5732_v3  ;;  %v5589_v46 = vand.u32 4294901760, %v5588_v52  ;;  %v5735_v28 = vand.u32 4294901760, %v5734_v10  ;;  %v12822_v10 = vld [vmem:[%s21477_s0 + $0x8] sm:$0xff] }
 0x5c7   :  { %5640 = vmatmul.f32.vlgmr.msrb.gmra.mxu3 %v16211_v22 }
 0x5c8   :  { %5590 = vmatpush.msrb.mxu1 %v5589_v46  ;;  %5736 = vmatpush.msra.mxu3 %v5735_v28 }
 0x5c9   :  { %5592 = vmatmul.f32.vlgmr.msrb.gmra.mxu1 %v16171_v30  ;;  %5664 = vmatmul.f32.vlgmr.msra.gmra.mxu0 %v16171_v30 }
 0x5ca   :  { %5830 = vmatpush.msrb.mxu3 %v5705_v49  ;;  %5684 = vmatpush.msra.mxu1 %v5559_v45 }
 0x5cb   :  { %5712 = vmatmul.f32.vlgmr.msra.gmra.mxu2 %v16237_v15 }
 0x5cc   :  { %5782 = vmatpush.msrb.mxu1 %v5705_v49 }
 0x5cf   :  { %5738 = vmatmul.f32.vlgmr.msra.gmra.mxu3 %v16171_v30 }
 0x5d1   :  { %5686 = vmatmul.f32.vlgmr.msra.gmra.mxu1 %v16171_v30  ;;  %5762 = vmatmul.f32.vlgmr.msrb.gmra.mxu0 %v16198_v58 }
 0x5d3   :  { %5810 = vmatmul.f32.vlgmr.msrb.gmra.mxu2 %v16171_v30 }
 0x5d7   :  { %5832 = vmatmul.f32.vlgmr.msrb.gmra.mxu3 %v16171_v30 }
 0x5d9   :  { %5786 = vmatmul.f32.vlgmr.msrb.gmra.mxu1 %v16211_v22  ;;  %v4837_v5 = vpop.f32.mrf.mxu2 }
 0x5da   :  { %v4838_v57 = vadd.f32 %v4837_v5, %v16539_v21 }
 0x5e1   :  { %v4863_v40 = vpop.f32.mrf.mxu3  ;;  %v4887_v4 = vpop.f32.mrf.mxu2 }
 0x5e2   :  { %v4864_v15 = vadd.f32 %v4863_v40, %v4838_v57 }
 0x5e4   :  { %v4888_v7 = vadd.f32 %v4887_v4, %v4864_v15 }
 0x5e9   :  { %v4911_v16 = vpop.f32.mrf.mxu3  ;;  %v4935_v27 = vpop.f32.mrf.mxu2 }
 0x5ea   :  { %v4912_v50 = vadd.f32 %v4911_v16, %v4888_v7 }
 0x5ec   :  { %v4936_v2 = vadd.f32 %v4935_v27, %v4912_v50 }
 0x5f1   :  { %v4957_v58 = vpop.f32.mrf.mxu3  ;;  %v4983_v25 = vpop.f32.mrf.mxu2 }
 0x5f2   :  { %v4958_v18 = vadd.f32 %v4957_v58, %v4936_v2  ;;  %v4984_v54 = vadd.f32 %v4983_v25, %v16539_v21 }
 0x5f4   :  { %v12690_v39 = vmul.f32 -1.442695, %v4958_v18 }
 0x5f6   :  { %12732 = vpow2.f32 %v12690_v39 }
 0x5f9   :  { %v5009_v30 = vpop.f32.mrf.mxu3  ;;  %v5033_v22 = vpop.f32.mrf.mxu2 }
 0x5fa   :  { %v5010_v36 = vadd.f32 %v5009_v30, %v4984_v54 }
 0x5fc   :  { %v12733_v56 = vpop.eup %12732  ;;  %v5034_v24 = vadd.f32 %v5033_v22, %v5010_v36 }
 0x5fd   :  { %v5857_v48 = vadd.f32 1.0, %v12733_v56 }
 0x5ff   :  { %12734 = vrcp.f32 %v5857_v48  ;;  %v5875_v12 = vand.u32 2147483648, %v5857_v48  ;;  %v5873_v26 = vand.u32 2147483647, %v5857_v48  ;;  %vm5869_vm0 = vweird.f32 %v5857_v48 }
 0x601   :  { %v5057_v31 = vpop.f32.mrf.mxu3  ;;  %v5081_v60 = vpop.f32.mrf.mxu2  ;;  %v5876_v47 = vor.u32 1.1754944e-38, %v5875_v12  ;;  %vm5874_vm2 = vcmp.eq.f32.partialorder %v5873_v26, 8.507059e+37 }
 0x602   :  { %v5058_v35 = vadd.f32 %v5057_v31, %v5034_v24 }
 0x604   :  { %v5082_v38 = vadd.f32 %v5081_v60, %v5058_v35 }
 0x605   :  { %v12735_v0 = vpop.eup %12734 }
 0x606   :  { %v5865_v53 = vmul.f32 %v12735_v0, %v5857_v48  ;;  %vm5870_vm15 = vweird.f32 %v12735_v0 }
 0x607   :  { %vm5871_vm1 = vmor %vm5869_vm0, %vm5870_vm15 }
 0x608   :  { %v5866_v1 = vsub.f32 1.0, %v5865_v53 }
 0x609   :  { %v5103_v37 = vpop.f32.mrf.mxu3  ;;  %v16543_v19 = vpop.f32.mrf.mxu2 }
 0x60a   :  { %v5867_v44 = vmul.f32 %v12735_v0, %v5866_v1  ;;  %v5104_v20 = vadd.f32 %v5103_v37, %v5082_v38  ;;  %v5130_v2 = vadd.f32 %v16543_v19, %v16539_v21 }
 0x60c   :  { %v5868_v17 = vadd.f32 %v12735_v0, %v5867_v44  ;;  %v12691_v9 = vmul.f32 -1.442695, %v5104_v20 }
 0x60e   :  { %v5872_v51 = vsel %vm5871_vm1, %v12735_v0, %v5868_v17  ;;  %12736 = vpow2.f32 %v12691_v9 }
 0x60f   :  { %v5877_v14 = vsel %vm5874_vm2, %v5876_v47, %v5872_v51 }
 0x610   :  { %v16548_v41 = vmul.f32 %v12821_v33, %v5877_v14 }
 0x611   :  { %v5155_v23 = vpop.f32.mrf.mxu3  ;;  %v5179_v61 = vpop.f32.mrf.mxu2 }
 0x612   :  { %6125 = vrot.lane.b32.xlu0 %v16548_v41, %s12850_s15  ;;  %6182 = vrot.lane.b32.xlu1 %v16548_v41, %s12851_s18  ;;  %v5156_v25 = vadd.f32 %v5155_v23, %v5130_v2 }
 0x613   :  { %6097 = vrot.lane.b32.xlu2 %v16548_v41, %s12839_s16 }
 0x614   :  { %v12737_v63 = vpop.eup %12736  ;;  %v5180_v39 = vadd.f32 %v5179_v61, %v5156_v25 }
 0x615   :  { %v5858_v6 = vadd.f32 1.0, %v12737_v63  ;;  %v5395_v57 = vpop.f32.mrf.mxu1 }
 0x617   :  { %12738 = vrcp.f32 %v5858_v6  ;;  %v5890_v29 = vand.u32 2147483648, %v5858_v6  ;;  %v5888_v45 = vand.u32 2147483647, %v5858_v6  ;;  %vm5884_vm6 = vweird.f32 %v5858_v6 }
 0x618   :  { %v5373_v40 = vpop.f32.mrf.mxu0 }
 0x619   :  { %v5891_v62 = vor.u32 1.1754944e-38, %v5890_v29  ;;  %vm5889_vm8 = vcmp.eq.f32.partialorder %v5888_v45, 8.507059e+37 }
 0x61a   :  { %v5203_v43 = vpop.f32.mrf.mxu3  ;;  %v5227_v34 = vpop.f32.mrf.mxu2  ;;  %6033 = vrot.lane.b32.xlu0 %v16548_v41, %s12852_s19  ;;  %6154 = vrot.lane.b32.xlu1 %v16548_v41, %s12846_s11 }
 0x61b   :  { %6005 = vrot.lane.b32.xlu2 %v16548_v41, %s12848_s13  ;;  %v5204_v54 = vadd.f32 %v5203_v43, %v5180_v39 }
 0x61d   :  { %v12739_v13 = vpop.eup %12738  ;;  %v5228_v36 = vadd.f32 %v5227_v34, %v5204_v54 }
 0x61e   :  { %v5880_v32 = vmul.f32 %v12739_v13, %v5858_v6  ;;  %vm5885_vm3 = vweird.f32 %v12739_v13 }
 0x61f   :  { %vm5886_vm7 = vmor %vm5884_vm6, %vm5885_vm3  ;;  %vm6196_vm3 = vcmp.lt.s32.totalorder %v22478_v8, 95 }
 0x620   :  { %v5881_v42 = vsub.f32 1.0, %v5880_v32 }
 0x622   :  { %v5882_v59 = vmul.f32 %v12739_v13, %v5881_v42  ;;  %v5249_v49 = vpop.f32.mrf.mxu3  ;;  %v5275_v55 = vpop.f32.mrf.mxu2  ;;  %6062 = vrot.lane.b32.xlu1 %v16548_v41, %s12841_s20 }
 0x623   :  { %v5250_v31 = vadd.f32 %v5249_v49, %v5228_v36  ;;  %v5276_v38 = vadd.f32 %v5275_v55, %v16539_v21 }
 0x624   :  { %v5883_v3 = vadd.f32 %v12739_v13, %v5882_v59 }
 0x625   :  { %v12692_v35 = vmul.f32 -1.442695, %v5250_v31 }
 0x626   :  { %v5887_v11 = vsel %vm5886_vm7, %v12739_v13, %v5883_v3 }
 0x627   :  { %v5892_v52 = vsel %vm5889_vm8, %v5891_v62, %v5887_v11  ;;  %12740 = vpow2.f32 %v12692_v35 }
 0x628   :  { %v16567_v46 = vmul.f32 %v12822_v10, %v5892_v52  ;;  %v5495_v7 = vpop.f32.mrf.mxu1 }
 0x62a   :  { %v5301_v28 = vpop.f32.mrf.mxu3  ;;  %v5325_v5 = vpop.f32.mrf.mxu2  ;;  %6099 = vrot.lane.b32.xlu0 %v16567_v46, %s12839_s16  ;;  %6127 = vrot.lane.b32.xlu1 %v16567_v46, %s12850_s15 }
 0x62b   :  { %6184 = vrot.lane.b32.xlu2 %v16567_v46, %s12851_s18  ;;  %v5471_v16 = vpop.f32.mrf.mxu0  ;;  %v5302_v26 = vadd.f32 %v5301_v28, %v5276_v38 }
 0x62d   :  { %v12741_v47 = vpop.eup %12740  ;;  %v5326_v51 = vadd.f32 %v5325_v5, %v5302_v26 }
 0x62e   :  { %v5859_v61 = vadd.f32 1.0, %v12741_v47 }
 0x630   :  { %vm5899_vm0 = vweird.f32 %v5859_v61  ;;  %v5903_v54 = vand.u32 2147483647, %v5859_v61 }
 0x632   :  { %v5349_v4 = vpop.f32.mrf.mxu3  ;;  %v5421_v15 = vpop.f32.mrf.mxu2  ;;  %vm5904_vm2 = vcmp.eq.f32.partialorder %v5903_v54, 8.507059e+37 }
 0x633   :  { %6156 = vrot.lane.b32.xlu2 %v16567_v46, %s12846_s11  ;;  %v5350_v33 = vadd.f32 %v5349_v4, %v5326_v51  ;;  %v5422_v29 = vadd.f32 %v5421_v15, %v16539_v21 }
 0x635   :  { %v5374_v63 = vadd.f32 %v5373_v40, %v5350_v33 }
 0x637   :  { %v5396_v43 = vadd.f32 %v5395_v57, %v5374_v63 }
 0x639   :  { %v12693_v32 = vmul.f32 -1.442695, %v5396_v43 }
 0x63a   :  { %v5447_v27 = vpop.f32.mrf.mxu3  ;;  %v16577_v50 = vpop.f32.mrf.mxu2 }
 0x63b   :  { %v5448_v59 = vadd.f32 %v5447_v27, %v5422_v29 }
 0x63d   :  { %v5472_v3 = vadd.f32 %v5471_v16, %v5448_v59  ;;  %v5905_v16 = vand.u32 2147483648, %v5859_v61 }
 0x63e   :  { %v16581_v58 = vpop.f32.mrf.mxu0 }
 0x63f   :  { %v5496_v4 = vadd.f32 %v5495_v7, %v5472_v3  ;;  %v12823_v7 = vld [vmem:[%s21477_s0 + $0x30] sm:$0xff]  ;;  %v5568_v35 = vadd.f32 %v16581_v58, %v16539_v21 }
 0x641   :  { %v5520_v36 = vadd.f32 %v16577_v50, %v5496_v4  ;;  %v5906_v50 = vor.u32 1.1754944e-38, %v5905_v16  ;;  %v12825_v4 = vld [vmem:[%s21477_s0 + $0x18] sm:$0xff] }
 0x642   :  { %v16583_v18 = vpop.f32.mrf.mxu3 }
 0x646   :  { %v16585_v30 = vpop.f32.mrf.mxu1  ;;  %v16587_v22 = vpop.f32.mrf.mxu2 }
 0x647   :  { %v16589_v56 = vpop.f32.mrf.mxu0 }
 0x64a   :  { %v16591_v48 = vpop.f32.mrf.mxu3 }
 0x64e   :  { %v16593_v60 = vpop.f32.mrf.mxu1  ;;  %v5713_v24 = vpop.f32.mrf.mxu2 }
 0x64f   :  { %v5714_v0 = vadd.f32 %v5713_v24, %v16539_v21  ;;  %v5763_v1 = vpop.f32.mrf.mxu0  ;;  %v12824_v21 = vld [vmem:[%s21477_s0 + $0x10] sm:$0xff] }
 0x652   :  { %v5739_v53 = vpop.f32.mrf.mxu3 }
 0x653   :  { %v5740_v12 = vadd.f32 %v5739_v53, %v5714_v0  ;;  %v5542_v0 = vadd.f32 %v16583_v18, %v5520_v36  ;;  %v5594_v53 = vadd.f32 %v16585_v30, %v5568_v35 }
 0x655   :  { %v5764_v37 = vadd.f32 %v5763_v1, %v5740_v12 }
 0x656   :  { %v5787_v19 = vpop.f32.mrf.mxu1  ;;  %v5811_v44 = vpop.f32.mrf.mxu2 }
 0x657   :  { %v5788_v20 = vadd.f32 %v5787_v19, %v5764_v37  ;;  %v12694_v37 = vmul.f32 -1.442695, %v5542_v0  ;;  %v5618_v19 = vadd.f32 %v16587_v22, %v5594_v53 }
 0x659   :  { %v5812_v17 = vadd.f32 %v5811_v44, %v5788_v20  ;;  %v5642_v30 = vadd.f32 %v16591_v48, %v5618_v19 }
 0x65a   :  { %v5833_v9 = vpop.f32.mrf.mxu3 }
 0x65b   :  { %v5834_v14 = vadd.f32 %v5833_v9, %v5812_v17  ;;  %v5666_v9 = vadd.f32 %v16589_v56, %v5642_v30 }
 0x65d   :  { %v12696_v23 = vmul.f32 -1.442695, %v5834_v14 }
 0x65f   :  { %12742 = vpow2.f32 %v12696_v23  ;;  %v5688_v23 = vadd.f32 %v16593_v60, %v5666_v9 }
 0x660   :  { %12744 = vrcp.f32 %v5859_v61 }
 0x661   :  { %v12695_v29 = vmul.f32 -1.442695, %v5688_v23 }
 0x665   :  { %v12743_v6 = vpop.eup %12742 }
 0x666   :  { %v5863_v34 = vadd.f32 1.0, %v12743_v6  ;;  %v12745_v13 = vpop.eup %12744 }
 0x667   :  { %v5895_v42 = vmul.f32 %v12745_v13, %v5859_v61  ;;  %vm5900_vm14 = vweird.f32 %v12745_v13 }
 0x668   :  { %12746 = vrcp.f32 %v5863_v34  ;;  %v5965_v11 = vand.u32 2147483648, %v5863_v34  ;;  %v5963_v5 = vand.u32 2147483647, %v5863_v34  ;;  %vm5959_vm10 = vweird.f32 %v5863_v34  ;;  %vm5901_vm1 = vmor %vm5899_vm0, %vm5900_vm14 }
 0x669   :  { %12748 = vpow2.f32 %v12693_v32  ;;  %v5896_v49 = vsub.f32 1.0, %v5895_v42 }
 0x66a   :  { %v5966_v15 = vor.u32 1.1754944e-38, %v5965_v11  ;;  %vm5964_vm15 = vcmp.eq.f32.partialorder %v5963_v5, 8.507059e+37 }
 0x66b   :  { %v5897_v10 = vmul.f32 %v12745_v13, %v5896_v49 }
 0x66d   :  { %v16598_v40 = vpop.permute.xlu2 %6097  ;;  %v5898_v27 = vadd.f32 %v12745_v13, %v5897_v10 }
 0x66e   :  { %v12747_v45 = vpop.eup %12746 }
 0x66f   :  { %v5955_v55 = vmul.f32 %v12747_v45, %v5863_v34  ;;  %v12749_v52 = vpop.eup %12748  ;;  %vm5960_vm9 = vweird.f32 %v12747_v45  ;;  %v5902_v24 = vsel %vm5901_vm1, %v12745_v13, %v5898_v27 }
 0x670   :  { %v16600_v2 = vadd.f32 1.0, %v12749_v52  ;;  %vm5961_vm12 = vmor %vm5959_vm10, %vm5960_vm9  ;;  %v5907_v38 = vsel %vm5904_vm2, %v5906_v50, %v5902_v24  ;;  %vm6139_vm10 = vcmp.lt.s32.totalorder %v22478_v8, 97 }
 0x671   :  { %v5956_v62 = vsub.f32 1.0, %v5955_v55  ;;  %v16626_v58 = vmul.f32 %v12824_v21, %v5907_v38 }
 0x672   :  { %12750 = vrcp.f32 %v16600_v2  ;;  %v5920_v32 = vand.u32 2147483648, %v16600_v2  ;;  %vm5914_vm7 = vweird.f32 %v16600_v2  ;;  %v5918_v42 = vand.u32 2147483647, %v16600_v2 }
 0x673   :  { %v5957_v28 = vmul.f32 %v12747_v45, %v5956_v62  ;;  %12752 = vpow2.f32 %v12694_v37 }
 0x674   :  { %v5921_v3 = vor.u32 1.1754944e-38, %v5920_v32  ;;  %vm5919_vm9 = vcmp.eq.f32.partialorder %v5918_v42, 8.507059e+37  ;;  %v12826_v32 = vld [vmem:[%s21477_s0 + $0x20] sm:$0xff] }
 0x675   :  { %v5958_v57 = vadd.f32 %v12747_v45, %v5957_v28  ;;  %v16619_v1 = vpop.permute.xlu2 %6005 }
 0x677   :  { %v5962_v25 = vsel %vm5961_vm12, %v12747_v45, %v5958_v57 }
 0x678   :  { %v5967_v39 = vsel %vm5964_vm15, %v5966_v15, %v5962_v25  ;;  %v16621_v12 = vpop.eup %12750 }
 0x679   :  { %v16606_v31 = vmul.f32 %v12823_v7, %v5967_v39  ;;  %v5910_v44 = vmul.f32 %v16621_v12, %v16600_v2  ;;  %v12753_v51 = vpop.eup %12752  ;;  %vm5915_vm6 = vweird.f32 %v16621_v12  ;;  %v16724_v2 = vand.u32 4294901760, %v16548_v41 }
 0x67a   :  { %v16674_v6 = vadd.f32 1.0, %v12753_v51  ;;  %vm16691_vm8 = vmor %vm5914_vm7, %vm5915_vm6 }
 0x67b   :  { %6017 = vrot.lane.b32.xlu0 %v16606_v31, %s12848_s13  ;;  %6045 = vrot.lane.b32.xlu1 %v16606_v31, %s12852_s19  ;;  %v5911_v20 = vsub.f32 1.0, %v5910_v44  ;;  %v16754_v35 = vsub.f32 %v16548_v41, %v16724_v2 }
 0x67c   :  { %6074 = vrot.lane.b32.xlu2 %v16606_v31, %s12841_s20  ;;  %12754 = vrcp.f32 %v16674_v6  ;;  %v5935_v9 = vand.u32 2147483648, %v16674_v6  ;;  %vm5929_vm14 = vweird.f32 %v16674_v6 }
 0x67d   :  { %v5912_v14 = vmul.f32 %v16621_v12, %v5911_v20  ;;  %12756 = vpow2.f32 %v12695_v29 }
 0x67f   :  { %v5913_v34 = vadd.f32 %v16621_v12, %v5912_v14  ;;  %v5933_v14 = vand.u32 2147483647, %v16674_v6 }
 0x681   :  { %v5917_v49 = vsel %vm16691_vm8, %v16621_v12, %v5913_v34  ;;  %v21695_v12 = vand.u32 4294901760, %v16754_v35  ;;  %v5936_v34 = vor.u32 1.1754944e-38, %v5935_v9  ;;  %vm5934_vm0 = vcmp.eq.f32.partialorder %v5933_v14, 8.507059e+37 }
 0x682   :  { %v5922_v10 = vsel %vm5919_vm9, %v5921_v3, %v5917_v49  ;;  %v16715_v5 = vpop.eup %12754  ;;  %vm6288_vm8 = vcmask 588800   ;;  %vm6047_vm9 = vcmp.lt.s32.totalorder %v22478_v8, 31 }
 0x683   :  { %6186 = vrot.lane.b32.xlu0 %v16626_v58, %s12851_s18  ;;  %5976 = vrot.lane.b32.xlu1 %v16548_v41, %s12853_s21  ;;  %v16720_v57 = vmul.f32 %v12825_v4, %v5922_v10  ;;  %v12757_v15 = vpop.eup %12756  ;;  %v5925_v27 = vmul.f32 %v16715_v5, %v16674_v6  ;;  %v6371_v30 = vsub.f32 %v16754_v35, %v21695_v12  ;;  %vm5930_vm12 = vweird.f32 %v16715_v5 }
 0x684   :  { %5988 = vrot.lane.b32.xlu2 %v16606_v31, %s12853_s21  ;;  %v16638_v18 = vpop.permute.xlu1 %6182  ;;  %v16655_v48 = vpop.permute.xlu0 %6125  ;;  %v16746_v36 = vadd.f32 1.0, %v12757_v15  ;;  %vm5931_vm15 = vmor %vm5929_vm14, %vm5930_vm12  ;;  %vm5990_vm12 = vcmp.lt.s32.totalorder %v22478_v8, 33 }
 0x685   :  { %v16641_v22 = vpop.permute.xlu2 %6184  ;;  %v5926_v50 = vsub.f32 1.0, %v5925_v27  ;;  %v6372_v23 = vand.u32 4294901760, %v6371_v30 }
 0x686   :  { %v6202_v26 = vsel %vm6196_vm3, %v16638_v18, %v16641_v22  ;;  %12758 = vrcp.f32 %v16746_v36  ;;  %v5950_v49 = vand.u32 2147483648, %v16746_v36  ;;  %vm5944_vm2 = vweird.f32 %v16746_v36 }
 0x687   :  { %v16647_v17 = vand.u32 4294901760, %v6202_v26  ;;  %v5927_v21 = vmul.f32 %v16715_v5, %v5926_v50  ;;  %v5948_v3 = vand.u32 2147483647, %v16746_v36 }
 0x688   :  { %v5951_v10 = vor.u32 1.1754944e-38, %v5950_v49 }
 0x689   :  { %v16651_v47 = vsub.f32 %v6202_v26, %v16647_v17  ;;  %6303 = vmatpush.msra.mxu0 %v16647_v17  ;;  %6460 = vmatpush.msra.mxu3 %v16647_v17  ;;  %v5928_v26 = vadd.f32 %v16715_v5, %v5927_v21  ;;  %vm5949_vm7 = vcmp.eq.f32.partialorder %v5948_v3, 8.507059e+37 }
 0x68b   :  { %v6346_v33 = vand.u32 4294901760, %v16651_v47  ;;  %6101 = vrot.lane.b32.xlu0 %v16626_v58, %s12839_s16  ;;  %6158 = vrot.lane.b32.xlu1 %v16626_v58, %s12846_s11 }
 0x68c   :  { %6129 = vrot.lane.b32.xlu2 %v16626_v58, %s12850_s15  ;;  %6416 = vmatpush.msra.mxu2 %v16651_v47  ;;  %v16666_v56 = vpop.permute.xlu1 %6154  ;;  %v16705_v62 = vpop.permute.xlu0 %6033 }
 0x68d   :  { %v16669_v61 = vpop.permute.xlu2 %6156  ;;  %v6347_v63 = vsub.f32 %v16651_v47, %v6346_v33  ;;  %v12759_v20 = vpop.eup %12758 }
 0x68e   :  { %v6173_v43 = vsel %vm4612_vm13, %v16666_v56, %v16669_v61  ;;  %vm5945_vm1 = vweird.f32 %v12759_v20 }
 0x68f   :  { %v16682_v13 = vand.u32 4294901760, %v6173_v43  ;;  %v6348_v60 = vand.u32 4294901760, %v6347_v63  ;;  %v5932_v63 = vsel %vm5931_vm15, %v16715_v5, %v5928_v26  ;;  %vm5946_vm6 = vmor %vm5944_vm2, %vm5945_vm1  ;;  %v12827_v5 = vld [vmem:[%s21477_s0 + $0x28] sm:$0xff] }
 0x690   :  { %v5937_v6 = vsel %vm5934_vm0, %v5936_v34, %v5932_v63 }
 0x691   :  { %6305 = vmatpush.msra.mxu0 %v16682_v13  ;;  %6349 = vmatpush.msra.mxu1 %v6348_v60  ;;  %v16689_v59 = vsub.f32 %v6173_v43, %v16682_v13  ;;  %v5940_v43 = vmul.f32 %v12759_v20, %v16746_v36  ;;  %v16807_v42 = vmul.f32 %v12826_v32, %v5937_v6 }
 0x692   :  { %6462 = vmatpush.msra.mxu3 %v16682_v13 }
 0x693   :  { %6007 = vrot.lane.b32.xlu0 %v16567_v46, %s12848_s13  ;;  %6064 = vrot.lane.b32.xlu1 %v16567_v46, %s12841_s20  ;;  %v6352_v55 = vand.u32 4294901760, %v16689_v59  ;;  %v5941_v60 = vsub.f32 1.0, %v5940_v43 }
 0x694   :  { %6035 = vrot.lane.b32.xlu2 %v16567_v46, %s12852_s19  ;;  %6419 = vmatpush.msra.mxu2 %v16689_v59  ;;  %v16710_v11 = vpop.permute.xlu1 %6062 }
 0x695   :  { %v6353_v52 = vsub.f32 %v16689_v59, %v6352_v55  ;;  %v5942_v29 = vmul.f32 %v12759_v20, %v5941_v60 }
 0x697   :  { %v6354_v28 = vand.u32 4294901760, %v6353_v52  ;;  %v5943_v45 = vadd.f32 %v12759_v20, %v5942_v29 }
 0x699   :  { %6355 = vmatpush.msra.mxu1 %v6354_v28  ;;  %v5947_v52 = vsel %vm5946_vm6, %v12759_v20, %v5943_v45 }
 0x69a   :  { %v5952_v28 = vsel %vm5949_vm7, %v5951_v10, %v5947_v52 }
 0x69b   :  { %6160 = vrot.lane.b32.xlu0 %v16720_v57, %s12846_s11  ;;  %5978 = vrot.lane.b32.xlu1 %v16567_v46, %s12853_s21  ;;  %v16827_v4 = vmul.f32 %v12827_v5, %v5952_v28 }
 0x69c   :  { %6188 = vrot.lane.b32.xlu2 %v16720_v57, %s12851_s18  ;;  %v16734_v25 = vpop.permute.xlu0 %6099  ;;  %v16736_v16 = vpop.permute.xlu1 %6127 }
 0x69d   :  { %v6116_v39 = vsel %vm207_vm5, %v16598_v40, %v16734_v25  ;;  %v6145_v54 = vsel %vm6139_vm10, %v16655_v48, %v16736_v16 }
 0x69e   :  { %v16748_v7 = vand.u32 4294901760, %v6116_v39  ;;  %v16750_v24 = vand.u32 4294901760, %v6145_v54 }
 0x6a0   :  { %6307 = vmatpush.msra.mxu0 %v16750_v24  ;;  %6464 = vmatpush.msra.mxu3 %v16750_v24  ;;  %v16759_v0 = vsub.f32 %v6145_v54, %v16750_v24  ;;  %v16762_v53 = vsub.f32 %v6116_v39, %v16748_v7 }
 0x6a2   :  { %6309 = vmatpush.msra.mxu0 %v16748_v7  ;;  %6422 = vmatpush.msra.mxu2 %v16759_v0  ;;  %v6358_v41 = vand.u32 4294901760, %v16759_v0  ;;  %v6364_v38 = vand.u32 4294901760, %v16762_v53 }
 0x6a3   :  { %6066 = vrot.lane.b32.xlu0 %v16626_v58, %s12841_s20  ;;  %6131 = vrot.lane.b32.xlu1 %v16720_v57, %s12850_s15 }
 0x6a4   :  { %6103 = vrot.lane.b32.xlu2 %v16720_v57, %s12839_s16  ;;  %6466 = vmatpush.msra.mxu3 %v16748_v7  ;;  %v6359_v37 = vsub.f32 %v16759_v0, %v6358_v41  ;;  %v6365_v19 = vsub.f32 %v16762_v53, %v6364_v38 }
 0x6a5   :  { %6311 = vmatpush.msra.mxu0 %v16724_v2  ;;  %6425 = vmatpush.msra.mxu2 %v16762_v53  ;;  %v22567_v53 = vand.u32 4294901760, %v16754_v35 }
 0x6a6   :  { %6468 = vmatpush.msra.mxu3 %v16724_v2  ;;  %v6360_v44 = vand.u32 4294901760, %v6359_v37  ;;  %v6366_v51 = vand.u32 4294901760, %v6365_v19  ;;  %v6211_v37 = vld [vmem:[%s21481_s5] sm:$0xff] }
 0x6a7   :  { %6428 = vmatpush.msra.mxu2 %v16754_v35  ;;  %v6290_v19 = vsel %vm6288_vm8, %v6211_v37, 0 }
 0x6a8   :  { %6361 = vmatpush.msra.mxu1 %v6360_v44  ;;  %v16881_v44 = vand.u32 4294901760, %v6290_v19 }
 0x6aa   :  { %6367 = vmatpush.msra.mxu1 %v6366_v51  ;;  %v16897_v9 = vsub.f32 %v6290_v19, %v16881_v44 }
 0x6ab   :  { %5980 = vrot.lane.b32.xlu0 %v16626_v58, %s12853_s21  ;;  %6037 = vrot.lane.b32.xlu1 %v16626_v58, %s12852_s19 }
 0x6ac   :  { %6009 = vrot.lane.b32.xlu2 %v16626_v58, %s12848_s13  ;;  %6373 = vmatpush.msra.mxu1 %v6372_v23  ;;  %v6212_v23 = vld [vmem:[%s21481_s5 + $0x8] sm:$0xff]  ;;  %v16923_v60 = vand.u32 4294901760, %v16897_v9 }
 0x6ad   :  { %v6293_v32 = vsel %vm6288_vm8, %v6212_v23, 0 }
 0x6ae   :  { %v16934_v3 = vand.u32 4294901760, %v6293_v32 }
 0x6b0   :  { %v16966_v23 = vsub.f32 %v6293_v32, %v16934_v3 }
 0x6b3   :  { %6133 = vrot.lane.b32.xlu0 %v16807_v42, %s12850_s15  ;;  %6190 = vrot.lane.b32.xlu1 %v16807_v42, %s12851_s18 }
 0x6b4   :  { %6162 = vrot.lane.b32.xlu2 %v16807_v42, %s12846_s11 }
 0x6bb   :  { %6039 = vrot.lane.b32.xlu0 %v16720_v57, %s12852_s19  ;;  %6105 = vrot.lane.b32.xlu1 %v16807_v42, %s12839_s16 }
 0x6bc   :  { %6068 = vrot.lane.b32.xlu2 %v16720_v57, %s12841_s20 }
 0x6c3   :  { %6192 = vrot.lane.b32.xlu0 %v16827_v4, %s12851_s18  ;;  %6011 = vrot.lane.b32.xlu1 %v16720_v57, %s12848_s13 }
 0x6c4   :  { %5982 = vrot.lane.b32.xlu2 %v16720_v57, %s12853_s21 }
 0x6cb   :  { %6107 = vrot.lane.b32.xlu0 %v16827_v4, %s12839_s16  ;;  %6164 = vrot.lane.b32.xlu1 %v16827_v4, %s12846_s11 }
 0x6cc   :  { %6135 = vrot.lane.b32.xlu2 %v16827_v4, %s12850_s15 }
 0x6d3   :  { %6013 = vrot.lane.b32.xlu0 %v16807_v42, %s12848_s13  ;;  %6070 = vrot.lane.b32.xlu1 %v16807_v42, %s12841_s20 }
 0x6d4   :  { %6041 = vrot.lane.b32.xlu2 %v16807_v42, %s12852_s19 }
 0x6d6   :  { %v16847_v15 = vpop.permute.xlu2 %6074 }
 0x6d7   :  { %v6082_v27 = vsel %vm171_vm4, %v16847_v15, %v16710_v11 }
 0x6d8   :  { %v16853_v39 = vand.u32 4294901760, %v6082_v27 }
 0x6da   :  { %6313 = vmatpush.msra.mxu0 %v16853_v39  ;;  %6470 = vmatpush.msra.mxu3 %v16853_v39  ;;  %v16858_v54 = vsub.f32 %v6082_v27, %v16853_v39  ;;  %v6323_v27 = vsub.f32 %v16897_v9, %v16923_v60 }
 0x6db   :  { %6166 = vrot.lane.b32.xlu0 %v16606_v31, %s12846_s11  ;;  %5984 = vrot.lane.b32.xlu1 %v16807_v42, %s12853_s21 }
 0x6dc   :  { %6194 = vrot.lane.b32.xlu2 %v16606_v31, %s12851_s18  ;;  %6431 = vmatpush.msra.mxu2 %v16858_v54  ;;  %v21692_v36 = vand.u32 4294901760, %v16858_v54 }
 0x6de   :  { %v6377_v50 = vsub.f32 %v16858_v54, %v21692_v36  ;;  %v16883_v30 = vpop.permute.xlu2 %5988  ;;  %v16975_v36 = vand.u32 4294901760, %v6323_v27 }
 0x6e0   :  { %v6378_v21 = vand.u32 4294901760, %v6377_v50 }
 0x6e2   :  { %6379 = vmatpush.msra.mxu1 %v6378_v21 }
 0x6e3   :  { %6072 = vrot.lane.b32.xlu0 %v16827_v4, %s12841_s20  ;;  %6137 = vrot.lane.b32.xlu1 %v16606_v31, %s12850_s15 }
 0x6e4   :  { %6109 = vrot.lane.b32.xlu2 %v16606_v31, %s12839_s16 }
 0x6e6   :  { %v16931_v49 = vpop.permute.xlu2 %6129 }
 0x6eb   :  { %5986 = vrot.lane.b32.xlu0 %v16827_v4, %s12853_s21  ;;  %6043 = vrot.lane.b32.xlu1 %v16827_v4, %s12852_s19 }
 0x6ec   :  { %6015 = vrot.lane.b32.xlu2 %v16827_v4, %s12848_s13 }
 0x6ed   :  { %v16892_v26 = vpop.permute.xlu0 %6017  ;;  %v16894_v20 = vpop.permute.xlu1 %6045 }
 0x6ee   :  { %v6025_v51 = vsel %vm4576_vm11, %v16892_v26, %v16619_v1  ;;  %v6054_v14 = vsel %vm6047_vm9, %v16894_v20, %v16705_v62 }
 0x6ef   :  { %v16910_v63 = vand.u32 4294901760, %v6025_v51  ;;  %v16912_v43 = vand.u32 4294901760, %v6054_v14 }
 0x6f1   :  { %6315 = vmatpush.msra.mxu0 %v16912_v43  ;;  %6472 = vmatpush.msra.mxu3 %v16912_v43  ;;  %v16917_v34 = vsub.f32 %v6054_v14, %v16912_v43  ;;  %v16920_v6 = vsub.f32 %v6025_v51, %v16910_v63  ;;  %v6144_v14 = vsel %vm6139_vm10, %v16736_v16, %v16931_v49 }
 0x6f2   :  { %v16980_v16 = vand.u32 4294901760, %v6144_v14 }
 0x6f3   :  { %6317 = vmatpush.msra.mxu0 %v16910_v63  ;;  %6434 = vmatpush.msra.mxu2 %v16917_v34  ;;  %v21691_v29 = vand.u32 4294901760, %v16917_v34  ;;  %v21690_v45 = vand.u32 4294901760, %v16920_v6 }
 0x6f4   :  { %6474 = vmatpush.msra.mxu3 %v16910_v63 }
 0x6f5   :  { %v16936_v52 = vpop.permute.xlu0 %6186  ;;  %v16938_v10 = vpop.permute.xlu1 %5976  ;;  %6437 = vmatpush.msra.mxu2 %v16920_v6  ;;  %v6383_v28 = vsub.f32 %v16917_v34, %v21691_v29  ;;  %v6389_v5 = vsub.f32 %v16920_v6, %v21690_v45 }
 0x6f6   :  { %v6201_v50 = vsel %vm6196_vm3, %v16641_v22, %v16936_v52  ;;  %v5997_v21 = vsel %vm5990_vm12, %v16883_v30, %v16938_v10 }
 0x6f7   :  { %v16957_v37 = vand.u32 4294901760, %v6201_v50  ;;  %v16959_v19 = vand.u32 4294901760, %v5997_v21  ;;  %v6384_v51 = vand.u32 4294901760, %v6383_v28  ;;  %v6390_v45 = vand.u32 4294901760, %v6389_v5 }
 0x6f8   :  { %v16989_v5 = vand.u32 4294901760, %v16966_v23 }
 0x6f9   :  { %v16969_v22 = vsub.f32 %v6201_v50, %v16957_v37  ;;  %6319 = vmatpush.msra.mxu0 %v16959_v19  ;;  %6385 = vmatpush.msra.mxu1 %v6384_v51  ;;  %v16973_v29 = vsub.f32 %v5997_v21, %v16959_v19  ;;  %v17016_v21 = vand.u32 4294901760, %v16567_v46  ;;  %v17020_v51 = vsub.f32 %v6144_v14, %v16980_v16 }
 0x6fa   :  { %6476 = vmatpush.msra.mxu3 %v16959_v19  ;;  %6325 = vmatmul.f32.vlgmr.msra.gmra.mxu0 %v16975_v36  ;;  %v6331_v0 = vsub.f32 %v16966_v23, %v16989_v5 }
 0x6fb   :  { %6500 = vmatpush.msrb.mxu0 %v6346_v33  ;;  %v21693_v32 = vand.u32 4294901760, %v16969_v22  ;;  %6391 = vmatpush.msra.mxu1 %v6390_v45  ;;  %v21694_v28 = vand.u32 4294901760, %v16973_v29 }
 0x6fc   :  { %6440 = vmatpush.msra.mxu2 %v16973_v29  ;;  %6480 = vmatmul.f32.vlgmr.msra.gmra.mxu3 %v16923_v60 }
 0x6fd   :  { %6504 = vmatpush.msrb.mxu0 %v6352_v55  ;;  %v16991_v27 = vpop.permute.xlu0 %6101  ;;  %v16993_v47 = vpop.permute.xlu1 %6158  ;;  %v6395_v33 = vsub.f32 %v16973_v29, %v21694_v28  ;;  %v6628_v59 = vsub.f32 %v16969_v22, %v21693_v32  ;;  %6443 = vmatmul.f32.vlgmr.msra.gmra.mxu2 %v16897_v9 }
 0x6fe   :  { %6584 = vmatpush.msrb.mxu2 %v16957_v37  ;;  %v17003_v55 = vpop.permute.xlu2 %6035  ;;  %v6115_v45 = vsel %vm207_vm5, %v16734_v25, %v16991_v27  ;;  %v6172_v50 = vsel %vm4612_vm13, %v16669_v61, %v16993_v47 }
 0x6ff   :  { %6508 = vmatpush.msrb.mxu0 %v6358_v41  ;;  %v17022_v32 = vand.u32 4294901760, %v6115_v45  ;;  %v17024_v28 = vand.u32 4294901760, %v6172_v50  ;;  %v6396_v25 = vand.u32 4294901760, %v6395_v33  ;;  %v6629_v61 = vand.u32 4294901760, %v6628_v59 }
 0x700   :  { %v6053_v41 = vsel %vm6047_vm9, %v16705_v62, %v17003_v55  ;;  %v6639_v33 = vand.u32 4294901760, %v17020_v51 }
 0x701   :  { %6512 = vmatpush.msrb.mxu0 %v6364_v38  ;;  %v17035_v14 = vsub.f32 %v6115_v45, %v17022_v32  ;;  %v17038_v12 = vsub.f32 %v6172_v50, %v17024_v28  ;;  %6397 = vmatpush.msra.mxu1 %v6396_v25  ;;  %v17045_v38 = vsub.f32 %v16567_v46, %v17016_v21  ;;  %v17051_v59 = vand.u32 4294901760, %v6053_v41 }
 0x702   :  { %6586 = vmatpush.msrb.mxu2 %v17024_v28  ;;  %6630 = vmatpush.msrb.mxu3 %v6629_v61  ;;  %v22568_v45 = vand.u32 4294901760, %v16858_v54  ;;  %v22569_v61 = vand.u32 4294901760, %v16917_v34 }
 0x703   :  { %6516 = vmatpush.msrb.mxu0 %v22567_v53  ;;  %6550 = vmatpush.msrb.mxu1 %v16647_v17  ;;  %v21696_v62 = vand.u32 4294901760, %v17038_v12  ;;  %v17062_v17 = vand.u32 4294901760, %v6331_v0  ;;  %v6645_v25 = vand.u32 4294901760, %v17035_v14  ;;  %v21698_v0 = vand.u32 4294901760, %v17045_v38 }
 0x704   :  { %6588 = vmatpush.msrb.mxu2 %v16980_v16  ;;  %6399 = vmatmul.f32.vlgmr.msra.gmra.mxu1 %v16881_v44  ;;  %v17090_v34 = vsub.f32 %v6053_v41, %v17051_v59 }
 0x705   :  { %6520 = vmatpush.msrb.mxu0 %v22568_v45  ;;  %6552 = vmatpush.msrb.mxu1 %v16682_v13  ;;  %v17057_v35 = vpop.permute.xlu0 %6007  ;;  %v17059_v46 = vpop.permute.xlu1 %6064  ;;  %v6634_v50 = vsub.f32 %v17038_v12, %v21696_v62 }
 0x706   :  { %6590 = vmatpush.msrb.mxu2 %v17022_v32  ;;  %v6024_v54 = vsel %vm4576_vm11, %v16619_v1, %v17057_v35  ;;  %v6081_v13 = vsel %vm171_vm4, %v16710_v11, %v17059_v46  ;;  %v6640_v11 = vsub.f32 %v17020_v51, %v6639_v33  ;;  %6486 = vmatmul.f32.gmra.mxu3 %v16989_v5 }
 0x707   :  { %6524 = vmatpush.msrb.mxu0 %v22569_v61  ;;  %6448 = vmatmul.f32.gmra.mxu2 %v16966_v23  ;;  %v17080_v53 = vand.u32 4294901760, %v6024_v54  ;;  %v17082_v45 = vand.u32 4294901760, %v6081_v13  ;;  %v6635_v1 = vand.u32 4294901760, %v6634_v50  ;;  %v22570_v61 = vand.u32 4294901760, %v16920_v6 }
 0x708   :  { %6554 = vmatpush.msrb.mxu1 %v16750_v24  ;;  %6592 = vmatpush.msrb.mxu2 %v17016_v21  ;;  %v6646_v24 = vsub.f32 %v17035_v14, %v6645_v25  ;;  %v22571_v6 = vand.u32 4294901760, %v16973_v29  ;;  %v6641_v41 = vand.u32 4294901760, %v6640_v11  ;;  %v6277_v11 = vld [vmem:[%s21482_s6 + $0x8] sm:$0xff] }
 0x709   :  { %6528 = vmatpush.msrb.mxu0 %v22570_v61  ;;  %v17096_v62 = vsub.f32 %v6081_v13, %v17082_v45  ;;  %v17104_v50 = vsub.f32 %v6024_v54, %v17080_v53  ;;  %6636 = vmatpush.msrb.mxu3 %v6635_v1  ;;  %v6663_v54 = vand.u32 4294901760, %v17090_v34 }
 0x70a   :  { %6556 = vmatpush.msrb.mxu1 %v16748_v7  ;;  %6333 = vmatmul.f32.gmra.mxu0 %v17062_v17  ;;  %v6652_v7 = vsub.f32 %v17045_v38, %v21698_v0  ;;  %v6647_v1 = vand.u32 4294901760, %v6646_v24  ;;  %v17140_v0 = vpop.permute.xlu2 %6188 }
 0x70b   :  { %6594 = vmatpush.msrb.mxu2 %v17082_v45  ;;  %6532 = vmatpush.msrb.mxu0 %v22571_v6  ;;  %v21697_v13 = vand.u32 4294901760, %v17096_v62  ;;  %v6669_v6 = vand.u32 4294901760, %v17104_v50 }
 0x70c   :  { %6558 = vmatpush.msrb.mxu1 %v16724_v2  ;;  %6642 = vmatpush.msrb.mxu3 %v6641_v41  ;;  %v6653_v41 = vand.u32 4294901760, %v6652_v7 }
 0x70d   :  { %6403 = vmatmul.f32.gmra.mxu1 %v16934_v3  ;;  %6596 = vmatpush.msrb.mxu2 %v17051_v59  ;;  %v17118_v29 = vpop.permute.xlu1 %5978  ;;  %v6658_v2 = vsub.f32 %v17096_v62, %v21697_v13 }
 0x70e   :  { %6697 = vmatpush.msra.mxu0 %v16969_v22  ;;  %6560 = vmatpush.msrb.mxu1 %v16853_v39  ;;  %v5996_v61 = vsel %vm5990_vm12, %v16938_v10, %v17118_v29  ;;  %v6664_v39 = vsub.f32 %v17090_v34, %v6663_v54 }
 0x70f   :  { %6598 = vmatpush.msrb.mxu2 %v17080_v53  ;;  %v17133_v24 = vand.u32 4294901760, %v5996_v61  ;;  %6648 = vmatpush.msrb.mxu3 %v6647_v1  ;;  %v6659_v13 = vand.u32 4294901760, %v6658_v2  ;;  %v17153_v1 = vpop.permute.xlu0 %6160 }
 0x710   :  { %6700 = vmatpush.msra.mxu0 %v17038_v12  ;;  %6562 = vmatpush.msrb.mxu1 %v16912_v43  ;;  %v6670_v43 = vsub.f32 %v17104_v50, %v6669_v6  ;;  %v6665_v2 = vand.u32 4294901760, %v6664_v39 }
 0x711   :  { %6285 = vperm.xlu1 %12730, %v6277_v11   ;;  %v17143_v10 = vsub.f32 %v5996_v61, %v17133_v24  ;;  %6654 = vmatpush.msrb.mxu3 %v6653_v41  ;;  %v6200_v61 = vsel %vm6196_vm3, %v16936_v52, %v17140_v0  ;;  %v6171_v41 = vsel %vm4612_vm13, %v16993_v47, %v17153_v1 }
 0x712   :  { %6703 = vmatpush.msra.mxu0 %v17020_v51  ;;  %6564 = vmatpush.msrb.mxu1 %v16910_v63  ;;  %v22572_v63 = vand.u32 4294901760, %v16969_v22  ;;  %v17181_v52 = vand.u32 4294901760, %v6200_v61  ;;  %v17190_v47 = vand.u32 4294901760, %v6171_v41 }
 0x713   :  { %6534 = vmatmul.f32.vlgmr.msrb.gmra.mxu0 %v16881_v44  ;;  %6600 = vmatpush.msrb.mxu2 %v17133_v24  ;;  %v6675_v7 = vand.u32 4294901760, %v17143_v10 }
 0x714   :  { %6660 = vmatpush.msrb.mxu3 %v6659_v13  ;;  %6706 = vmatpush.msra.mxu0 %v17035_v14  ;;  %v6671_v13 = vand.u32 4294901760, %v6670_v43  ;;  %v22574_v43 = vand.u32 4294901760, %v17045_v38 }
 0x715   :  { %6566 = vmatpush.msrb.mxu1 %v16959_v19  ;;  %6781 = vmatpush.msra.mxu2 %v22572_v63  ;;  %v6676_v11 = vsub.f32 %v17143_v10, %v6675_v7  ;;  %v22573_v19 = vand.u32 4294901760, %v17038_v12  ;;  %v17176_v39 = vpop.permute.xlu1 %6131  ;;  %v17185_v12 = vpop.permute.xlu2 %6103 }
 0x716   :  { %6568 = vmatmul.f32.vlgmr.msrb.gmra.mxu1 %v16881_v44  ;;  %6666 = vmatpush.msrb.mxu3 %v6665_v2  ;;  %v6143_v51 = vsel %vm6139_vm10, %v16931_v49, %v17176_v39  ;;  %v6114_v14 = vsel %vm207_vm5, %v16991_v27, %v17185_v12  ;;  %v17216_v2 = vsub.f32 %v6171_v41, %v17190_v47 }
 0x717   :  { %6709 = vmatpush.msra.mxu0 %v17045_v38  ;;  %6741 = vmatpush.msra.mxu1 %v16957_v37  ;;  %v6677_v22 = vand.u32 4294901760, %v6676_v11  ;;  %v17211_v49 = vand.u32 4294901760, %v6143_v51  ;;  %v17220_v27 = vand.u32 4294901760, %v6114_v14  ;;  %v22575_v38 = vand.u32 4294901760, %v17096_v62 }
 0x718   :  { %6785 = vmatpush.msra.mxu2 %v22573_v19  ;;  %6672 = vmatpush.msrb.mxu3 %v6671_v13  ;;  %v6914_v13 = vand.u32 4294901760, %v17216_v2 }
 0x719   :  { %6712 = vmatpush.msra.mxu0 %v17096_v62  ;;  %6743 = vmatpush.msra.mxu1 %v17024_v28  ;;  %v17229_v63 = vsub.f32 %v6143_v51, %v17211_v49  ;;  %v17243_v62 = vand.u32 4294901760, %v16626_v58 }
 0x71a   :  { %6789 = vmatpush.msra.mxu2 %v6639_v33  ;;  %6678 = vmatpush.msrb.mxu3 %v6677_v22  ;;  %v17200_v33 = vsub.f32 %v6200_v61, %v17181_v52  ;;  %v17247_v61 = vsub.f32 %v6114_v14, %v17220_v27 }
 0x71b   :  { %6606 = vmatmul.f32.vlgmr.msrb.gmra.mxu2 %v16975_v36  ;;  %6715 = vmatpush.msra.mxu0 %v17090_v34 }
 0x71c   :  { %6745 = vmatpush.msra.mxu1 %v16980_v16  ;;  %6793 = vmatpush.msra.mxu2 %v6645_v25  ;;  %v17206_v25 = vpop.permute.xlu0 %6066 }
 0x71d   :  { %6538 = vmatmul.f32.gmra.mxu0 %v16934_v3  ;;  %6831 = vmatpush.msra.mxu3 %v16957_v37  ;;  %v6908_v37 = vand.u32 4294901760, %v17200_v33  ;;  %v17231_v11 = vpop.permute.xlu1 %6037  ;;  %v17249_v34 = vpop.permute.xlu2 %6009 }
 0x71e   :  { %6718 = vmatpush.msra.mxu0 %v17104_v50  ;;  %6747 = vmatpush.msra.mxu1 %v17022_v32  ;;  %v6920_v50 = vand.u32 4294901760, %v17229_v63 }
 0x71f   :  { %6797 = vmatpush.msra.mxu2 %v22574_v43  ;;  %6572 = vmatmul.f32.gmra.mxu1 %v16934_v3 }
 0x720   :  { %6680 = vmatmul.f32.vlgmr.msrb.gmra.mxu3 %v16881_v44  ;;  %6721 = vmatpush.msra.mxu0 %v17143_v10  ;;  %v6921_v41 = vsub.f32 %v17229_v63, %v6920_v50 }
 0x721   :  { %6749 = vmatpush.msra.mxu1 %v17016_v21  ;;  %6801 = vmatpush.msra.mxu2 %v22575_v38 }
 0x722   :  { %6833 = vmatpush.msra.mxu3 %v17024_v28  ;;  %6865 = vmatpush.msrb.mxu0 %v17181_v52  ;;  %v6080_v28 = vsel %vm171_vm4, %v17059_v46, %v17206_v25  ;;  %v6052_v46 = vsel %vm6047_vm9, %v17003_v55, %v17231_v11  ;;  %v17282_v55 = vsub.f32 %v16626_v58, %v17243_v62 }
 0x723   :  { %6751 = vmatpush.msra.mxu1 %v17082_v45  ;;  %6805 = vmatpush.msra.mxu2 %v6663_v54  ;;  %v17263_v54 = vand.u32 4294901760, %v6080_v28  ;;  %v17284_v22 = vand.u32 4294901760, %v6052_v46 }
 0x724   :  { %6835 = vmatpush.msra.mxu3 %v16980_v16  ;;  %6867 = vmatpush.msrb.mxu0 %v17190_v47  ;;  %v6909_v16 = vsub.f32 %v17200_v33, %v6908_v37  ;;  %v17272_v19 = vpop.permute.xlu0 %5980  ;;  %v6932_v14 = vand.u32 4294901760, %v17282_v55 }
 0x725   :  { %6614 = vmatmul.f32.gmra.mxu2 %v17062_v17  ;;  %6753 = vmatpush.msra.mxu1 %v17051_v59  ;;  %v5995_v58 = vsel %vm5990_vm12, %v17118_v29, %v17272_v19  ;;  %v17308_v43 = vsub.f32 %v6052_v46, %v17284_v22  ;;  %v17329_v46 = vpop.permute.xlu1 %6190 }
 0x726   :  { %6809 = vmatpush.msra.mxu2 %v6669_v6  ;;  %6837 = vmatpush.msra.mxu3 %v17022_v32  ;;  %v6023_v6 = vsel %vm4576_vm11, %v17057_v35, %v17249_v34  ;;  %v6915_v32 = vsub.f32 %v17216_v2, %v6914_v13  ;;  %v6926_v35 = vand.u32 4294901760, %v17247_v61  ;;  %v17315_v29 = vand.u32 4294901760, %v5995_v58 }
 0x727   :  { %6869 = vmatpush.msrb.mxu0 %v17211_v49  ;;  %6755 = vmatpush.msra.mxu1 %v17080_v53  ;;  %v17291_v10 = vand.u32 4294901760, %v6023_v6 }
 0x728   :  { %6724 = vmatmul.f32.vlgmr.msra.gmra.mxu0 %v16897_v9  ;;  %6813 = vmatpush.msra.mxu2 %v6675_v7  ;;  %v17294_v7 = vsub.f32 %v6080_v28, %v17263_v54  ;;  %v6916_v51 = vand.u32 4294901760, %v6915_v32  ;;  %v6922_v28 = vand.u32 4294901760, %v6921_v41  ;;  %v21699_v32 = vand.u32 4294901760, %v17308_v43  ;;  %v17341_v41 = vpop.permute.xlu2 %6162 }
 0x729   :  { %6839 = vmatpush.msra.mxu3 %v17016_v21  ;;  %6871 = vmatpush.msrb.mxu0 %v17220_v27  ;;  %v6910_v21 = vand.u32 4294901760, %v6909_v16  ;;  %v17319_v38 = vsub.f32 %v6023_v6, %v17291_v10 }
 0x72a   :  { %6684 = vmatmul.f32.gmra.mxu3 %v16934_v3  ;;  %6757 = vmatpush.msra.mxu1 %v17133_v24  ;;  %v6938_v16 = vand.u32 4294901760, %v17294_v7 }
 0x72b   :  { %6978 = vmatpush.msrb.mxu2 %v17200_v33  ;;  %6841 = vmatpush.msra.mxu3 %v17082_v45  ;;  %v6927_v45 = vsub.f32 %v17247_v61, %v6926_v35 }
 0x72c   :  { %6873 = vmatpush.msrb.mxu0 %v17243_v62  ;;  %6911 = vmatpush.msrb.mxu1 %v6910_v21  ;;  %v6276_v21 = vld [vmem:[%s21482_s6] sm:$0xff] }
 0x72d   :  { %6981 = vmatpush.msrb.mxu2 %v17216_v2  ;;  %6761 = vmatmul.f32.vlgmr.msra.gmra.mxu1 %v16923_v60  ;;  %v6928_v6 = vand.u32 4294901760, %v6927_v45  ;;  %v6945_v45 = vsub.f32 %v17308_v43, %v21699_v32  ;;  %v17365_v32 = vpop.permute.xlu0 %6133 }
 0x72e   :  { %6843 = vmatpush.msra.mxu3 %v17051_v59  ;;  %6875 = vmatpush.msrb.mxu0 %v17263_v54  ;;  %v6933_v59 = vsub.f32 %v17282_v55, %v6932_v14 }
 0x72f   :  { %6917 = vmatpush.msrb.mxu1 %v6916_v51  ;;  %6815 = vmatmul.f32.vlgmr.msra.gmra.mxu2 %v16881_v44  ;;  %v6939_v51 = vsub.f32 %v17294_v7, %v6938_v16 }
 0x730   :  { %6845 = vmatpush.msra.mxu3 %v17080_v53  ;;  %6984 = vmatpush.msrb.mxu2 %v17229_v63  ;;  %v17334_v53 = vsub.f32 %v5995_v58, %v17315_v29  ;;  %v21700_v58 = vand.u32 4294901760, %v17319_v38 }
 0x731   :  { %6877 = vmatpush.msrb.mxu0 %v17284_v22  ;;  %6923 = vmatpush.msrb.mxu1 %v6922_v28  ;;  %v6199_v28 = vsel %vm6196_vm3, %v17140_v0, %v17329_v46  ;;  %v6170_v0 = vsel %vm4612_vm13, %v17153_v1, %v17341_v41  ;;  %v17386_v1 = vpop.permute.xlu1 %6105 }
 0x732   :  { %6729 = vmatmul.f32.gmra.mxu0 %v16966_v23  ;;  %6987 = vmatpush.msrb.mxu2 %v17247_v61  ;;  %v6113_v2 = vsel %vm207_vm5, %v17185_v12, %v17386_v1 }
 0x733   :  { %6847 = vmatpush.msra.mxu3 %v17133_v24  ;;  %6879 = vmatpush.msrb.mxu0 %v17291_v10  ;;  %v6934_v24 = vand.u32 4294901760, %v6933_v59  ;;  %v6940_v59 = vand.u32 4294901760, %v6939_v51  ;;  %v6946_v51 = vand.u32 4294901760, %v6945_v45 }
 0x734   :  { %6929 = vmatpush.msrb.mxu1 %v6928_v6  ;;  %6849 = vmatmul.f32.vlgmr.msra.gmra.mxu3 %v16881_v44  ;;  %v21701_v6 = vand.u32 4294901760, %v17334_v53 }
 0x735   :  { %6990 = vmatpush.msrb.mxu2 %v17282_v55  ;;  %7022 = vmatpush.msrb.mxu3 %v17181_v52 }
 0x736   :  { %6280 = vperm.xlu2 %12731, %v6276_v21   ;;  %6881 = vmatpush.msrb.mxu0 %v17315_v29  ;;  %v6951_v21 = vsub.f32 %v17319_v38, %v21700_v58  ;;  %v6957_v33 = vsub.f32 %v17334_v53, %v21701_v6  ;;  %v17394_v58 = vpop.permute.xlu2 %6068 }
 0x737   :  { %6935 = vmatpush.msrb.mxu1 %v6934_v24  ;;  %6993 = vmatpush.msrb.mxu2 %v17294_v7  ;;  %v17374_v24 = vand.u32 4294901760, %v6199_v28  ;;  %v6079_v61 = vsel %vm171_vm4, %v17206_v25, %v17394_v58 }
 0x738   :  { %7024 = vmatpush.msrb.mxu3 %v17190_v47  ;;  %7062 = vmatpush.msra.mxu0 %v6908_v37  ;;  %v6142_v37 = vsel %vm6139_vm10, %v17176_v39, %v17365_v32  ;;  %v6952_v45 = vand.u32 4294901760, %v6951_v21  ;;  %v17424_v21 = vpop.permute.xlu0 %6039 }
 0x739   :  { %6767 = vmatmul.f32.gmra.mxu1 %v16989_v5  ;;  %6819 = vmatmul.f32.gmra.mxu2 %v16934_v3  ;;  %v17397_v6 = vsub.f32 %v6199_v28, %v17374_v24  ;;  %v17401_v39 = vand.u32 4294901760, %v6142_v37  ;;  %v17417_v28 = vand.u32 4294901760, %v6113_v2  ;;  %v6051_v25 = vsel %vm6047_vm9, %v17231_v11, %v17424_v21 }
 0x73a   :  { %6941 = vmatpush.msrb.mxu1 %v6940_v59  ;;  %6996 = vmatpush.msrb.mxu2 %v17308_v43  ;;  %v17390_v59 = vand.u32 4294901760, %v6170_v0  ;;  %v22576_v11 = vand.u32 4294901760, %v17308_v43 }
 0x73b   :  { %7026 = vmatpush.msrb.mxu3 %v17211_v49  ;;  %7066 = vmatpush.msra.mxu0 %v6914_v13  ;;  %v6958_v13 = vand.u32 4294901760, %v6957_v33  ;;  %v17422_v12 = vsub.f32 %v6142_v37, %v17401_v39 }
 0x73c   :  { %6947 = vmatpush.msrb.mxu1 %v6946_v51  ;;  %6999 = vmatpush.msrb.mxu2 %v17319_v38  ;;  %v17412_v63 = vsub.f32 %v6170_v0, %v17390_v59  ;;  %v17451_v0 = vpop.permute.xlu1 %6011  ;;  %v17456_v51 = vand.u32 4294901760, %v6079_v61 }
 0x73d   :  { %7028 = vmatpush.msrb.mxu3 %v17220_v27  ;;  %7070 = vmatpush.msra.mxu0 %v6920_v50  ;;  %v7189_v50 = vand.u32 4294901760, %v17397_v6  ;;  %v7201_v33 = vand.u32 4294901760, %v17422_v12 }
 0x73e   :  { %6953 = vmatpush.msrb.mxu1 %v6952_v45  ;;  %6887 = vmatmul.f32.vlgmr.msrb.gmra.mxu0 %v16975_v36  ;;  %v7195_v55 = vand.u32 4294901760, %v17412_v63  ;;  %v17461_v37 = vpop.permute.xlu2 %5982 }
 0x73f   :  { %6853 = vmatmul.f32.gmra.mxu3 %v16934_v3  ;;  %7002 = vmatpush.msrb.mxu2 %v17334_v53 }
 0x740   :  { %7030 = vmatpush.msrb.mxu3 %v17243_v62  ;;  %7074 = vmatpush.msra.mxu0 %v6926_v35  ;;  %v17436_v35 = vand.u32 4294901760, %v16720_v57  ;;  %v7196_v43 = vsub.f32 %v17412_v63, %v7195_v55 }
 0x741   :  { %6959 = vmatpush.msrb.mxu1 %v6958_v13  ;;  %7146 = vmatpush.msra.mxu2 %v17374_v24 }
 0x742   :  { %7032 = vmatpush.msrb.mxu3 %v17263_v54  ;;  %7078 = vmatpush.msra.mxu0 %v6932_v14  ;;  %v17449_v14 = vsub.f32 %v6113_v2, %v17417_v28  ;;  %v17468_v7 = vsub.f32 %v16720_v57, %v17436_v35  ;;  %v22577_v57 = vand.u32 4294901760, %v17319_v38  ;;  %v17486_v2 = vsub.f32 %v6079_v61, %v17456_v51 }
 0x743   :  { %7112 = vmatpush.msra.mxu1 %v17181_v52  ;;  %7148 = vmatpush.msra.mxu2 %v17390_v59  ;;  %v7190_v52 = vsub.f32 %v17397_v6, %v7189_v50  ;;  %v7202_v38 = vsub.f32 %v17422_v12, %v7201_v33 }
 0x744   :  { %6961 = vmatmul.f32.vlgmr.msrb.gmra.mxu1 %v16881_v44  ;;  %7005 = vmatmul.f32.vlgmr.msrb.gmra.mxu2 %v16897_v9  ;;  %v7207_v45 = vand.u32 4294901760, %v17449_v14  ;;  %v7213_v61 = vand.u32 4294901760, %v17468_v7 }
 0x745   :  { %7034 = vmatpush.msrb.mxu3 %v17284_v22  ;;  %7082 = vmatpush.msra.mxu0 %v6938_v16  ;;  %v6022_v16 = vsel %vm4576_vm11, %v17249_v34, %v17451_v0  ;;  %v5994_v34 = vsel %vm5990_vm12, %v17272_v19, %v17461_v37  ;;  %v22578_v19 = vand.u32 4294901760, %v17334_v53  ;;  %v7219_v53 = vand.u32 4294901760, %v17486_v2 }
 0x746   :  { %7114 = vmatpush.msra.mxu1 %v17190_v47  ;;  %7150 = vmatpush.msra.mxu2 %v17401_v39  ;;  %v17470_v47 = vand.u32 4294901760, %v6051_v25  ;;  %v17497_v13 = vand.u32 4294901760, %v6022_v16 }
 0x747   :  { %7036 = vmatpush.msrb.mxu3 %v17291_v10  ;;  %7086 = vmatpush.msra.mxu0 %v22576_v11  ;;  %v17507_v11 = vand.u32 4294901760, %v5994_v34 }
 0x748   :  { %7116 = vmatpush.msra.mxu1 %v17211_v49  ;;  %6895 = vmatmul.f32.gmra.mxu0 %v17062_v17  ;;  %v7191_v49 = vand.u32 4294901760, %v7190_v52  ;;  %v17502_v52 = vsub.f32 %v6051_v25, %v17470_v47  ;;  %v7203_v25 = vand.u32 4294901760, %v7202_v38 }
 0x749   :  { %7152 = vmatpush.msra.mxu2 %v17417_v28  ;;  %7038 = vmatpush.msrb.mxu3 %v17315_v29  ;;  %v17527_v38 = vsub.f32 %v5994_v34, %v17507_v11 }
 0x74a   :  { %7090 = vmatpush.msra.mxu0 %v22577_v57  ;;  %7118 = vmatpush.msra.mxu1 %v17220_v27  ;;  %v7197_v27 = vand.u32 4294901760, %v7196_v43  ;;  %v7208_v57 = vsub.f32 %v17449_v14, %v7207_v45  ;;  %v7225_v43 = vand.u32 4294901760, %v17502_v52 }
 0x74b   :  { %7042 = vmatmul.f32.vlgmr.msrb.gmra.mxu3 %v16923_v60  ;;  %7154 = vmatpush.msra.mxu2 %v17436_v35 }
 0x74c   :  { %7192 = vmatpush.msra.mxu3 %v7191_v49  ;;  %7094 = vmatpush.msra.mxu0 %v22578_v19  ;;  %v17517_v49 = vsub.f32 %v6022_v16, %v17497_v13  ;;  %v7209_v16 = vand.u32 4294901760, %v7208_v57  ;;  %v7237_v57 = vand.u32 4294901760, %v17527_v38 }
 0x74d   :  { %7120 = vmatpush.msra.mxu1 %v17243_v62  ;;  %7156 = vmatpush.msra.mxu2 %v17456_v51  ;;  %v7214_v62 = vsub.f32 %v17468_v7, %v7213_v61 }
 0x74e   :  { %6965 = vmatmul.f32.gmra.mxu1 %v16934_v3  ;;  %7198 = vmatpush.msra.mxu3 %v7197_v27  ;;  %v7231_v34 = vand.u32 4294901760, %v17517_v49  ;;  %v17538_v27 = vpop.permute.xlu0 %6192 }
 0x74f   :  { %7259 = vmatpush.msrb.mxu0 %v17397_v6  ;;  %7010 = vmatmul.f32.gmra.mxu2 %v16966_v23  ;;  %v7215_v19 = vand.u32 4294901760, %v7214_v62  ;;  %v6198_v6 = vsel %vm6196_vm3, %v17329_v46, %v17538_v27 }
 0x750   :  { %7122 = vmatpush.msra.mxu1 %v17263_v54  ;;  %7158 = vmatpush.msra.mxu2 %v17470_v47  ;;  %v7220_v54 = vsub.f32 %v17486_v2, %v7219_v53  ;;  %v17580_v46 = vand.u32 4294901760, %v6198_v6 }
 0x751   :  { %7204 = vmatpush.msra.mxu3 %v7203_v25  ;;  %7262 = vmatpush.msrb.mxu0 %v17412_v63  ;;  %v17547_v25 = vpop.permute.xlu1 %6164 }
 0x752   :  { %7124 = vmatpush.msra.mxu1 %v17284_v22  ;;  %7096 = vmatmul.f32.vlgmr.msra.gmra.mxu0 %v16881_v44  ;;  %v7226_v22 = vsub.f32 %v17502_v52, %v7225_v43  ;;  %v7221_v62 = vand.u32 4294901760, %v7220_v54  ;;  %v17571_v54 = vpop.permute.xlu2 %6135 }
 0x753   :  { %7160 = vmatpush.msra.mxu2 %v17497_v13  ;;  %7210 = vmatpush.msra.mxu3 %v7209_v16 }
 0x754   :  { %7265 = vmatpush.msrb.mxu0 %v17422_v12  ;;  %7126 = vmatpush.msra.mxu1 %v17291_v10  ;;  %v7232_v10 = vsub.f32 %v17517_v49, %v7231_v34  ;;  %v7227_v16 = vand.u32 4294901760, %v7226_v22 }
 0x755   :  { %7048 = vmatmul.f32.gmra.mxu3 %v16989_v5  ;;  %7162 = vmatpush.msra.mxu2 %v17507_v11 }
 0x756   :  { %7216 = vmatpush.msra.mxu3 %v7215_v19  ;;  %7268 = vmatpush.msrb.mxu0 %v17449_v14  ;;  %v6169_v19 = vsel %vm4612_vm13, %v17341_v41, %v17547_v25  ;;  %v6141_v41 = vsel %vm6139_vm10, %v17365_v32, %v17571_v54  ;;  %v17601_v14 = vsub.f32 %v6198_v6, %v17580_v46 }
 0x757   :  { %7128 = vmatpush.msra.mxu1 %v17315_v29  ;;  %7343 = vmatpush.msrb.mxu2 %v7189_v50  ;;  %v7238_v29 = vsub.f32 %v17527_v38, %v7237_v57  ;;  %v7233_v50 = vand.u32 4294901760, %v7232_v10  ;;  %v17592_v12 = vand.u32 4294901760, %v6169_v19 }
 0x758   :  { %7130 = vmatmul.f32.vlgmr.msra.gmra.mxu1 %v16881_v44  ;;  %7222 = vmatpush.msra.mxu3 %v7221_v62 }
 0x759   :  { %7271 = vmatpush.msrb.mxu0 %v17468_v7  ;;  %7303 = vmatpush.msrb.mxu1 %v17374_v24  ;;  %v7239_v63 = vand.u32 4294901760, %v7238_v29  ;;  %v17614_v7 = vsub.f32 %v6169_v19, %v17592_v12 }
 0x75a   :  { %7168 = vmatmul.f32.vlgmr.msra.gmra.mxu2 %v16975_v36  ;;  %7228 = vmatpush.msra.mxu3 %v7227_v16  ;;  %v17629_v22 = vpop.permute.xlu2 %6041 }
 0x75b   :  { %7347 = vmatpush.msrb.mxu2 %v7195_v55  ;;  %7274 = vmatpush.msrb.mxu0 %v17486_v2  ;;  %v17583_v55 = vpop.permute.xlu0 %6107  ;;  %v7476_v2 = vand.u32 4294901760, %v17614_v7 }
 0x75c   :  { %7305 = vmatpush.msrb.mxu1 %v17390_v59  ;;  %7100 = vmatmul.f32.gmra.mxu0 %v16934_v3  ;;  %v6112_v32 = vsel %vm207_vm5, %v17386_v1, %v17583_v55 }
 0x75d   :  { %7351 = vmatpush.msrb.mxu2 %v7201_v33  ;;  %7234 = vmatpush.msra.mxu3 %v7233_v50  ;;  %v17595_v33 = vpop.permute.xlu1 %6070 }
 0x75e   :  { %7277 = vmatpush.msrb.mxu0 %v17502_v52  ;;  %7307 = vmatpush.msrb.mxu1 %v17401_v39  ;;  %v6078_v62 = vsel %vm171_vm4, %v17394_v58, %v17595_v33  ;;  %v6050_v58 = vsel %vm6047_vm9, %v17424_v21, %v17629_v22 }
 0x75f   :  { %7355 = vmatpush.msrb.mxu2 %v7207_v45  ;;  %7240 = vmatpush.msra.mxu3 %v7239_v63  ;;  %v17609_v45 = vand.u32 4294901760, %v6141_v41  ;;  %v17659_v52 = vand.u32 4294901760, %v6078_v62 }
 0x760   :  { %7280 = vmatpush.msrb.mxu0 %v17517_v49  ;;  %7309 = vmatpush.msrb.mxu1 %v17417_v28 }
 0x761   :  { %7359 = vmatpush.msrb.mxu2 %v7213_v61  ;;  %7393 = vmatpush.msrb.mxu3 %v17374_v24  ;;  %v17618_v61 = vand.u32 4294901760, %v6112_v32  ;;  %v7470_v24 = vand.u32 4294901760, %v17601_v14  ;;  %v17627_v1 = vsub.f32 %v6141_v41, %v17609_v45 }
 0x762   :  { %7134 = vmatmul.f32.gmra.mxu1 %v16934_v3  ;;  %7242 = vmatmul.f32.vlgmr.msra.gmra.mxu3 %v16881_v44 }
 0x763   :  { %7283 = vmatpush.msrb.mxu0 %v17527_v38  ;;  %7311 = vmatpush.msrb.mxu1 %v17436_v35  ;;  %v17647_v10 = vpop.permute.xlu0 %6013  ;;  %v7482_v49 = vand.u32 4294901760, %v17627_v1  ;;  %v17682_v38 = vand.u32 4294901760, %v6050_v58 }
 0x764   :  { %7176 = vmatmul.f32.gmra.mxu2 %v17062_v17  ;;  %7395 = vmatpush.msrb.mxu3 %v17390_v59  ;;  %v17641_v59 = vand.u32 4294901760, %v16807_v42  ;;  %v6021_v21 = vsel %vm4576_vm11, %v17451_v0, %v17647_v10 }
 0x765   :  { %7363 = vmatpush.msrb.mxu2 %v7219_v53  ;;  %7427 = vmatpush.msra.mxu0 %v17580_v46  ;;  %v17645_v53 = vsub.f32 %v6112_v32, %v17618_v61  ;;  %v17696_v16 = vand.u32 4294901760, %v6021_v21  ;;  %v7483_v29 = vsub.f32 %v17627_v1, %v7482_v49  ;;  %v17706_v50 = vsub.f32 %v6050_v58, %v17682_v38 }
 0x766   :  { %7313 = vmatpush.msrb.mxu1 %v17456_v51  ;;  %7397 = vmatpush.msrb.mxu3 %v17401_v39  ;;  %v7471_v39 = vsub.f32 %v17601_v14, %v7470_v24 }
 0x767   :  { %7367 = vmatpush.msrb.mxu2 %v7225_v43  ;;  %7429 = vmatpush.msra.mxu0 %v17592_v12  ;;  %v17663_v43 = vpop.permute.xlu1 %5984  ;;  %v7488_v0 = vand.u32 4294901760, %v17645_v53  ;;  %v17718_v41 = vsub.f32 %v6021_v21, %v17696_v16  ;;  %v7484_v32 = vand.u32 4294901760, %v7483_v29  ;;  %v7506_v21 = vand.u32 4294901760, %v17706_v50 }
 0x768   :  { %7315 = vmatpush.msrb.mxu1 %v17470_v47  ;;  %7286 = vmatmul.f32.vlgmr.msrb.gmra.mxu0 %v16897_v9 }
 0x769   :  { %7371 = vmatpush.msrb.mxu2 %v7231_v34  ;;  %7399 = vmatpush.msrb.mxu3 %v17417_v28  ;;  %v7477_v28 = vsub.f32 %v17614_v7, %v7476_v2  ;;  %v17680_v34 = vsub.f32 %v16807_v42, %v17641_v59  ;;  %v7472_v42 = vand.u32 4294901760, %v7471_v39  ;;  %v7489_v19 = vsub.f32 %v17645_v53, %v7488_v0 }
 0x76a   :  { %7431 = vmatpush.msra.mxu0 %v17609_v45  ;;  %7317 = vmatpush.msrb.mxu1 %v17497_v13  ;;  %v7507_v29 = vsub.f32 %v17706_v50, %v7506_v21 }
 0x76b   :  { %7375 = vmatpush.msrb.mxu2 %v7237_v57  ;;  %7401 = vmatpush.msrb.mxu3 %v17436_v35  ;;  %v17688_v35 = vsub.f32 %v6078_v62, %v17659_v52  ;;  %v5993_v57 = vsel %vm5990_vm12, %v17461_v37, %v17663_v43  ;;  %v7478_v6 = vand.u32 4294901760, %v7477_v28  ;;  %v7494_v37 = vand.u32 4294901760, %v17680_v34  ;;  %v17722_v62 = vpop.permute.xlu2 %6194  ;;  %v17734_v28 = vpop.permute.xlu0 %6166 }
 0x76c   :  { %7433 = vmatpush.msra.mxu0 %v17618_v61  ;;  %7246 = vmatmul.f32.gmra.mxu3 %v16934_v3  ;;  %v7490_v39 = vand.u32 4294901760, %v7489_v19 }
 0x76d   :  { %7319 = vmatpush.msrb.mxu1 %v17507_v11  ;;  %7540 = vmatpush.msra.mxu2 %v17601_v14  ;;  %v7500_v63 = vand.u32 4294901760, %v17688_v35 }
 0x76e   :  { %7403 = vmatpush.msrb.mxu3 %v17456_v51  ;;  %7377 = vmatmul.f32.vlgmr.msrb.gmra.mxu2 %v16881_v44  ;;  %v17708_v51 = vand.u32 4294901760, %v5993_v57 }
 0x76f   :  { %7435 = vmatpush.msra.mxu0 %v17641_v59  ;;  %7473 = vmatpush.msra.mxu1 %v7472_v42 }
 0x770   :  { %7543 = vmatpush.msra.mxu2 %v17614_v7  ;;  %7323 = vmatmul.f32.vlgmr.msrb.gmra.mxu1 %v16923_v60  ;;  %v17730_v58 = vsub.f32 %v5993_v57, %v17708_v51  ;;  %v21702_v57 = vand.u32 4294901760, %v17718_v41 }
 0x771   :  { %7405 = vmatpush.msrb.mxu3 %v17470_v47  ;;  %7437 = vmatpush.msra.mxu0 %v17659_v52  ;;  %v7495_v47 = vsub.f32 %v17680_v34, %v7494_v37 }
 0x772   :  { %7479 = vmatpush.msra.mxu1 %v7478_v6  ;;  %7291 = vmatmul.f32.gmra.mxu0 %v16966_v23  ;;  %v7518_v6 = vand.u32 4294901760, %v17730_v58 }
 0x773   :  { %7546 = vmatpush.msra.mxu2 %v17627_v1  ;;  %7407 = vmatpush.msrb.mxu3 %v17497_v13  ;;  %v7501_v13 = vsub.f32 %v17688_v35, %v7500_v63  ;;  %v7496_v42 = vand.u32 4294901760, %v7495_v47  ;;  %v6168_v47 = vsel %vm4612_vm13, %v17547_v25, %v17734_v28 }
 0x774   :  { %7439 = vmatpush.msra.mxu0 %v17682_v38  ;;  %7485 = vmatpush.msra.mxu1 %v7484_v32  ;;  %v17781_v25 = vand.u32 4294901760, %v6168_v47 }
 0x775   :  { %7549 = vmatpush.msra.mxu2 %v17645_v53  ;;  %7409 = vmatpush.msrb.mxu3 %v17507_v11  ;;  %v6197_v11 = vsel %vm6196_vm3, %v17538_v27, %v17722_v62  ;;  %v7502_v19 = vand.u32 4294901760, %v7501_v13  ;;  %v7513_v27 = vsub.f32 %v17718_v41, %v21702_v57  ;;  %v7508_v13 = vand.u32 4294901760, %v7507_v29  ;;  %v17776_v57 = vpop.permute.xlu2 %6109 }
 0x776   :  { %7441 = vmatpush.msra.mxu0 %v17696_v16  ;;  %7491 = vmatpush.msra.mxu1 %v7490_v39  ;;  %v17761_v32 = vand.u32 4294901760, %v6197_v11  ;;  %v17767_v39 = vpop.permute.xlu1 %6137  ;;  %v6111_v7 = vsel %vm207_vm5, %v17583_v55, %v17776_v57  ;;  %v17808_v1 = vsub.f32 %v6168_v47, %v17781_v25 }
 0x777   :  { %7411 = vmatmul.f32.vlgmr.msrb.gmra.mxu3 %v16881_v44  ;;  %7552 = vmatpush.msra.mxu2 %v17680_v34  ;;  %v6140_v14 = vsel %vm6139_vm10, %v17571_v54, %v17767_v39 }
 0x778   :  { %7584 = vmatpush.msra.mxu3 %v17580_v46  ;;  %7381 = vmatmul.f32.gmra.mxu2 %v16934_v3  ;;  %v17789_v29 = vsub.f32 %v6197_v11, %v17761_v32  ;;  %v17805_v11 = vpop.f32.mrf.mxu0 }
 0x779   :  { %7443 = vmatpush.msra.mxu0 %v17708_v51  ;;  %7497 = vmatpush.msra.mxu1 %v7496_v42  ;;  %v7519_v42 = vsub.f32 %v17730_v58, %v7518_v6 }
 0x77a   :  { %7555 = vmatpush.msra.mxu2 %v17688_v35  ;;  %7329 = vmatmul.f32.gmra.mxu1 %v16989_v5  ;;  %v21707_v55 = vand.u32 4294901760, %v17789_v29 }
 0x77b   :  { %7586 = vmatpush.msra.mxu3 %v17592_v12  ;;  %7624 = vmatpush.msrb.mxu0 %v7470_v24  ;;  %v7514_v24 = vand.u32 4294901760, %v7513_v27  ;;  %v7520_v54 = vand.u32 4294901760, %v7519_v42  ;;  %v21703_v42 = vand.u32 4294901760, %v17808_v1 }
 0x77c   :  { %7503 = vmatpush.msra.mxu1 %v7502_v19  ;;  %7449 = vmatmul.f32.vlgmr.msra.gmra.mxu0 %v16975_v36  ;;  %v17791_v19 = vpop.permute.xlu0 %6072 }
 0x77d   :  { %7558 = vmatpush.msra.mxu2 %v17706_v50  ;;  %7588 = vmatpush.msra.mxu3 %v17609_v45  ;;  %v6077_v53 = vsel %vm171_vm4, %v17595_v33, %v17791_v19  ;;  %v7752_v33 = vsub.f32 %v17789_v29, %v21707_v55  ;;  %v17845_v34 = vpop.permute.xlu2 %6015  ;;  %v7758_v50 = vsub.f32 %v17808_v1, %v21703_v42 }
 0x77e   :  { %7628 = vmatpush.msrb.mxu0 %v7476_v2  ;;  %7509 = vmatpush.msra.mxu1 %v7508_v13  ;;  %v17801_v2 = vand.u32 4294901760, %v6140_v14  ;;  %v17828_v47 = vpop.permute.xlu1 %6043  ;;  %v17834_v13 = vand.u32 4294901760, %v16827_v4 }
 0x77f   :  { %7561 = vmatpush.msra.mxu2 %v17718_v41  ;;  %7590 = vmatpush.msra.mxu3 %v17618_v61 }
 0x780   :  { %7632 = vmatpush.msrb.mxu0 %v7482_v49  ;;  %7515 = vmatpush.msra.mxu1 %v7514_v24  ;;  %v17813_v49 = vand.u32 4294901760, %v6111_v7  ;;  %v17866_v35 = vsub.f32 %v16827_v4, %v17834_v13  ;;  %v22579_v4 = vand.u32 4294901760, %v17718_v41 }
 0x781   :  { %7415 = vmatmul.f32.gmra.mxu3 %v16934_v3  ;;  %7564 = vmatpush.msra.mxu2 %v17730_v58  ;;  %v17817_v27 = vpop.f32.mrf.mxu1 }
 0x782   :  { %7592 = vmatpush.msra.mxu3 %v17641_v59  ;;  %7636 = vmatpush.msrb.mxu0 %v7488_v0  ;;  %v17826_v0 = vsub.f32 %v6140_v14, %v17801_v2  ;;  %v17843_v14 = vsub.f32 %v6111_v7, %v17813_v49 }
 0x783   :  { %7521 = vmatpush.msra.mxu1 %v7520_v54  ;;  %7567 = vmatmul.f32.vlgmr.msra.gmra.mxu2 %v16897_v9 }
 0x784   :  { %7523 = vmatmul.f32.vlgmr.msra.gmra.mxu1 %v16881_v44  ;;  %7708 = vmatpush.msrb.mxu2 %v17761_v32  ;;  %v17858_v24 = vpop.permute.xlu0 %5986  ;;  %v21705_v7 = vand.u32 4294901760, %v17843_v14 }
 0x785   :  { %7594 = vmatpush.msra.mxu3 %v17659_v52  ;;  %7640 = vmatpush.msrb.mxu0 %v7494_v37  ;;  %v6049_v37 = vsel %vm6047_vm9, %v17629_v22, %v17828_v47  ;;  %v6020_v22 = vsel %vm4576_vm11, %v17647_v10, %v17845_v34 }
 0x786   :  { %7674 = vmatpush.msrb.mxu1 %v17580_v46  ;;  %7710 = vmatpush.msrb.mxu2 %v17781_v25  ;;  %v17850_v46 = vand.u32 4294901760, %v6077_v53  ;;  %v17892_v42 = vand.u32 4294901760, %v6020_v22 }
 0x787   :  { %7596 = vmatpush.msra.mxu3 %v17682_v38  ;;  %7644 = vmatpush.msrb.mxu0 %v7500_v63  ;;  %v17877_v63 = vand.u32 4294901760, %v6049_v37  ;;  %v6334_v54 = vpop.f32.mrf.mxu0 }
 0x788   :  { %7676 = vmatpush.msrb.mxu1 %v17592_v12  ;;  %7457 = vmatmul.f32.gmra.mxu0 %v17062_v17  ;;  %v21704_v12 = vand.u32 4294901760, %v17826_v0  ;;  %v17884_v10 = vsub.f32 %v6077_v53, %v17850_v46  ;;  %v21706_v53 = vand.u32 4294901760, %v17866_v35 }
 0x789   :  { %7712 = vmatpush.msrb.mxu2 %v17801_v2  ;;  %7598 = vmatpush.msra.mxu3 %v17696_v16 }
 0x78a   :  { %7648 = vmatpush.msrb.mxu0 %v7506_v21  ;;  %7678 = vmatpush.msrb.mxu1 %v17609_v45  ;;  %v7753_v21 = vand.u32 4294901760, %v7752_v33  ;;  %v5992_v45 = vsel %vm5990_vm12, %v17663_v43, %v17858_v24  ;;  %v7764_v41 = vsub.f32 %v17826_v0, %v21704_v12  ;;  %v6404_v33 = vpop.f32.mrf.mxu1  ;;  %v7781_v58 = vand.u32 4294901760, %v17884_v10 }
 0x78b   :  { %7714 = vmatpush.msrb.mxu2 %v17813_v49  ;;  %7600 = vmatpush.msra.mxu3 %v17708_v51  ;;  %v17902_v43 = vand.u32 4294901760, %v5992_v45 }
 0x78c   :  { %7652 = vmatpush.msrb.mxu0 %v22579_v4  ;;  %7680 = vmatpush.msrb.mxu1 %v17618_v61  ;;  %v7759_v61 = vand.u32 4294901760, %v7758_v50  ;;  %v17905_v4 = vsub.f32 %v6049_v37, %v17877_v63  ;;  %v6444_v37 = vpop.f32.mrf.mxu2  ;;  %v17919_v50 = vsub.f32 %v6020_v22, %v17892_v42 }
 0x78d   :  { %7604 = vmatmul.f32.vlgmr.msra.gmra.mxu3 %v16923_v60  ;;  %7716 = vmatpush.msrb.mxu2 %v17834_v13 }
 0x78e   :  { %7754 = vmatpush.msrb.mxu3 %v7753_v21  ;;  %7572 = vmatmul.f32.gmra.mxu2 %v16966_v23  ;;  %v7770_v21 = vsub.f32 %v17843_v14, %v21705_v7  ;;  %v7776_v7 = vsub.f32 %v17866_v35, %v21706_v53  ;;  %v7782_v53 = vsub.f32 %v17884_v10, %v7781_v58 }
 0x78f   :  { %7656 = vmatpush.msrb.mxu0 %v7518_v6  ;;  %7682 = vmatpush.msrb.mxu1 %v17641_v59  ;;  %v7765_v59 = vand.u32 4294901760, %v7764_v41  ;;  %v6481_v41 = vpop.f32.mrf.mxu3 }
 0x790   :  { %7718 = vmatpush.msrb.mxu2 %v17850_v46  ;;  %v17912_v12 = vpop.permute.xlu2 %6280  ;;  %7527 = vmatmul.f32.gmra.mxu1 %v16934_v3  ;;  %v7771_v22 = vand.u32 4294901760, %v7770_v21  ;;  %v6535_v21 = vpop.f32.mrf.mxu0 }
 0x791   :  { %7760 = vmatpush.msrb.mxu3 %v7759_v61  ;;  %v6327_v6 = vadd.f32 %v17805_v11, %v17912_v12  ;;  %7821 = vmatpush.msra.mxu0 %v17789_v29  ;;  %v17930_v11 = vsub.f32 %v5992_v45, %v17902_v43  ;;  %v7793_v45 = vand.u32 4294901760, %v17919_v50 }
 0x792   :  { %7684 = vmatpush.msrb.mxu1 %v17659_v52  ;;  %7658 = vmatmul.f32.vlgmr.msrb.gmra.mxu0 %v16881_v44  ;;  %v21708_v52 = vand.u32 4294901760, %v17905_v4 }
 0x793   :  { %7720 = vmatpush.msrb.mxu2 %v17877_v63  ;;  %v6401_v61 = vadd.f32 %v17817_v27, %v6327_v6  ;;  %7766 = vmatpush.msrb.mxu3 %v7765_v59  ;;  %v7777_v27 = vand.u32 4294901760, %v7776_v7  ;;  %v17941_v6 = vpop.permute.xlu1 %6285  ;;  %v7799_v59 = vand.u32 4294901760, %v17930_v11  ;;  %v6569_v7 = vpop.f32.mrf.mxu1 }
 0x794   :  { %7824 = vmatpush.msra.mxu0 %v17808_v1  ;;  %7686 = vmatpush.msrb.mxu1 %v17682_v38 }
 0x795   :  { %7722 = vmatpush.msrb.mxu2 %v17892_v42  ;;  %v6445_v55 = vadd.f32 %v6444_v37, %v6401_v61  ;;  %7772 = vmatpush.msrb.mxu3 %v7771_v22  ;;  %v7788_v37 = vsub.f32 %v17905_v4, %v21708_v52  ;;  %v7783_v61 = vand.u32 4294901760, %v7782_v53 }
 0x796   :  { %7827 = vmatpush.msra.mxu0 %v17826_v0  ;;  %7688 = vmatpush.msrb.mxu1 %v17696_v16  ;;  %v6335_v16 = vadd.f32 %v6334_v54, %v17941_v6  ;;  %v6203_v54 = vsel %vm6196_vm3, %v17722_v62, %v16638_v18 }
 0x797   :  { %7610 = vmatmul.f32.gmra.mxu3 %v16989_v5  ;;  %v6482_v38 = vadd.f32 %v6481_v41, %v6445_v55  ;;  %7724 = vmatpush.msrb.mxu2 %v17902_v43  ;;  %v7794_v55 = vsub.f32 %v17919_v50, %v7793_v45  ;;  %v22580_v41 = vand.u32 4294901760, %v17789_v29  ;;  %v7789_v53 = vand.u32 4294901760, %v7788_v37  ;;  %v6487_v62 = vpop.f32.mrf.mxu3 }
 0x798   :  { %7778 = vmatpush.msrb.mxu3 %v7777_v27  ;;  %7830 = vmatpush.msra.mxu0 %v17843_v14  ;;  %v6405_v52 = vadd.f32 %v6404_v33, %v6335_v16  ;;  %v7800_v29 = vsub.f32 %v17930_v11, %v7799_v59  ;;  %v22582_v37 = vand.u32 4294901760, %v17826_v0  ;;  %v22583_v16 = vand.u32 4294901760, %v17843_v14 }
 0x799   :  { %7690 = vmatpush.msrb.mxu1 %v17708_v51  ;;  %v6536_v22 = vadd.f32 %v6535_v21, %v6482_v38  ;;  %7730 = vmatmul.f32.vlgmr.msrb.gmra.mxu2 %v16975_v36  ;;  %v6449_v51 = vpop.f32.mrf.mxu2  ;;  %v22581_v21 = vand.u32 4294901760, %v17808_v1  ;;  %v7795_v18 = vand.u32 4294901760, %v7794_v55  ;;  %v6146_v0 = vsel %vm6139_vm10, %v17767_v39, %v16655_v48 }
 0x79a   :  { %7692 = vmatmul.f32.vlgmr.msrb.gmra.mxu1 %v16881_v44  ;;  %7905 = vmatpush.msra.mxu2 %v22580_v41  ;;  %v6450_v38 = vadd.f32 %v6449_v51, %v6405_v52  ;;  %v7801_v52 = vand.u32 4294901760, %v7800_v29  ;;  %v6117_v41 = vsel %vm207_vm5, %v17776_v57, %v16598_v40  ;;  %v22584_v48 = vand.u32 4294901760, %v17866_v35 }
 0x79b   :  { %7784 = vmatpush.msrb.mxu3 %v7783_v61  ;;  %v17960_v27 = vadd.f32 %v6569_v7, %v6536_v22  ;;  %7833 = vmatpush.msra.mxu0 %v17866_v35  ;;  %v17976_v7 = vand.u32 4294901760, %v6203_v54  ;;  %v6174_v61 = vsel %vm4612_vm13, %v17734_v28, %v16666_v56  ;;  %v6539_v22 = vpop.f32.mrf.mxu0 }
 0x79c   :  { %7865 = vmatpush.msra.mxu1 %v17761_v32  ;;  %7909 = vmatpush.msra.mxu2 %v22581_v21  ;;  %v6488_v1 = vadd.f32 %v6487_v62, %v6450_v38  ;;  %v6573_v56 = vpop.f32.mrf.mxu1  ;;  %v18001_v14 = vand.u32 4294901760, %v6174_v61  ;;  %v22585_v38 = vand.u32 4294901760, %v17905_v4 }
 0x79d   :  { %7662 = vmatmul.f32.gmra.mxu0 %v16934_v3  ;;  %v12697_v33 = vmul.f32 -1.442695, %v17960_v27  ;;  %7790 = vmatpush.msrb.mxu3 %v7789_v53  ;;  %v17995_v28 = vsub.f32 %v6203_v54, %v17976_v7  ;;  %v18010_v54 = vand.u32 4294901760, %v6146_v0  ;;  %v18015_v53 = vand.u32 4294901760, %v6117_v41 }
 0x79e   :  { %7836 = vmatpush.msra.mxu0 %v17884_v10  ;;  %7867 = vmatpush.msra.mxu1 %v17781_v25  ;;  %v6540_v55 = vadd.f32 %v6539_v22, %v6488_v1  ;;  %v18023_v21 = vsub.f32 %v6174_v61, %v18001_v14  ;;  %v6019_v1 = vsel %vm4576_vm11, %v17845_v34, %v16892_v26 }
 0x79f   :  { %7913 = vmatpush.msra.mxu2 %v22582_v37  ;;  %12760 = vpow2.f32 %v12697_v33  ;;  %7796 = vmatpush.msrb.mxu3 %v7795_v18  ;;  %v8032_v35 = vand.u32 4294901760, %v17995_v28  ;;  %v18033_v33 = vsub.f32 %v6146_v0, %v18010_v54  ;;  %v18039_v10 = vsub.f32 %v6117_v41, %v18015_v53 }
 0x7a0   :  { %7839 = vmatpush.msra.mxu0 %v17905_v4  ;;  %7869 = vmatpush.msra.mxu1 %v17801_v2  ;;  %v18005_v51 = vadd.f32 %v6573_v56, %v6540_v55 }
 0x7a1   :  { %7917 = vmatpush.msra.mxu2 %v22583_v16  ;;  %7802 = vmatpush.msrb.mxu3 %v7801_v52  ;;  %v6607_v57 = vpop.f32.mrf.mxu2  ;;  %v8033_v4 = vsub.f32 %v17995_v28, %v8032_v35  ;;  %v18091_v52 = vand.u32 4294901760, %v6019_v1 }
 0x7a2   :  { %7842 = vmatpush.msra.mxu0 %v17919_v50  ;;  %7871 = vmatpush.msra.mxu1 %v17813_v49  ;;  %v12704_v40 = vmul.f32 -1.442695, %v18005_v51 }
 0x7a3   :  { %7738 = vmatmul.f32.gmra.mxu2 %v17062_v17  ;;  %7804 = vmatmul.f32.vlgmr.msrb.gmra.mxu3 %v16881_v44  ;;  %v6681_v18 = vpop.f32.mrf.mxu3  ;;  %v8034_v61 = vand.u32 4294901760, %v8033_v4 }
 0x7a4   :  { %7921 = vmatpush.msra.mxu2 %v22584_v48  ;;  %7955 = vmatpush.msra.mxu3 %v17761_v32  ;;  %12762 = vpow2.f32 %v12704_v40  ;;  %v6608_v32 = vadd.f32 %v6607_v57, %v17912_v12 }
 0x7a5   :  { %v12761_v39 = vpop.eup %12760  ;;  %7696 = vmatmul.f32.gmra.mxu1 %v16934_v3  ;;  %7845 = vmatpush.msra.mxu0 %v17930_v11  ;;  %v6725_v62 = vpop.f32.mrf.mxu0 }
 0x7a6   :  { %7873 = vmatpush.msra.mxu1 %v17834_v13  ;;  %v18019_v29 = vadd.f32 1.0, %v12761_v39  ;;  %7925 = vmatpush.msra.mxu2 %v7781_v58  ;;  %v18048_v58 = vand.u32 4294901760, %v16606_v31 }
 0x7a7   :  { %7957 = vmatpush.msra.mxu3 %v17781_v25  ;;  %7989 = vmatpush.msrb.mxu0 %v17976_v7  ;;  %v6076_v25 = vsel %vm171_vm4, %v17791_v19, %v16847_v15  ;;  %v8038_v15 = vand.u32 4294901760, %v18023_v21  ;;  %v6048_v19 = vsel %vm6047_vm9, %v17828_v47, %v16894_v20 }
 0x7a8   :  { %7875 = vmatpush.msra.mxu1 %v17850_v46  ;;  %12764 = vrcp.f32 %v18019_v29  ;;  %7848 = vmatmul.f32.vlgmr.msra.gmra.mxu0 %v16897_v9  ;;  %v18067_v50 = vand.u32 4294901760, %v6076_v25  ;;  %v18080_v26 = vsub.f32 %v16606_v31, %v18048_v58  ;;  %v18082_v34 = vand.u32 4294901760, %v6048_v19 }
 0x7a9   :  { %7929 = vmatpush.msra.mxu2 %v22585_v38  ;;  %7959 = vmatpush.msra.mxu3 %v17801_v2  ;;  %v6682_v2 = vadd.f32 %v6681_v18, %v6608_v32  ;;  %v6615_v47 = vpop.f32.mrf.mxu2  ;;  %v8039_v11 = vsub.f32 %v18023_v21, %v8038_v15  ;;  %v5991_v31 = vsel %vm5990_vm12, %v17858_v24, %v16883_v30  ;;  %vm8323_vm15 = vweird.f32 %v18019_v29 }
 0x7aa   :  { %7991 = vmatpush.msrb.mxu0 %v18001_v14  ;;  %7877 = vmatpush.msra.mxu1 %v17877_v63  ;;  %v12763_v37 = vpop.eup %12762  ;;  %v6616_v16 = vadd.f32 %v6615_v47, %v17941_v6  ;;  %v18101_v55 = vsub.f32 %v6076_v25, %v18067_v50  ;;  %v8056_v41 = vand.u32 4294901760, %v18080_v26  ;;  %v18115_v48 = vand.u32 4294901760, %v5991_v31 }
 0x7ab   :  { %7933 = vmatpush.msra.mxu2 %v7793_v45  ;;  %7961 = vmatpush.msra.mxu3 %v17813_v49  ;;  %v8044_v45 = vand.u32 4294901760, %v18033_v33  ;;  %v8050_v49 = vand.u32 4294901760, %v18039_v10  ;;  %v6726_v22 = vadd.f32 %v6725_v62, %v6682_v2  ;;  %v18108_v30 = vadd.f32 1.0, %v12763_v37 }
 0x7ac   :  { %7993 = vmatpush.msrb.mxu0 %v18010_v54  ;;  %7879 = vmatpush.msra.mxu1 %v17892_v42  ;;  %v8040_v39 = vand.u32 4294901760, %v8039_v11  ;;  %v18126_v18 = vsub.f32 %v6019_v1, %v18091_v52  ;;  %v8062_v4 = vand.u32 4294901760, %v18101_v55  ;;  %v18137_v2 = vsub.f32 %v5991_v31, %v18115_v48 }
 0x7ad   :  { %7808 = vmatmul.f32.gmra.mxu3 %v16934_v3  ;;  %7937 = vmatpush.msra.mxu2 %v7799_v59  ;;  %v6762_v59 = vpop.f32.mrf.mxu1  ;;  %v8045_v0 = vsub.f32 %v18033_v33, %v8044_v45  ;;  %v8051_v24 = vsub.f32 %v18039_v10, %v8050_v49  ;;  %v6685_v57 = vpop.f32.mrf.mxu3  ;;  %12766 = vrcp.f32 %v18108_v30  ;;  %vm8428_vm6 = vweird.f32 %v18108_v30 }
 0x7ae   :  { %v18072_v20 = vpop.eup %12764  ;;  %7963 = vmatpush.msra.mxu3 %v17834_v13  ;;  %7995 = vmatpush.msrb.mxu0 %v18015_v53  ;;  %v6763_v38 = vadd.f32 %v6762_v59, %v6726_v22  ;;  %v6686_v25 = vadd.f32 %v6685_v57, %v6616_v16  ;;  %v8327_v59 = vand.u32 2147483647, %v18019_v29  ;;  %v8063_v31 = vsub.f32 %v18101_v55, %v8062_v4 }
 0x7af   :  { %7881 = vmatpush.msra.mxu1 %v17902_v43  ;;  %v8319_v13 = vmul.f32 %v18072_v20, %v18019_v29  ;;  %7939 = vmatmul.f32.vlgmr.msra.gmra.mxu2 %v16881_v44  ;;  %v6730_v32 = vpop.f32.mrf.mxu0  ;;  %v8046_v62 = vand.u32 4294901760, %v8045_v0  ;;  %vm8324_vm14 = vweird.f32 %v18072_v20  ;;  %v8074_v22 = vand.u32 4294901760, %v18126_v18 }
 0x7b0   :  { %7885 = vmatmul.f32.vlgmr.msra.gmra.mxu1 %v16923_v60  ;;  %8102 = vmatpush.msrb.mxu2 %v17995_v28  ;;  %v6731_v11 = vadd.f32 %v6730_v32, %v6686_v25  ;;  %vm18155_vm0 = vmor %vm8323_vm15, %vm8324_vm14  ;;  %vm8328_vm1 = vcmp.eq.f32.partialorder %v8327_v59, 8.507059e+37 }
 0x7b1   :  { %7965 = vmatpush.msra.mxu3 %v17850_v46  ;;  %v8320_v56 = vsub.f32 1.0, %v8319_v13  ;;  %7997 = vmatpush.msrb.mxu0 %v18048_v58  ;;  %v18118_v46 = vsub.f32 %v6048_v19, %v18082_v34  ;;  %v8057_v19 = vsub.f32 %v18080_v26, %v8056_v41 }
 0x7b2   :  { %8035 = vmatpush.msrb.mxu1 %v8034_v61  ;;  %7853 = vmatmul.f32.gmra.mxu0 %v16966_v23  ;;  %v8329_v61 = vand.u32 2147483648, %v18019_v29 }
 0x7b3   :  { %8105 = vmatpush.msrb.mxu2 %v18023_v21  ;;  %v8321_v40 = vmul.f32 %v18072_v20, %v8320_v56  ;;  %7967 = vmatpush.msra.mxu3 %v17877_v63  ;;  %v8052_v63 = vand.u32 4294901760, %v8051_v24  ;;  %v8068_v1 = vand.u32 4294901760, %v18118_v46  ;;  %v8058_v29 = vand.u32 4294901760, %v8057_v19  ;;  %v18161_v16 = vpop.eup %12766 }
 0x7b4   :  { %7999 = vmatpush.msrb.mxu0 %v18067_v50  ;;  %8041 = vmatpush.msrb.mxu1 %v8040_v39  ;;  %v8080_v24 = vand.u32 4294901760, %v18137_v2  ;;  %vm8429_vm2 = vweird.f32 %v18161_v16 }
 0x7b5   :  { %8108 = vmatpush.msrb.mxu2 %v18033_v33  ;;  %7969 = vmatpush.msra.mxu3 %v17892_v42  ;;  %v8322_v37 = vadd.f32 %v18072_v20, %v8321_v40  ;;  %v6816_v42 = vpop.f32.mrf.mxu2  ;;  %v8069_v56 = vsub.f32 %v18118_v46, %v8068_v1  ;;  %v8330_v40 = vor.u32 1.1754944e-38, %v8329_v61  ;;  %vm18245_vm7 = vmor %vm8428_vm6, %vm8429_vm2 }
 0x7b6   :  { %8001 = vmatpush.msrb.mxu0 %v18082_v34  ;;  %8047 = vmatpush.msrb.mxu1 %v8046_v62  ;;  %v6768_v47 = vpop.f32.mrf.mxu1  ;;  %v6817_v13 = vadd.f32 %v6816_v42, %v6763_v38  ;;  %v8075_v38 = vsub.f32 %v18126_v18, %v8074_v22  ;;  %v8081_v42 = vsub.f32 %v18137_v2, %v8080_v24 }
 0x7b7   :  { %8111 = vmatpush.msrb.mxu2 %v18039_v10  ;;  %7971 = vmatpush.msra.mxu3 %v17902_v43  ;;  %v8326_v0 = vsel %vm18155_vm0, %v18072_v20, %v8322_v37  ;;  %v6850_v39 = vpop.f32.mrf.mxu3  ;;  %v6769_v57 = vadd.f32 %v6768_v47, %v6731_v11  ;;  %v8064_v20 = vand.u32 4294901760, %v8063_v31  ;;  %v8070_v37 = vand.u32 4294901760, %v8069_v56 }
 0x7b8   :  { %8003 = vmatpush.msrb.mxu0 %v18091_v52  ;;  %8053 = vmatpush.msrb.mxu1 %v8052_v63  ;;  %v18173_v32 = vadd.f32 %v6850_v39, %v6817_v13  ;;  %v8331_v62 = vsel %vm8328_vm1, %v8330_v40, %v8326_v0  ;;  %v18183_v63 = vld [vmem:[%s21483_s1] sm:$0xff]  ;;  %v8076_v11 = vand.u32 4294901760, %v8075_v38  ;;  %v8082_v21 = vand.u32 4294901760, %v8081_v42 }
 0x7b9   :  { %7943 = vmatmul.f32.gmra.mxu2 %v16934_v3  ;;  %7973 = vmatmul.f32.vlgmr.msra.gmra.mxu3 %v16881_v44  ;;  %v8544_v61 = vperm.slane %v18183_v63, 0 }
 0x7ba   :  { %8114 = vmatpush.msrb.mxu2 %v18080_v26  ;;  %8146 = vmatpush.msrb.mxu3 %v17976_v7  ;;  %v12698_v19 = vmul.f32 -1.442695, %v18173_v32 }
 0x7bb   :  { %7891 = vmatmul.f32.gmra.mxu1 %v16989_v5  ;;  %8005 = vmatpush.msrb.mxu0 %v18115_v48  ;;  %v6888_v25 = vpop.f32.mrf.mxu0 }
 0x7bc   :  { %8059 = vmatpush.msrb.mxu1 %v8058_v29  ;;  %8011 = vmatmul.f32.vlgmr.msrb.gmra.mxu0 %v16975_v36  ;;  %v8424_v36 = vmul.f32 %v18161_v16, %v18108_v30  ;;  %12768 = vpow2.f32 %v12698_v19  ;;  %v6889_v33 = vadd.f32 %v6888_v25, %v17912_v12 }
 0x7bd   :  { %8117 = vmatpush.msrb.mxu2 %v18101_v55  ;;  %8148 = vmatpush.msrb.mxu3 %v18001_v14  ;;  %v6820_v47 = vpop.f32.mrf.mxu2 }
 0x7be   :  { %8186 = vmatpush.msra.mxu0 %v8032_v35  ;;  %8065 = vmatpush.msrb.mxu1 %v8064_v20  ;;  %v6821_v28 = vadd.f32 %v6820_v47, %v6769_v57  ;;  %v8528_v35 = vmul.f32 %v8331_v62, %v17960_v27  ;;  %v8425_v59 = vsub.f32 1.0, %v8424_v36 }
 0x7bf   :  { %8120 = vmatpush.msrb.mxu2 %v18118_v46  ;;  %8150 = vmatpush.msrb.mxu3 %v18010_v54 }
 0x7c0   :  { %8190 = vmatpush.msra.mxu0 %v8038_v15  ;;  %8071 = vmatpush.msrb.mxu1 %v8070_v37  ;;  %v18211_v31 = vmul.f32 %v8544_v61, %v8528_v35  ;;  %v8426_v43 = vmul.f32 %v18161_v16, %v8425_v59 }
 0x7c1   :  { %8123 = vmatpush.msrb.mxu2 %v18126_v18  ;;  %v6962_v13 = vpop.f32.mrf.mxu1  ;;  %8152 = vmatpush.msrb.mxu3 %v18015_v53 }
 0x7c2   :  { %8194 = vmatpush.msra.mxu0 %v8044_v45  ;;  %8077 = vmatpush.msrb.mxu1 %v8076_v11  ;;  %v6854_v15 = vpop.f32.mrf.mxu3  ;;  %v12769_v45 = vpop.eup %12768 }
 0x7c3   :  { %7977 = vmatmul.f32.gmra.mxu3 %v16934_v3  ;;  %8126 = vmatpush.msrb.mxu2 %v18137_v2  ;;  %v18207_v27 = vadd.f32 %v6854_v15, %v6821_v28  ;;  %v18222_v0 = vadd.f32 1.0, %v12769_v45 }
 0x7c4   :  { %8154 = vmatpush.msrb.mxu3 %v18048_v58  ;;  %8198 = vmatpush.msra.mxu0 %v8050_v49 }
 0x7c5   :  { %8083 = vmatpush.msrb.mxu1 %v8082_v21  ;;  %8129 = vmatmul.f32.vlgmr.msrb.gmra.mxu2 %v16897_v9  ;;  %v12705_v29 = vmul.f32 -1.442695, %v18207_v27  ;;  %v6896_v10 = vpop.f32.mrf.mxu0  ;;  %v6963_v9 = vadd.f32 %v6962_v13, %v6889_v33  ;;  %v8344_v19 = vand.u32 2147483648, %v18222_v0  ;;  %vm8338_vm15 = vweird.f32 %v18222_v0 }
 0x7c6   :  { %8019 = vmatmul.f32.gmra.mxu0 %v17062_v17  ;;  %8085 = vmatmul.f32.vlgmr.msrb.gmra.mxu1 %v16881_v44  ;;  %v8427_v17 = vadd.f32 %v18161_v16, %v8426_v43  ;;  %v6897_v39 = vadd.f32 %v6896_v10, %v17941_v6  ;;  %v8342_v37 = vand.u32 2147483647, %v18222_v0  ;;  %v8545_v33 = vperm.slane %v18183_v63, 1 }
 0x7c7   :  { %8156 = vmatpush.msrb.mxu3 %v18067_v50  ;;  %8202 = vmatpush.msra.mxu0 %v8056_v41  ;;  %12770 = vpow2.f32 %v12705_v29  ;;  %v7006_v49 = vpop.f32.mrf.mxu2  ;;  %v8432_v41 = vand.u32 2147483647, %v18108_v30  ;;  %v8345_v28 = vor.u32 1.1754944e-38, %v8344_v19 }
 0x7c8   :  { %8236 = vmatpush.msra.mxu1 %v17976_v7  ;;  %12772 = vrcp.f32 %v18222_v0  ;;  %8810 = vrot.lane.b32.xlu1 %v18211_v31, %s12839_s16  ;;  %v8434_v7 = vand.u32 2147483648, %v18108_v30  ;;  %v7007_v55 = vadd.f32 %v7006_v49, %v6963_v9  ;;  %v8431_v30 = vsel %vm18245_vm7, %v18161_v16, %v8427_v17 }
 0x7c9   :  { %8158 = vmatpush.msrb.mxu3 %v18082_v34  ;;  %8206 = vmatpush.msra.mxu0 %v8062_v4  ;;  %vm8433_vm8 = vcmp.eq.f32.partialorder %v8432_v41, 8.507059e+37  ;;  %vm8343_vm1 = vcmp.eq.f32.partialorder %v8342_v37, 8.507059e+37 }
 0x7ca   :  { %8238 = vmatpush.msra.mxu1 %v18001_v14  ;;  %8866 = vrot.lane.b32.xlu0 %v18211_v31, %s12850_s15 }
 0x7cb   :  { %8160 = vmatpush.msrb.mxu3 %v18091_v52  ;;  %v6966_v26 = vpop.f32.mrf.mxu1  ;;  %8210 = vmatpush.msra.mxu0 %v8068_v1  ;;  %v8435_v1 = vor.u32 1.1754944e-38, %v8434_v7 }
 0x7cc   :  { %8240 = vmatpush.msra.mxu1 %v18010_v54  ;;  %8922 = vrot.lane.b32.xlu2 %v18211_v31, %s12846_s11  ;;  %v6967_v2 = vadd.f32 %v6966_v26, %v6897_v39 }
 0x7cd   :  { %8162 = vmatpush.msrb.mxu3 %v18115_v48  ;;  %v12771_v4 = vpop.eup %12770  ;;  %8214 = vmatpush.msra.mxu0 %v8074_v22  ;;  %v8436_v18 = vsel %vm8433_vm8, %v8435_v1, %v8431_v30 }
 0x7ce   :  { %8242 = vmatpush.msra.mxu1 %v18015_v53  ;;  %v7043_v54 = vpop.f32.mrf.mxu3  ;;  %v18258_v46 = vpop.eup %12772  ;;  %8134 = vmatmul.f32.gmra.mxu2 %v16966_v23  ;;  %v18262_v56 = vadd.f32 1.0, %v12771_v4  ;;  %v8535_v16 = vmul.f32 %v8436_v18, %v18005_v51 }
 0x7cf   :  { %8166 = vmatmul.f32.vlgmr.msrb.gmra.mxu3 %v16923_v60  ;;  %v7044_v40 = vadd.f32 %v7043_v54, %v7007_v55  ;;  %8089 = vmatmul.f32.gmra.mxu1 %v16934_v3  ;;  %v8334_v53 = vmul.f32 %v18258_v46, %v18222_v0  ;;  %v7097_v60 = vpop.f32.mrf.mxu0  ;;  %vm8339_vm14 = vweird.f32 %v18258_v46 }
 0x7d0   :  { %8218 = vmatpush.msra.mxu0 %v8080_v24  ;;  %8244 = vmatpush.msra.mxu1 %v18048_v58  ;;  %12774 = vrcp.f32 %v18262_v56  ;;  %v18289_v51 = vmul.f32 %v8544_v61, %v8535_v16  ;;  %vm8340_vm0 = vmor %vm8338_vm15, %vm8339_vm14  ;;  %v8449_v45 = vand.u32 2147483648, %v18262_v56  ;;  %vm8443_vm6 = vweird.f32 %v18262_v56 }
 0x7d1   :  { %8220 = vmatmul.f32.vlgmr.msra.gmra.mxu0 %v16881_v44  ;;  %v8335_v23 = vsub.f32 1.0, %v8334_v53  ;;  %8628 = vrot.lane.b32.xlu1 %v18211_v31, %s12848_s13  ;;  %v7098_v22 = vadd.f32 %v7097_v60, %v7044_v40  ;;  %v8546_v40 = vperm.slane %v18183_v63, 2 }
 0x7d2   :  { %8246 = vmatpush.msra.mxu1 %v18067_v50  ;;  %8684 = vrot.lane.b32.xlu0 %v18211_v31, %s12852_s19  ;;  %v7011_v24 = vpop.f32.mrf.mxu2  ;;  %v8450_v0 = vor.u32 1.1754944e-38, %v8449_v45 }
 0x7d3   :  { %v8336_v57 = vmul.f32 %v18258_v46, %v8335_v23  ;;  %v7012_v50 = vadd.f32 %v7011_v24, %v6967_v2 }
 0x7d4   :  { %8248 = vmatpush.msra.mxu1 %v18082_v34  ;;  %8740 = vrot.lane.b32.xlu2 %v18211_v31, %s12841_s20 }
 0x7d5   :  { %v7131_v58 = vpop.f32.mrf.mxu1 }
 0x7d6   :  { %v18283_v20 = vadd.f32 %v7131_v58, %v7098_v22  ;;  %v12775_v38 = vpop.eup %12774  ;;  %8250 = vmatpush.msra.mxu1 %v18091_v52  ;;  %v8337_v52 = vadd.f32 %v18258_v46, %v8336_v57 }
 0x7d7   :  { %8172 = vmatmul.f32.gmra.mxu3 %v16989_v5  ;;  %v8439_v34 = vmul.f32 %v12775_v38, %v18262_v56  ;;  %vm8444_vm2 = vweird.f32 %v12775_v38 }
 0x7d8   :  { %v12699_v25 = vmul.f32 -1.442695, %v18283_v20  ;;  %v7049_v62 = vpop.f32.mrf.mxu3  ;;  %8252 = vmatpush.msra.mxu1 %v18115_v48  ;;  %v8341_v42 = vsel %vm8340_vm0, %v18258_v46, %v8337_v52  ;;  %vm8445_vm7 = vmor %vm8443_vm6, %vm8444_vm2 }
 0x7d9   :  { %8224 = vmatmul.f32.gmra.mxu0 %v16934_v3  ;;  %v7050_v36 = vadd.f32 %v7049_v62, %v7012_v50  ;;  %8254 = vmatmul.f32.vlgmr.msra.gmra.mxu1 %v16881_v44  ;;  %v8440_v5 = vsub.f32 1.0, %v8439_v34  ;;  %v7101_v48 = vpop.f32.mrf.mxu0  ;;  %v8346_v13 = vsel %vm8343_vm1, %v8345_v28, %v8341_v42 }
 0x7da   :  { %12776 = vpow2.f32 %v12699_v25  ;;  %8868 = vrot.lane.b32.xlu1 %v18289_v51, %s12850_s15  ;;  %8924 = vrot.lane.b32.xlu0 %v18289_v51, %s12846_s11  ;;  %v8529_v43 = vmul.f32 %v8346_v13, %v18173_v32 }
 0x7db   :  { %v7102_v44 = vadd.f32 %v7101_v48, %v7050_v36  ;;  %v8441_v47 = vmul.f32 %v12775_v38, %v8440_v5 }
 0x7dc   :  { %8572 = vrot.lane.b32.xlu2 %v18211_v31, %s12853_s21  ;;  %v18323_v10 = vmul.f32 %v8545_v33, %v8529_v43 }
 0x7dd   :  { %v8442_v21 = vadd.f32 %v12775_v38, %v8441_v47  ;;  %v18325_v9 = vpop.f32.mrf.mxu2 }
 0x7df   :  { %v7135_v35 = vpop.f32.mrf.mxu1  ;;  %v8446_v29 = vsel %vm8445_vm7, %v12775_v38, %v8442_v21 }
 0x7e0   :  { %v12777_v61 = vpop.eup %12776  ;;  %v18308_v11 = vadd.f32 %v7135_v35, %v7102_v44 }
 0x7e1   :  { %v8306_v59 = vadd.f32 1.0, %v12777_v61  ;;  %8258 = vmatmul.f32.gmra.mxu1 %v16934_v3  ;;  %v8447_v3 = vand.u32 2147483647, %v18262_v56 }
 0x7e2   :  { %v12706_v15 = vmul.f32 -1.442695, %v18308_v11  ;;  %8686 = vrot.lane.b32.xlu1 %v18289_v51, %s12852_s19  ;;  %8742 = vrot.lane.b32.xlu0 %v18289_v51, %s12841_s20 }
 0x7e3   :  { %12778 = vrcp.f32 %v8306_v59  ;;  %vm8448_vm8 = vcmp.eq.f32.partialorder %v8447_v3, 8.507059e+37  ;;  %v8359_v55 = vand.u32 2147483648, %v8306_v59  ;;  %v8357_v54 = vand.u32 2147483647, %v8306_v59 }
 0x7e4   :  { %12780 = vpow2.f32 %v12706_v15  ;;  %8812 = vrot.lane.b32.xlu2 %v18289_v51, %s12839_s16  ;;  %v8451_v49 = vsel %vm8448_vm8, %v8450_v0, %v8446_v29  ;;  %vm8353_vm15 = vweird.f32 %v8306_v59 }
 0x7e5   :  { %v8536_v41 = vmul.f32 %v8451_v49, %v18207_v27  ;;  %v18332_v4 = vpop.f32.mrf.mxu3  ;;  %v18336_v46 = vpop.f32.mrf.mxu0  ;;  %v8360_v39 = vor.u32 1.1754944e-38, %v8359_v55  ;;  %vm8358_vm1 = vcmp.eq.f32.partialorder %v8357_v54, 8.507059e+37 }
 0x7e7   :  { %v18338_v1 = vmul.f32 %v8545_v33, %v8536_v41  ;;  %v18341_v53 = vpop.f32.mrf.mxu2 }
 0x7e9   :  { %v12779_v17 = vpop.eup %12778 }
 0x7ea   :  { %v12781_v7 = vpop.eup %12780  ;;  %v8349_v32 = vmul.f32 %v12779_v17, %v8306_v59  ;;  %8870 = vrot.lane.b32.xlu1 %v18323_v10, %s12850_s15  ;;  %8574 = vrot.lane.b32.xlu0 %v18289_v51, %s12853_s21  ;;  %vm8354_vm14 = vweird.f32 %v12779_v17 }
 0x7eb   :  { %v8313_v26 = vadd.f32 1.0, %v12781_v7  ;;  %vm8355_vm0 = vmor %vm8353_vm15, %vm8354_vm14 }
 0x7ec   :  { %v8350_v14 = vsub.f32 1.0, %v8349_v32  ;;  %8630 = vrot.lane.b32.xlu2 %v18289_v51, %s12848_s13 }
 0x7ed   :  { %12782 = vrcp.f32 %v8313_v26  ;;  %v18348_v2 = vpop.f32.mrf.mxu1  ;;  %v8464_v58 = vand.u32 2147483648, %v8313_v26  ;;  %v8462_v50 = vand.u32 2147483647, %v8313_v26  ;;  %vm8458_vm6 = vweird.f32 %v8313_v26 }
 0x7ee   :  { %v8351_v30 = vmul.f32 %v12779_v17, %v8350_v14 }
 0x7ef   :  { %v18354_v57 = vpop.f32.mrf.mxu3  ;;  %v18356_v34 = vpop.f32.mrf.mxu0  ;;  %vm8463_vm8 = vcmp.eq.f32.partialorder %v8462_v50, 8.507059e+37 }
 0x7f0   :  { %v8352_v56 = vadd.f32 %v12779_v17, %v8351_v30 }
 0x7f1   :  { %v18362_v36 = vpop.f32.mrf.mxu2 }
 0x7f2   :  { %v8356_v27 = vsel %vm8355_vm0, %v12779_v17, %v8352_v56  ;;  %8928 = vrot.lane.b32.xlu1 %v18338_v1, %s12846_s11  ;;  %8926 = vrot.lane.b32.xlu0 %v18323_v10, %s12846_s11 }
 0x7f3   :  { %v12783_v18 = vpop.eup %12782  ;;  %v8361_v60 = vsel %vm8358_vm1, %v8360_v39, %v8356_v27 }
 0x7f4   :  { %v8530_v23 = vmul.f32 %v8361_v60, %v18283_v20  ;;  %v8454_v22 = vmul.f32 %v12783_v18, %v8313_v26  ;;  %8814 = vrot.lane.b32.xlu2 %v18323_v10, %s12839_s16  ;;  %vm8459_vm2 = vweird.f32 %v12783_v18  ;;  %v8465_v20 = vor.u32 1.1754944e-38, %v8464_v58 }
 0x7f5   :  { %vm8460_vm7 = vmor %vm8458_vm6, %vm8459_vm2 }
 0x7f6   :  { %v18352_v16 = vmul.f32 %v8546_v40, %v8530_v23  ;;  %v8455_v24 = vsub.f32 1.0, %v8454_v22 }
 0x7f7   :  { %v18367_v19 = vpop.f32.mrf.mxu1 }
 0x7f8   :  { %22590 = vst [vmem:[#allocation78_spill] sm:$0xff] %v18352_v16  ;;  %v8456_v38 = vmul.f32 %v12783_v18, %v8455_v24 }
 0x7f9   :  { %v18373_v44 = vpop.f32.mrf.mxu0 }
 0x7fa   :  { %v8457_v25 = vadd.f32 %v12783_v18, %v8456_v38  ;;  %8874 = vrot.lane.b32.xlu1 %v18352_v16, %s12850_s15  ;;  %8816 = vrot.lane.b32.xlu0 %v18338_v1, %s12839_s16  ;;  %v18371_v37 = vpop.f32.mrf.mxu3 }
 0x7fb   :  { %v18381_v42 = vpop.f32.mrf.mxu2 }
 0x7fc   :  { %v8461_v62 = vsel %vm8460_vm7, %v12783_v18, %v8457_v25  ;;  %8872 = vrot.lane.b32.xlu2 %v18338_v1, %s12850_s15 }
 0x7fd   :  { %v8466_v52 = vsel %vm8463_vm8, %v8465_v20, %v8461_v62 }
 0x7fe   :  { %v8537_v5 = vmul.f32 %v8466_v52, %v18308_v11 }
 0x800   :  { %v18369_v48 = vmul.f32 %v8546_v40, %v8537_v5 }
 0x801   :  { %v18383_v47 = vpop.f32.mrf.mxu1 }
 0x802   :  { %22591 = vst [vmem:[#allocation20_spill] sm:$0xff] %v18369_v48  ;;  %8932 = vrot.lane.b32.xlu1 %v18369_v48, %s12846_s11  ;;  %8876 = vrot.lane.b32.xlu0 %v18369_v48, %s12850_s15 }
 0x804   :  { %8930 = vrot.lane.b32.xlu2 %v18352_v16, %s12846_s11  ;;  %v18385_v28 = vpop.f32.mrf.mxu3 }
 0x805   :  { %v18387_v35 = vpop.f32.mrf.mxu0 }
 0x806   :  { %v18389_v61 = vpop.f32.mrf.mxu2 }
 0x80d   :  { %v18391_v11 = vpop.f32.mrf.mxu1 }
 0x80f   :  { %v18395_v59 = vpop.f32.mrf.mxu0 }
 0x810   :  { %v18393_v13 = vpop.f32.mrf.mxu3 }
 0x811   :  { %v18397_v21 = vpop.f32.mrf.mxu2 }
 0x817   :  { %v18399_v15 = vpop.f32.mrf.mxu1 }
 0x81a   :  { %v18401_v33 = vpop.f32.mrf.mxu3  ;;  %v18403_v45 = vpop.f32.mrf.mxu0 }
 0x81c   :  { %v18405_v43 = vpop.f32.mrf.mxu2 }
 0x822   :  { %v18407_v3 = vpop.f32.mrf.mxu1 }
 0x825   :  { %v18413_v17 = vpop.f32.mrf.mxu0 }
 0x826   :  { %v18409_v29 = vpop.permute.xlu2 %8922  ;;  %v18411_v0 = vpop.f32.mrf.mxu3  ;;  %22594 = vst [vmem:[#allocation65_spill] sm:$0xff] %v18413_v17 }
 0x827   :  { %22592 = vst [vmem:[#allocation26_spill] sm:$0xff] %v18409_v29  ;;  %v7739_v49 = vpop.f32.mrf.mxu2 }
 0x828   :  { %22593 = vst [vmem:[#allocation122_spill] sm:$0xff] %v18411_v0  ;;  %v7740_v30 = vadd.f32 %v7739_v49, %v17941_v6 }
 0x82d   :  { %v18417_v32 = vpop.f32.mrf.mxu1 }
 0x82e   :  { %v18415_v7 = vpop.permute.xlu2 %8740  ;;  %22596 = vst [vmem:[#allocation55_spill] sm:$0xff] %v18417_v32 }
 0x82f   :  { %22595 = vst [vmem:[#allocation51_spill] sm:$0xff] %v18415_v7  ;;  %v7854_v41 = vpop.f32.mrf.mxu0 }
 0x830   :  { %v7809_v26 = vpop.f32.mrf.mxu3 }
 0x831   :  { %v7810_v56 = vadd.f32 %v7809_v26, %v7740_v30 }
 0x832   :  { %v18421_v55 = vpop.f32.mrf.mxu2 }
 0x833   :  { %22598 = vst [vmem:[#allocation32_spill] sm:$0xff] %v18421_v55  ;;  %v7855_v60 = vadd.f32 %v7854_v41, %v7810_v56 }
 0x836   :  { %v18419_v14 = vpop.permute.xlu2 %8572 }
 0x837   :  { %22597 = vst [vmem:[#allocation56_spill] sm:$0xff] %v18419_v14 }
 0x838   :  { %v7892_v54 = vpop.f32.mrf.mxu1 }
 0x839   :  { %v8012_v18 = vpop.f32.mrf.mxu0  ;;  %v7893_v24 = vadd.f32 %v7892_v54, %v7855_v60 }
 0x83a   :  { %v18424_v39 = vpop.permute.xlu1 %8810  ;;  %v8013_v41 = vadd.f32 %v8012_v18, %v17912_v12 }
 0x83b   :  { %22599 = vst [vmem:[#allocation60_spill] sm:$0xff] %v18424_v39 }
 0x83c   :  { %v18426_v27 = vpop.f32.mrf.mxu3  ;;  %v18428_v40 = vpop.permute.xlu0 %8866 }
 0x83d   :  { %22600 = vst [vmem:[#allocation123_spill] sm:$0xff] %v18426_v27  ;;  %v7944_v22 = vpop.f32.mrf.mxu2 }
 0x83e   :  { %22601 = vst [vmem:[#allocation121_spill] sm:$0xff] %v18428_v40  ;;  %v18430_v23 = vpop.permute.xlu2 %8812  ;;  %v7945_v50 = vadd.f32 %v7944_v22, %v7893_v24 }
 0x83f   :  { %22602 = vst [vmem:[#allocation41_spill] sm:$0xff] %v18430_v23 }
 0x843   :  { %v8086_v58 = vpop.f32.mrf.mxu1  ;;  %v18432_v38 = vpop.permute.xlu1 %8628 }
 0x844   :  { %22603 = vst [vmem:[#allocation52_spill] sm:$0xff] %v18432_v38  ;;  %v18434_v25 = vpop.permute.xlu0 %8684  ;;  %v8020_v52 = vpop.f32.mrf.mxu0  ;;  %v8087_v54 = vadd.f32 %v8086_v58, %v8013_v41 }
 0x845   :  { %22604 = vst [vmem:[#allocation68_spill] sm:$0xff] %v18434_v25 }
 0x846   :  { %v7978_v20 = vpop.f32.mrf.mxu3  ;;  %v18438_v5 = vpop.permute.xlu2 %8630 }
 0x847   :  { %v18436_v62 = vadd.f32 %v7978_v20, %v7945_v50  ;;  %22606 = vst [vmem:[#allocation110_spill] sm:$0xff] %v18438_v5  ;;  %v8021_v20 = vadd.f32 %v8020_v52, %v17941_v6 }
 0x848   :  { %v8130_v49 = vpop.f32.mrf.mxu2 }
 0x849   :  { %22605 = vst [vmem:[#allocation90_spill] sm:$0xff] %v18436_v62  ;;  %v8131_v14 = vadd.f32 %v8130_v49, %v8087_v54 }
 0x84c   :  { %v18440_v26 = vpop.permute.xlu1 %8868  ;;  %v8090_v30 = vpop.f32.mrf.mxu1 }
 0x84d   :  { %22607 = vst [vmem:[#allocation16_spill] sm:$0xff] %v18440_v26  ;;  %v18443_v56 = vpop.permute.xlu0 %8924  ;;  %v8091_v62 = vadd.f32 %v8090_v30, %v8021_v20 }
 0x84e   :  { %22608 = vst [vmem:[#allocation107_spill] sm:$0xff] %v18443_v56  ;;  %v8221_v60 = vpop.f32.mrf.mxu0  ;;  %v18445_v38 = vpop.permute.xlu2 %8814 }
 0x84f   :  { %22609 = vst [vmem:[#allocation15_spill] sm:$0xff] %v18445_v38 }
 0x851   :  { %v8135_v25 = vpop.f32.mrf.mxu2 }
 0x852   :  { %v8167_v22 = vpop.f32.mrf.mxu3  ;;  %v8136_v55 = vadd.f32 %v8135_v25, %v8091_v62 }
 0x853   :  { %v8168_v24 = vadd.f32 %v8167_v22, %v8131_v14 }
 0x854   :  { %v18447_v50 = vpop.permute.xlu1 %8686 }
 0x855   :  { %22610 = vst [vmem:[#allocation72_spill] sm:$0xff] %v18447_v50  ;;  %v18450_v5 = vpop.permute.xlu0 %8742  ;;  %v8222_v7 = vadd.f32 %v8221_v60, %v8168_v24 }
 0x856   :  { %22611 = vst [vmem:[#allocation114_spill] sm:$0xff] %v18450_v5  ;;  %v8255_v18 = vpop.f32.mrf.mxu1  ;;  %v8225_v41 = vpop.f32.mrf.mxu0 }
 0x857   :  { %v18452_v27 = vadd.f32 %v8255_v18, %v8222_v7  ;;  %v18457_v50 = vpop.permute.xlu2 %8872  ;;  %v8848_v18 = vsel %vm207_vm5, %v18424_v39, %v18445_v38  ;;  %v18506_v39 = vand.u32 4294901760, %v18211_v31 }
 0x858   :  { %22613 = vst [vmem:[#allocation143_spill] sm:$0xff] %v18457_v50  ;;  %v8905_v7 = vsel %vm6139_vm10, %v18440_v26, %v18457_v50  ;;  %v7170_v50 = vadd.f32 %v18325_v9, %v17912_v12 }
 0x859   :  { %v12703_v58 = vmul.f32 -1.442695, %v18452_v27  ;;  %v18470_v30 = vand.u32 4294901760, %v8905_v7 }
 0x85a   :  { %v8173_v49 = vpop.f32.mrf.mxu3 }
 0x85b   :  { %v8174_v14 = vadd.f32 %v8173_v49, %v8136_v55  ;;  %12784 = vpow2.f32 %v12703_v58  ;;  %22615 = vst [vmem:[#allocation64_spill] sm:$0xff] %v18470_v30 }
 0x85c   :  { %v18455_v54 = vpop.permute.xlu1 %8870 }
 0x85d   :  { %22612 = vst [vmem:[#allocation111_spill] sm:$0xff] %v18455_v54  ;;  %v8226_v22 = vadd.f32 %v8225_v41, %v8174_v14  ;;  %v18459_v52 = vpop.permute.xlu0 %8574  ;;  %v8904_v24 = vsel %vm6139_vm10, %v18428_v40, %v18455_v54  ;;  %v18492_v41 = vsub.f32 %v8905_v7, %v18470_v30  ;;  %v18508_v40 = vand.u32 4294901760, %v8848_v18 }
 0x85e   :  { %22614 = vst [vmem:[#allocation144_spill] sm:$0xff] %v18459_v52  ;;  %v8259_v5 = vpop.f32.mrf.mxu1  ;;  %v18485_v58 = vand.u32 4294901760, %v8904_v24 }
 0x85f   :  { %v18461_v60 = vadd.f32 %v8259_v5, %v8226_v22 }
 0x861   :  { %v12785_v25 = vpop.eup %12784  ;;  %v12710_v62 = vmul.f32 -1.442695, %v18461_v60 }
 0x862   :  { %v18468_v55 = vadd.f32 1.0, %v12785_v25 }
 0x863   :  { %12786 = vpow2.f32 %v12710_v62  ;;  %v18503_v62 = vand.u32 4294901760, %v18289_v51 }
 0x864   :  { %v18476_v5 = vpop.permute.xlu1 %8928  ;;  %12788 = vrcp.f32 %v18468_v55  ;;  %v8419_v32 = vand.u32 2147483648, %v18468_v55  ;;  %vm8413_vm15 = vweird.f32 %v18468_v55 }
 0x865   :  { %22616 = vst [vmem:[#allocation82_spill] sm:$0xff] %v18476_v5  ;;  %v18479_v20 = vpop.permute.xlu0 %8926  ;;  %v8961_v49 = vsel %vm4612_vm13, %v18443_v56, %v18476_v5 }
 0x866   :  { %22617 = vst [vmem:[#allocation45_spill] sm:$0xff] %v18479_v20  ;;  %v18494_v14 = vand.u32 4294901760, %v8961_v49  ;;  %v8960_v22 = vsel %vm4612_vm13, %v18409_v29, %v18479_v20  ;;  %v18516_v29 = vsub.f32 %v8904_v24, %v18485_v58 }
 0x867   :  { %v18500_v25 = vand.u32 4294901760, %v8960_v22 }
 0x868   :  { %22618 = vst [vmem:[#allocation85_spill] sm:$0xff] %v18494_v14  ;;  %v18511_v7 = vsub.f32 %v8961_v49, %v18494_v14  ;;  %9173 = vmatpush.msra.mxu2 %v18494_v14  ;;  %9369 = vmatpush.msrb.mxu1 %v18494_v14  ;;  %v7178_v49 = vadd.f32 %v18341_v53, %v17941_v6 }
 0x869   :  { %22619 = vst [vmem:[#allocation101_spill] sm:$0xff] %v18500_v25  ;;  %v12787_v26 = vpop.eup %12786  ;;  %v18519_v56 = vsub.f32 %v8960_v22, %v18500_v25  ;;  %v18532_v22 = vsub.f32 %v18289_v51, %v18503_v62 }
 0x86a   :  { %22620 = vst [vmem:[#allocation92_spill] sm:$0xff] %v18511_v7  ;;  %v12789_v38 = vpop.eup %12788  ;;  %v18521_v54 = vadd.f32 1.0, %v12787_v26  ;;  %9175 = vmatpush.msra.mxu2 %v18500_v25  ;;  %9316 = vmatpush.msrb.mxu0 %v18511_v7  ;;  %v18536_v26 = vsub.f32 %v18211_v31, %v18506_v39  ;;  %v22622_v5 = vand.u32 4294901760, %v18511_v7  ;;  %v7248_v8 = vadd.f32 %v18354_v57, %v7178_v49 }
 0x86b   :  { %v8409_v14 = vmul.f32 %v12789_v38, %v18468_v55  ;;  %9371 = vmatpush.msrb.mxu1 %v18500_v25  ;;  %v18544_v25 = vsub.f32 %v8848_v18, %v18508_v40  ;;  %v8417_v18 = vand.u32 2147483647, %v18468_v55  ;;  %vm8414_vm14 = vweird.f32 %v12789_v38 }
 0x86c   :  { %12790 = vrcp.f32 %v18521_v54  ;;  %9177 = vmatpush.msra.mxu2 %v18470_v30  ;;  %9319 = vmatpush.msrb.mxu0 %v18519_v56  ;;  %v9216_v52 = vsub.f32 %v18511_v7, %v22622_v5  ;;  %v22623_v5 = vand.u32 4294901760, %v18492_v41  ;;  %v22624_v53 = vand.u32 4294901760, %v18519_v56  ;;  %vm8415_vm0 = vmor %vm8413_vm15, %vm8414_vm14 }
 0x86d   :  { %v18546_v24 = vpop.permute.xlu0 %8816  ;;  %v8410_v20 = vsub.f32 1.0, %v8409_v14  ;;  %9373 = vmatpush.msrb.mxu1 %v18470_v30  ;;  %v8420_v57 = vor.u32 1.1754944e-38, %v8419_v32  ;;  %v8550_v49 = vperm.slane %v18183_v63, 6  ;;  %vm8418_vm1 = vcmp.eq.f32.partialorder %v8417_v18, 8.507059e+37 }
 0x86e   :  { %22621 = vst [vmem:[#allocation113_spill] sm:$0xff] %v18546_v24  ;;  %v8849_v9 = vsel %vm207_vm5, %v18430_v23, %v18546_v24  ;;  %9179 = vmatpush.msra.mxu2 %v18485_v58  ;;  %9322 = vmatpush.msrb.mxu0 %v18492_v41  ;;  %v9228_v14 = vsub.f32 %v18492_v41, %v22623_v5  ;;  %v9217_v23 = vand.u32 4294901760, %v9216_v52  ;;  %vm8518_vm6 = vweird.f32 %v18521_v54 }
 0x86f   :  { %v18561_v17 = vand.u32 4294901760, %v8849_v9  ;;  %v8411_v7 = vmul.f32 %v12789_v38, %v8410_v20  ;;  %9375 = vmatpush.msrb.mxu1 %v18485_v58  ;;  %v9222_v30 = vsub.f32 %v18519_v56, %v22624_v53  ;;  %v7244_v24 = vadd.f32 %v18332_v4, %v7170_v50 }
 0x870   :  { %9325 = vmatpush.msrb.mxu0 %v18516_v29  ;;  %9218 = vmatpush.msra.mxu3 %v9217_v23  ;;  %v22625_v53 = vand.u32 4294901760, %v18516_v29  ;;  %v21737_v23 = vand.u32 4294901760, %v18544_v25  ;;  %v7293_v18 = vadd.f32 %v18356_v34, %v7248_v8  ;;  %v21735_v8 = vand.u32 4294901760, %v18536_v26 }
 0x871   :  { %v18575_v0 = vsub.f32 %v8849_v9, %v18561_v17  ;;  %9181 = vmatpush.msra.mxu2 %v18561_v17  ;;  %v8412_v20 = vadd.f32 %v12789_v38, %v8411_v7  ;;  %9377 = vmatpush.msrb.mxu1 %v18561_v17  ;;  %v9223_v52 = vand.u32 4294901760, %v9222_v30  ;;  %v9229_v9 = vand.u32 4294901760, %v9228_v14 }
 0x872   :  { %v9234_v4 = vsub.f32 %v18516_v29, %v22625_v53  ;;  %v12791_v50 = vpop.eup %12790  ;;  %v7288_v32 = vadd.f32 %v18336_v46, %v7244_v24  ;;  %v8524_v24 = vand.u32 2147483648, %v18521_v54 }
 0x873   :  { %9183 = vmatpush.msra.mxu2 %v18508_v40  ;;  %9328 = vmatpush.msrb.mxu0 %v18575_v0  ;;  %v21738_v55 = vand.u32 4294901760, %v18575_v0  ;;  %v8416_v7 = vsel %vm8415_vm0, %v12789_v38, %v8412_v20  ;;  %v8514_v30 = vmul.f32 %v12791_v50, %v18521_v54  ;;  %v21736_v38 = vand.u32 4294901760, %v18532_v22 }
 0x874   :  { %9224 = vmatpush.msra.mxu3 %v9223_v52  ;;  %9379 = vmatpush.msrb.mxu1 %v18508_v40  ;;  %v8421_v5 = vsel %vm8418_vm1, %v8420_v57, %v8416_v7  ;;  %v9235_v46 = vand.u32 4294901760, %v9234_v4  ;;  %v9246_v57 = vsub.f32 %v18544_v25, %v21737_v23  ;;  %vm8519_vm2 = vweird.f32 %v12791_v50 }
 0x875   :  { %9185 = vmatpush.msra.mxu2 %v18503_v62  ;;  %9331 = vmatpush.msrb.mxu0 %v18544_v25  ;;  %v9240_v53 = vsub.f32 %v18575_v0, %v21738_v55  ;;  %v8534_v20 = vmul.f32 %v8421_v5, %v18452_v27  ;;  %v8515_v52 = vsub.f32 1.0, %v8514_v30  ;;  %v8522_v7 = vand.u32 2147483647, %v18521_v54  ;;  %vm8520_vm7 = vmor %vm8518_vm6, %vm8519_vm2 }
 0x876   :  { %9230 = vmatpush.msra.mxu3 %v9229_v9  ;;  %9381 = vmatpush.msrb.mxu1 %v18503_v62  ;;  %v7325_v4 = vadd.f32 %v18348_v2, %v7288_v32  ;;  %v9252_v30 = vsub.f32 %v18532_v22, %v21736_v38  ;;  %v7331_v9 = vadd.f32 %v18367_v19, %v7293_v18  ;;  %v9247_v2 = vand.u32 4294901760, %v9246_v57 }
 0x877   :  { %9187 = vmatpush.msra.mxu2 %v18506_v39  ;;  %9334 = vmatpush.msrb.mxu0 %v18532_v22  ;;  %v9241_v14 = vand.u32 4294901760, %v9240_v53  ;;  %v18609_v34 = vmul.f32 %v8550_v49, %v8534_v20  ;;  %v8516_v27 = vmul.f32 %v12791_v50, %v8515_v52  ;;  %v8525_v53 = vor.u32 1.1754944e-38, %v8524_v24 }
 0x878   :  { %9236 = vmatpush.msra.mxu3 %v9235_v46  ;;  %9383 = vmatpush.msrb.mxu1 %v18506_v39  ;;  %v9258_v19 = vsub.f32 %v18536_v26, %v21735_v8  ;;  %vm8523_vm8 = vcmp.eq.f32.partialorder %v8522_v7, 8.507059e+37  ;;  %v7379_v54 = vadd.f32 %v18362_v36, %v7325_v4  ;;  %v9253_v20 = vand.u32 4294901760, %v9252_v30 }
 0x879   :  { %22626 = vst [vmem:[#allocation118_spill] sm:$0xff] %v18609_v34  ;;  %9337 = vmatpush.msrb.mxu0 %v18536_v26  ;;  %v8517_v5 = vadd.f32 %v12791_v50, %v8516_v27  ;;  %8708 = vrot.lane.b32.xlu1 %v18609_v34, %s12852_s19  ;;  %v7383_v52 = vadd.f32 %v18381_v42, %v7331_v9 }
 0x87a   :  { %8764 = vrot.lane.b32.xlu0 %v18609_v34, %s12841_s20  ;;  %8652 = vrot.lane.b32.xlu2 %v18609_v34, %s12848_s13  ;;  %v18633_v24 = vadd.f32 %v18371_v37, %v7379_v54 }
 0x87b   :  { %9242 = vmatpush.msra.mxu3 %v9241_v14  ;;  %v8521_v32 = vsel %vm8520_vm7, %v12791_v50, %v8517_v5  ;;  %v9259_v14 = vand.u32 4294901760, %v9258_v19  ;;  %v18636_v57 = vadd.f32 %v18385_v28, %v7383_v52 }
 0x87c   :  { %v8526_v18 = vsel %vm8523_vm8, %v8525_v53, %v8521_v32  ;;  %v12700_v36 = vmul.f32 -1.442695, %v18633_v24 }
 0x87d   :  { %9248 = vmatpush.msra.mxu3 %v9247_v2  ;;  %v8541_v46 = vmul.f32 %v8526_v18, %v18461_v60  ;;  %v12707_v37 = vmul.f32 -1.442695, %v18636_v57  ;;  %v7459_v60 = vadd.f32 %v18387_v35, %v17941_v6  ;;  %v7451_v35 = vadd.f32 %v18373_v44, %v17912_v12 }
 0x87e   :  { %12792 = vpow2.f32 %v12700_v36 }
 0x87f   :  { %9254 = vmatpush.msra.mxu3 %v9253_v20  ;;  %v18638_v27 = vmul.f32 %v8550_v49, %v8541_v46  ;;  %12794 = vpow2.f32 %v12707_v37  ;;  %v7529_v7 = vadd.f32 %v18391_v11, %v7459_v60  ;;  %v7525_v11 = vadd.f32 %v18383_v47, %v7451_v35 }
 0x881   :  { %22627 = vst [vmem:[#allocation11_spill] sm:$0xff] %v18638_v27  ;;  %9260 = vmatpush.msra.mxu3 %v9259_v14  ;;  %8766 = vrot.lane.b32.xlu1 %v18638_v27, %s12841_s20  ;;  %v7574_v4 = vadd.f32 %v18397_v21, %v7529_v7  ;;  %v7569_v5 = vadd.f32 %v18389_v61, %v7525_v11 }
 0x882   :  { %8596 = vrot.lane.b32.xlu0 %v18609_v34, %s12853_s21  ;;  %8710 = vrot.lane.b32.xlu2 %v18638_v27, %s12852_s19 }
 0x883   :  { %v7612_v30 = vadd.f32 %v18401_v33, %v7574_v4  ;;  %v7606_v44 = vadd.f32 %v18393_v13, %v7569_v5 }
 0x884   :  { %v12793_v42 = vpop.eup %12792 }
 0x885   :  { %v12795_v28 = vpop.eup %12794  ;;  %v8307_v50 = vadd.f32 1.0, %v12793_v42  ;;  %v7664_v21 = vadd.f32 %v18403_v45, %v7612_v30 }
 0x886   :  { %v8314_v49 = vadd.f32 1.0, %v12795_v28 }
 0x887   :  { %12796 = vrcp.f32 %v8307_v50  ;;  %v18678_v53 = vadd.f32 %v18407_v3, %v7664_v21  ;;  %vm8368_vm0 = vweird.f32 %v8307_v50  ;;  %v7732_v21 = vadd.f32 %v18405_v43, %v17912_v12 }
 0x888   :  { %12798 = vrcp.f32 %v8314_v49  ;;  %v8479_v54 = vand.u32 2147483648, %v8314_v49  ;;  %vm8473_vm2 = vweird.f32 %v8314_v49  ;;  %v8477_v18 = vand.u32 2147483647, %v8314_v49 }
 0x889   :  { %8598 = vrot.lane.b32.xlu1 %v18638_v27, %s12853_s21  ;;  %v12708_v47 = vmul.f32 -1.442695, %v18678_v53 }
 0x88a   :  { %8654 = vrot.lane.b32.xlu0 %v18638_v27, %s12848_s13  ;;  %8820 = vrot.lane.b32.xlu2 %v18369_v48, %s12839_s16  ;;  %v8480_v37 = vor.u32 1.1754944e-38, %v8479_v54  ;;  %vm8478_vm8 = vcmp.eq.f32.partialorder %v8477_v18, 8.507059e+37  ;;  %v22633_v18 = vld [vmem:[#allocation32_spill] sm:$0xff] }
 0x88b   :  { %12800 = vpow2.f32 %v12708_v47  ;;  %v22631_v47 = vld [vmem:[#allocation65_spill] sm:$0xff] }
 0x88d   :  { %v12797_v6 = vpop.eup %12796 }
 0x88e   :  { %v8364_v9 = vmul.f32 %v12797_v6, %v8307_v50  ;;  %vm8369_vm14 = vweird.f32 %v12797_v6 }
 0x88f   :  { %vm8370_vm1 = vmor %vm8368_vm0, %vm8369_vm14 }
 0x890   :  { %v8365_v2 = vsub.f32 1.0, %v8364_v9 }
 0x891   :  { %8984 = vrot.lane.b32.xlu1 %v18338_v1, %s12851_s18 }
 0x892   :  { %8980 = vrot.lane.b32.xlu0 %v18289_v51, %s12851_s18  ;;  %8818 = vrot.lane.b32.xlu2 %v18352_v16, %s12839_s16  ;;  %v12799_v51 = vpop.eup %12798  ;;  %v8366_v61 = vmul.f32 %v12797_v6, %v8365_v2 }
 0x893   :  { %v8469_v33 = vmul.f32 %v12799_v51, %v8314_v49  ;;  %vm8474_vm15 = vweird.f32 %v12799_v51  ;;  %v12801_v14 = vpop.eup %12800  ;;  %v8547_v49 = vperm.slane %v18183_v63, 3 }
 0x894   :  { %v8367_v3 = vadd.f32 %v12797_v6, %v8366_v61  ;;  %vm8475_vm6 = vmor %vm8473_vm2, %vm8474_vm15  ;;  %v8315_v60 = vadd.f32 1.0, %v12801_v14  ;;  %v22634_v14 = vld [vmem:[#allocation123_spill] sm:$0xff] }
 0x895   :  { %v8470_v19 = vsub.f32 1.0, %v8469_v33  ;;  %v22630_v33 = vld [vmem:[#allocation122_spill] sm:$0xff] }
 0x896   :  { %v8371_v52 = vsel %vm8370_vm1, %v12797_v6, %v8367_v3  ;;  %v7806_v5 = vadd.f32 %v22630_v33, %v7732_v21  ;;  %vm8488_vm15 = vweird.f32 %v8315_v60  ;;  %v22632_v3 = vld [vmem:[#allocation55_spill] sm:$0xff] }
 0x897   :  { %v8471_v13 = vmul.f32 %v12799_v51, %v8470_v19  ;;  %v8494_v19 = vand.u32 2147483648, %v8315_v60 }
 0x898   :  { %v7850_v12 = vadd.f32 %v22631_v47, %v7806_v5 }
 0x899   :  { %8982 = vrot.lane.b32.xlu1 %v18323_v10, %s12851_s18  ;;  %v8472_v32 = vadd.f32 %v12799_v51, %v8471_v13  ;;  %v8495_v13 = vor.u32 1.1754944e-38, %v8494_v19 }
 0x89a   :  { %8978 = vrot.lane.b32.xlu0 %v18211_v31, %s12851_s18  ;;  %8746 = vrot.lane.b32.xlu2 %v18338_v1, %s12841_s20  ;;  %v7660_v31 = vadd.f32 %v18395_v59, %v7606_v44  ;;  %v8374_v59 = vand.u32 2147483648, %v8307_v50 }
 0x89b   :  { %v8476_v46 = vsel %vm8475_vm6, %v12799_v51, %v8472_v32  ;;  %v7887_v32 = vadd.f32 %v22632_v3, %v7850_v12  ;;  %v22647_v3 = vld [vmem:[#allocation72_spill] sm:$0xff] }
 0x89c   :  { %v18689_v45 = vadd.f32 %v18399_v15, %v7660_v31  ;;  %v8372_v15 = vand.u32 2147483647, %v8307_v50  ;;  %v8375_v36 = vor.u32 1.1754944e-38, %v8374_v59  ;;  %v8481_v28 = vsel %vm8478_vm8, %v8480_v37, %v8476_v46 }
 0x89d   :  { %v8538_v7 = vmul.f32 %v8481_v28, %v18636_v57  ;;  %v8492_v31 = vand.u32 2147483647, %v8315_v60 }
 0x89e   :  { %v12701_v20 = vmul.f32 -1.442695, %v18689_v45  ;;  %vm8373_vm7 = vcmp.eq.f32.partialorder %v8372_v15, 8.507059e+37 }
 0x89f   :  { %v8376_v42 = vsel %vm8373_vm7, %v8375_v36, %v8371_v52  ;;  %v18709_v6 = vmul.f32 %v8547_v49, %v8538_v7  ;;  %vm8493_vm1 = vcmp.eq.f32.partialorder %v8492_v31, 8.507059e+37 }
 0x8a0   :  { %12802 = vpow2.f32 %v12701_v20  ;;  %v8531_v50 = vmul.f32 %v8376_v42, %v18633_v24  ;;  %v7941_v20 = vadd.f32 %v22633_v18, %v7887_v32  ;;  %v22635_v42 = vld [vmem:[#allocation90_spill] sm:$0xff]  ;;  %v22648_v18 = vld [vmem:[#allocation68_spill] sm:$0xff] }
 0x8a1   :  { %8690 = vrot.lane.b32.xlu1 %v18338_v1, %s12852_s19  ;;  %12804 = vrcp.f32 %v8315_v60  ;;  %22629 = vst [vmem:[#allocation98_spill] sm:$0xff] %v18709_v6  ;;  %v12709_v28 = vmul.f32 -1.442695, %v22635_v42 }
 0x8a2   :  { %8744 = vrot.lane.b32.xlu0 %v18323_v10, %s12841_s20  ;;  %8688 = vrot.lane.b32.xlu2 %v18323_v10, %s12852_s19  ;;  %v18707_v30 = vmul.f32 %v8547_v49, %v8531_v50  ;;  %v18743_v36 = vadd.f32 %v22634_v14, %v7941_v20  ;;  %v18749_v50 = vld [vmem:[%s21483_s1] sm:$0xff] }
 0x8a3   :  { %v8548_v49 = vperm.slane %v18749_v50, 4 }
 0x8a4   :  { %22628 = vst [vmem:[#allocation83_spill] sm:$0xff] %v18707_v30 }
 0x8a6   :  { %v12803_v4 = vpop.eup %12802 }
 0x8a7   :  { %v8308_v35 = vadd.f32 1.0, %v12803_v4  ;;  %v12805_v24 = vpop.eup %12804 }
 0x8a8   :  { %v8484_v63 = vmul.f32 %v12805_v24, %v8315_v60  ;;  %vm8489_vm14 = vweird.f32 %v12805_v24 }
 0x8a9   :  { %8632 = vrot.lane.b32.xlu1 %v18323_v10, %s12848_s13  ;;  %12806 = vrcp.f32 %v8308_v35  ;;  %vm8490_vm0 = vmor %vm8488_vm15, %vm8489_vm14  ;;  %v8389_v15 = vand.u32 2147483648, %v8308_v35  ;;  %vm8383_vm6 = vweird.f32 %v8308_v35  ;;  %v8387_v52 = vand.u32 2147483647, %v8308_v35 }
 0x8aa   :  { %8634 = vrot.lane.b32.xlu0 %v18338_v1, %s12848_s13  ;;  %8578 = vrot.lane.b32.xlu2 %v18338_v1, %s12853_s21  ;;  %v8485_v51 = vsub.f32 1.0, %v8484_v63  ;;  %12808 = vpow2.f32 %v12709_v28  ;;  %v18764_v63 = vpop.permute.xlu2 %8930 }
 0x8ab   :  { %v8390_v60 = vor.u32 1.1754944e-38, %v8389_v15  ;;  %vm8388_vm8 = vcmp.eq.f32.partialorder %v8387_v52, 8.507059e+37  ;;  %22638 = vst [vmem:[#allocation105_spill] sm:$0xff] %v18764_v63 }
 0x8ac   :  { %v8486_v9 = vmul.f32 %v12805_v24, %v8485_v51 }
 0x8ae   :  { %v8487_v2 = vadd.f32 %v12805_v24, %v8486_v9 }
 0x8af   :  { %v12807_v57 = vpop.eup %12806 }
 0x8b0   :  { %v8379_v11 = vmul.f32 %v12807_v57, %v8308_v35  ;;  %v8491_v61 = vsel %vm8490_vm0, %v12805_v24, %v8487_v2  ;;  %vm8384_vm2 = vweird.f32 %v12807_v57  ;;  %v18755_v35 = vpop.permute.xlu1 %8874  ;;  %vm9168_vm0 = vcmask 130048  }
 0x8b1   :  { %8988 = vrot.lane.b32.xlu1 %v18369_v48, %s12851_s18  ;;  %v8496_v54 = vsel %vm8493_vm1, %v8495_v13, %v8491_v61  ;;  %vm8385_vm7 = vmor %vm8383_vm6, %vm8384_vm2  ;;  %22637 = vst [vmem:[#allocation50_spill] sm:$0xff] %v18755_v35 }
 0x8b2   :  { %8576 = vrot.lane.b32.xlu0 %v18323_v10, %s12853_s21  ;;  %8986 = vrot.lane.b32.xlu2 %v18352_v16, %s12851_s18  ;;  %v8380_v44 = vsub.f32 1.0, %v8379_v11  ;;  %v8539_v46 = vmul.f32 %v8496_v54, %v18678_v53  ;;  %v12702_v53 = vmul.f32 -1.442695, %v18743_v36 }
 0x8b4   :  { %v8381_v43 = vmul.f32 %v12807_v57, %v8380_v44  ;;  %v18752_v4 = vmul.f32 %v8548_v49, %v8539_v46  ;;  %12810 = vpow2.f32 %v12702_v53 }
 0x8b6   :  { %v8382_v59 = vadd.f32 %v12807_v57, %v8381_v43  ;;  %22636 = vst [vmem:[#allocation115_spill] sm:$0xff] %v18752_v4  ;;  %v22645_v43 = vld [vmem:[#allocation51_spill] sm:$0xff] }
 0x8b8   :  { %v8386_v37 = vsel %vm8385_vm7, %v12807_v57, %v8382_v59  ;;  %v12809_v57 = vpop.eup %12808  ;;  %v18776_v9 = vpop.permute.xlu1 %8932 }
 0x8b9   :  { %8934 = vrot.lane.b32.xlu1 %v18707_v30, %s12846_s11  ;;  %v8391_v7 = vsel %vm8388_vm8, %v8390_v60, %v8386_v37  ;;  %v18772_v21 = vadd.f32 1.0, %v12809_v57  ;;  %v22651_v37 = vld [vmem:[#allocation114_spill] sm:$0xff] }
 0x8ba   :  { %8936 = vrot.lane.b32.xlu0 %v18709_v6, %s12846_s11  ;;  %8880 = vrot.lane.b32.xlu2 %v18709_v6, %s12850_s15  ;;  %v8532_v24 = vmul.f32 %v8391_v7, %v18689_v45  ;;  %v12811_v11 = vpop.eup %12810  ;;  %v18778_v45 = vpop.permute.xlu0 %8876 }
 0x8bb   :  { %22640 = vst [vmem:[#allocation13_spill] sm:$0xff] %v18778_v45  ;;  %v18782_v5 = vadd.f32 1.0, %v12811_v11  ;;  %12812 = vrcp.f32 %v18772_v21  ;;  %v22653_v11 = vld [vmem:[#allocation52_spill] sm:$0xff]  ;;  %vm8503_vm14 = vweird.f32 %v18772_v21  ;;  %v8509_v8 = vand.u32 2147483648, %v18772_v21 }
 0x8bc   :  { %v18766_v51 = vmul.f32 %v8548_v49, %v8532_v24 }
 0x8bd   :  { %12814 = vrcp.f32 %v18782_v5  ;;  %vm8398_vm7 = vweird.f32 %v18782_v5 }
 0x8be   :  { %22639 = vst [vmem:[#allocation117_spill] sm:$0xff] %v18766_v51 }
 0x8c1   :  { %8824 = vrot.lane.b32.xlu1 %v18709_v6, %s12839_s16  ;;  %v18796_v19 = vpop.eup %12812 }
 0x8c2   :  { %8878 = vrot.lane.b32.xlu0 %v18707_v30, %s12850_s15  ;;  %8822 = vrot.lane.b32.xlu2 %v18707_v30, %s12839_s16  ;;  %v8499_v12 = vmul.f32 %v18796_v19, %v18772_v21  ;;  %vm8504_vm15 = vweird.f32 %v18796_v19 }
 0x8c3   :  { %v18800_v47 = vpop.eup %12814  ;;  %vm18912_vm1 = vmor %vm8503_vm14, %vm8504_vm15 }
 0x8c4   :  { %v8394_v59 = vmul.f32 %v18800_v47, %v18782_v5  ;;  %v8500_v15 = vsub.f32 1.0, %v8499_v12  ;;  %vm8399_vm2 = vweird.f32 %v18800_v47 }
 0x8c5   :  { %vm18978_vm8 = vmor %vm8398_vm7, %vm8399_vm2 }
 0x8c6   :  { %v8395_v49 = vsub.f32 1.0, %v8394_v59  ;;  %v8501_v24 = vmul.f32 %v18796_v19, %v8500_v15 }
 0x8c8   :  { %v8502_v23 = vadd.f32 %v18796_v19, %v8501_v24 }
 0x8c9   :  { %8748 = vrot.lane.b32.xlu1 %v18352_v16, %s12841_s20 }
 0x8ca   :  { %8750 = vrot.lane.b32.xlu0 %v18369_v48, %s12841_s20  ;;  %8694 = vrot.lane.b32.xlu2 %v18369_v48, %s12852_s19  ;;  %v8506_v27 = vsel %vm18912_vm1, %v18796_v19, %v8502_v23 }
 0x8d1   :  { %8638 = vrot.lane.b32.xlu1 %v18369_v48, %s12848_s13 }
 0x8d2   :  { %8692 = vrot.lane.b32.xlu0 %v18352_v16, %s12852_s19  ;;  %8636 = vrot.lane.b32.xlu2 %v18352_v16, %s12848_s13 }
 0x8d4   :  { %v18780_v33 = vpop.permute.xlu2 %8652 }
 0x8d5   :  { %22641 = vst [vmem:[#allocation102_spill] sm:$0xff] %v18780_v33  ;;  %v8668_v12 = vsel %vm4576_vm11, %v18780_v33, %v22653_v11 }
 0x8d6   :  { %v18874_v55 = vand.u32 4294901760, %v8668_v12 }
 0x8d9   :  { %8580 = vrot.lane.b32.xlu1 %v18352_v16, %s12853_s21 }
 0x8da   :  { %8582 = vrot.lane.b32.xlu0 %v18369_v48, %s12853_s21  ;;  %8940 = vrot.lane.b32.xlu2 %v18752_v4, %s12846_s11 }
 0x8dc   :  { %v18798_v31 = vpop.permute.xlu2 %8710 }
 0x8dd   :  { %22644 = vst [vmem:[#allocation89_spill] sm:$0xff] %v18798_v31  ;;  %v8725_v32 = vsel %vm6047_vm9, %v18798_v31, %v22647_v3 }
 0x8de   :  { %v18830_v14 = vand.u32 4294901760, %v8725_v32 }
 0x8e0   :  { %v18854_v59 = vsub.f32 %v8725_v32, %v18830_v14  ;;  %v22657_v32 = vld [vmem:[#allocation144_spill] sm:$0xff] }
 0x8e1   :  { %8992 = vrot.lane.b32.xlu1 %v18709_v6, %s12851_s18 }
 0x8e2   :  { %8938 = vrot.lane.b32.xlu0 %v18766_v51, %s12846_s11  ;;  %8884 = vrot.lane.b32.xlu2 %v18752_v4, %s12850_s15  ;;  %v22663_v16 = vand.u32 4294901760, %v18854_v59 }
 0x8e4   :  { %v9276_v23 = vsub.f32 %v18854_v59, %v22663_v16 }
 0x8e9   :  { %8882 = vrot.lane.b32.xlu1 %v18766_v51, %s12850_s15 }
 0x8ea   :  { %8990 = vrot.lane.b32.xlu0 %v18707_v30, %s12851_s18  ;;  %8828 = vrot.lane.b32.xlu2 %v18752_v4, %s12839_s16 }
 0x8eb   :  { %v18792_v44 = vpop.permute.xlu1 %8708 }
 0x8ec   :  { %22642 = vst [vmem:[#allocation6_spill] sm:$0xff] %v18792_v44  ;;  %v18794_v2 = vpop.permute.xlu0 %8764  ;;  %v8724_v20 = vsel %vm6047_vm9, %v18792_v44, %v22648_v18  ;;  %v22656_v44 = vld [vmem:[#allocation56_spill] sm:$0xff] }
 0x8ed   :  { %22643 = vst [vmem:[#allocation93_spill] sm:$0xff] %v18794_v2  ;;  %v8780_v13 = vsel %vm171_vm4, %v18794_v2, %v22645_v43  ;;  %v18838_v7 = vand.u32 4294901760, %v8724_v20  ;;  %v22658_v2 = vld [vmem:[#allocation110_spill] sm:$0xff] }
 0x8ee   :  { %v18818_v54 = vand.u32 4294901760, %v8780_v13 }
 0x8ef   :  { %22652 = vst [vmem:[#allocation100_spill] sm:$0xff] %v18838_v7  ;;  %v18866_v38 = vsub.f32 %v8724_v20, %v18838_v7 }
 0x8f0   :  { %v18841_v53 = vsub.f32 %v8780_v13, %v18818_v54  ;;  %v8507_v13 = vand.u32 2147483647, %v18772_v21 }
 0x8f1   :  { %8754 = vrot.lane.b32.xlu1 %v18709_v6, %s12841_s20 }
 0x8f2   :  { %8826 = vrot.lane.b32.xlu0 %v18766_v51, %s12839_s16  ;;  %8752 = vrot.lane.b32.xlu2 %v18707_v30, %s12841_s20  ;;  %vm8508_vm6 = vcmp.eq.f32.partialorder %v8507_v13, 8.507059e+37 }
 0x8f3   :  { %v18826_v52 = vpop.permute.xlu1 %8766 }
 0x8f4   :  { %22649 = vst [vmem:[#allocation70_spill] sm:$0xff] %v18826_v52  ;;  %v18828_v46 = vpop.permute.xlu0 %8596  ;;  %v8781_v28 = vsel %vm171_vm4, %v18826_v52, %v22651_v37 }
 0x8f5   :  { %22650 = vst [vmem:[#allocation95_spill] sm:$0xff] %v18828_v46  ;;  %v18836_v60 = vand.u32 4294901760, %v8781_v28  ;;  %v8612_v24 = vsel %vm5990_vm12, %v18828_v46, %v22656_v44  ;;  %v18925_v44 = vsub.f32 %v8668_v12, %v18874_v55 }
 0x8f6   :  { %v18927_v21 = vand.u32 4294901760, %v8612_v24 }
 0x8f7   :  { %v18845_v57 = vsub.f32 %v8781_v28, %v18836_v60  ;;  %9189 = vmatpush.msra.mxu2 %v18836_v60  ;;  %9385 = vmatpush.msrb.mxu1 %v18836_v60  ;;  %v8396_v28 = vmul.f32 %v18800_v47, %v8395_v49 }
 0x8f8   :  { %v18956_v13 = vsub.f32 %v8612_v24, %v18927_v21  ;;  %v9034_v24 = vld [vmem:[%s21484_s7] sm:$0xff] }
 0x8f9   :  { %8696 = vrot.lane.b32.xlu1 %v18707_v30, %s12852_s19  ;;  %v21746_v15 = vand.u32 4294901760, %v18845_v57  ;;  %9191 = vmatpush.msra.mxu2 %v18818_v54  ;;  %v8397_v12 = vadd.f32 %v18800_v47, %v8396_v28 }
 0x8fa   :  { %8698 = vrot.lane.b32.xlu0 %v18709_v6, %s12852_s19  ;;  %8642 = vrot.lane.b32.xlu2 %v18709_v6, %s12848_s13 }
 0x8fb   :  { %9340 = vmatpush.msrb.mxu0 %v18845_v57  ;;  %9387 = vmatpush.msrb.mxu1 %v18818_v54  ;;  %v18878_v49 = vpop.permute.xlu1 %8598  ;;  %v9264_v33 = vsub.f32 %v18845_v57, %v21746_v15 }
 0x8fc   :  { %22654 = vst [vmem:[#allocation128_spill] sm:$0xff] %v18878_v49  ;;  %v18880_v20 = vpop.permute.xlu0 %8654  ;;  %v8613_v31 = vsel %vm5990_vm12, %v18878_v49, %v22657_v32  ;;  %9193 = vmatpush.msra.mxu2 %v18830_v14  ;;  %v9035_v49 = vld [vmem:[%s21484_s7 + $0x8] sm:$0xff] }
 0x8fd   :  { %22655 = vst [vmem:[#allocation112_spill] sm:$0xff] %v18880_v20  ;;  %v8669_v52 = vsel %vm4576_vm11, %v18880_v20, %v22658_v2  ;;  %v18899_v15 = vand.u32 4294901760, %v8613_v31  ;;  %9343 = vmatpush.msrb.mxu0 %v18841_v53  ;;  %9389 = vmatpush.msrb.mxu1 %v18830_v14  ;;  %v9265_v46 = vand.u32 4294901760, %v9264_v33  ;;  %v22662_v20 = vand.u32 4294901760, %v18841_v53  ;;  %v18998_v2 = vpop.permute.xlu2 %8820 }
 0x8fe   :  { %v18901_v48 = vand.u32 4294901760, %v8669_v52  ;;  %9195 = vmatpush.msra.mxu2 %v18838_v7  ;;  %v21756_v33 = vand.u32 4294901760, %v18866_v38  ;;  %v9170_v19 = vsel %vm9168_vm0, %v9035_v49, 0  ;;  %22668 = vst [vmem:[#allocation5_spill] sm:$0xff] %v18998_v2 }
 0x8ff   :  { %v9270_v34 = vsub.f32 %v18841_v53, %v22662_v20  ;;  %9346 = vmatpush.msrb.mxu0 %v18854_v59  ;;  %9391 = vmatpush.msrb.mxu1 %v18838_v7  ;;  %v8510_v20 = vor.u32 1.1754944e-38, %v8509_v8  ;;  %v18972_v16 = vand.u32 4294901760, %v9170_v19 }
 0x900   :  { %22659 = vst [vmem:[#allocation9_spill] sm:$0xff] %v18901_v48  ;;  %v18930_v32 = vsub.f32 %v8669_v52, %v18901_v48  ;;  %9197 = vmatpush.msra.mxu2 %v18901_v48  ;;  %9266 = vmatpush.msra.mxu3 %v9265_v46  ;;  %v18942_v52 = vsub.f32 %v8613_v31, %v18899_v15 }
 0x901   :  { %9349 = vmatpush.msrb.mxu0 %v18866_v38  ;;  %9393 = vmatpush.msrb.mxu1 %v18901_v48  ;;  %v8511_v46 = vsel %vm8508_vm6, %v8510_v20, %v8506_v27  ;;  %v9271_v28 = vand.u32 4294901760, %v9270_v34  ;;  %v9282_v31 = vsub.f32 %v18866_v38, %v21756_v33  ;;  %v9277_v20 = vand.u32 4294901760, %v9276_v23 }
 0x902   :  { %v21759_v8 = vand.u32 4294901760, %v18930_v32  ;;  %8586 = vrot.lane.b32.xlu1 %v18709_v6, %s12853_s21  ;;  %8640 = vrot.lane.b32.xlu0 %v18707_v30, %s12848_s13  ;;  %v8401_v6 = vsel %vm18978_vm8, %v18800_v47, %v8397_v12  ;;  %v8402_v48 = vand.u32 2147483647, %v18782_v5  ;;  %v8540_v7 = vmul.f32 %v8511_v46, %v22635_v42 }
 0x903   :  { %8584 = vrot.lane.b32.xlu2 %v18707_v30, %s12853_s21  ;;  %9199 = vmatpush.msra.mxu2 %v18874_v55  ;;  %v18961_v27 = vpop.permute.xlu1 %8984  ;;  %v8404_v30 = vand.u32 2147483648, %v18782_v5  ;;  %v9283_v23 = vand.u32 4294901760, %v9282_v31  ;;  %v19001_v47 = vand.u32 4294901760, %v9034_v24  ;;  %v22670_v12 = vand.u32 4294901760, %v18925_v44 }
 0x904   :  { %22664 = vst [vmem:[#allocation99_spill] sm:$0xff] %v18961_v27  ;;  %v18963_v49 = vpop.permute.xlu0 %8980  ;;  %v9288_v34 = vsub.f32 %v18930_v32, %v21759_v8  ;;  %9272 = vmatpush.msra.mxu3 %v9271_v28  ;;  %9352 = vmatpush.msrb.mxu0 %v18930_v32  ;;  %v19012_v46 = vsub.f32 %v9170_v19, %v18972_v16  ;;  %vm8403_vm14 = vcmp.eq.f32.partialorder %v8402_v48, 8.507059e+37  ;;  %v22672_v28 = vld [vmem:[#allocation92_spill] sm:$0xff] }
 0x905   :  { %22665 = vst [vmem:[#allocation134_spill] sm:$0xff] %v18963_v49  ;;  %v9017_v8 = vsel %vm6196_vm3, %v18963_v49, %v18961_v27  ;;  %9395 = vmatpush.msrb.mxu1 %v18874_v55  ;;  %9201 = vmatpush.msra.mxu2 %v18899_v15  ;;  %v9294_v42 = vsub.f32 %v18925_v44, %v22670_v12  ;;  %v8405_v31 = vor.u32 1.1754944e-38, %v8404_v30  ;;  %v22673_v49 = vand.u32 4294901760, %v22672_v28 }
 0x906   :  { %v18993_v11 = vand.u32 4294901760, %v9017_v8  ;;  %9278 = vmatpush.msra.mxu3 %v9277_v20  ;;  %9355 = vmatpush.msrb.mxu0 %v18925_v44  ;;  %v9289_v33 = vand.u32 4294901760, %v9288_v34  ;;  %22669 = vst [vmem:[#allocation91_spill] sm:$0xff] %v19001_v47  ;;  %v8549_v34 = vperm.slane %v18749_v50, 5  ;;  %v22674_v12 = vand.u32 4294901760, %v18942_v52 }
 0x907   :  { %9397 = vmatpush.msrb.mxu1 %v18899_v15  ;;  %9203 = vmatpush.msra.mxu2 %v18927_v21  ;;  %22671 = vst [vmem:[#allocation88_spill] sm:$0xff] %v19012_v46  ;;  %v8406_v27 = vsel %vm8403_vm14, %v8405_v31, %v8401_v6  ;;  %v19028_v30 = vsub.f32 %v9034_v24, %v19001_v47  ;;  %v22677_v50 = vand.u32 4294901760, %v18519_v56  ;;  %v19044_v24 = vand.u32 4294901760, %v19012_v46 }
 0x908   :  { %v19004_v5 = vsub.f32 %v9017_v8, %v18993_v11  ;;  %9284 = vmatpush.msra.mxu3 %v9283_v23  ;;  %9358 = vmatpush.msrb.mxu0 %v18942_v52  ;;  %v9300_v19 = vsub.f32 %v18942_v52, %v22674_v12  ;;  %v19024_v20 = vmul.f32 %v8549_v34, %v8540_v7  ;;  %v22680_v7 = vand.u32 4294901760, %v18956_v13 }
 0x909   :  { %9399 = vmatpush.msrb.mxu1 %v18927_v21  ;;  %9410 = vmatpush.msrb.mxu2 %v22673_v49  ;;  %22676 = vst [vmem:[#allocation14_spill] sm:$0xff] %v19028_v30  ;;  %v9295_v49 = vand.u32 4294901760, %v9294_v42 }
 0x90a   :  { %v21766_v8 = vand.u32 4294901760, %v19004_v5  ;;  %22675 = vst [vmem:[#allocation135_spill] sm:$0xff] %v19024_v20  ;;  %9290 = vmatpush.msra.mxu3 %v9289_v33  ;;  %9361 = vmatpush.msrb.mxu0 %v18956_v13  ;;  %v9306_v23 = vsub.f32 %v18956_v13, %v22680_v7  ;;  %v22682_v33 = vld [vmem:[#allocation82_spill] sm:$0xff]  ;;  %v9301_v12 = vand.u32 4294901760, %v9300_v19  ;;  %v8533_v7 = vmul.f32 %v8406_v27, %v18743_v36 }
 0x90b   :  { %9414 = vmatpush.msrb.mxu2 %v22677_v50  ;;  %v19036_v28 = vpop.permute.xlu1 %8982  ;;  %22681 = vst [vmem:[#allocation106_spill] sm:$0xff] %v19044_v24  ;;  %8994 = vrot.lane.b32.xlu1 %v18766_v51, %s12851_s18  ;;  %v8959_v42 = vsel %vm4612_vm13, %v22682_v33, %v18776_v9  ;;  %v19075_v19 = vand.u32 4294901760, %v19028_v30  ;;  %v9534_v36 = vsub.f32 %v19012_v46, %v19044_v24 }
 0x90c   :  { %v9557_v48 = vsub.f32 %v19004_v5, %v21766_v8  ;;  %9528 = vmatpush.msra.mxu0 %v18993_v11  ;;  %22678 = vst [vmem:[#allocation66_spill] sm:$0xff] %v19036_v28  ;;  %v19038_v6 = vpop.permute.xlu0 %8978  ;;  %8996 = vrot.lane.b32.xlu0 %v18752_v4, %s12851_s18  ;;  %v22683_v8 = vld [vmem:[#allocation45_spill] sm:$0xff]  ;;  %v19079_v27 = vand.u32 4294901760, %v8959_v42 }
 0x90d   :  { %22679 = vst [vmem:[#allocation62_spill] sm:$0xff] %v19038_v6  ;;  %v9016_v56 = vsel %vm6196_vm3, %v19038_v6, %v19036_v28  ;;  %8944 = vrot.lane.b32.xlu2 %v19024_v20, %s12846_s11  ;;  %9296 = vmatpush.msra.mxu3 %v9295_v49  ;;  %v8958_v6 = vsel %vm4612_vm13, %v22683_v8, %v18764_v63  ;;  %v22684_v28 = vand.u32 4294901760, %v18492_v41  ;;  %v9307_v49 = vand.u32 4294901760, %v9306_v23  ;;  %v19081_v8 = vpop.permute.xlu2 %8818  ;;  %v22689_v63 = vld [vmem:[#allocation85_spill] sm:$0xff] }
 0x90e   :  { %v19060_v31 = vand.u32 4294901760, %v9016_v56  ;;  %v9558_v50 = vand.u32 4294901760, %v9557_v48  ;;  %9364 = vmatmul.f32.vlgmr.msrb.gmra.mxu0 %v19028_v30  ;;  %22685 = vst [vmem:[#allocation136_spill] sm:$0xff] %v19081_v8  ;;  %v22686_v41 = vand.u32 4294901760, %v18516_v29  ;;  %v22687_v48 = vld [vmem:[#allocation143_spill] sm:$0xff]  ;;  %v19096_v29 = vmul.f32 %v8549_v34, %v8533_v7  ;;  %9403 = vmatmul.f32.vlgmr.msrb.gmra.mxu1 %v19075_v19  ;;  %v22694_v34 = vld [vmem:[#allocation101_spill] sm:$0xff] }
 0x90f   :  { %9418 = vmatpush.msrb.mxu2 %v22684_v28  ;;  %9302 = vmatpush.msra.mxu3 %v9301_v12  ;;  %v8903_v28 = vsel %vm6139_vm10, %v22687_v48, %v18778_v45  ;;  %v22688_v12 = vand.u32 4294901760, %v18575_v0  ;;  %v19108_v48 = vsub.f32 %v8959_v42, %v19079_v27  ;;  %v22695_v7 = vld [vmem:[#allocation111_spill] sm:$0xff] }
 0x910   :  { %v19071_v33 = vsub.f32 %v9016_v56, %v19060_v31  ;;  %9530 = vmatpush.msra.mxu0 %v19060_v31  ;;  %9559 = vmatpush.msra.mxu1 %v9558_v50  ;;  %v19091_v56 = vand.u32 4294901760, %v8958_v6  ;;  %22690 = vst [vmem:[#allocation133_spill] sm:$0xff] %v19096_v29  ;;  %v19110_v0 = vand.u32 4294901760, %v8903_v28 }
 0x911   :  { %9422 = vmatpush.msrb.mxu2 %v22686_v41  ;;  %9308 = vmatpush.msra.mxu3 %v9307_v49  ;;  %v19102_v49 = vand.u32 4294901760, %v9534_v36  ;;  %v8902_v36 = vsel %vm6139_vm10, %v22695_v7, %v18755_v35  ;;  %v22698_v7 = vld [vmem:[#allocation64_spill] sm:$0xff] }
 0x912   :  { %9587 = vmatpush.msrb.mxu0 %v19004_v5  ;;  %v21770_v23 = vand.u32 4294901760, %v19071_v33  ;;  %9310 = vmatmul.f32.vlgmr.msra.gmra.mxu3 %v19001_v47 }
 0x913   :  { %9426 = vmatpush.msrb.mxu2 %v22688_v12  ;;  %9477 = vmatpush.msrb.mxu3 %v22689_v63  ;;  %v19099_v50 = vpop.permute.xlu1 %8690  ;;  %22692 = vst [vmem:[#allocation27_spill] sm:$0xff] %v19102_v49  ;;  %v22693_v63 = vand.u32 4294901760, %v18544_v25  ;;  %v19124_v12 = vsub.f32 %v8958_v6, %v19091_v56  ;;  %v22696_v25 = vand.u32 4294901760, %v18532_v22  ;;  %v21772_v6 = vand.u32 4294901760, %v19108_v48 }
 0x914   :  { %9590 = vmatpush.msrb.mxu0 %v19071_v33  ;;  %22691 = vst [vmem:[#allocation43_spill] sm:$0xff] %v19099_v50  ;;  %v9563_v41 = vsub.f32 %v19071_v33, %v21770_v23  ;;  %8888 = vrot.lane.b32.xlu1 %v19024_v20, %s12850_s15  ;;  %v19136_v23 = vand.u32 4294901760, %v8902_v36  ;;  %v22699_v22 = vand.u32 4294901760, %v18536_v26 }
 0x915   :  { %9430 = vmatpush.msrb.mxu2 %v22693_v63  ;;  %9479 = vmatpush.msrb.mxu3 %v22694_v34  ;;  %v22697_v63 = vld [vmem:[#allocation113_spill] sm:$0xff]  ;;  %v21774_v26 = vand.u32 4294901760, %v19124_v12 }
 0x916   :  { %8942 = vrot.lane.b32.xlu0 %v19096_v29, %s12846_s11  ;;  %v9564_v42 = vand.u32 4294901760, %v9563_v41  ;;  %8886 = vrot.lane.b32.xlu2 %v19096_v29, %s12850_s15  ;;  %v8847_v34 = vsel %vm207_vm5, %v22697_v63, %v18998_v2  ;;  %v19140_v41 = vsub.f32 %v8903_v28, %v19110_v0  ;;  %v19152_v2 = vpop.permute.xlu2 %8746  ;;  %v22701_v28 = vand.u32 4294901760, %v18845_v57 }
 0x917   :  { %9434 = vmatpush.msrb.mxu2 %v22696_v25  ;;  %9481 = vmatpush.msrb.mxu3 %v22698_v7  ;;  %v22700_v25 = vld [vmem:[#allocation15_spill] sm:$0xff]  ;;  %v19150_v7 = vand.u32 4294901760, %v8847_v34  ;;  %v22703_v57 = vand.u32 4294901760, %v18841_v53  ;;  %v9722_v53 = vsub.f32 %v19124_v12, %v21774_v26 }
 0x918   :  { %9536 = vmatmul.f32.vlgmr.msra.gmra.mxu0 %v19102_v49  ;;  %v8846_v63 = vsel %vm207_vm5, %v22700_v25, %v19081_v8  ;;  %9565 = vmatpush.msra.mxu1 %v9564_v42  ;;  %v9716_v42 = vsub.f32 %v19108_v48, %v21772_v6  ;;  %v22705_v8 = vand.u32 4294901760, %v19140_v41 }
 0x919   :  { %9673 = vmatpush.msra.mxu0 %v19079_v27  ;;  %9438 = vmatpush.msrb.mxu2 %v22699_v22  ;;  %v19168_v25 = vand.u32 4294901760, %v8846_v63  ;;  %v19183_v6 = vsub.f32 %v8847_v34, %v19150_v7 }
 0x91a   :  { %9483 = vmatpush.msrb.mxu3 %v18485_v58  ;;  %9612 = vmatpush.msrb.mxu1 %v18993_v11  ;;  %v19163_v58 = vsub.f32 %v8902_v36, %v19136_v23  ;;  %v19180_v36 = vand.u32 4294901760, %v18338_v1  ;;  %v9728_v26 = vsub.f32 %v19140_v41, %v22705_v8  ;;  %v9723_v8 = vand.u32 4294901760, %v9722_v53 }
 0x91b   :  { %9675 = vmatpush.msra.mxu0 %v19091_v56  ;;  %9442 = vmatpush.msrb.mxu2 %v22701_v28  ;;  %v19160_v22 = vpop.permute.xlu1 %8632  ;;  %v19174_v28 = vpop.permute.xlu0 %8744  ;;  %v19198_v34 = vsub.f32 %v8846_v63, %v19168_v25  ;;  %v22706_v63 = vand.u32 4294901760, %v18866_v38 }
 0x91c   :  { %9485 = vmatpush.msrb.mxu3 %v18561_v17  ;;  %22702 = vst [vmem:[#allocation141_spill] sm:$0xff] %v19160_v22  ;;  %8830 = vrot.lane.b32.xlu1 %v19096_v29, %s12839_s16  ;;  %v9717_v17 = vand.u32 4294901760, %v9716_v42  ;;  %v8778_v38 = vsel %vm171_vm4, %v22645_v43, %v19174_v28  ;;  %v8723_v43 = vsel %vm6047_vm9, %v22647_v3, %v19099_v50 }
 0x91d   :  { %9677 = vmatpush.msra.mxu0 %v19110_v0  ;;  %9446 = vmatpush.msrb.mxu2 %v22703_v57  ;;  %v22704_v57 = vand.u32 4294901760, %v18854_v59  ;;  %v19210_v59 = vsub.f32 %v18338_v1, %v19180_v36  ;;  %v19224_v1 = vand.u32 4294901760, %v18323_v10 }
 0x91e   :  { %9487 = vmatpush.msrb.mxu3 %v18508_v40  ;;  %8832 = vrot.lane.b32.xlu0 %v19024_v20, %s12839_s16  ;;  %v9207_v40 = vsub.f32 %v19028_v30, %v19075_v19  ;;  %v19228_v45 = vpop.permute.xlu2 %8688 }
 0x91f   :  { %8758 = vrot.lane.b32.xlu2 %v18752_v4, %s12841_s20  ;;  %9679 = vmatpush.msra.mxu0 %v19136_v23  ;;  %22707 = vst [vmem:[#allocation142_spill] sm:$0xff] %v19228_v45  ;;  %v19262_v3 = vsub.f32 %v18323_v10, %v19224_v1  ;;  %v8722_v10 = vsel %vm6047_vm9, %v22648_v18, %v19228_v45  ;;  %v22713_v18 = vand.u32 4294901760, %v18956_v13 }
 0x920   :  { %9450 = vmatpush.msrb.mxu2 %v22704_v57  ;;  %9489 = vmatpush.msrb.mxu3 %v18503_v62  ;;  %v8779_v62 = vsel %vm171_vm4, %v22651_v37, %v19152_v2  ;;  %v19218_v42 = vand.u32 4294901760, %v9207_v40  ;;  %v21778_v57 = vand.u32 4294901760, %v19183_v6  ;;  %v22708_v37 = vand.u32 4294901760, %v18930_v32 }
 0x921   :  { %9614 = vmatpush.msrb.mxu1 %v19060_v31  ;;  %9681 = vmatpush.msra.mxu0 %v19150_v7  ;;  %v21777_v40 = vand.u32 4294901760, %v19198_v34 }
 0x922   :  { %9567 = vmatmul.f32.vlgmr.msra.gmra.mxu1 %v18972_v16  ;;  %9454 = vmatpush.msrb.mxu2 %v22706_v63  ;;  %v19240_v63 = vand.u32 4294901760, %v8779_v62  ;;  %v9740_v32 = vsub.f32 %v19183_v6, %v21778_v57  ;;  %v22719_v57 = vld [vmem:[#allocation9_spill] sm:$0xff] }
 0x923   :  { %9718 = vmatpush.msra.mxu1 %v9717_v17  ;;  %9491 = vmatpush.msrb.mxu3 %v18506_v39  ;;  %v19226_v35 = vpop.permute.xlu1 %8988  ;;  %v9729_v17 = vand.u32 4294901760, %v9728_v26  ;;  %v22709_v39 = vand.u32 4294901760, %v19163_v58  ;;  %v21780_v26 = vand.u32 4294901760, %v19210_v59 }
 0x924   :  { %9683 = vmatpush.msra.mxu0 %v19168_v25  ;;  %9458 = vmatpush.msrb.mxu2 %v22708_v37  ;;  %v19255_v37 = vpop.permute.xlu0 %8634 }
 0x925   :  { %9724 = vmatpush.msra.mxu1 %v9723_v8  ;;  %v9734_v53 = vsub.f32 %v19163_v58, %v22709_v39  ;;  %9493 = vmatpush.msrb.mxu3 %v18836_v60  ;;  %v19253_v8 = vand.u32 4294901760, %v8778_v38  ;;  %22710 = vst [vmem:[#allocation94_spill] sm:$0xff] %v19255_v37  ;;  %v22711_v60 = vand.u32 4294901760, %v18925_v44  ;;  %v9746_v39 = vsub.f32 %v19198_v34, %v21777_v40 }
 0x926   :  { %9685 = vmatpush.msra.mxu0 %v19180_v36  ;;  %9209 = vmatmul.f32.vlgmr.msra.gmra.mxu2 %v19218_v42  ;;  %v19272_v44 = vsub.f32 %v8779_v62, %v19240_v63  ;;  %v9752_v62 = vsub.f32 %v19210_v59, %v21780_v26  ;;  %v22716_v26 = vand.u32 4294901760, %v19004_v5  ;;  %v19311_v13 = vpop.permute.xlu2 %8578  ;;  %v22721_v5 = vand.u32 4294901760, %v19262_v3 }
 0x927   :  { %9730 = vmatpush.msra.mxu1 %v9729_v17  ;;  %9462 = vmatpush.msrb.mxu2 %v22711_v60  ;;  %v9735_v17 = vand.u32 4294901760, %v9734_v53  ;;  %v19274_v60 = vand.u32 4294901760, %v8723_v43  ;;  %v9741_v53 = vand.u32 4294901760, %v9740_v32  ;;  %v19289_v40 = vsub.f32 %v8778_v38, %v19253_v8  ;;  %v22714_v38 = vld [vmem:[#allocation110_spill] sm:$0xff]  ;;  %22717 = vst [vmem:[#allocation30_spill] sm:$0xff] %v19311_v13 }
 0x928   :  { %9495 = vmatpush.msrb.mxu3 %v18818_v54  ;;  %8702 = vrot.lane.b32.xlu1 %v18752_v4, %s12852_s19  ;;  %v22712_v54 = vand.u32 4294901760, %v18942_v52  ;;  %v9747_v52 = vand.u32 4294901760, %v9746_v39  ;;  %v19298_v32 = vand.u32 4294901760, %v8722_v10  ;;  %v9753_v39 = vand.u32 4294901760, %v9752_v62 }
 0x929   :  { %8756 = vrot.lane.b32.xlu0 %v18766_v51, %s12841_s20  ;;  %8700 = vrot.lane.b32.xlu2 %v18766_v51, %s12852_s19 }
 0x92a   :  { %9687 = vmatpush.msra.mxu0 %v19224_v1  ;;  %9736 = vmatpush.msra.mxu1 %v9735_v17  ;;  %v19301_v17 = vsub.f32 %v8723_v43, %v19274_v60  ;;  %v22718_v43 = vld [vmem:[#allocation52_spill] sm:$0xff]  ;;  %v19329_v62 = vsub.f32 %v8722_v10, %v19298_v32 }
 0x92b   :  { %9466 = vmatpush.msrb.mxu2 %v22712_v54  ;;  %9497 = vmatpush.msrb.mxu3 %v18830_v14  ;;  %v19294_v50 = vpop.permute.xlu1 %8934  ;;  %v8667_v14 = vsel %vm4576_vm11, %v22714_v38, %v19255_v37  ;;  %v22715_v54 = vld [vmem:[#allocation100_spill] sm:$0xff]  ;;  %v22720_v38 = vand.u32 4294901760, %v19071_v33 }
 0x92c   :  { %9689 = vmatpush.msra.mxu0 %v19240_v63  ;;  %9742 = vmatpush.msra.mxu1 %v9741_v53  ;;  %v19325_v53 = vand.u32 4294901760, %v8667_v14 }
 0x92d   :  { %9470 = vmatpush.msrb.mxu2 %v22713_v18  ;;  %9499 = vmatpush.msrb.mxu3 %v22715_v54  ;;  %v8666_v18 = vsel %vm4576_vm11, %v22718_v43, %v19160_v22  ;;  %v21783_v54 = vand.u32 4294901760, %v19289_v40  ;;  %v22723_v43 = vand.u32 4294901760, %v19272_v44 }
 0x92e   :  { %9691 = vmatpush.msra.mxu0 %v19253_v8  ;;  %9748 = vmatpush.msra.mxu1 %v9747_v52  ;;  %v22722_v52 = vld [vmem:[#allocation144_spill] sm:$0xff] }
 0x92f   :  { %9639 = vmatpush.msra.mxu2 %v22716_v26  ;;  %9501 = vmatpush.msrb.mxu3 %v22719_v57  ;;  %v9758_v26 = vsub.f32 %v19262_v3, %v22721_v5  ;;  %v8611_v33 = vsel %vm5990_vm12, %v22722_v52, %v19311_v13  ;;  %v19335_v57 = vpop.permute.xlu0 %8576  ;;  %v19343_v5 = vand.u32 4294901760, %v8666_v18  ;;  %v9770_v52 = vsub.f32 %v19289_v40, %v21783_v54 }
 0x930   :  { %9693 = vmatpush.msra.mxu0 %v19274_v60  ;;  %9754 = vmatpush.msra.mxu1 %v9753_v39  ;;  %v19356_v39 = vand.u32 4294901760, %v8611_v33  ;;  %v19359_v13 = vsub.f32 %v8667_v14, %v19325_v53  ;;  %v22725_v54 = vand.u32 4294901760, %v19301_v17  ;;  %v21787_v14 = vand.u32 4294901760, %v19329_v62 }
 0x931   :  { %9643 = vmatpush.msra.mxu2 %v22720_v38  ;;  %v9764_v38 = vsub.f32 %v19272_v44, %v22723_v43  ;;  %9503 = vmatpush.msrb.mxu3 %v18874_v55  ;;  %v9759_v10 = vand.u32 4294901760, %v9758_v26  ;;  %v22724_v55 = vld [vmem:[#allocation56_spill] sm:$0xff]  ;;  %v19374_v45 = vsub.f32 %v8666_v18, %v19343_v5 }
 0x932   :  { %9472 = vmatmul.f32.vlgmr.msrb.gmra.mxu2 %v19001_v47  ;;  %8644 = vrot.lane.b32.xlu1 %v18766_v51, %s12848_s13  ;;  %v8610_v22 = vsel %vm5990_vm12, %v22724_v55, %v19335_v57  ;;  %v9776_v37 = vsub.f32 %v19301_v17, %v22725_v54  ;;  %v21786_v18 = vand.u32 4294901760, %v19359_v13 }
 0x933   :  { %9816 = vmatpush.msrb.mxu2 %v19108_v48  ;;  %8646 = vrot.lane.b32.xlu0 %v18752_v4, %s12848_s13  ;;  %v19354_v43 = vpop.permute.xlu1 %8824  ;;  %v9765_v26 = vand.u32 4294901760, %v9764_v38  ;;  %v19378_v55 = vand.u32 4294901760, %v8610_v22  ;;  %v19382_v38 = vsub.f32 %v8611_v33, %v19356_v39 }
 0x934   :  { %8590 = vrot.lane.b32.xlu2 %v18752_v4, %s12853_s21  ;;  %9695 = vmatpush.msra.mxu0 %v19298_v32  ;;  %v9777_v54 = vand.u32 4294901760, %v9776_v37  ;;  %v9788_v37 = vsub.f32 %v19359_v13, %v21786_v18  ;;  %v22729_v18 = vand.u32 4294901760, %v19124_v12 }
 0x935   :  { %9760 = vmatpush.msra.mxu1 %v9759_v10  ;;  %9505 = vmatpush.msrb.mxu3 %v18899_v15  ;;  %v9771_v15 = vand.u32 4294901760, %v9770_v52  ;;  %v9782_v10 = vsub.f32 %v19329_v62, %v21787_v14  ;;  %v19395_v33 = vsub.f32 %v8610_v22, %v19378_v55  ;;  %v22726_v22 = vld [vmem:[#allocation11_spill] sm:$0xff] }
 0x936   :  { %9819 = vmatpush.msrb.mxu2 %v19124_v12  ;;  %9697 = vmatpush.msra.mxu0 %v19325_v53  ;;  %v22733_v12 = vand.u32 4294901760, %v19163_v58 }
 0x937   :  { %9766 = vmatpush.msra.mxu1 %v9765_v26  ;;  %9507 = vmatpush.msrb.mxu3 %v18927_v21  ;;  %v21790_v21 = vand.u32 4294901760, %v19374_v45  ;;  %v9783_v52 = vand.u32 4294901760, %v9782_v10  ;;  %v19409_v26 = vpop.permute.xlu2 %8986  ;;  %v9789_v10 = vand.u32 4294901760, %v9788_v37  ;;  %v22730_v37 = vand.u32 4294901760, %v19395_v33 }
 0x938   :  { %9822 = vmatpush.msrb.mxu2 %v19140_v41  ;;  %9699 = vmatpush.msra.mxu0 %v19343_v5 }
 0x939   :  { %9664 = vmatpush.msra.mxu3 %v18993_v11  ;;  %9772 = vmatpush.msra.mxu1 %v9771_v15  ;;  %v22727_v15 = vld [vmem:[#allocation118_spill] sm:$0xff] }
 0x93a   :  { %9825 = vmatpush.msrb.mxu2 %v19163_v58  ;;  %9701 = vmatpush.msra.mxu0 %v19356_v39 }
 0x93b   :  { %9666 = vmatpush.msra.mxu3 %v19060_v31  ;;  %9778 = vmatpush.msra.mxu1 %v9777_v54  ;;  %v19398_v11 = vpop.permute.xlu1 %8748  ;;  %v21791_v31 = vand.u32 4294901760, %v19382_v38  ;;  %v9794_v54 = vsub.f32 %v19374_v45, %v21790_v21  ;;  %v19428_v21 = vpop.permute.xlu0 %8936 }
 0x93c   :  { %9509 = vmatmul.f32.vlgmr.msrb.gmra.mxu3 %v19001_v47  ;;  %9828 = vmatpush.msrb.mxu2 %v19183_v6 }
 0x93d   :  { %9869 = vmatpush.msrb.mxu3 %v19079_v27  ;;  %8948 = vrot.lane.b32.xlu1 %v22726_v22, %s12846_s11  ;;  %v9800_v14 = vsub.f32 %v19382_v38, %v21791_v31  ;;  %v9806_v31 = vsub.f32 %v19395_v33, %v22730_v37 }
 0x93e   :  { %8588 = vrot.lane.b32.xlu0 %v18766_v51, %s12853_s21  ;;  %8946 = vrot.lane.b32.xlu2 %v22727_v15, %s12846_s11  ;;  %v22728_v51 = vand.u32 4294901760, %v19108_v48  ;;  %v22732_v48 = vand.u32 4294901760, %v19140_v41  ;;  %v22734_v41 = vand.u32 4294901760, %v19183_v6  ;;  %v22737_v6 = vand.u32 4294901760, %v19210_v59 }
 0x93f   :  { %9703 = vmatpush.msra.mxu0 %v19378_v55  ;;  %9784 = vmatpush.msra.mxu1 %v9783_v52  ;;  %v9795_v52 = vand.u32 4294901760, %v9794_v54  ;;  %v19447_v54 = vpop.permute.xlu2 %8880 }
 0x940   :  { %9593 = vmatmul.f32.vlgmr.msrb.gmra.mxu0 %v19012_v46  ;;  %9831 = vmatpush.msrb.mxu2 %v19198_v34 }
 0x941   :  { %9871 = vmatpush.msrb.mxu3 %v19091_v56  ;;  %9910 = vmatpush.msrb.mxu0 %v22728_v51  ;;  %v9801_v51 = vand.u32 4294901760, %v9800_v14 }
 0x942   :  { %9790 = vmatpush.msra.mxu1 %v9789_v10  ;;  %9834 = vmatpush.msrb.mxu2 %v19210_v59 }
 0x943   :  { %9873 = vmatpush.msrb.mxu3 %v19110_v0  ;;  %9914 = vmatpush.msrb.mxu0 %v22729_v18  ;;  %v19437_v4 = vpop.permute.xlu1 %8638  ;;  %v9807_v18 = vand.u32 4294901760, %v9806_v31  ;;  %v19462_v14 = vpop.permute.xlu0 %8878  ;;  %v22736_v31 = vand.u32 4294901760, %v19198_v34  ;;  %v22739_v34 = vand.u32 4294901760, %v19262_v3 }
 0x944   :  { %22731 = vst [vmem:[#allocation103_spill] sm:$0xff] %v19437_v4  ;;  %9796 = vmatpush.msra.mxu1 %v9795_v52  ;;  %9837 = vmatpush.msrb.mxu2 %v19262_v3  ;;  %v22741_v3 = vld [vmem:[#allocation66_spill] sm:$0xff]  ;;  %v22742_v52 = vand.u32 4294901760, %v19272_v44 }
 0x945   :  { %9875 = vmatpush.msrb.mxu3 %v19136_v23  ;;  %9918 = vmatpush.msrb.mxu0 %v22732_v48 }
 0x946   :  { %9802 = vmatpush.msra.mxu1 %v9801_v51  ;;  %9840 = vmatpush.msrb.mxu2 %v19272_v44  ;;  %v22743_v51 = vand.u32 4294901760, %v19289_v40  ;;  %v22744_v44 = vand.u32 4294901760, %v19301_v17 }
 0x947   :  { %9877 = vmatpush.msrb.mxu3 %v19150_v7  ;;  %9922 = vmatpush.msrb.mxu0 %v22733_v12 }
 0x948   :  { %8892 = vrot.lane.b32.xlu1 %v22726_v22, %s12850_s15  ;;  %9000 = vrot.lane.b32.xlu0 %v19024_v20, %s12851_s18 }
 0x949   :  { %8998 = vrot.lane.b32.xlu2 %v19096_v29, %s12851_s18  ;;  %9808 = vmatpush.msra.mxu1 %v9807_v18 }
 0x94a   :  { %9618 = vmatmul.f32.vlgmr.msrb.gmra.mxu1 %v19044_v24  ;;  %9843 = vmatpush.msrb.mxu2 %v19289_v40 }
 0x94b   :  { %9879 = vmatpush.msrb.mxu3 %v19168_v25  ;;  %9926 = vmatpush.msrb.mxu0 %v22734_v41  ;;  %v19460_v58 = vpop.permute.xlu1 %8580  ;;  %v19505_v37 = vpop.permute.xlu0 %8750 }
 0x94c   :  { %22735 = vst [vmem:[#allocation132_spill] sm:$0xff] %v19460_v58  ;;  %9977 = vmatpush.msrb.mxu1 %v19079_v27  ;;  %9846 = vmatpush.msrb.mxu2 %v19301_v17  ;;  %v22738_v27 = vld [vmem:[#allocation99_spill] sm:$0xff]  ;;  %v22746_v17 = vand.u32 4294901760, %v19329_v62 }
 0x94d   :  { %9881 = vmatpush.msrb.mxu3 %v19180_v36  ;;  %9930 = vmatpush.msrb.mxu0 %v22736_v31  ;;  %v9015_v10 = vsel %vm6196_vm3, %v22738_v27, %v19226_v35  ;;  %v8957_v31 = vsel %vm4612_vm13, %v18776_v9, %v19428_v21 }
 0x94e   :  { %9979 = vmatpush.msrb.mxu1 %v19091_v56  ;;  %9849 = vmatpush.msrb.mxu2 %v19329_v62  ;;  %v19482_v56 = vpop.permute.xlu2 %8822  ;;  %v19493_v59 = vand.u32 4294901760, %v9015_v10  ;;  %v22748_v62 = vand.u32 4294901760, %v19359_v13 }
 0x94f   :  { %9883 = vmatpush.msrb.mxu3 %v19224_v1  ;;  %9934 = vmatpush.msrb.mxu0 %v22737_v6  ;;  %v22749_v6 = vand.u32 4294901760, %v19374_v45 }
 0x950   :  { %9981 = vmatpush.msrb.mxu1 %v19110_v0  ;;  %9645 = vmatmul.f32.vlgmr.msra.gmra.mxu2 %v18972_v16  ;;  %v10055_v12 = vsub.f32 %v9015_v10, %v19493_v59  ;;  %v22751_v10 = vand.u32 4294901760, %v19382_v38 }
 0x951   :  { %9852 = vmatpush.msrb.mxu2 %v19359_v13  ;;  %9885 = vmatpush.msrb.mxu3 %v19240_v63 }
 0x952   :  { %9938 = vmatpush.msrb.mxu0 %v22739_v34  ;;  %9983 = vmatpush.msrb.mxu1 %v19136_v23  ;;  %v9014_v23 = vsel %vm6196_vm3, %v22741_v3, %v19409_v26  ;;  %v19564_v34 = vand.u32 4294901760, %v8957_v31 }
 0x953   :  { %8836 = vrot.lane.b32.xlu1 %v22726_v22, %s12839_s16  ;;  %8890 = vrot.lane.b32.xlu0 %v22727_v15, %s12850_s15  ;;  %v19491_v0 = vpop.permute.xlu1 %8992  ;;  %v19512_v48 = vand.u32 4294901760, %v9014_v23  ;;  %v19541_v41 = vpop.permute.xlu0 %8692 }
 0x954   :  { %22740 = vst [vmem:[#allocation126_spill] sm:$0xff] %v19491_v0  ;;  %8834 = vrot.lane.b32.xlu2 %v22727_v15, %s12839_s16  ;;  %9855 = vmatpush.msrb.mxu2 %v19374_v45 }
 0x955   :  { %9887 = vmatpush.msrb.mxu3 %v19253_v8  ;;  %9942 = vmatpush.msrb.mxu0 %v22742_v52  ;;  %v10061_v40 = vsub.f32 %v9014_v23, %v19512_v48  ;;  %22747 = vst [vmem:[#allocation140_spill] sm:$0xff] %v19541_v41  ;;  %v22755_v52 = vld [vmem:[#allocation50_spill] sm:$0xff] }
 0x956   :  { %9985 = vmatpush.msrb.mxu1 %v19150_v7  ;;  %9858 = vmatpush.msrb.mxu2 %v19382_v38  ;;  %v19527_v18 = vpop.permute.xlu2 %8694 }
 0x957   :  { %9889 = vmatpush.msrb.mxu3 %v19274_v60  ;;  %9946 = vmatpush.msrb.mxu0 %v22743_v51  ;;  %22745 = vst [vmem:[#allocation138_spill] sm:$0xff] %v19527_v18  ;;  %v8900_v51 = vsel %vm6139_vm10, %v22755_v52, %v19462_v14  ;;  %v8777_v52 = vsel %vm171_vm4, %v19152_v2, %v19505_v37 }
 0x958   :  { %9987 = vmatpush.msrb.mxu1 %v19168_v25  ;;  %9861 = vmatpush.msrb.mxu2 %v19395_v33  ;;  %v10056_v25 = vand.u32 4294901760, %v10055_v12 }
 0x959   :  { %9891 = vmatpush.msrb.mxu3 %v19298_v32  ;;  %9950 = vmatpush.msrb.mxu0 %v22744_v44 }
 0x95a   :  { %9989 = vmatpush.msrb.mxu1 %v19180_v36  ;;  %9668 = vmatmul.f32.vlgmr.msra.gmra.mxu3 %v18972_v16  ;;  %v10057_v36 = vsub.f32 %v10055_v12, %v10056_v25 }
 0x95b   :  { %9864 = vmatmul.f32.vlgmr.msrb.gmra.mxu2 %v19028_v30  ;;  %9893 = vmatpush.msrb.mxu3 %v19325_v53  ;;  %v19524_v7 = vpop.permute.xlu1 %8882 }
 0x95c   :  { %10028 = vmatpush.msra.mxu2 %v19493_v59  ;;  %9954 = vmatpush.msrb.mxu0 %v22746_v17  ;;  %v10058_v9 = vand.u32 4294901760, %v10057_v36  ;;  %v22758_v36 = vld [vmem:[#allocation5_spill] sm:$0xff] }
 0x95d   :  { %9991 = vmatpush.msrb.mxu1 %v19224_v1  ;;  %8760 = vrot.lane.b32.xlu1 %v19096_v29, %s12841_s20  ;;  %v10062_v1 = vand.u32 4294901760, %v10061_v40 }
 0x95e   :  { %8762 = vrot.lane.b32.xlu0 %v19024_v20, %s12841_s20  ;;  %8706 = vrot.lane.b32.xlu2 %v19024_v20, %s12852_s19  ;;  %v19572_v23 = vpop.permute.xlu2 %8636 }
 0x95f   :  { %10030 = vmatpush.msra.mxu2 %v19512_v48  ;;  %9895 = vmatpush.msrb.mxu3 %v19343_v5  ;;  %v10063_v45 = vsub.f32 %v10061_v40, %v10062_v1  ;;  %22753 = vst [vmem:[#allocation127_spill] sm:$0xff] %v19572_v23 }
 0x960   :  { %9958 = vmatpush.msrb.mxu0 %v22748_v62  ;;  %9993 = vmatpush.msrb.mxu1 %v19240_v63  ;;  %v22750_v63 = vld [vmem:[#allocation105_spill] sm:$0xff]  ;;  %v8845_v62 = vsel %vm207_vm5, %v22758_v36, %v19354_v43  ;;  %v8776_v36 = vsel %vm171_vm4, %v19174_v28, %v19398_v11 }
 0x961   :  { %10087 = vmatpush.msrb.mxu2 %v10055_v12  ;;  %9897 = vmatpush.msrb.mxu3 %v19356_v39  ;;  %v8956_v27 = vsel %vm4612_vm13, %v22750_v63, %v19294_v50  ;;  %v10064_v12 = vand.u32 4294901760, %v10063_v45 }
 0x962   :  { %9962 = vmatpush.msrb.mxu0 %v22749_v6  ;;  %9995 = vmatpush.msrb.mxu1 %v19253_v8  ;;  %v22752_v8 = vld [vmem:[#allocation13_spill] sm:$0xff]  ;;  %v19574_v38 = vand.u32 4294901760, %v8956_v27  ;;  %v19623_v6 = vand.u32 4294901760, %v8845_v62 }
 0x963   :  { %10090 = vmatpush.msrb.mxu2 %v10061_v40  ;;  %9899 = vmatpush.msrb.mxu3 %v19378_v55  ;;  %v19555_v13 = vpop.permute.xlu1 %8754  ;;  %v8901_v3 = vsel %vm6139_vm10, %v22752_v8, %v19447_v54  ;;  %v19590_v40 = vsub.f32 %v8957_v31, %v19564_v34 }
 0x964   :  { %9966 = vmatpush.msrb.mxu0 %v22751_v10  ;;  %9997 = vmatpush.msrb.mxu1 %v19274_v60  ;;  %v22754_v60 = vand.u32 4294901760, %v19395_v33  ;;  %v19587_v44 = vand.u32 4294901760, %v8901_v3  ;;  %v19598_v33 = vsub.f32 %v8956_v27, %v19574_v38  ;;  %22760 = vst [vmem:[#allocation137_spill] sm:$0xff] %v19623_v6 }
 0x965   :  { %9903 = vmatmul.f32.vlgmr.msrb.gmra.mxu3 %v19075_v19  ;;  %10036 = vmatmul.f32.vlgmr.msra.gmra.mxu2 %v19102_v49 }
 0x966   :  { %10059 = vmatpush.msra.mxu3 %v10058_v9  ;;  %10139 = vmatpush.msra.mxu2 %v10056_v25  ;;  %v19600_v25 = vand.u32 4294901760, %v8900_v51  ;;  %v19631_v27 = vpop.permute.xlu2 %8940  ;;  %v22762_v9 = vld [vmem:[#allocation20_spill] sm:$0xff]  ;;  %v21795_v8 = vand.u32 4294901760, %v19598_v33 }
 0x967   :  { %9970 = vmatpush.msrb.mxu0 %v22754_v60  ;;  %9999 = vmatpush.msrb.mxu1 %v19298_v32  ;;  %v19595_v32 = vpop.permute.xlu0 %8582  ;;  %v19650_v45 = vand.u32 4294901760, %v22762_v9 }
 0x968   :  { %8650 = vrot.lane.b32.xlu1 %v19024_v20, %s12848_s13  ;;  %8704 = vrot.lane.b32.xlu0 %v19096_v29, %s12852_s19  ;;  %22756 = vst [vmem:[#allocation139_spill] sm:$0xff] %v19595_v32  ;;  %v19626_v63 = vsub.f32 %v8900_v51, %v19600_v25  ;;  %v22764_v51 = vld [vmem:[#allocation78_spill] sm:$0xff] }
 0x969   :  { %8648 = vrot.lane.b32.xlu2 %v19096_v29, %s12848_s13  ;;  %9709 = vmatmul.f32.vlgmr.msra.gmra.mxu0 %v19218_v42  ;;  %v19685_v2 = vsub.f32 %v22762_v9, %v19650_v45 }
 0x96a   :  { %10065 = vmatpush.msra.mxu3 %v10064_v12  ;;  %10143 = vmatpush.msra.mxu2 %v10062_v1  ;;  %v19613_v1 = vsub.f32 %v8901_v3, %v19587_v44 }
 0x96b   :  { %10316 = vmatpush.msra.mxu0 %v19590_v40  ;;  %10001 = vmatpush.msrb.mxu1 %v19325_v53  ;;  %v19604_v17 = vpop.permute.xlu1 %8696  ;;  %v22759_v53 = vld [vmem:[#allocation136_spill] sm:$0xff] }
 0x96c   :  { %22757 = vst [vmem:[#allocation125_spill] sm:$0xff] %v19604_v17  ;;  %10112 = vmatpush.msrb.mxu3 %v19493_v59  ;;  %9810 = vmatmul.f32.vlgmr.msra.gmra.mxu1 %v19001_v47  ;;  %v8844_v31 = vsel %vm207_vm5, %v22759_v53, %v19482_v56 }
 0x96d   :  { %10319 = vmatpush.msra.mxu0 %v19598_v33  ;;  %10003 = vmatpush.msrb.mxu1 %v19343_v5  ;;  %v21794_v5 = vand.u32 4294901760, %v19590_v40  ;;  %v19635_v10 = vand.u32 4294901760, %v8844_v31 }
 0x96e   :  { %10114 = vmatpush.msrb.mxu3 %v19512_v48  ;;  %10093 = vmatmul.f32.vlgmr.msrb.gmra.mxu2 %v19012_v46  ;;  %v19710_v28 = vpop.permute.xlu2 %8884 }
 0x96f   :  { %10322 = vmatpush.msra.mxu0 %v19613_v1  ;;  %10005 = vmatpush.msrb.mxu1 %v19356_v39  ;;  %22761 = vst [vmem:[#allocation151_spill] sm:$0xff] %v19635_v10  ;;  %v19643_v39 = vsub.f32 %v8845_v62, %v19623_v6  ;;  %v19663_v60 = vsub.f32 %v8844_v31, %v19635_v10  ;;  %v19687_v62 = vand.u32 4294901760, %v8777_v52 }
 0x970   :  { %10067 = vmatmul.f32.vlgmr.msra.gmra.mxu3 %v18972_v16  ;;  %10173 = vmatpush.msrb.mxu2 %v19564_v34  ;;  %v10222_v31 = vsub.f32 %v19598_v33, %v21795_v8  ;;  %v19708_v8 = vand.u32 4294901760, %v8776_v36 }
 0x971   :  { %10164 = vmatpush.msra.mxu3 %v19493_v59  ;;  %10325 = vmatpush.msra.mxu0 %v19626_v63  ;;  %v10216_v59 = vsub.f32 %v19590_v40, %v21794_v5  ;;  %22765 = vst [vmem:[#allocation18_spill] sm:$0xff] %v19687_v62  ;;  %v9162_v5 = vld [vmem:[%s21485_s8] sm:$0xff] }
 0x972   :  { %10007 = vmatpush.msrb.mxu1 %v19378_v55  ;;  %8592 = vrot.lane.b32.xlu1 %v19096_v29, %s12853_s21  ;;  %v19655_v55 = vpop.permute.xlu0 %8938  ;;  %22767 = vst [vmem:[#allocation147_spill] sm:$0xff] %v19708_v8  ;;  %v19737_v29 = vsub.f32 %v8776_v36, %v19708_v8  ;;  %v22775_v36 = vand.u32 4294901760, %v19643_v39 }
 0x973   :  { %8594 = vrot.lane.b32.xlu0 %v19024_v20, %s12853_s21  ;;  %9004 = vrot.lane.b32.xlu2 %v22726_v22, %s12851_s18  ;;  %v10217_v53 = vand.u32 4294901760, %v10216_v59  ;;  %v22766_v59 = vld [vmem:[#allocation43_spill] sm:$0xff]  ;;  %v22768_v22 = vand.u32 4294901760, %v19613_v1  ;;  %v19720_v20 = vsub.f32 %v8777_v52, %v19687_v62 }
 0x974   :  { %10166 = vmatpush.msra.mxu3 %v19512_v48  ;;  %10175 = vmatpush.msrb.mxu2 %v19574_v38  ;;  %v19660_v3 = vpop.permute.xlu1 %8586  ;;  %v19672_v48 = vand.u32 4294901760, %v22764_v51  ;;  %v8721_v12 = vsel %vm6047_vm9, %v22766_v59, %v19527_v18  ;;  %v22769_v59 = vld [vmem:[#allocation142_spill] sm:$0xff]  ;;  %v10240_v52 = vsub.f32 %v19643_v39, %v22775_v36  ;;  %v22779_v36 = vand.u32 4294901760, %v19663_v60 }
 0x975   :  { %22763 = vst [vmem:[#allocation150_spill] sm:$0xff] %v19660_v3  ;;  %10328 = vmatpush.msra.mxu0 %v19643_v39  ;;  %10369 = vmatpush.msra.mxu1 %v19564_v34  ;;  %v8720_v3 = vsel %vm6047_vm9, %v22769_v59, %v19541_v41  ;;  %v19730_v18 = vand.u32 4294901760, %v8721_v12  ;;  %v22772_v59 = vld [vmem:[#allocation94_spill] sm:$0xff] }
 0x976   :  { %10177 = vmatpush.msrb.mxu2 %v19587_v44  ;;  %9972 = vmatmul.f32.vlgmr.msrb.gmra.mxu0 %v19001_v47  ;;  %v19699_v9 = vsub.f32 %v22764_v51, %v19672_v48  ;;  %v10228_v51 = vsub.f32 %v19613_v1, %v22768_v22  ;;  %v22770_v22 = vand.u32 4294901760, %v19626_v63 }
 0x977   :  { %10331 = vmatpush.msra.mxu0 %v19663_v60  ;;  %10371 = vmatpush.msra.mxu1 %v19574_v38  ;;  %22771 = vst [vmem:[#allocation146_spill] sm:$0xff] %v19730_v18 }
 0x978   :  { %10179 = vmatpush.msrb.mxu2 %v19600_v25  ;;  %10118 = vmatmul.f32.vlgmr.msrb.gmra.mxu3 %v19044_v24  ;;  %v10234_v17 = vsub.f32 %v19626_v63, %v22770_v22  ;;  %v10229_v22 = vand.u32 4294901760, %v10228_v51  ;;  %v19747_v24 = vand.u32 4294901760, %v8720_v3  ;;  %v22777_v51 = vld [vmem:[#allocation141_spill] sm:$0xff] }
 0x979   :  { %10334 = vmatpush.msra.mxu0 %v19685_v2  ;;  %10373 = vmatpush.msra.mxu1 %v19587_v44 }
 0x97a   :  { %10181 = vmatpush.msrb.mxu2 %v19623_v6  ;;  %10218 = vmatpush.msrb.mxu3 %v10217_v53  ;;  %v10223_v53 = vand.u32 4294901760, %v10222_v31  ;;  %v8991_v31 = vpop.permute.xlu0 %8990  ;;  %22774 = vst [vmem:[#allocation46_spill] sm:$0xff] %v19747_v24  ;;  %v10235_v41 = vand.u32 4294901760, %v10234_v17 }
 0x97b   :  { %10337 = vmatpush.msra.mxu0 %v19699_v9  ;;  %10375 = vmatpush.msra.mxu1 %v19600_v25 }
 0x97c   :  { %10009 = vmatmul.f32.vlgmr.msrb.gmra.mxu1 %v19001_v47  ;;  %9165 = vperm.xlu1 %12730, %v9162_v5   ;;  %v8665_v5 = vsel %vm4576_vm11, %v22772_v59, %v19437_v4  ;;  %v8664_v59 = vsel %vm4576_vm11, %v22777_v51, %v19572_v23  ;;  %v19765_v4 = vsub.f32 %v8721_v12, %v19730_v18  ;;  %v22781_v12 = vand.u32 4294901760, %v19685_v2 }
 0x97d   :  { %9002 = vrot.lane.b32.xlu0 %v22727_v15, %s12851_s18  ;;  %10183 = vmatpush.msrb.mxu2 %v19635_v10  ;;  %v19745_v15 = vpop.permute.xlu1 %8994  ;;  %v19783_v23 = vand.u32 4294901760, %v8664_v59 }
 0x97e   :  { %10224 = vmatpush.msrb.mxu3 %v10223_v53  ;;  %10340 = vmatpush.msra.mxu0 %v19720_v20  ;;  %22773 = vst [vmem:[#allocation145_spill] sm:$0xff] %v19745_v15  ;;  %v19757_v53 = vsel %vm6196_vm3, %v8991_v31, %v19745_v15  ;;  %v10246_v15 = vsub.f32 %v19663_v60, %v22779_v36  ;;  %v10241_v36 = vand.u32 4294901760, %v10240_v52 }
 0x97f   :  { %10377 = vmatpush.msra.mxu1 %v19623_v6  ;;  %10185 = vmatpush.msrb.mxu2 %v19650_v45  ;;  %22776 = vst [vmem:[#allocation163_spill] sm:$0xff] %v19757_v53  ;;  %v19767_v6 = vand.u32 4294901760, %v8665_v5  ;;  %v10252_v51 = vsub.f32 %v19685_v2, %v22781_v12 }
 0x980   :  { %10230 = vmatpush.msrb.mxu3 %v10229_v22  ;;  %10343 = vmatpush.msra.mxu0 %v19737_v29  ;;  %v22780_v22 = vld [vmem:[#allocation30_spill] sm:$0xff]  ;;  %v10247_v53 = vand.u32 4294901760, %v10246_v15 }
 0x981   :  { %22778 = vst [vmem:[#allocation154_spill] sm:$0xff] %v19767_v6  ;;  %10379 = vmatpush.msra.mxu1 %v19635_v10  ;;  %10145 = vmatmul.f32.vlgmr.msra.gmra.mxu2 %v18972_v16  ;;  %v8609_v17 = vsel %vm5990_vm12, %v22780_v22, %v19595_v32  ;;  %v19786_v10 = vsub.f32 %v8720_v3, %v19747_v24  ;;  %v19791_v22 = vpop.permute.xlu2 %8828 }
 0x982   :  { %10187 = vmatpush.msrb.mxu2 %v19672_v48  ;;  %10236 = vmatpush.msrb.mxu3 %v10235_v41  ;;  %v8608_v41 = vsel %vm5990_vm12, %v19335_v57, %v19460_v58  ;;  %v9013_v3 = vsel %vm6196_vm3, %v19226_v35, %v19491_v0  ;;  %v19804_v52 = vsub.f32 %v8665_v5, %v19767_v6  ;;  %v19806_v12 = vand.u32 4294901760, %v8609_v17 }
 0x983   :  { %10346 = vmatpush.msra.mxu0 %v19765_v4  ;;  %10381 = vmatpush.msra.mxu1 %v19650_v45  ;;  %v22782_v57 = vand.u32 4294901760, %v19699_v9  ;;  %v9012_v35 = vsel %vm6196_vm3, %v19409_v26, %v8991_v31  ;;  %v10253_v5 = vand.u32 4294901760, %v10252_v51  ;;  %v19821_v32 = vand.u32 4294901760, %v8608_v41 }
 0x984   :  { %10168 = vmatmul.f32.vlgmr.msra.gmra.mxu3 %v18972_v16  ;;  %10189 = vmatpush.msrb.mxu2 %v19687_v62  ;;  %v19823_v15 = vand.u32 4294901760, %v9013_v3  ;;  %v19835_v51 = vsub.f32 %v8609_v17, %v19806_v12  ;;  %v19837_v0 = vand.u32 4294901760, %v9012_v35 }
 0x985   :  { %10242 = vmatpush.msrb.mxu3 %v10241_v36  ;;  %10349 = vmatpush.msra.mxu0 %v19786_v10  ;;  %v10258_v58 = vsub.f32 %v19699_v9, %v22782_v57  ;;  %v19819_v36 = vsub.f32 %v8664_v59, %v19783_v23  ;;  %v22783_v57 = vand.u32 4294901760, %v19720_v20  ;;  %v19847_v59 = vsub.f32 %v8608_v41, %v19821_v32 }
 0x986   :  { %10383 = vmatpush.msra.mxu1 %v19672_v48  ;;  %10191 = vmatpush.msrb.mxu2 %v19708_v8  ;;  %v19829_v31 = vpop.permute.xlu1 %8888  ;;  %v10555_v17 = vsub.f32 %v9013_v3, %v19823_v15 }
 0x987   :  { %10248 = vmatpush.msrb.mxu3 %v10247_v53  ;;  %10352 = vmatpush.msra.mxu0 %v19804_v52  ;;  %v10264_v26 = vsub.f32 %v19720_v20, %v22783_v57  ;;  %22784 = vst [vmem:[#allocation35_spill] sm:$0xff] %v19829_v31  ;;  %v10259_v53 = vand.u32 4294901760, %v10258_v58  ;;  %v22785_v57 = vand.u32 4294901760, %v19737_v29  ;;  %v22786_v58 = vand.u32 4294901760, %v19765_v4 }
 0x988   :  { %10385 = vmatpush.msra.mxu1 %v19687_v62  ;;  %10193 = vmatpush.msrb.mxu2 %v19730_v18  ;;  %v19858_v62 = vsub.f32 %v9012_v35, %v19837_v0 }
 0x989   :  { %10254 = vmatpush.msrb.mxu3 %v10253_v5  ;;  %10355 = vmatpush.msra.mxu0 %v19819_v36  ;;  %v10270_v31 = vsub.f32 %v19737_v29, %v22785_v57  ;;  %v10265_v5 = vand.u32 4294901760, %v10264_v26  ;;  %v21823_v57 = vand.u32 4294901760, %v19804_v52  ;;  %v19861_v41 = vpop.permute.xlu2 %8752  ;;  %v22787_v26 = vand.u32 4294901760, %v19786_v10 }
 0x98a   :  { %10387 = vmatpush.msra.mxu1 %v19708_v8  ;;  %10195 = vmatpush.msrb.mxu2 %v19747_v24  ;;  %v10276_v8 = vsub.f32 %v19765_v4, %v22786_v58  ;;  %v10556_v58 = vand.u32 4294901760, %v10555_v17 }
 0x98b   :  { %10260 = vmatpush.msrb.mxu3 %v10259_v53  ;;  %10358 = vmatpush.msra.mxu0 %v19835_v51  ;;  %v10271_v3 = vand.u32 4294901760, %v10270_v31  ;;  %v10282_v53 = vsub.f32 %v19786_v10, %v22787_v26  ;;  %v10288_v31 = vsub.f32 %v19804_v52, %v21823_v57  ;;  %v21828_v57 = vand.u32 4294901760, %v19835_v51 }
 0x98c   :  { %10389 = vmatpush.msra.mxu1 %v19730_v18  ;;  %10197 = vmatpush.msrb.mxu2 %v19767_v6  ;;  %v19868_v18 = vpop.permute.xlu0 %8826 }
 0x98d   :  { %10266 = vmatpush.msrb.mxu3 %v10265_v5  ;;  %10361 = vmatpush.msra.mxu0 %v19847_v59  ;;  %v10277_v5 = vand.u32 4294901760, %v10276_v8  ;;  %v10283_v8 = vand.u32 4294901760, %v10282_v53  ;;  %v8955_v53 = vsel %vm4612_vm13, %v19428_v21, %v19631_v27 }
 0x98e   :  { %10391 = vmatpush.msra.mxu1 %v19747_v24  ;;  %10364 = vmatmul.f32.vlgmr.msra.gmra.mxu0 %v19028_v30  ;;  %v19872_v35 = vpop.permute.xlu1 %8830  ;;  %v10289_v30 = vand.u32 4294901760, %v10288_v31  ;;  %v21833_v24 = vand.u32 4294901760, %v19847_v59  ;;  %v8954_v31 = vsel %vm4612_vm13, %v19294_v50, %v19655_v55  ;;  %v8899_v50 = vsel %vm6139_vm10, %v19447_v54, %v19710_v28 }
 0x98f   :  { %10528 = vmatpush.msrb.mxu0 %v19823_v15  ;;  %10199 = vmatpush.msrb.mxu2 %v19783_v23  ;;  %22788 = vst [vmem:[#allocation157_spill] sm:$0xff] %v19872_v35  ;;  %v19883_v26 = vsel %vm207_vm5, %v19868_v18, %v19872_v35  ;;  %v22790_v35 = vand.u32 4294901760, %v19819_v36  ;;  %v8898_v54 = vsel %vm6139_vm10, %v19462_v14, %v19524_v7 }
 0x990   :  { %10272 = vmatpush.msrb.mxu3 %v10271_v3  ;;  %10393 = vmatpush.msra.mxu1 %v19767_v6  ;;  %22789 = vst [vmem:[#allocation38_spill] sm:$0xff] %v19883_v26  ;;  %v10562_v3 = vand.u32 4294901760, %v19858_v62  ;;  %v10557_v6 = vsub.f32 %v10555_v17, %v10556_v58  ;;  %v8843_v14 = vsel %vm207_vm5, %v19354_v43, %v19791_v22  ;;  %v22796_v43 = vand.u32 4294901760, %v19643_v39 }
 0x991   :  { %10530 = vmatpush.msrb.mxu0 %v19837_v0  ;;  %10201 = vmatpush.msrb.mxu2 %v19806_v12  ;;  %v10294_v26 = vsub.f32 %v19819_v36, %v22790_v35  ;;  %v10300_v35 = vsub.f32 %v19835_v51, %v21828_v57  ;;  %v19928_v57 = vand.u32 4294901760, %v8954_v31 }
 0x992   :  { %10278 = vmatpush.msrb.mxu3 %v10277_v5  ;;  %10395 = vmatpush.msra.mxu1 %v19783_v23  ;;  %v22791_v5 = vand.u32 4294901760, %v19590_v40  ;;  %v10558_v21 = vand.u32 4294901760, %v10557_v6 }
 0x993   :  { %10587 = vmatpush.msra.mxu0 %v10555_v17  ;;  %10203 = vmatpush.msrb.mxu2 %v19821_v32  ;;  %v10563_v17 = vsub.f32 %v19858_v62, %v10562_v3  ;;  %v10295_v40 = vand.u32 4294901760, %v10294_v26  ;;  %v10301_v26 = vand.u32 4294901760, %v10300_v35 }
 0x994   :  { %10284 = vmatpush.msrb.mxu3 %v10283_v8  ;;  %10397 = vmatpush.msra.mxu1 %v19806_v12  ;;  %v19914_v8 = vand.u32 4294901760, %v8955_v53 }
 0x995   :  { %10590 = vmatpush.msra.mxu0 %v19858_v62  ;;  %10209 = vmatmul.f32.vlgmr.msrb.gmra.mxu2 %v19218_v42  ;;  %v10306_v62 = vsub.f32 %v19847_v59, %v21833_v24  ;;  %v10564_v6 = vand.u32 4294901760, %v10563_v17  ;;  %v22809_v24 = vld [vmem:[#allocation151_spill] sm:$0xff] }
 0x996   :  { %10410 = vmatpush.msra.mxu2 %v22791_v5  ;;  %10290 = vmatpush.msrb.mxu3 %v10289_v30  ;;  %v22792_v30 = vand.u32 4294901760, %v19598_v33  ;;  %v19926_v5 = vpop.permute.xlu2 %8642  ;;  %v22793_v33 = vand.u32 4294901760, %v19613_v1  ;;  %v19947_v17 = vsub.f32 %v8955_v53, %v19914_v8  ;;  %v19949_v1 = vand.u32 4294901760, %v8899_v50 }
 0x997   :  { %10399 = vmatpush.msra.mxu1 %v19821_v32  ;;  %10536 = vmatmul.f32.vlgmr.msrb.gmra.mxu0 %v19102_v49  ;;  %v19930_v49 = vpop.permute.xlu0 %8698  ;;  %v10307_v35 = vand.u32 4294901760, %v10306_v62  ;;  %v8842_v53 = vsel %vm207_vm5, %v19482_v56, %v19868_v18  ;;  %v19975_v62 = vand.u32 4294901760, %v8843_v14 }
 0x998   :  { %10403 = vmatmul.f32.vlgmr.msra.gmra.mxu1 %v19075_v19  ;;  %10414 = vmatpush.msra.mxu2 %v22792_v30  ;;  %v19985_v18 = vand.u32 4294901760, %v8842_v53 }
 0x999   :  { %10559 = vmatpush.msrb.mxu1 %v10558_v21  ;;  %10639 = vmatpush.msrb.mxu0 %v10556_v58  ;;  %v19959_v21 = vsub.f32 %v8954_v31, %v19928_v57  ;;  %v19973_v31 = vsub.f32 %v8899_v50, %v19949_v1 }
 0x99a   :  { %10296 = vmatpush.msrb.mxu3 %v10295_v40  ;;  %10418 = vmatpush.msra.mxu2 %v22793_v33  ;;  %v19934_v30 = vpop.permute.xlu1 %8702  ;;  %v19961_v40 = vand.u32 4294901760, %v8898_v54 }
 0x99b   :  { %22794 = vst [vmem:[#allocation161_spill] sm:$0xff] %v19934_v30  ;;  %10565 = vmatpush.msrb.mxu1 %v10564_v6  ;;  %10643 = vmatpush.msrb.mxu0 %v10562_v3  ;;  %v19944_v58 = vsel %vm6047_vm9, %v19930_v49, %v19934_v30  ;;  %v22795_v3 = vand.u32 4294901760, %v19626_v63  ;;  %v21832_v63 = vand.u32 4294901760, %v19947_v17  ;;  %v22797_v6 = vand.u32 4294901760, %v19663_v60  ;;  %v22799_v60 = vld [vmem:[#allocation98_spill] sm:$0xff] }
 0x99c   :  { %10302 = vmatpush.msrb.mxu3 %v10301_v26  ;;  %v19983_v56 = vsub.f32 %v8898_v54, %v19961_v40  ;;  %v21831_v39 = vand.u32 4294901760, %v19959_v21  ;;  %v19994_v50 = vand.u32 4294901760, %v22799_v60  ;;  %v20000_v26 = vsub.f32 %v8843_v14, %v19975_v62 }
 0x99d   :  { %10612 = vmatpush.msra.mxu1 %v19823_v15  ;;  %10422 = vmatpush.msra.mxu2 %v22795_v3  ;;  %v10716_v33 = vsub.f32 %v19947_v17, %v21832_v63  ;;  %v22801_v54 = vand.u32 4294901760, %v19699_v9  ;;  %v20015_v14 = vsub.f32 %v8842_v53, %v19985_v18  ;;  %v8775_v9 = vsel %vm171_vm4, %v19505_v37, %v19555_v13  ;;  %v22805_v53 = vld [vmem:[#allocation83_spill] sm:$0xff]  ;;  %v22807_v37 = vld [vmem:[#allocation106_spill] sm:$0xff] }
 0x99e   :  { %10308 = vmatpush.msrb.mxu3 %v10307_v35  ;;  %v20055_v63 = vand.u32 4294901760, %v8775_v9 }
 0x99f   :  { %10614 = vmatpush.msra.mxu1 %v19837_v0  ;;  %10310 = vmatmul.f32.vlgmr.msrb.gmra.mxu3 %v19001_v47 }
 0x9a0   :  { %10426 = vmatpush.msra.mxu2 %v22796_v43  ;;  %10477 = vmatpush.msra.mxu3 %v19564_v34  ;;  %v22798_v34 = vand.u32 4294901760, %v19685_v2  ;;  %v20007_v2 = vpop.permute.xlu0 %8640  ;;  %v20036_v43 = vand.u32 4294901760, %v22805_v53 }
 0x9a1   :  { %10567 = vmatmul.f32.vlgmr.msrb.gmra.mxu1 %v18972_v16  ;;  %10593 = vmatmul.f32.vlgmr.msra.gmra.mxu0 %v19012_v46 }
 0x9a2   :  { %10430 = vmatpush.msra.mxu2 %v22797_v6  ;;  %10479 = vmatpush.msra.mxu3 %v19574_v38  ;;  %v20002_v38 = vpop.permute.xlu2 %8584  ;;  %v20040_v6 = vsub.f32 %v22799_v60, %v19994_v50  ;;  %v22808_v60 = vand.u32 4294901760, %v19737_v29 }
 0x9a3   :  { %10664 = vmatpush.msrb.mxu1 %v19823_v15  ;;  %10673 = vmatpush.msra.mxu0 %v19914_v8  ;;  %22800 = vst [vmem:[#allocation167_spill] sm:$0xff] %v20002_v38  ;;  %v21834_v15 = vand.u32 4294901760, %v19973_v31 }
 0x9a4   :  { %10434 = vmatpush.msra.mxu2 %v22798_v34  ;;  %10481 = vmatpush.msra.mxu3 %v19587_v44  ;;  %v20012_v35 = vpop.permute.xlu1 %8644  ;;  %v21835_v44 = vand.u32 4294901760, %v19983_v56  ;;  %v8774_v34 = vsel %vm171_vm4, %v19398_v11, %v19861_v41 }
 0x9a5   :  { %10666 = vmatpush.msrb.mxu1 %v19837_v0  ;;  %10675 = vmatpush.msra.mxu0 %v19928_v57  ;;  %22802 = vst [vmem:[#allocation156_spill] sm:$0xff] %v20012_v35  ;;  %v10722_v0 = vsub.f32 %v19959_v21, %v21831_v39  ;;  %v20026_v3 = vsel %vm4576_vm11, %v20007_v2, %v20012_v35  ;;  %v10717_v39 = vand.u32 4294901760, %v10716_v33  ;;  %v22821_v35 = vld [vmem:[#allocation18_spill] sm:$0xff] }
 0x9a6   :  { %10438 = vmatpush.msra.mxu2 %v22801_v54  ;;  %10483 = vmatpush.msra.mxu3 %v19600_v25  ;;  %22803 = vst [vmem:[#allocation159_spill] sm:$0xff] %v20026_v3  ;;  %v22804_v25 = vand.u32 4294901760, %v19720_v20  ;;  %v22806_v54 = vld [vmem:[#allocation137_spill] sm:$0xff]  ;;  %v10728_v20 = vsub.f32 %v19973_v31, %v21834_v15  ;;  %v10734_v33 = vsub.f32 %v19983_v56, %v21835_v44  ;;  %v20062_v15 = vand.u32 4294901760, %v8774_v34  ;;  %v22833_v3 = vld [vmem:[#allocation46_spill] sm:$0xff] }
 0x9a7   :  { %10677 = vmatpush.msra.mxu0 %v19949_v1  ;;  %v10723_v11 = vand.u32 4294901760, %v10722_v0  ;;  %v22812_v44 = vand.u32 4294901760, %v20000_v26 }
 0x9a8   :  { %10442 = vmatpush.msra.mxu2 %v22804_v25  ;;  %10485 = vmatpush.msra.mxu3 %v22806_v54  ;;  %v22810_v25 = vld [vmem:[#allocation138_spill] sm:$0xff]  ;;  %v10729_v0 = vand.u32 4294901760, %v10728_v20  ;;  %v10735_v20 = vand.u32 4294901760, %v10734_v33 }
 0x9a9   :  { %10618 = vmatmul.f32.vlgmr.msra.gmra.mxu1 %v22807_v37  ;;  %10679 = vmatpush.msra.mxu0 %v19961_v40  ;;  %v8719_v29 = vsel %vm6047_vm9, %v22810_v25, %v19930_v49  ;;  %v10740_v54 = vsub.f32 %v20000_v26, %v22812_v44  ;;  %v22813_v49 = vld [vmem:[#allocation125_spill] sm:$0xff]  ;;  %v22814_v25 = vld [vmem:[#allocation140_spill] sm:$0xff]  ;;  %v22816_v44 = vand.u32 4294901760, %v20015_v14 }
 0x9aa   :  { %10446 = vmatpush.msra.mxu2 %v22808_v60  ;;  %10487 = vmatpush.msra.mxu3 %v22809_v24  ;;  %v22811_v60 = vand.u32 4294901760, %v19765_v4  ;;  %v8718_v4 = vsel %vm6047_vm9, %v22814_v25, %v22813_v49  ;;  %v20097_v25 = vsub.f32 %v8774_v34, %v20062_v15  ;;  %v20099_v24 = vpop.permute.xlu2 %8944 }
 0x9ab   :  { %10718 = vmatpush.msra.mxu1 %v10717_v39  ;;  %10681 = vmatpush.msra.mxu0 %v19975_v62  ;;  %v20074_v39 = vsub.f32 %v22805_v53, %v20036_v43  ;;  %v20088_v53 = vsub.f32 %v8775_v9, %v20055_v63  ;;  %v22818_v9 = vand.u32 4294901760, %v20040_v6 }
 0x9ac   :  { %10450 = vmatpush.msra.mxu2 %v22811_v60  ;;  %10489 = vmatpush.msra.mxu3 %v19650_v45  ;;  %v22815_v60 = vand.u32 4294901760, %v19786_v10  ;;  %v20090_v45 = vand.u32 4294901760, %v8719_v29  ;;  %v22817_v10 = vand.u32 4294901760, %v19804_v52  ;;  %v10741_v52 = vand.u32 4294901760, %v10740_v54  ;;  %v22825_v54 = vld [vmem:[#allocation147_spill] sm:$0xff] }
 0x9ad   :  { %10724 = vmatpush.msra.mxu1 %v10723_v11  ;;  %10683 = vmatpush.msra.mxu0 %v19985_v18  ;;  %v10746_v11 = vsub.f32 %v20015_v14, %v22816_v44  ;;  %v20114_v44 = vand.u32 4294901760, %v8718_v4 }
 0x9ae   :  { %10454 = vmatpush.msra.mxu2 %v22815_v60  ;;  %10491 = vmatpush.msra.mxu3 %v19672_v48  ;;  %v10752_v48 = vsub.f32 %v20040_v6, %v22818_v9  ;;  %v22820_v60 = vld [vmem:[#allocation103_spill] sm:$0xff]  ;;  %v22823_v9 = vand.u32 4294901760, %v19819_v36  ;;  %v20127_v33 = vsub.f32 %v8719_v29, %v20090_v45  ;;  %v22826_v36 = vand.u32 4294901760, %v19835_v51 }
 0x9af   :  { %10730 = vmatpush.msra.mxu1 %v10729_v0  ;;  %10685 = vmatpush.msra.mxu0 %v19994_v50  ;;  %v20108_v0 = vpop.permute.xlu1 %8948  ;;  %v8663_v34 = vsel %vm4576_vm11, %v22820_v60, %v19926_v5  ;;  %v22824_v60 = vld [vmem:[#allocation127_spill] sm:$0xff]  ;;  %v22827_v29 = vand.u32 4294901760, %v20074_v39 }
 0x9b0   :  { %10458 = vmatpush.msra.mxu2 %v22817_v10  ;;  %22819 = vst [vmem:[#allocation174_spill] sm:$0xff] %v20108_v0  ;;  %10493 = vmatpush.msra.mxu3 %v22821_v35  ;;  %v20121_v10 = vsel %vm4612_vm13, %v20099_v24, %v20108_v0  ;;  %v8662_v35 = vsel %vm4576_vm11, %v22824_v60, %v20007_v2  ;;  %v20135_v30 = vand.u32 4294901760, %v8663_v34  ;;  %v22828_v2 = vld [vmem:[#allocation150_spill] sm:$0xff]  ;;  %v22829_v60 = vld [vmem:[#allocation139_spill] sm:$0xff] }
 0x9b1   :  { %10736 = vmatpush.msra.mxu1 %v10735_v20  ;;  %22822 = vst [vmem:[#allocation181_spill] sm:$0xff] %v20121_v10  ;;  %10687 = vmatpush.msra.mxu0 %v20036_v43  ;;  %v10747_v20 = vand.u32 4294901760, %v10746_v11  ;;  %v20144_v10 = vsub.f32 %v8718_v4, %v20114_v44  ;;  %v8607_v11 = vsel %vm5990_vm12, %v22829_v60, %v22828_v2  ;;  %v20152_v51 = vand.u32 4294901760, %v8662_v35  ;;  %v22832_v4 = vld [vmem:[#allocation132_spill] sm:$0xff] }
 0x9b2   :  { %10462 = vmatpush.msra.mxu2 %v22823_v9  ;;  %10495 = vmatpush.msra.mxu3 %v22825_v54  ;;  %v10758_v9 = vsub.f32 %v20074_v39, %v22827_v29  ;;  %v10753_v54 = vand.u32 4294901760, %v10752_v48  ;;  %v8606_v29 = vsel %vm5990_vm12, %v22832_v4, %v20002_v38  ;;  %v21841_v60 = vand.u32 4294901760, %v20127_v33 }
 0x9b3   :  { %10742 = vmatpush.msra.mxu1 %v10741_v52  ;;  %10689 = vmatpush.msra.mxu0 %v20055_v63  ;;  %v22830_v52 = vld [vmem:[#allocation146_spill] sm:$0xff]  ;;  %v20169_v0 = vand.u32 4294901760, %v8607_v11  ;;  %v22839_v38 = vand.u32 4294901760, %v20144_v10 }
 0x9b4   :  { %10466 = vmatpush.msra.mxu2 %v22826_v36  ;;  %10497 = vmatpush.msra.mxu3 %v22830_v52  ;;  %v22831_v36 = vand.u32 4294901760, %v19847_v59  ;;  %v20167_v52 = vsub.f32 %v8663_v34, %v20135_v30  ;;  %v10759_v59 = vand.u32 4294901760, %v10758_v9  ;;  %v20182_v34 = vsub.f32 %v8662_v35, %v20152_v51 }
 0x9b5   :  { %10748 = vmatpush.msra.mxu1 %v10747_v20  ;;  %10691 = vmatpush.msra.mxu0 %v20062_v15  ;;  %v22834_v20 = vand.u32 4294901760, %v20088_v53  ;;  %v20193_v4 = vsub.f32 %v8607_v11, %v20169_v0  ;;  %v10782_v11 = vsub.f32 %v20144_v10, %v22839_v38 }
 0x9b6   :  { %10470 = vmatpush.msra.mxu2 %v22831_v36  ;;  %10499 = vmatpush.msra.mxu3 %v22833_v3  ;;  %v22835_v3 = vld [vmem:[#allocation154_spill] sm:$0xff]  ;;  %v21845_v35 = vand.u32 4294901760, %v20182_v34  ;;  %v22840_v38 = vand.u32 4294901760, %v20167_v52 }
 0x9b7   :  { %10754 = vmatpush.msra.mxu1 %v10753_v54  ;;  %v10764_v48 = vsub.f32 %v20088_v53, %v22834_v20  ;;  %10693 = vmatpush.msra.mxu0 %v20090_v45  ;;  %v22836_v54 = vand.u32 4294901760, %v20097_v25  ;;  %v20179_v20 = vand.u32 4294901760, %v8606_v29 }
 0x9b8   :  { %10472 = vmatmul.f32.vlgmr.msra.gmra.mxu2 %v19001_v47  ;;  %10501 = vmatpush.msra.mxu3 %v22835_v3  ;;  %v10776_v3 = vsub.f32 %v20127_v33, %v21841_v60 }
 0x9b9   :  { %10816 = vmatpush.msrb.mxu2 %v19947_v17  ;;  %v10770_v36 = vsub.f32 %v20097_v25, %v22836_v54  ;;  %10695 = vmatpush.msra.mxu0 %v20114_v44  ;;  %v10765_v9 = vand.u32 4294901760, %v10764_v48 }
 0x9ba   :  { %10760 = vmatpush.msra.mxu1 %v10759_v59  ;;  %10645 = vmatmul.f32.vlgmr.msrb.gmra.mxu0 %v18972_v16  ;;  %v20190_v54 = vpop.permute.xlu1 %8892  ;;  %v22838_v59 = vld [vmem:[#allocation35_spill] sm:$0xff] }
 0x9bb   :  { %10819 = vmatpush.msrb.mxu2 %v19959_v21  ;;  %22837 = vst [vmem:[#allocation173_spill] sm:$0xff] %v20190_v54  ;;  %10503 = vmatpush.msra.mxu3 %v19783_v23  ;;  %v20202_v48 = vsel %vm6139_vm10, %v22838_v59, %v20190_v54  ;;  %v10771_v60 = vand.u32 4294901760, %v10770_v36  ;;  %v20209_v23 = vsub.f32 %v8606_v29, %v20179_v20  ;;  %v20215_v54 = vpop.permute.xlu0 %8996  ;;  %v10783_v36 = vand.u32 4294901760, %v10782_v11 }
 0x9bc   :  { %10697 = vmatpush.msra.mxu0 %v20135_v30  ;;  %10766 = vmatpush.msra.mxu1 %v10765_v9  ;;  %v10777_v9 = vand.u32 4294901760, %v10776_v3  ;;  %v10788_v29 = vsub.f32 %v20167_v52, %v22840_v38 }
 0x9bd   :  { %10822 = vmatpush.msrb.mxu2 %v19973_v31  ;;  %10505 = vmatpush.msra.mxu3 %v19806_v12  ;;  %v21844_v12 = vand.u32 4294901760, %v20193_v4 }
 0x9be   :  { %10699 = vmatpush.msra.mxu0 %v20152_v51  ;;  %10772 = vmatpush.msra.mxu1 %v10771_v60  ;;  %v21846_v60 = vand.u32 4294901760, %v20209_v23  ;;  %v10789_v3 = vand.u32 4294901760, %v10788_v29 }
 0x9bf   :  { %10825 = vmatpush.msrb.mxu2 %v19983_v56  ;;  %10507 = vmatpush.msra.mxu3 %v19821_v32  ;;  %v10794_v32 = vsub.f32 %v20182_v34, %v21845_v35  ;;  %v10800_v11 = vsub.f32 %v20193_v4, %v21844_v12  ;;  %v22842_v12 = vand.u32 4294901760, %v19959_v21  ;;  %v20259_v21 = vpop.permute.xlu2 %8886 }
 0x9c0   :  { %10701 = vmatpush.msra.mxu0 %v20169_v0  ;;  %10778 = vmatpush.msra.mxu1 %v10777_v9  ;;  %v22841_v9 = vand.u32 4294901760, %v19947_v17 }
 0x9c1   :  { %10509 = vmatmul.f32.vlgmr.msra.gmra.mxu3 %v19001_v47  ;;  %10828 = vmatpush.msrb.mxu2 %v20000_v26  ;;  %v10795_v38 = vand.u32 4294901760, %v10794_v32  ;;  %v10801_v35 = vand.u32 4294901760, %v10800_v11  ;;  %v22843_v32 = vand.u32 4294901760, %v19973_v31  ;;  %v22845_v31 = vand.u32 4294901760, %v20000_v26  ;;  %v20272_v11 = vpop.f32.mrf.mxu0 }
 0x9c2   :  { %10869 = vmatpush.msrb.mxu3 %v19914_v8  ;;  %10703 = vmatpush.msra.mxu0 %v20179_v20 }
 0x9c3   :  { %10784 = vmatpush.msra.mxu1 %v10783_v36  ;;  %10709 = vmatmul.f32.vlgmr.msra.gmra.mxu0 %v19218_v42  ;;  %v10806_v36 = vsub.f32 %v20209_v23, %v21846_v60  ;;  %v20251_v17 = vpop.permute.xlu0 %8942 }
 0x9c4   :  { %10668 = vmatmul.f32.vlgmr.msrb.gmra.mxu1 %v18972_v16  ;;  %10831 = vmatpush.msrb.mxu2 %v20015_v14  ;;  %v8952_v60 = vsel %vm4612_vm13, %v19655_v55, %v20251_v17  ;;  %v22864_v55 = vand.u32 4294901760, %v20193_v4 }
 0x9c5   :  { %10871 = vmatpush.msrb.mxu3 %v19928_v57  ;;  %10910 = vmatpush.msrb.mxu0 %v22841_v9  ;;  %v20245_v29 = vpop.permute.xlu1 %8836  ;;  %v20257_v9 = vpop.f32.mrf.mxu2 }
 0x9c6   :  { %10790 = vmatpush.msra.mxu1 %v10789_v3  ;;  %10834 = vmatpush.msrb.mxu2 %v20040_v6  ;;  %v10807_v3 = vand.u32 4294901760, %v10806_v36  ;;  %v22847_v36 = vand.u32 4294901760, %v20015_v14 }
 0x9c7   :  { %10873 = vmatpush.msrb.mxu3 %v19949_v1  ;;  %10914 = vmatpush.msrb.mxu0 %v22842_v12  ;;  %v22844_v12 = vand.u32 4294901760, %v19983_v56  ;;  %v22846_v56 = vld [vmem:[#allocation126_spill] sm:$0xff] }
 0x9c8   :  { %10796 = vmatpush.msra.mxu1 %v10795_v38  ;;  %10837 = vmatpush.msrb.mxu2 %v20074_v39  ;;  %v9011_v38 = vsel %vm6196_vm3, %v22846_v56, %v20215_v54  ;;  %v22854_v56 = vand.u32 4294901760, %v20088_v53 }
 0x9c9   :  { %10875 = vmatpush.msrb.mxu3 %v19961_v40  ;;  %10918 = vmatpush.msrb.mxu0 %v22843_v32  ;;  %v20288_v32 = vand.u32 4294901760, %v9011_v38 }
 0x9ca   :  { %10802 = vmatpush.msra.mxu1 %v10801_v35  ;;  %10840 = vmatpush.msrb.mxu2 %v20088_v53  ;;  %v20268_v35 = vpop.f32.mrf.mxu3  ;;  %v20323_v53 = vpop.f32.mrf.mxu0 }
 0x9cb   :  { %10877 = vmatpush.msrb.mxu3 %v19975_v62  ;;  %10922 = vmatpush.msrb.mxu0 %v22844_v12  ;;  %v20294_v14 = vpop.permute.xlu0 %8832  ;;  %v22852_v12 = vld [vmem:[#allocation163_spill] sm:$0xff] }
 0x9cc   :  { %10808 = vmatpush.msra.mxu1 %v10807_v3  ;;  %10843 = vmatpush.msrb.mxu2 %v20097_v25  ;;  %v20292_v3 = vpop.f32.mrf.mxu1  ;;  %22850 = vst [vmem:[#allocation188_spill] sm:$0xff] %v20294_v14 }
 0x9cd   :  { %10810 = vmatmul.f32.vlgmr.msra.gmra.mxu1 %v19001_v47  ;;  %10879 = vmatpush.msrb.mxu3 %v19985_v18 }
 0x9ce   :  { %10926 = vmatpush.msrb.mxu0 %v22845_v31  ;;  %10977 = vmatpush.msrb.mxu1 %v19914_v8  ;;  %v22849_v8 = vand.u32 4294901760, %v20040_v6  ;;  %v20300_v31 = vand.u32 4294901760, %v22852_v12  ;;  %v20304_v6 = vpop.f32.mrf.mxu2 }
 0x9cf   :  { %10846 = vmatpush.msrb.mxu2 %v20127_v33  ;;  %10881 = vmatpush.msrb.mxu3 %v19994_v50  ;;  %v20283_v26 = vpop.permute.xlu1 %8760 }
 0x9d0   :  { %10930 = vmatpush.msrb.mxu0 %v22847_v36  ;;  %10979 = vmatpush.msrb.mxu1 %v19928_v57  ;;  %22848 = vst [vmem:[#allocation176_spill] sm:$0xff] %v20283_v26  ;;  %v22851_v57 = vand.u32 4294901760, %v20074_v39  ;;  %v11055_v36 = vsub.f32 %v9011_v38, %v20288_v32 }
 0x9d1   :  { %10849 = vmatpush.msrb.mxu2 %v20144_v10  ;;  %10883 = vmatpush.msrb.mxu3 %v20036_v43 }
 0x9d2   :  { %10934 = vmatpush.msrb.mxu0 %v22849_v8  ;;  %10981 = vmatpush.msrb.mxu1 %v19949_v1  ;;  %v20306_v1 = vpop.permute.xlu2 %8758  ;;  %v20317_v39 = vpop.f32.mrf.mxu3  ;;  %v11061_v8 = vsub.f32 %v22852_v12, %v20300_v31  ;;  %v11056_v38 = vand.u32 4294901760, %v11055_v36 }
 0x9d3   :  { %10852 = vmatpush.msrb.mxu2 %v20167_v52  ;;  %10885 = vmatpush.msrb.mxu3 %v20055_v63  ;;  %22853 = vst [vmem:[#allocation191_spill] sm:$0xff] %v20306_v1 }
 0x9d4   :  { %10938 = vmatpush.msrb.mxu0 %v22851_v57  ;;  %10983 = vmatpush.msrb.mxu1 %v19961_v40  ;;  %v22855_v40 = vand.u32 4294901760, %v20097_v25  ;;  %v22857_v25 = vld [vmem:[#allocation14_spill] sm:$0xff]  ;;  %v20337_v12 = vpop.f32.mrf.mxu1 }
 0x9d5   :  { %10855 = vmatpush.msrb.mxu2 %v20182_v34  ;;  %10887 = vmatpush.msrb.mxu3 %v20062_v15 }
 0x9d6   :  { %10942 = vmatpush.msrb.mxu0 %v22854_v56  ;;  %10985 = vmatpush.msrb.mxu1 %v19975_v62  ;;  %v22856_v62 = vand.u32 4294901760, %v20127_v33  ;;  %v11062_v33 = vand.u32 4294901760, %v11061_v8  ;;  %v20339_v56 = vpop.f32.mrf.mxu2 }
 0x9d7   :  { %10858 = vmatpush.msrb.mxu2 %v20193_v4  ;;  %10889 = vmatpush.msrb.mxu3 %v20090_v45 }
 0x9d8   :  { %10946 = vmatpush.msrb.mxu0 %v22855_v40  ;;  %10987 = vmatpush.msrb.mxu1 %v19985_v18  ;;  %v22859_v18 = vand.u32 4294901760, %v20144_v10  ;;  %v20341_v40 = vpop.permute.xlu0 %8756  ;;  %v11057_v10 = vsub.f32 %v11055_v36, %v11056_v38 }
 0x9d9   :  { %10861 = vmatpush.msrb.mxu2 %v20209_v23  ;;  %10891 = vmatpush.msrb.mxu3 %v20114_v44  ;;  %22860 = vst [vmem:[#allocation34_spill] sm:$0xff] %v20341_v40 }
 0x9da   :  { %10950 = vmatpush.msrb.mxu0 %v22856_v62  ;;  %10989 = vmatpush.msrb.mxu1 %v19994_v50  ;;  %v20330_v57 = vpop.permute.xlu1 %8650  ;;  %v8953_v50 = vsel %vm4612_vm13, %v19631_v27, %v20099_v24  ;;  %v22861_v62 = vand.u32 4294901760, %v20167_v52  ;;  %v22862_v27 = vand.u32 4294901760, %v20182_v34  ;;  %v11063_v24 = vsub.f32 %v11061_v8, %v11062_v33  ;;  %v20364_v52 = vpop.f32.mrf.mxu0 }
 0x9db   :  { %10864 = vmatmul.f32.vlgmr.msrb.gmra.mxu2 %v22857_v25  ;;  %22858 = vst [vmem:[#allocation36_spill] sm:$0xff] %v20330_v57  ;;  %10893 = vmatpush.msrb.mxu3 %v20135_v30  ;;  %v11058_v34 = vand.u32 4294901760, %v11057_v10 }
 0x9dc   :  { %11028 = vmatpush.msra.mxu2 %v20288_v32  ;;  %10954 = vmatpush.msrb.mxu0 %v22859_v18  ;;  %v20382_v57 = vpop.f32.mrf.mxu1 }
 0x9dd   :  { %10991 = vmatpush.msrb.mxu1 %v20036_v43  ;;  %10895 = vmatpush.msrb.mxu3 %v20152_v51  ;;  %v20352_v43 = vpop.permute.xlu2 %8700  ;;  %v20355_v18 = vpop.f32.mrf.mxu3 }
 0x9de   :  { %11030 = vmatpush.msra.mxu2 %v20300_v31  ;;  %10958 = vmatpush.msrb.mxu0 %v22861_v62  ;;  %v22866_v62 = vld [vmem:[#allocation27_spill] sm:$0xff] }
 0x9df   :  { %10993 = vmatpush.msrb.mxu1 %v20055_v63  ;;  %10897 = vmatpush.msrb.mxu3 %v20169_v0  ;;  %v20366_v63 = vand.u32 4294901760, %v8953_v50 }
 0x9e0   :  { %11087 = vmatpush.msrb.mxu2 %v11055_v36  ;;  %10962 = vmatpush.msrb.mxu0 %v22862_v27  ;;  %v8897_v36 = vsel %vm6139_vm10, %v19710_v28, %v22838_v59  ;;  %v22868_v59 = vand.u32 4294901760, %v20209_v23 }
 0x9e1   :  { %10995 = vmatpush.msrb.mxu1 %v20062_v15  ;;  %22863 = vst [vmem:[#allocation171_spill] sm:$0xff] %v20366_v63  ;;  %10899 = vmatpush.msrb.mxu3 %v20179_v20  ;;  %v20376_v15 = vand.u32 4294901760, %v8952_v60  ;;  %v20385_v28 = vsub.f32 %v8953_v50, %v20366_v63  ;;  %v20391_v4 = vand.u32 4294901760, %v8897_v36  ;;  %v8841_v50 = vsel %vm207_vm5, %v19791_v22, %v20294_v14 }
 0x9e2   :  { %11090 = vmatpush.msrb.mxu2 %v11061_v8  ;;  %10966 = vmatpush.msrb.mxu0 %v22864_v55  ;;  %v11064_v8 = vand.u32 4294901760, %v11063_v24  ;;  %v20403_v24 = vpop.permute.xlu0 %8646  ;;  %v22870_v55 = vld [vmem:[#allocation38_spill] sm:$0xff] }
 0x9e3   :  { %10997 = vmatpush.msrb.mxu1 %v20090_v45  ;;  %22865 = vst [vmem:[#allocation184_spill] sm:$0xff] %v20376_v15  ;;  %10903 = vmatmul.f32.vlgmr.msrb.gmra.mxu3 %v19075_v19  ;;  %v8896_v45 = vsel %vm6139_vm10, %v19524_v7, %v20259_v21  ;;  %v20397_v10 = vsub.f32 %v8952_v60, %v20376_v15  ;;  %v20418_v60 = vand.u32 4294901760, %v8841_v50 }
 0x9e4   :  { %11036 = vmatmul.f32.vlgmr.msra.gmra.mxu2 %v22866_v62  ;;  %11059 = vmatpush.msra.mxu3 %v11058_v34  ;;  %v20380_v27 = vpop.permute.xlu1 %8592  ;;  %v20407_v7 = vand.u32 4294901760, %v8896_v45  ;;  %v20428_v34 = vand.u32 4294901760, %v22870_v55 }
 0x9e5   :  { %11139 = vmatpush.msra.mxu2 %v11056_v38  ;;  %22867 = vst [vmem:[#allocation189_spill] sm:$0xff] %v20380_v27  ;;  %10970 = vmatpush.msrb.mxu0 %v22868_v59  ;;  %v9865_v38 = vpop.f32.mrf.mxu2  ;;  %v20414_v23 = vpop.permute.xlu2 %8590  ;;  %v22873_v27 = vand.u32 4294901760, %v20385_v28 }
 0x9e6   :  { %10999 = vmatpush.msrb.mxu1 %v20114_v44  ;;  %11065 = vmatpush.msra.mxu3 %v11064_v8  ;;  %v20412_v44 = vsub.f32 %v8897_v36, %v20391_v4  ;;  %22869 = vst [vmem:[#allocation158_spill] sm:$0xff] %v20414_v23  ;;  %v20425_v36 = vsub.f32 %v8896_v45, %v20407_v7 }
 0x9e7   :  { %11143 = vmatpush.msra.mxu2 %v11062_v33  ;;  %11316 = vmatpush.msra.mxu0 %v20385_v28  ;;  %v11216_v45 = vsub.f32 %v20385_v28, %v22873_v27  ;;  %v20459_v26 = vsub.f32 %v22870_v55, %v20428_v34  ;;  %v8772_v27 = vsel %vm171_vm4, %v19861_v41, %v20341_v40 }
 0x9e8   :  { %11001 = vmatpush.msrb.mxu1 %v20135_v30  ;;  %11112 = vmatpush.msrb.mxu3 %v20288_v32  ;;  %v9904_v22 = vpop.f32.mrf.mxu3  ;;  %v9710_v30 = vpop.f32.mrf.mxu0  ;;  %v22876_v40 = vand.u32 4294901760, %v20412_v44 }
 0x9e9   :  { %10972 = vmatmul.f32.vlgmr.msrb.gmra.mxu0 %v19001_v47  ;;  %v9811_v33 = vpop.f32.mrf.mxu1 }
 0x9ea   :  { %11319 = vmatpush.msra.mxu0 %v20397_v10  ;;  %11003 = vmatpush.msrb.mxu1 %v20152_v51  ;;  %v20435_v51 = vsub.f32 %v8841_v50, %v20418_v60 }
 0x9eb   :  { %11114 = vmatpush.msrb.mxu3 %v20300_v31 }
 0x9ec   :  { %11322 = vmatpush.msra.mxu0 %v20412_v44  ;;  %11005 = vmatpush.msrb.mxu1 %v20169_v0  ;;  %v22871_v0 = vld [vmem:[#allocation115_spill] sm:$0xff] }
 0x9ed   :  { %11067 = vmatmul.f32.vlgmr.msra.gmra.mxu3 %v18972_v16  ;;  %11093 = vmatmul.f32.vlgmr.msrb.gmra.mxu2 %v19012_v46  ;;  %v20440_v8 = vand.u32 4294901760, %v22871_v0 }
 0x9ee   :  { %11164 = vmatpush.msra.mxu3 %v20288_v32  ;;  %11173 = vmatpush.msrb.mxu2 %v20366_v63  ;;  %v20443_v59 = vpop.permute.xlu1 %9165  ;;  %v8773_v32 = vsel %vm171_vm4, %v19555_v13, %v20306_v1  ;;  %v22874_v13 = vld [vmem:[#allocation117_spill] sm:$0xff] }
 0x9ef   :  { %11325 = vmatpush.msra.mxu0 %v20425_v36  ;;  %11007 = vmatpush.msrb.mxu1 %v20179_v20  ;;  %22872 = vst [vmem:[#allocation175_spill] sm:$0xff] %v20443_v59  ;;  %v9211_v20 = vadd.f32 %v20257_v9, %v20443_v59  ;;  %v9711_v50 = vadd.f32 %v9710_v30, %v20443_v59  ;;  %v20464_v1 = vand.u32 4294901760, %v22874_v13  ;;  %v20467_v9 = vpop.f32.mrf.mxu2  ;;  %v20473_v30 = vpop.permute.xlu0 %8588  ;;  %v20477_v46 = vand.u32 4294901760, %v8773_v32 }
 0x9f0   :  { %11009 = vmatmul.f32.vlgmr.msrb.gmra.mxu1 %v19001_v47  ;;  %11166 = vmatpush.msra.mxu3 %v20300_v31  ;;  %v20483_v31 = vsub.f32 %v22871_v0, %v20440_v8  ;;  %v22875_v47 = vand.u32 4294901760, %v20397_v10  ;;  %v11217_v0 = vand.u32 4294901760, %v11216_v45 }
 0x9f1   :  { %11175 = vmatpush.msrb.mxu2 %v20376_v15  ;;  %11328 = vmatpush.msra.mxu0 %v20435_v51  ;;  %v9312_v55 = vadd.f32 %v20268_v35, %v9211_v20  ;;  %v9812_v59 = vadd.f32 %v9811_v33, %v9711_v50  ;;  %v20495_v50 = vand.u32 4294901760, %v8772_v27  ;;  %v20511_v45 = vsub.f32 %v8773_v32, %v20477_v46 }
 0x9f2   :  { %11369 = vmatpush.msra.mxu1 %v20366_v63  ;;  %v11222_v41 = vsub.f32 %v20397_v10, %v22875_v47  ;;  %v20489_v63 = vpop.permute.xlu2 %8946  ;;  %v20501_v47 = vsub.f32 %v22874_v13, %v20464_v1  ;;  %v8716_v13 = vsel %vm6047_vm9, %v22813_v49, %v20352_v43  ;;  %v21863_v32 = vand.u32 4294901760, %v20459_v26 }
 0x9f3   :  { %11177 = vmatpush.msrb.mxu2 %v20391_v4  ;;  %11331 = vmatpush.msra.mxu0 %v20459_v26  ;;  %v9366_v35 = vadd.f32 %v20272_v11, %v9312_v55  ;;  %v9866_v33 = vadd.f32 %v9865_v38, %v9812_v59  ;;  %v20493_v20 = vpop.f32.mrf.mxu3  ;;  %v9973_v14 = vpop.f32.mrf.mxu0  ;;  %v21862_v38 = vand.u32 4294901760, %v20435_v51  ;;  %v22877_v55 = vand.u32 4294901760, %v20425_v36 }
 0x9f4   :  { %11371 = vmatpush.msra.mxu1 %v20376_v15  ;;  %v11228_v15 = vsub.f32 %v20412_v44, %v22876_v40  ;;  %v11223_v40 = vand.u32 4294901760, %v11222_v41 }
 0x9f5   :  { %11179 = vmatpush.msrb.mxu2 %v20407_v7  ;;  %11334 = vmatpush.msra.mxu0 %v20483_v31  ;;  %v9405_v11 = vadd.f32 %v20292_v3, %v9366_v35  ;;  %v9905_v59 = vadd.f32 %v9904_v22, %v9866_v33  ;;  %v20522_v3 = vand.u32 4294901760, %v19944_v58  ;;  %v20529_v35 = vsub.f32 %v8772_v27, %v20495_v50 }
 0x9f6   :  { %11373 = vmatpush.msra.mxu1 %v20391_v4  ;;  %11118 = vmatmul.f32.vlgmr.msrb.gmra.mxu3 %v22807_v37  ;;  %v11234_v37 = vsub.f32 %v20425_v36, %v22877_v55  ;;  %v11229_v41 = vand.u32 4294901760, %v11228_v15  ;;  %v21864_v33 = vand.u32 4294901760, %v20501_v47  ;;  %v21866_v27 = vand.u32 4294901760, %v20483_v31 }
 0x9f7   :  { %11181 = vmatpush.msrb.mxu2 %v20418_v60  ;;  %11218 = vmatpush.msrb.mxu3 %v11217_v0  ;;  %v9474_v22 = vadd.f32 %v20304_v6, %v9405_v11  ;;  %v9974_v49 = vadd.f32 %v9973_v14, %v9905_v59  ;;  %v8661_v0 = vsel %vm4576_vm11, %v19926_v5, %v20403_v24  ;;  %v20544_v11 = vand.u32 4294901760, %v8716_v13 }
 0x9f8   :  { %11337 = vmatpush.msra.mxu0 %v20501_v47  ;;  %11375 = vmatpush.msra.mxu1 %v20407_v7  ;;  %v11240_v6 = vsub.f32 %v20435_v51, %v21862_v38  ;;  %v11235_v59 = vand.u32 4294901760, %v11234_v37  ;;  %v20549_v55 = vsub.f32 %v19944_v58, %v20522_v3  ;;  %v11246_v38 = vsub.f32 %v20459_v26, %v21863_v32 }
 0x9f9   :  { %11145 = vmatmul.f32.vlgmr.msra.gmra.mxu2 %v18972_v16  ;;  %11224 = vmatpush.msrb.mxu3 %v11223_v40  ;;  %v9511_v14 = vadd.f32 %v20317_v39, %v9474_v22  ;;  %v10010_v15 = vpop.f32.mrf.mxu1  ;;  %v10094_v40 = vpop.f32.mrf.mxu2  ;;  %v8605_v37 = vsel %vm5990_vm12, %v22828_v2, %v20414_v23  ;;  %v11258_v58 = vsub.f32 %v20501_v47, %v21864_v33 }
 0x9fa   :  { %11183 = vmatpush.msrb.mxu2 %v20428_v34  ;;  %11340 = vmatpush.msra.mxu0 %v20511_v45  ;;  %v10011_v5 = vadd.f32 %v10010_v15, %v9974_v49  ;;  %v20551_v39 = vpop.permute.xlu0 %9000  ;;  %v20563_v49 = vand.u32 4294901760, %v8661_v0  ;;  %v11241_v2 = vand.u32 4294901760, %v11240_v6  ;;  %v11252_v15 = vsub.f32 %v20483_v31, %v21866_v27 }
 0x9fb   :  { %11377 = vmatpush.msra.mxu1 %v20418_v60  ;;  %11230 = vmatpush.msrb.mxu3 %v11229_v41  ;;  %22878 = vst [vmem:[#allocation183_spill] sm:$0xff] %v20551_v39  ;;  %v9538_v22 = vadd.f32 %v20323_v53, %v9511_v14  ;;  %v20570_v41 = vpop.permute.xlu2 %8998  ;;  %v10119_v32 = vpop.f32.mrf.mxu3  ;;  %v20580_v33 = vsub.f32 %v8716_v13, %v20544_v11  ;;  %v20592_v6 = vand.u32 4294901760, %v8605_v37 }
 0x9fc   :  { %11185 = vmatpush.msrb.mxu2 %v20440_v8  ;;  %11343 = vmatpush.msra.mxu0 %v20529_v35  ;;  %v10038_v53 = vadd.f32 %v20467_v9, %v10011_v5  ;;  %22879 = vst [vmem:[#allocation193_spill] sm:$0xff] %v20570_v41  ;;  %v22880_v9 = vld [vmem:[#allocation159_spill] sm:$0xff]  ;;  %v9009_v23 = vsel %vm6196_vm3, %v20215_v54, %v20551_v39  ;;  %v22882_v54 = vld [vmem:[#allocation145_spill] sm:$0xff] }
 0x9fd   :  { %11379 = vmatpush.msra.mxu1 %v20428_v34  ;;  %11236 = vmatpush.msrb.mxu3 %v11235_v59  ;;  %v9569_v14 = vadd.f32 %v20337_v12, %v9538_v22  ;;  %v20583_v5 = vand.u32 4294901760, %v22880_v9  ;;  %v22881_v22 = vld [vmem:[#allocation167_spill] sm:$0xff]  ;;  %v11247_v59 = vand.u32 4294901760, %v11246_v38  ;;  %v9008_v39 = vsel %vm6196_vm3, %v22882_v54, %v20570_v41 }
 0x9fe   :  { %11187 = vmatpush.msrb.mxu2 %v20464_v1  ;;  %11346 = vmatpush.msra.mxu0 %v20549_v55  ;;  %v10069_v12 = vadd.f32 %v20493_v20, %v10038_v53  ;;  %v8604_v13 = vsel %vm5990_vm12, %v22881_v22, %v20473_v30  ;;  %v20605_v20 = vsub.f32 %v8661_v0, %v20563_v49  ;;  %v21869_v53 = vand.u32 4294901760, %v20529_v35 }
 0x9ff   :  { %11381 = vmatpush.msra.mxu1 %v20440_v8  ;;  %11168 = vmatmul.f32.vlgmr.msra.gmra.mxu3 %v18972_v16  ;;  %v9595_v27 = vadd.f32 %v20364_v52, %v9569_v14  ;;  %v20610_v52 = vand.u32 4294901760, %v9009_v23  ;;  %v11253_v38 = vand.u32 4294901760, %v11252_v15  ;;  %v20619_v54 = vsub.f32 %v22880_v9, %v20583_v5 }
 0xa00   :  { %11189 = vmatpush.msrb.mxu2 %v20477_v46  ;;  %11242 = vmatpush.msrb.mxu3 %v11241_v2  ;;  %v10095_v22 = vadd.f32 %v10094_v40, %v10069_v12  ;;  %v22883_v2 = vand.u32 4294901760, %v20511_v45  ;;  %v20621_v41 = vand.u32 4294901760, %v8604_v13  ;;  %v20626_v40 = vand.u32 4294901760, %v9008_v39 }
 0xa01   :  { %11349 = vmatpush.msra.mxu0 %v20580_v33  ;;  %11383 = vmatpush.msra.mxu1 %v20464_v1  ;;  %v9620_v14 = vadd.f32 %v20382_v57, %v9595_v27  ;;  %v21876_v57 = vand.u32 4294901760, %v20549_v55  ;;  %v20631_v9 = vsub.f32 %v8605_v37, %v20592_v6  ;;  %v11270_v12 = vsub.f32 %v20529_v35, %v21869_v53 }
 0xa02   :  { %11191 = vmatpush.msrb.mxu2 %v20495_v50  ;;  %11248 = vmatpush.msrb.mxu3 %v11247_v59  ;;  %v11264_v0 = vsub.f32 %v20511_v45, %v22883_v2  ;;  %v10120_v27 = vadd.f32 %v10119_v32, %v10095_v22  ;;  %v11259_v59 = vand.u32 4294901760, %v11258_v58  ;;  %v21875_v32 = vand.u32 4294901760, %v20580_v33 }
 0xa03   :  { %11352 = vmatpush.msra.mxu0 %v20605_v20  ;;  %11385 = vmatpush.msra.mxu1 %v20477_v46  ;;  %v9647_v15 = vadd.f32 %v20339_v56, %v9620_v14  ;;  %v20640_v56 = vsub.f32 %v9009_v23, %v20610_v52  ;;  %v11276_v2 = vsub.f32 %v20549_v55, %v21876_v57  ;;  %v21872_v23 = vand.u32 4294901760, %v20605_v20  ;;  %v22905_v57 = vld [vmem:[#allocation34_spill] sm:$0xff] }
 0xa04   :  { %11193 = vmatpush.msrb.mxu2 %v20522_v3  ;;  %11254 = vmatpush.msrb.mxu3 %v11253_v38  ;;  %v10146_v22 = vpop.f32.mrf.mxu2  ;;  %v11265_v58 = vand.u32 4294901760, %v11264_v0  ;;  %v20645_v38 = vsub.f32 %v8604_v13, %v20621_v41  ;;  %v20654_v53 = vsub.f32 %v9008_v39, %v20626_v40  ;;  %v12829_v13 = vld [vmem:[%s21477_s0] sm:$0xff] }
 0xa05   :  { %11355 = vmatpush.msra.mxu0 %v20619_v54  ;;  %11387 = vmatpush.msra.mxu1 %v20495_v50  ;;  %v10147_v37 = vadd.f32 %v10146_v22, %v10120_v27  ;;  %v9670_v14 = vadd.f32 %v20355_v18, %v9647_v15  ;;  %v11271_v27 = vand.u32 4294901760, %v11270_v12  ;;  %v11282_v15 = vsub.f32 %v20580_v33, %v21875_v32  ;;  %v22904_v32 = vld [vmem:[#allocation176_spill] sm:$0xff] }
 0xa06   :  { %11195 = vmatpush.msrb.mxu2 %v20544_v11  ;;  %11260 = vmatpush.msrb.mxu3 %v11259_v59  ;;  %v11556_v59 = vand.u32 4294901760, %v20640_v56  ;;  %v11277_v22 = vand.u32 4294901760, %v11276_v2  ;;  %v11288_v12 = vsub.f32 %v20605_v20, %v21872_v23  ;;  %v22887_v23 = vand.u32 4294901760, %v20412_v44 }
 0xa07   :  { %11358 = vmatpush.msra.mxu0 %v20631_v9  ;;  %11389 = vmatpush.msra.mxu1 %v20522_v3  ;;  %v10169_v18 = vpop.f32.mrf.mxu3  ;;  %v12672_v0 = vadd.f32 %v12829_v13, %v9670_v14  ;;  %v11283_v2 = vand.u32 4294901760, %v11282_v15  ;;  %v21870_v13 = vand.u32 4294901760, %v20631_v9  ;;  %v22888_v44 = vand.u32 4294901760, %v20425_v36  ;;  %v22892_v36 = vld [vmem:[#allocation157_spill] sm:$0xff] }
 0xa08   :  { %11197 = vmatpush.msrb.mxu2 %v20563_v49  ;;  %11266 = vmatpush.msrb.mxu3 %v11265_v58  ;;  %v10170_v39 = vadd.f32 %v10169_v18, %v10147_v37  ;;  %v21871_v58 = vand.u32 4294901760, %v20619_v54  ;;  %v12830_v37 = vld [vmem:[%s21477_s0 + $0x8] sm:$0xff]  ;;  %v11562_v18 = vand.u32 4294901760, %v20654_v53 }
 0xa09   :  { %11361 = vmatpush.msra.mxu0 %v20645_v38  ;;  %11391 = vmatpush.msra.mxu1 %v20544_v11  ;;  %12679 = vst [vmem:[%s21486_s9] sm:$0xff] %v12672_v0  ;;  %v11557_v0 = vsub.f32 %v20640_v56, %v11556_v59 }
 0xa0a   :  { %11364 = vmatmul.f32.vlgmr.msra.gmra.mxu0 %v22857_v25  ;;  %11199 = vmatpush.msrb.mxu2 %v20583_v5  ;;  %v12673_v14 = vadd.f32 %v12830_v37, %v10170_v39  ;;  %v11289_v39 = vand.u32 4294901760, %v11288_v12  ;;  %v11294_v15 = vsub.f32 %v20619_v54, %v21871_v58  ;;  %v11563_v37 = vsub.f32 %v20654_v53, %v11562_v18 }
 0xa0b   :  { %11528 = vmatpush.msrb.mxu0 %v20610_v52  ;;  %11272 = vmatpush.msrb.mxu3 %v11271_v27  ;;  %v20690_v27 = vpop.permute.xlu0 %8890  ;;  %v22884_v12 = vand.u32 4294901760, %v20385_v28 }
 0xa0c   :  { %11393 = vmatpush.msra.mxu1 %v20563_v49  ;;  %11201 = vmatpush.msrb.mxu2 %v20592_v6  ;;  %12680 = vst [vmem:[%s21486_s9 + $0x8] sm:$0xff] %v12673_v14  ;;  %v11558_v14 = vand.u32 4294901760, %v11557_v0  ;;  %v11564_v0 = vand.u32 4294901760, %v11563_v37  ;;  %v20736_v37 = vand.u32 4294901760, %v20202_v48 }
 0xa0d   :  { %11530 = vmatpush.msrb.mxu0 %v20626_v40  ;;  %11278 = vmatpush.msrb.mxu3 %v11277_v22  ;;  %v21873_v22 = vand.u32 4294901760, %v20645_v38 }
 0xa0e   :  { %11395 = vmatpush.msra.mxu1 %v20583_v5  ;;  %11203 = vmatpush.msrb.mxu2 %v20621_v41 }
 0xa0f   :  { %11587 = vmatpush.msra.mxu0 %v20640_v56  ;;  %11284 = vmatpush.msrb.mxu3 %v11283_v2  ;;  %v11300_v56 = vsub.f32 %v20631_v9, %v21870_v13  ;;  %v8950_v2 = vsel %vm4612_vm13, %v20251_v17, %v20489_v63  ;;  %v22885_v13 = vld [vmem:[#allocation181_spill] sm:$0xff] }
 0xa10   :  { %11397 = vmatpush.msra.mxu1 %v20592_v6  ;;  %11209 = vmatmul.f32.vlgmr.msrb.gmra.mxu2 %v19218_v42  ;;  %v20717_v28 = vand.u32 4294901760, %v22885_v13  ;;  %v20721_v58 = vand.u32 4294901760, %v8950_v2 }
 0xa11   :  { %11590 = vmatpush.msra.mxu0 %v20654_v53  ;;  %11290 = vmatpush.msrb.mxu3 %v11289_v39  ;;  %v11295_v53 = vand.u32 4294901760, %v11294_v15  ;;  %v11306_v39 = vsub.f32 %v20645_v38, %v21873_v22  ;;  %v11301_v17 = vand.u32 4294901760, %v11300_v56  ;;  %v20725_v15 = vpop.permute.xlu2 %8834  ;;  %v8894_v22 = vsel %vm6139_vm10, %v20259_v21, %v20690_v27 }
 0xa12   :  { %11410 = vmatpush.msra.mxu2 %v22884_v12  ;;  %11399 = vmatpush.msra.mxu1 %v20621_v41  ;;  %v22886_v12 = vand.u32 4294901760, %v20397_v10  ;;  %v20748_v56 = vsub.f32 %v8950_v2, %v20721_v58  ;;  %v20764_v2 = vsub.f32 %v20202_v48, %v20736_v37 }
 0xa13   :  { %11403 = vmatmul.f32.vlgmr.msra.gmra.mxu1 %v19075_v19  ;;  %11536 = vmatmul.f32.vlgmr.msrb.gmra.mxu0 %v22866_v62  ;;  %v11307_v10 = vand.u32 4294901760, %v11306_v39  ;;  %v22893_v39 = vand.u32 4294901760, %v20435_v51 }
 0xa14   :  { %11414 = vmatpush.msra.mxu2 %v22886_v12  ;;  %11559 = vmatpush.msrb.mxu1 %v11558_v14  ;;  %v22891_v14 = vld [vmem:[#allocation91_spill] sm:$0xff]  ;;  %v21877_v48 = vand.u32 4294901760, %v20748_v56 }
 0xa15   :  { %11639 = vmatpush.msrb.mxu0 %v11556_v59  ;;  %11296 = vmatpush.msrb.mxu3 %v11295_v53  ;;  %v20733_v59 = vsub.f32 %v22885_v13, %v20717_v28  ;;  %v20750_v13 = vand.u32 4294901760, %v8894_v22  ;;  %v8838_v53 = vsel %vm207_vm5, %v22892_v36, %v20725_v15  ;;  %v22894_v12 = vld [vmem:[#allocation171_spill] sm:$0xff] }
 0xa16   :  { %11418 = vmatpush.msra.mxu2 %v22887_v23  ;;  %11565 = vmatpush.msrb.mxu1 %v11564_v0  ;;  %v22889_v23 = vld [vmem:[#allocation188_spill] sm:$0xff]  ;;  %v20773_v51 = vand.u32 4294901760, %v8838_v53 }
 0xa17   :  { %11643 = vmatpush.msrb.mxu0 %v11562_v18  ;;  %11302 = vmatpush.msrb.mxu3 %v11301_v17  ;;  %v8839_v21 = vsel %vm207_vm5, %v22889_v23, %v20245_v29  ;;  %v20745_v18 = vpop.permute.xlu0 %8762  ;;  %v21874_v0 = vand.u32 4294901760, %v20733_v59  ;;  %v22897_v23 = vld [vmem:[#allocation184_spill] sm:$0xff]  ;;  %v20776_v36 = vsub.f32 %v8894_v22, %v20750_v13 }
 0xa18   :  { %11612 = vmatpush.msra.mxu1 %v20610_v52  ;;  %11422 = vmatpush.msra.mxu2 %v22888_v44  ;;  %22890 = vst [vmem:[#allocation172_spill] sm:$0xff] %v20745_v18  ;;  %v20766_v17 = vand.u32 4294901760, %v8839_v21  ;;  %v22896_v44 = vand.u32 4294901760, %v20459_v26  ;;  %v22899_v26 = vld [vmem:[#allocation135_spill] sm:$0xff] }
 0xa19   :  { %11308 = vmatpush.msrb.mxu3 %v11307_v10  ;;  %v22895_v10 = vld [vmem:[#allocation88_spill] sm:$0xff] }
 0xa1a   :  { %11614 = vmatpush.msra.mxu1 %v20626_v40  ;;  %11310 = vmatmul.f32.vlgmr.msrb.gmra.mxu3 %v22891_v14  ;;  %v20791_v22 = vsub.f32 %v8839_v21, %v20766_v17 }
 0xa1b   :  { %11426 = vmatpush.msra.mxu2 %v22893_v39  ;;  %11477 = vmatpush.msra.mxu3 %v22894_v12  ;;  %v22898_v39 = vand.u32 4294901760, %v20483_v31  ;;  %v20785_v12 = vand.u32 4294901760, %v22899_v26  ;;  %v20796_v31 = vpop.permute.xlu2 %8706 }
 0xa1c   :  { %11567 = vmatmul.f32.vlgmr.msrb.gmra.mxu1 %v18972_v16  ;;  %11593 = vmatmul.f32.vlgmr.msra.gmra.mxu0 %v22895_v10 }
 0xa1d   :  { %11430 = vmatpush.msra.mxu2 %v22896_v44  ;;  %11479 = vmatpush.msra.mxu3 %v22897_v23  ;;  %v11716_v44 = vsub.f32 %v20733_v59, %v21874_v0  ;;  %v20802_v23 = vsub.f32 %v8838_v53, %v20773_v51  ;;  %v22903_v53 = vld [vmem:[#allocation133_spill] sm:$0xff]  ;;  %v22906_v0 = vld [vmem:[#allocation106_spill] sm:$0xff] }
 0xa1e   :  { %11664 = vmatpush.msrb.mxu1 %v20610_v52  ;;  %11673 = vmatpush.msra.mxu0 %v20717_v28  ;;  %v21879_v52 = vand.u32 4294901760, %v20764_v2 }
 0xa1f   :  { %11434 = vmatpush.msra.mxu2 %v22898_v39  ;;  %11481 = vmatpush.msra.mxu3 %v20391_v4  ;;  %v22900_v4 = vand.u32 4294901760, %v20501_v47  ;;  %v22901_v39 = vld [vmem:[#allocation191_spill] sm:$0xff]  ;;  %v20813_v47 = vpop.permute.xlu0 %8704 }
 0xa20   :  { %11666 = vmatpush.msrb.mxu1 %v20626_v40  ;;  %11675 = vmatpush.msra.mxu0 %v20721_v58  ;;  %v8771_v21 = vsel %vm171_vm4, %v22901_v39, %v20745_v18  ;;  %v11722_v40 = vsub.f32 %v20748_v56, %v21877_v48  ;;  %v20823_v39 = vsub.f32 %v22899_v26, %v20785_v12  ;;  %v22907_v26 = vand.u32 4294901760, %v20529_v35 }
 0xa21   :  { %11438 = vmatpush.msra.mxu2 %v22900_v4  ;;  %11483 = vmatpush.msra.mxu3 %v20407_v7  ;;  %v22902_v7 = vand.u32 4294901760, %v20511_v45  ;;  %v20819_v4 = vand.u32 4294901760, %v22903_v53  ;;  %v8770_v48 = vsel %vm171_vm4, %v22905_v57, %v22904_v32  ;;  %v11717_v45 = vand.u32 4294901760, %v11716_v44  ;;  %v22908_v57 = vld [vmem:[#allocation161_spill] sm:$0xff] }
 0xa22   :  { %11677 = vmatpush.msra.mxu0 %v20736_v37  ;;  %v20835_v18 = vand.u32 4294901760, %v8771_v21  ;;  %v8715_v32 = vsel %vm6047_vm9, %v22908_v57, %v20796_v31  ;;  %v11723_v44 = vand.u32 4294901760, %v11722_v40  ;;  %v20849_v10 = vand.u32 4294901760, %v8770_v48 }
 0xa23   :  { %11442 = vmatpush.msra.mxu2 %v22902_v7  ;;  %11485 = vmatpush.msra.mxu3 %v20418_v60  ;;  %v11728_v60 = vsub.f32 %v20764_v2, %v21879_v52  ;;  %v22909_v52 = vand.u32 4294901760, %v20776_v36  ;;  %v22910_v35 = vand.u32 4294901760, %v20549_v55  ;;  %v20863_v57 = vand.u32 4294901760, %v8715_v32 }
 0xa24   :  { %11679 = vmatpush.msra.mxu0 %v20750_v13  ;;  %11618 = vmatmul.f32.vlgmr.msra.gmra.mxu1 %v22906_v0  ;;  %v21882_v0 = vand.u32 4294901760, %v20802_v23  ;;  %v20866_v55 = vsub.f32 %v8771_v21, %v20835_v18  ;;  %v20879_v21 = vpop.permute.xlu2 %8648 }
 0xa25   :  { %11446 = vmatpush.msra.mxu2 %v22907_v26  ;;  %11487 = vmatpush.msra.mxu3 %v20428_v34  ;;  %v11734_v7 = vsub.f32 %v20776_v36, %v22909_v52  ;;  %v20856_v34 = vsub.f32 %v22903_v53, %v20819_v4  ;;  %v11729_v40 = vand.u32 4294901760, %v11728_v60  ;;  %v21880_v26 = vand.u32 4294901760, %v20823_v39 }
 0xa26   :  { %11681 = vmatpush.msra.mxu0 %v20766_v17  ;;  %11718 = vmatpush.msra.mxu1 %v11717_v45  ;;  %v22911_v45 = vand.u32 4294901760, %v20791_v22  ;;  %v22912_v53 = vand.u32 4294901760, %v20580_v33  ;;  %v22914_v33 = vld [vmem:[#allocation36_spill] sm:$0xff] }
 0xa27   :  { %11450 = vmatpush.msra.mxu2 %v22910_v35  ;;  %11489 = vmatpush.msra.mxu3 %v20440_v8  ;;  %v8714_v8 = vsel %vm6047_vm9, %v20352_v43, %v20813_v47  ;;  %v11735_v60 = vand.u32 4294901760, %v11734_v7  ;;  %v20882_v35 = vsub.f32 %v8770_v48, %v20849_v10  ;;  %v22913_v43 = vand.u32 4294901760, %v20605_v20 }
 0xa28   :  { %11683 = vmatpush.msra.mxu0 %v20773_v51  ;;  %11724 = vmatpush.msra.mxu1 %v11723_v44  ;;  %v11740_v52 = vsub.f32 %v20791_v22, %v22911_v45  ;;  %v11746_v44 = vsub.f32 %v20802_v23, %v21882_v0  ;;  %v8659_v7 = vsel %vm4576_vm11, %v20403_v24, %v22914_v33  ;;  %v21883_v24 = vand.u32 4294901760, %v20866_v55  ;;  %v22921_v0 = vld [vmem:[#allocation189_spill] sm:$0xff] }
 0xa29   :  { %11454 = vmatpush.msra.mxu2 %v22912_v53  ;;  %11491 = vmatpush.msra.mxu3 %v20464_v1  ;;  %v21881_v1 = vand.u32 4294901760, %v20856_v34  ;;  %v11752_v20 = vsub.f32 %v20823_v39, %v21880_v26  ;;  %v20899_v48 = vsub.f32 %v8715_v32, %v20863_v57  ;;  %v22916_v53 = vand.u32 4294901760, %v20619_v54 }
 0xa2a   :  { %11685 = vmatpush.msra.mxu0 %v20785_v12  ;;  %11730 = vmatpush.msra.mxu1 %v11729_v40  ;;  %v20892_v40 = vand.u32 4294901760, %v8714_v8  ;;  %v11741_v45 = vand.u32 4294901760, %v11740_v52  ;;  %v20912_v32 = vand.u32 4294901760, %v8659_v7  ;;  %v22918_v26 = vand.u32 4294901760, %v20631_v9 }
 0xa2b   :  { %11458 = vmatpush.msra.mxu2 %v22913_v43  ;;  %11493 = vmatpush.msra.mxu3 %v20477_v46  ;;  %v20901_v46 = vpop.permute.xlu0 %8594  ;;  %v22917_v43 = vld [vmem:[#allocation156_spill] sm:$0xff]  ;;  %v21884_v54 = vand.u32 4294901760, %v20882_v35  ;;  %v11753_v9 = vand.u32 4294901760, %v11752_v20  ;;  %v10404_v20 = vpop.f32.mrf.mxu1 }
 0xa2c   :  { %11687 = vmatpush.msra.mxu0 %v20819_v4  ;;  %11736 = vmatpush.msra.mxu1 %v11735_v60  ;;  %22915 = vst [vmem:[#allocation63_spill] sm:$0xff] %v20901_v46  ;;  %v8658_v52 = vsel %vm4576_vm11, %v22917_v43, %v20879_v21  ;;  %v11747_v60 = vand.u32 4294901760, %v11746_v44  ;;  %v22919_v43 = vld [vmem:[#allocation158_spill] sm:$0xff] }
 0xa2d   :  { %11462 = vmatpush.msra.mxu2 %v22916_v53  ;;  %11495 = vmatpush.msra.mxu3 %v20495_v50  ;;  %v11758_v50 = vsub.f32 %v20856_v34, %v21881_v1  ;;  %v20922_v53 = vsub.f32 %v8714_v8, %v20892_v40  ;;  %v8603_v44 = vsel %vm5990_vm12, %v22919_v43, %v20901_v46  ;;  %v21885_v1 = vand.u32 4294901760, %v20899_v48 }
 0xa2e   :  { %11689 = vmatpush.msra.mxu0 %v20835_v18  ;;  %11742 = vmatpush.msra.mxu1 %v11741_v45  ;;  %v10365_v45 = vpop.f32.mrf.mxu0  ;;  %v11764_v8 = vsub.f32 %v20866_v55, %v21883_v24  ;;  %v8602_v43 = vsel %vm5990_vm12, %v20473_v30, %v22921_v0  ;;  %v10210_v24 = vpop.f32.mrf.mxu2 }
 0xa2f   :  { %11466 = vmatpush.msra.mxu2 %v22918_v26  ;;  %11497 = vmatpush.msra.mxu3 %v20522_v3  ;;  %v20929_v3 = vand.u32 4294901760, %v8658_v52  ;;  %v22920_v26 = vand.u32 4294901760, %v20645_v38  ;;  %v20944_v38 = vsub.f32 %v8659_v7, %v20912_v32 }
 0xa30   :  { %11691 = vmatpush.msra.mxu0 %v20849_v10  ;;  %11748 = vmatpush.msra.mxu1 %v11747_v60  ;;  %v20946_v60 = vand.u32 4294901760, %v8603_v44 }
 0xa31   :  { %11470 = vmatpush.msra.mxu2 %v22920_v26  ;;  %11499 = vmatpush.msra.mxu3 %v20544_v11  ;;  %v11759_v11 = vand.u32 4294901760, %v11758_v50  ;;  %v11770_v26 = vsub.f32 %v20882_v35, %v21884_v54  ;;  %v20957_v7 = vsub.f32 %v8658_v52, %v20929_v3  ;;  %v11776_v50 = vsub.f32 %v20899_v48, %v21885_v1  ;;  %v10311_v54 = vpop.f32.mrf.mxu3  ;;  %v22922_v52 = vld [vmem:[#allocation175_spill] sm:$0xff] }
 0xa32   :  { %11693 = vmatpush.msra.mxu0 %v20863_v57  ;;  %11754 = vmatpush.msra.mxu1 %v11753_v9  ;;  %v20959_v9 = vand.u32 4294901760, %v8602_v43  ;;  %v20968_v30 = vsub.f32 %v8603_v44, %v20946_v60  ;;  %v10211_v0 = vadd.f32 %v10210_v24, %v22922_v52  ;;  %v22923_v1 = vand.u32 4294901760, %v20922_v53 }
 0xa33   :  { %11472 = vmatmul.f32.vlgmr.msra.gmra.mxu2 %v22891_v14  ;;  %11501 = vmatpush.msra.mxu3 %v20563_v49  ;;  %v11765_v49 = vand.u32 4294901760, %v11764_v8  ;;  %v11787_v8 = vand.u32 4294901760, %v20944_v38  ;;  %v11777_v24 = vand.u32 4294901760, %v11776_v50 }
 0xa34   :  { %11816 = vmatpush.msrb.mxu2 %v20733_v59  ;;  %11695 = vmatpush.msra.mxu0 %v20892_v40  ;;  %v11782_v46 = vsub.f32 %v20922_v53, %v22923_v1  ;;  %v10312_v44 = vadd.f32 %v10311_v54, %v10211_v0  ;;  %v21888_v0 = vand.u32 4294901760, %v20968_v30  ;;  %v10568_v54 = vpop.f32.mrf.mxu1 }
 0xa35   :  { %11760 = vmatpush.msra.mxu1 %v11759_v11  ;;  %11645 = vmatmul.f32.vlgmr.msrb.gmra.mxu0 %v18972_v16  ;;  %v11771_v11 = vand.u32 4294901760, %v11770_v26  ;;  %v21887_v26 = vand.u32 4294901760, %v20957_v7 }
 0xa36   :  { %11819 = vmatpush.msrb.mxu2 %v20748_v56  ;;  %11503 = vmatpush.msra.mxu3 %v20583_v5  ;;  %v20979_v5 = vsub.f32 %v8602_v43, %v20959_v9  ;;  %v11783_v1 = vand.u32 4294901760, %v11782_v46  ;;  %v10366_v43 = vadd.f32 %v10365_v45, %v10312_v44  ;;  %v11800_v45 = vsub.f32 %v20968_v30, %v21888_v0 }
 0xa37   :  { %11697 = vmatpush.msra.mxu0 %v20912_v32  ;;  %11766 = vmatpush.msra.mxu1 %v11765_v49  ;;  %v10537_v49 = vpop.f32.mrf.mxu0 }
 0xa38   :  { %11822 = vmatpush.msrb.mxu2 %v20764_v2  ;;  %11505 = vmatpush.msra.mxu3 %v20592_v6  ;;  %v11788_v6 = vsub.f32 %v20944_v38, %v11787_v8  ;;  %v11805_v50 = vand.u32 4294901760, %v20979_v5 }
 0xa39   :  { %11699 = vmatpush.msra.mxu0 %v20929_v3  ;;  %11772 = vmatpush.msra.mxu1 %v11771_v11  ;;  %v22924_v11 = vand.u32 4294901760, %v20733_v59  ;;  %v11801_v59 = vand.u32 4294901760, %v11800_v45  ;;  %v21022_v45 = vpop.permute.xlu2 %9004 }
 0xa3a   :  { %11825 = vmatpush.msrb.mxu2 %v20776_v36  ;;  %11507 = vmatpush.msra.mxu3 %v20621_v41  ;;  %v11794_v41 = vsub.f32 %v20957_v7, %v21887_v26  ;;  %v11789_v46 = vand.u32 4294901760, %v11788_v6  ;;  %v11806_v26 = vsub.f32 %v20979_v5, %v11805_v50  ;;  %v22925_v6 = vand.u32 4294901760, %v20748_v56 }
 0xa3b   :  { %11701 = vmatpush.msra.mxu0 %v20946_v60  ;;  %11778 = vmatpush.msra.mxu1 %v11777_v24  ;;  %v10473_v44 = vpop.f32.mrf.mxu2  ;;  %v10405_v24 = vadd.f32 %v10404_v20, %v10366_v43  ;;  %v22926_v20 = vand.u32 4294901760, %v20764_v2  ;;  %v22927_v56 = vand.u32 4294901760, %v20776_v36  ;;  %v21027_v2 = vpop.permute.xlu0 %9002 }
 0xa3c   :  { %11509 = vmatmul.f32.vlgmr.msra.gmra.mxu3 %v22891_v14  ;;  %11828 = vmatpush.msrb.mxu2 %v20791_v22 }
 0xa3d   :  { %11869 = vmatpush.msrb.mxu3 %v20717_v28  ;;  %11703 = vmatpush.msra.mxu0 %v20959_v9 }
 0xa3e   :  { %11784 = vmatpush.msra.mxu1 %v11783_v1  ;;  %11709 = vmatmul.f32.vlgmr.msra.gmra.mxu0 %v19218_v42  ;;  %v11795_v1 = vand.u32 4294901760, %v11794_v41  ;;  %v11807_v41 = vand.u32 4294901760, %v11806_v26  ;;  %v22928_v26 = vand.u32 4294901760, %v20791_v22  ;;  %v22931_v22 = vld [vmem:[#allocation193_spill] sm:$0xff] }
 0xa3f   :  { %11668 = vmatmul.f32.vlgmr.msrb.gmra.mxu1 %v18972_v16  ;;  %11831 = vmatpush.msrb.mxu2 %v20802_v23  ;;  %v10594_v0 = vpop.f32.mrf.mxu0 }
 0xa40   :  { %11871 = vmatpush.msrb.mxu3 %v20721_v58  ;;  %11910 = vmatpush.msrb.mxu0 %v22924_v11  ;;  %v10474_v11 = vadd.f32 %v10473_v44, %v10405_v24  ;;  %v22929_v24 = vld [vmem:[#allocation183_spill] sm:$0xff] }
 0xa41   :  { %11790 = vmatpush.msra.mxu1 %v11789_v46  ;;  %11834 = vmatpush.msrb.mxu2 %v20823_v39 }
 0xa42   :  { %11873 = vmatpush.msrb.mxu3 %v20736_v37  ;;  %11914 = vmatpush.msrb.mxu0 %v22925_v6  ;;  %v9007_v6 = vsel %vm6196_vm3, %v22929_v24, %v21022_v45 }
 0xa43   :  { %11796 = vmatpush.msra.mxu1 %v11795_v1  ;;  %11837 = vmatpush.msrb.mxu2 %v20856_v34  ;;  %v10619_v1 = vpop.f32.mrf.mxu1 }
 0xa44   :  { %11875 = vmatpush.msrb.mxu3 %v20750_v13  ;;  %11918 = vmatpush.msrb.mxu0 %v22926_v20  ;;  %v10510_v43 = vpop.f32.mrf.mxu3 }
 0xa45   :  { %11802 = vmatpush.msra.mxu1 %v11801_v59  ;;  %11840 = vmatpush.msrb.mxu2 %v20866_v55  ;;  %v10511_v46 = vadd.f32 %v10510_v43, %v10474_v11  ;;  %v22932_v11 = vand.u32 4294901760, %v20823_v39  ;;  %v22934_v39 = vand.u32 4294901760, %v20866_v55 }
 0xa46   :  { %11877 = vmatpush.msrb.mxu3 %v20766_v17  ;;  %11922 = vmatpush.msrb.mxu0 %v22927_v56  ;;  %v12831_v56 = vld [vmem:[%s21477_s0 + $0x10] sm:$0xff] }
 0xa47   :  { %11808 = vmatpush.msra.mxu1 %v11807_v41  ;;  %11843 = vmatpush.msrb.mxu2 %v20882_v35  ;;  %v10538_v44 = vadd.f32 %v10537_v49, %v10511_v46  ;;  %v22930_v49 = vand.u32 4294901760, %v20802_v23  ;;  %v10646_v20 = vpop.f32.mrf.mxu0 }
 0xa48   :  { %11810 = vmatmul.f32.vlgmr.msra.gmra.mxu1 %v22891_v14  ;;  %11879 = vmatpush.msrb.mxu3 %v20773_v51 }
 0xa49   :  { %11926 = vmatpush.msrb.mxu0 %v22928_v26  ;;  %11977 = vmatpush.msrb.mxu1 %v20717_v28  ;;  %v10569_v36 = vadd.f32 %v10568_v54, %v10538_v44  ;;  %v9006_v28 = vsel %vm6196_vm3, %v22931_v22, %v21027_v2  ;;  %v21047_v54 = vand.u32 4294901760, %v9007_v6  ;;  %v22938_v44 = vld [vmem:[#allocation107_spill] sm:$0xff]  ;;  %v22939_v26 = vld [vmem:[#allocation174_spill] sm:$0xff] }
 0xa4a   :  { %11846 = vmatpush.msrb.mxu2 %v20899_v48  ;;  %11881 = vmatpush.msrb.mxu3 %v20785_v12 }
 0xa4b   :  { %11930 = vmatpush.msrb.mxu0 %v22930_v49  ;;  %11979 = vmatpush.msrb.mxu1 %v20721_v58  ;;  %v10595_v59 = vadd.f32 %v10594_v0, %v10569_v36  ;;  %v21054_v58 = vand.u32 4294901760, %v9006_v28  ;;  %v22933_v0 = vand.u32 4294901760, %v20856_v34  ;;  %v10669_v41 = vpop.f32.mrf.mxu1  ;;  %v22935_v34 = vand.u32 4294901760, %v20882_v35 }
 0xa4c   :  { %11849 = vmatpush.msrb.mxu2 %v20922_v53  ;;  %11883 = vmatpush.msrb.mxu3 %v20819_v4  ;;  %v22941_v36 = vand.u32 4294901760, %v20957_v7 }
 0xa4d   :  { %11934 = vmatpush.msrb.mxu0 %v22932_v11  ;;  %11981 = vmatpush.msrb.mxu1 %v20736_v37  ;;  %v10620_v23 = vadd.f32 %v10619_v1, %v10595_v59  ;;  %v12055_v37 = vsub.f32 %v9007_v6, %v21047_v54  ;;  %v22936_v1 = vand.u32 4294901760, %v20899_v48  ;;  %v8963_v48 = vsel %vm4612_vm13, %v22939_v26, %v22938_v44  ;;  %v22945_v11 = vld [vmem:[#allocation121_spill] sm:$0xff]  ;;  %v22951_v44 = vld [vmem:[#allocation172_spill] sm:$0xff] }
 0xa4e   :  { %11852 = vmatpush.msrb.mxu2 %v20944_v38  ;;  %11885 = vmatpush.msrb.mxu3 %v20835_v18  ;;  %v21104_v6 = vand.u32 4294901760, %v8963_v48  ;;  %v22942_v38 = vld [vmem:[#allocation16_spill] sm:$0xff] }
 0xa4f   :  { %11938 = vmatpush.msrb.mxu0 %v22933_v0  ;;  %11983 = vmatpush.msrb.mxu1 %v20750_v13  ;;  %v10647_v43 = vadd.f32 %v10646_v20, %v10620_v23  ;;  %v12061_v13 = vsub.f32 %v9006_v28, %v21054_v58 }
 0xa50   :  { %11855 = vmatpush.msrb.mxu2 %v20957_v7  ;;  %11887 = vmatpush.msrb.mxu3 %v20849_v10  ;;  %v10710_v7 = vpop.f32.mrf.mxu0  ;;  %v21120_v22 = vsub.f32 %v8963_v48, %v21104_v6 }
 0xa51   :  { %11942 = vmatpush.msrb.mxu0 %v22934_v39  ;;  %11985 = vmatpush.msrb.mxu1 %v20766_v17  ;;  %v10670_v46 = vadd.f32 %v10669_v41, %v10647_v43  ;;  %v12056_v17 = vand.u32 4294901760, %v12055_v37  ;;  %v12062_v35 = vand.u32 4294901760, %v12061_v13  ;;  %v10711_v20 = vadd.f32 %v10710_v7, %v22922_v52  ;;  %v22946_v43 = vld [vmem:[#allocation41_spill] sm:$0xff]  ;;  %v22947_v41 = vld [vmem:[#allocation60_spill] sm:$0xff] }
 0xa52   :  { %11858 = vmatpush.msrb.mxu2 %v20968_v30  ;;  %11889 = vmatpush.msrb.mxu3 %v20863_v57  ;;  %v12215_v39 = vand.u32 4294901760, %v21120_v22  ;;  %v22955_v7 = vld [vmem:[#allocation89_spill] sm:$0xff] }
 0xa53   :  { %11946 = vmatpush.msrb.mxu0 %v22935_v34  ;;  %11987 = vmatpush.msrb.mxu1 %v20773_v51  ;;  %v12674_v55 = vadd.f32 %v12831_v56, %v10670_v46  ;;  %v22937_v51 = vand.u32 4294901760, %v20922_v53  ;;  %v22940_v53 = vld [vmem:[#allocation26_spill] sm:$0xff]  ;;  %v12063_v24 = vsub.f32 %v12061_v13, %v12062_v35 }
 0xa54   :  { %11861 = vmatpush.msrb.mxu2 %v20979_v5  ;;  %11891 = vmatpush.msrb.mxu3 %v20892_v40 }
 0xa55   :  { %12681 = vst [vmem:[%s21486_s9 + $0x10] sm:$0xff] %v12674_v55  ;;  %11950 = vmatpush.msrb.mxu0 %v22936_v1  ;;  %11989 = vmatpush.msrb.mxu1 %v20785_v12  ;;  %v12057_v12 = vsub.f32 %v12055_v37, %v12056_v17 }
 0xa56   :  { %11864 = vmatmul.f32.vlgmr.msrb.gmra.mxu2 %v22857_v25  ;;  %11893 = vmatpush.msrb.mxu3 %v20912_v32 }
 0xa57   :  { %12028 = vmatpush.msra.mxu2 %v21047_v54  ;;  %11954 = vmatpush.msrb.mxu0 %v22937_v51  ;;  %v12058_v49 = vand.u32 4294901760, %v12057_v12  ;;  %v22952_v12 = vld [vmem:[#allocation118_spill] sm:$0xff] }
 0xa58   :  { %11991 = vmatpush.msrb.mxu1 %v20819_v4  ;;  %11895 = vmatpush.msrb.mxu3 %v20929_v3  ;;  %v8962_v4 = vsel %vm4612_vm13, %v20489_v63, %v22940_v53  ;;  %v22944_v63 = vand.u32 4294901760, %v20968_v30  ;;  %v8906_v30 = vsel %vm6139_vm10, %v20690_v27, %v22945_v11  ;;  %v8851_v27 = vsel %vm207_vm5, %v20245_v29, %v22946_v43  ;;  %v22956_v11 = vld [vmem:[#allocation106_spill] sm:$0xff] }
 0xa59   :  { %12030 = vmatpush.msra.mxu2 %v21054_v58  ;;  %11958 = vmatpush.msrb.mxu0 %v11787_v8  ;;  %v22943_v8 = vld [vmem:[#allocation173_spill] sm:$0xff]  ;;  %v21114_v59 = vand.u32 4294901760, %v8962_v4  ;;  %v21140_v5 = vand.u32 4294901760, %v8906_v30  ;;  %v21154_v29 = vand.u32 4294901760, %v8851_v27  ;;  %v21195_v53 = vand.u32 4294901760, %v22952_v12 }
 0xa5a   :  { %11993 = vmatpush.msrb.mxu1 %v20835_v18  ;;  %11897 = vmatpush.msrb.mxu3 %v20946_v60  ;;  %v8907_v18 = vsel %vm6139_vm10, %v22943_v8, %v22942_v38 }
 0xa5b   :  { %12087 = vmatpush.msrb.mxu2 %v12055_v37  ;;  %11962 = vmatpush.msrb.mxu0 %v22941_v36  ;;  %v21122_v28 = vand.u32 4294901760, %v8907_v18  ;;  %v21132_v23 = vsub.f32 %v8962_v4, %v21114_v59  ;;  %v8850_v37 = vsel %vm207_vm5, %v20725_v15, %v22947_v41  ;;  %v21160_v46 = vsub.f32 %v8906_v30, %v21140_v5  ;;  %v22953_v4 = vld [vmem:[#allocation93_spill] sm:$0xff]  ;;  %v22954_v36 = vld [vmem:[#allocation176_spill] sm:$0xff] }
 0xa5c   :  { %11995 = vmatpush.msrb.mxu1 %v20849_v10  ;;  %11899 = vmatpush.msrb.mxu3 %v20959_v9  ;;  %v12064_v10 = vand.u32 4294901760, %v12063_v24  ;;  %v8768_v24 = vsel %vm171_vm4, %v22954_v36, %v22953_v4  ;;  %v21229_v43 = vsub.f32 %v22952_v12, %v21195_v53 }
 0xa5d   :  { %12090 = vmatpush.msrb.mxu2 %v12061_v13  ;;  %11966 = vmatpush.msrb.mxu0 %v22944_v63  ;;  %v22948_v13 = vld [vmem:[#allocation88_spill] sm:$0xff]  ;;  %v12221_v55 = vand.u32 4294901760, %v21132_v23  ;;  %v12233_v8 = vand.u32 4294901760, %v21160_v46 }
 0xa5e   :  { %11997 = vmatpush.msrb.mxu1 %v20863_v57  ;;  %11903 = vmatmul.f32.vlgmr.msrb.gmra.mxu3 %v19075_v19  ;;  %v10811_v57 = vpop.f32.mrf.mxu1  ;;  %v10865_v0 = vpop.f32.mrf.mxu2 }
 0xa5f   :  { %12036 = vmatmul.f32.vlgmr.msra.gmra.mxu2 %v22866_v62  ;;  %12059 = vmatpush.msra.mxu3 %v12058_v49  ;;  %v12222_v38 = vsub.f32 %v21132_v23, %v12221_v55  ;;  %v12234_v41 = vsub.f32 %v21160_v46, %v12233_v8 }
 0xa60   :  { %12139 = vmatpush.msra.mxu2 %v12056_v17  ;;  %11970 = vmatpush.msrb.mxu0 %v11805_v50  ;;  %v10812_v50 = vadd.f32 %v10811_v57, %v10711_v20  ;;  %v21172_v17 = vsub.f32 %v8851_v27, %v21154_v29 }
 0xa61   :  { %11999 = vmatpush.msrb.mxu1 %v20892_v40  ;;  %12065 = vmatpush.msra.mxu3 %v12064_v10  ;;  %v21145_v40 = vsub.f32 %v8907_v18, %v21122_v28  ;;  %v8713_v10 = vsel %vm6047_vm9, %v20796_v31, %v22955_v7  ;;  %v12235_v4 = vand.u32 4294901760, %v12234_v41 }
 0xa62   :  { %12143 = vmatpush.msra.mxu2 %v12062_v35  ;;  %12316 = vmatpush.msra.mxu0 %v21120_v22  ;;  %v22950_v35 = vld [vmem:[#allocation70_spill] sm:$0xff]  ;;  %v12239_v31 = vand.u32 4294901760, %v21172_v17 }
 0xa63   :  { %12001 = vmatpush.msrb.mxu1 %v20912_v32  ;;  %12112 = vmatpush.msrb.mxu3 %v21047_v54  ;;  %v10866_v32 = vadd.f32 %v10865_v0, %v10812_v50  ;;  %v8769_v26 = vsel %vm171_vm4, %v22951_v44, %v22950_v35  ;;  %v21223_v0 = vand.u32 4294901760, %v8768_v24  ;;  %v12223_v50 = vand.u32 4294901760, %v12222_v38  ;;  %v22958_v44 = vld [vmem:[#allocation112_spill] sm:$0xff] }
 0xa64   :  { %12319 = vmatpush.msra.mxu0 %v21132_v23  ;;  %v21206_v63 = vand.u32 4294901760, %v8769_v26 }
 0xa65   :  { %12003 = vmatpush.msrb.mxu1 %v20929_v3  ;;  %12114 = vmatpush.msrb.mxu3 %v21054_v58  ;;  %v21164_v3 = vand.u32 4294901760, %v8850_v37  ;;  %v21250_v35 = vsub.f32 %v8768_v24, %v21223_v0 }
 0xa66   :  { %12322 = vmatpush.msra.mxu0 %v21145_v40  ;;  %12067 = vmatmul.f32.vlgmr.msra.gmra.mxu3 %v18972_v16  ;;  %v10904_v15 = vpop.f32.mrf.mxu3  ;;  %v10973_v56 = vpop.f32.mrf.mxu0 }
 0xa67   :  { %12005 = vmatpush.msrb.mxu1 %v20946_v60  ;;  %11972 = vmatmul.f32.vlgmr.msrb.gmra.mxu0 %v22891_v14  ;;  %v10905_v34 = vadd.f32 %v10904_v15, %v10866_v32  ;;  %v22949_v60 = vld [vmem:[#allocation11_spill] sm:$0xff]  ;;  %v11037_v51 = vpop.f32.mrf.mxu2  ;;  %v21190_v48 = vsub.f32 %v8850_v37, %v21164_v3  ;;  %v21236_v37 = vand.u32 4294901760, %v8713_v10  ;;  %v21239_v32 = vsub.f32 %v8769_v26, %v21206_v63  ;;  %v22957_v15 = vld [vmem:[#allocation6_spill] sm:$0xff] }
 0xa68   :  { %12093 = vmatmul.f32.vlgmr.msrb.gmra.mxu2 %v22948_v13  ;;  %12164 = vmatpush.msra.mxu3 %v21047_v54  ;;  %v21177_v1 = vand.u32 4294901760, %v22949_v60  ;;  %v12216_v54 = vsub.f32 %v21120_v22, %v12215_v39  ;;  %v8657_v26 = vsel %vm4576_vm11, %v22914_v33, %v22958_v44  ;;  %v22959_v33 = vld [vmem:[#allocation102_spill] sm:$0xff] }
 0xa69   :  { %12173 = vmatpush.msrb.mxu2 %v21104_v6  ;;  %12325 = vmatpush.msra.mxu0 %v21160_v46  ;;  %v21266_v36 = vsub.f32 %v8713_v10, %v21236_v37  ;;  %v8656_v24 = vsel %vm4576_vm11, %v20879_v21, %v22959_v33  ;;  %v21278_v7 = vand.u32 4294901760, %v8657_v26  ;;  %v21892_v41 = vand.u32 4294901760, %v21239_v32 }
 0xa6a   :  { %12007 = vmatpush.msrb.mxu1 %v20959_v9  ;;  %12166 = vmatpush.msra.mxu3 %v21054_v58  ;;  %v12227_v9 = vand.u32 4294901760, %v21145_v40  ;;  %v10974_v58 = vadd.f32 %v10973_v56, %v10905_v34  ;;  %v21212_v49 = vsub.f32 %v22949_v60, %v21177_v1  ;;  %v12217_v30 = vand.u32 4294901760, %v12216_v54 }
 0xa6b   :  { %12009 = vmatmul.f32.vlgmr.msrb.gmra.mxu1 %v22891_v14  ;;  %12175 = vmatpush.msrb.mxu2 %v21114_v59  ;;  %v8712_v34 = vsel %vm6047_vm9, %v20813_v47, %v22957_v15  ;;  %v21893_v56 = vand.u32 4294901760, %v21190_v48  ;;  %v12240_v47 = vsub.f32 %v21172_v17, %v12239_v31  ;;  %v21291_v15 = vand.u32 4294901760, %v8656_v24 }
 0xa6c   :  { %12328 = vmatpush.msra.mxu0 %v21172_v17  ;;  %12369 = vmatpush.msra.mxu1 %v21104_v6  ;;  %v12228_v57 = vsub.f32 %v21145_v40, %v12227_v9  ;;  %v22967_v22 = vand.u32 4294901760, %v21212_v49  ;;  %v22969_v23 = vand.u32 4294901760, %v21239_v32 }
 0xa6d   :  { %12177 = vmatpush.msrb.mxu2 %v21122_v28  ;;  %v11010_v18 = vpop.f32.mrf.mxu1  ;;  %v12246_v38 = vsub.f32 %v21190_v48, %v21893_v56 }
 0xa6e   :  { %12331 = vmatpush.msra.mxu0 %v21190_v48  ;;  %12371 = vmatpush.msra.mxu1 %v21114_v59  ;;  %v11011_v20 = vadd.f32 %v11010_v18, %v10974_v58  ;;  %v12229_v60 = vand.u32 4294901760, %v12228_v57  ;;  %v21889_v58 = vand.u32 4294901760, %v21212_v49  ;;  %v21890_v18 = vand.u32 4294901760, %v21229_v43  ;;  %v22961_v57 = vld [vmem:[#allocation63_spill] sm:$0xff] }
 0xa6f   :  { %12179 = vmatpush.msrb.mxu2 %v21140_v5  ;;  %12118 = vmatmul.f32.vlgmr.msrb.gmra.mxu3 %v22956_v11 }
 0xa70   :  { %12334 = vmatpush.msra.mxu0 %v21212_v49  ;;  %12373 = vmatpush.msra.mxu1 %v21122_v28  ;;  %v11068_v27 = vpop.f32.mrf.mxu3  ;;  %v11038_v54 = vadd.f32 %v11037_v51, %v11011_v20  ;;  %v11094_v12 = vpop.f32.mrf.mxu2  ;;  %v21262_v51 = vand.u32 4294901760, %v8712_v34  ;;  %v12241_v20 = vand.u32 4294901760, %v12240_v47  ;;  %v22963_v47 = vld [vmem:[#allocation95_spill] sm:$0xff] }
 0xa71   :  { %12181 = vmatpush.msrb.mxu2 %v21154_v29  ;;  %12218 = vmatpush.msrb.mxu3 %v12217_v30  ;;  %v22960_v30 = vld [vmem:[#allocation128_spill] sm:$0xff] }
 0xa72   :  { %12337 = vmatpush.msra.mxu0 %v21229_v43  ;;  %12375 = vmatpush.msra.mxu1 %v21140_v5  ;;  %v11069_v10 = vadd.f32 %v11068_v27, %v11038_v54  ;;  %v8601_v21 = vsel %vm5990_vm12, %v22961_v57, %v22960_v30  ;;  %v21298_v54 = vsub.f32 %v8712_v34, %v21262_v51  ;;  %v12247_v30 = vand.u32 4294901760, %v12246_v38 }
 0xa73   :  { %12145 = vmatmul.f32.vlgmr.msra.gmra.mxu2 %v18972_v16  ;;  %12224 = vmatpush.msrb.mxu3 %v12223_v50  ;;  %v12252_v50 = vsub.f32 %v21212_v49, %v21889_v58  ;;  %v21891_v34 = vand.u32 4294901760, %v21250_v35  ;;  %v21312_v57 = vsub.f32 %v8657_v26, %v21278_v7  ;;  %v22965_v58 = vld [vmem:[#allocation62_spill] sm:$0xff]  ;;  %v12264_v26 = vsub.f32 %v21239_v32, %v21892_v41 }
 0xa74   :  { %12183 = vmatpush.msrb.mxu2 %v21164_v3  ;;  %12340 = vmatpush.msra.mxu0 %v21239_v32  ;;  %v11095_v38 = vadd.f32 %v11094_v12, %v11069_v10 }
 0xa75   :  { %12377 = vmatpush.msra.mxu1 %v21154_v29  ;;  %12230 = vmatpush.msrb.mxu3 %v12229_v60  ;;  %v22962_v60 = vld [vmem:[#allocation134_spill] sm:$0xff]  ;;  %v12287_v41 = vand.u32 4294901760, %v21312_v57 }
 0xa76   :  { %12185 = vmatpush.msrb.mxu2 %v21177_v1  ;;  %12343 = vmatpush.msra.mxu0 %v21250_v35  ;;  %v9019_v27 = vsel %vm6196_vm3, %v21022_v45, %v22962_v60  ;;  %v12258_v45 = vsub.f32 %v21229_v43, %v21890_v18  ;;  %v21314_v60 = vand.u32 4294901760, %v8601_v21  ;;  %v21329_v18 = vsub.f32 %v8656_v24, %v21291_v15 }
 0xa77   :  { %12379 = vmatpush.msra.mxu1 %v21164_v3  ;;  %12236 = vmatpush.msrb.mxu3 %v12235_v4  ;;  %v22964_v4 = vld [vmem:[#allocation189_spill] sm:$0xff]  ;;  %v12270_v24 = vsub.f32 %v21250_v35, %v21891_v34 }
 0xa78   :  { %12187 = vmatpush.msrb.mxu2 %v21195_v53  ;;  %12346 = vmatpush.msra.mxu0 %v21266_v36  ;;  %v8600_v33 = vsel %vm5990_vm12, %v22964_v4, %v22963_v47  ;;  %v9018_v47 = vsel %vm6196_vm3, %v21027_v2, %v22965_v58  ;;  %v12253_v4 = vand.u32 4294901760, %v12252_v50  ;;  %v21894_v2 = vand.u32 4294901760, %v21266_v36 }
 0xa79   :  { %12381 = vmatpush.msra.mxu1 %v21177_v1  ;;  %12168 = vmatmul.f32.vlgmr.msra.gmra.mxu3 %v18972_v16  ;;  %v11119_v44 = vpop.f32.mrf.mxu3  ;;  %v21331_v61 = vand.u32 4294901760, %v8600_v33  ;;  %v21336_v12 = vand.u32 4294901760, %v9018_v47  ;;  %v12259_v10 = vand.u32 4294901760, %v12258_v45  ;;  %v12265_v45 = vand.u32 4294901760, %v12264_v26 }
 0xa7a   :  { %12189 = vmatpush.msrb.mxu2 %v21206_v63  ;;  %12242 = vmatpush.msrb.mxu3 %v12241_v20  ;;  %v21322_v20 = vand.u32 4294901760, %v9019_v27  ;;  %v11120_v58 = vadd.f32 %v11119_v44, %v11095_v38  ;;  %v12281_v44 = vand.u32 4294901760, %v21298_v54 }
 0xa7b   :  { %12349 = vmatpush.msra.mxu0 %v21298_v54  ;;  %12383 = vmatpush.msra.mxu1 %v21195_v53 }
 0xa7c   :  { %12191 = vmatpush.msrb.mxu2 %v21223_v0  ;;  %12248 = vmatpush.msrb.mxu3 %v12247_v30  ;;  %v11146_v50 = vpop.f32.mrf.mxu2  ;;  %v21340_v30 = vsub.f32 %v8601_v21, %v21314_v60  ;;  %v12555_v38 = vsub.f32 %v9019_v27, %v21322_v20  ;;  %v12276_v21 = vsub.f32 %v21266_v36, %v21894_v2 }
 0xa7d   :  { %12352 = vmatpush.msra.mxu0 %v21312_v57  ;;  %12385 = vmatpush.msra.mxu1 %v21206_v63  ;;  %v11147_v34 = vadd.f32 %v11146_v50, %v11120_v58  ;;  %v12561_v27 = vsub.f32 %v9018_v47, %v21336_v12  ;;  %v12288_v58 = vsub.f32 %v21312_v57, %v12287_v41  ;;  %v12293_v50 = vand.u32 4294901760, %v21329_v18 }
 0xa7e   :  { %12193 = vmatpush.msrb.mxu2 %v21236_v37  ;;  %12254 = vmatpush.msrb.mxu3 %v12253_v4  ;;  %v21351_v4 = vsub.f32 %v8600_v33, %v21331_v61  ;;  %v12271_v33 = vand.u32 4294901760, %v12270_v24  ;;  %v12556_v2 = vand.u32 4294901760, %v12555_v38  ;;  %v12277_v47 = vand.u32 4294901760, %v12276_v21  ;;  %v12832_v24 = vld [vmem:[%s21477_s0 + $0x18] sm:$0xff] }
 0xa7f   :  { %12355 = vmatpush.msra.mxu0 %v21329_v18  ;;  %12387 = vmatpush.msra.mxu1 %v21223_v0  ;;  %v12299_v21 = vand.u32 4294901760, %v21340_v30 }
 0xa80   :  { %12195 = vmatpush.msrb.mxu2 %v21262_v51  ;;  %12260 = vmatpush.msrb.mxu3 %v12259_v10  ;;  %v12282_v10 = vsub.f32 %v21298_v54, %v12281_v44 }
 0xa81   :  { %12358 = vmatpush.msra.mxu0 %v21340_v30  ;;  %12389 = vmatpush.msra.mxu1 %v21236_v37 }
 0xa82   :  { %12197 = vmatpush.msrb.mxu2 %v21278_v7  ;;  %12266 = vmatpush.msrb.mxu3 %v12265_v45  ;;  %v11169_v26 = vpop.f32.mrf.mxu3  ;;  %v12283_v45 = vand.u32 4294901760, %v12282_v10  ;;  %v12305_v10 = vand.u32 4294901760, %v21351_v4 }
 0xa83   :  { %12361 = vmatpush.msra.mxu0 %v21351_v4  ;;  %12391 = vmatpush.msra.mxu1 %v21262_v51  ;;  %v11170_v56 = vadd.f32 %v11169_v26, %v11147_v34  ;;  %v12557_v26 = vsub.f32 %v12555_v38, %v12556_v2 }
 0xa84   :  { %12364 = vmatmul.f32.vlgmr.msra.gmra.mxu0 %v22857_v25  ;;  %12199 = vmatpush.msrb.mxu2 %v21291_v15  ;;  %v12562_v25 = vand.u32 4294901760, %v12561_v27 }
 0xa85   :  { %12528 = vmatpush.msrb.mxu0 %v21322_v20  ;;  %12272 = vmatpush.msrb.mxu3 %v12271_v33  ;;  %v12675_v34 = vadd.f32 %v12832_v24, %v11170_v56  ;;  %v12289_v56 = vand.u32 4294901760, %v12288_v58  ;;  %v12294_v33 = vsub.f32 %v21329_v18, %v12293_v50  ;;  %v12558_v58 = vand.u32 4294901760, %v12557_v26 }
 0xa86   :  { %12393 = vmatpush.msra.mxu1 %v21278_v7  ;;  %12201 = vmatpush.msrb.mxu2 %v21314_v60 }
 0xa87   :  { %12530 = vmatpush.msrb.mxu0 %v21336_v12  ;;  %12278 = vmatpush.msrb.mxu3 %v12277_v47  ;;  %12682 = vst [vmem:[%s21486_s9 + $0x18] sm:$0xff] %v12675_v34  ;;  %v12563_v47 = vsub.f32 %v12561_v27, %v12562_v25  ;;  %v12295_v24 = vand.u32 4294901760, %v12294_v33 }
 0xa88   :  { %12395 = vmatpush.msra.mxu1 %v21291_v15  ;;  %12203 = vmatpush.msrb.mxu2 %v21331_v61 }
 0xa89   :  { %12587 = vmatpush.msra.mxu0 %v12555_v38  ;;  %12284 = vmatpush.msrb.mxu3 %v12283_v45  ;;  %v12300_v38 = vsub.f32 %v21340_v30, %v12299_v21 }
 0xa8a   :  { %12397 = vmatpush.msra.mxu1 %v21314_v60  ;;  %12209 = vmatmul.f32.vlgmr.msrb.gmra.mxu2 %v19218_v42  ;;  %v12564_v42 = vand.u32 4294901760, %v12563_v47 }
 0xa8b   :  { %12590 = vmatpush.msra.mxu0 %v12561_v27  ;;  %12290 = vmatpush.msrb.mxu3 %v12289_v56  ;;  %v12306_v27 = vsub.f32 %v21351_v4, %v12305_v10  ;;  %v12301_v34 = vand.u32 4294901760, %v12300_v38  ;;  %v12834_v38 = vld [vmem:[%s21477_s0 + $0x28] sm:$0xff] }
 0xa8c   :  { %12410 = vmatpush.msra.mxu2 %v12215_v39  ;;  %12399 = vmatpush.msra.mxu1 %v21331_v61 }
 0xa8d   :  { %12403 = vmatmul.f32.vlgmr.msra.gmra.mxu1 %v19075_v19  ;;  %12536 = vmatmul.f32.vlgmr.msrb.gmra.mxu0 %v22866_v62  ;;  %v12307_v19 = vand.u32 4294901760, %v12306_v27  ;;  %v22966_v62 = vand.u32 4294901760, %v21190_v48 }
 0xa8e   :  { %12414 = vmatpush.msra.mxu2 %v12221_v55  ;;  %12559 = vmatpush.msrb.mxu1 %v12558_v58 }
 0xa8f   :  { %12639 = vmatpush.msrb.mxu0 %v12556_v2  ;;  %12296 = vmatpush.msrb.mxu3 %v12295_v24 }
 0xa90   :  { %12418 = vmatpush.msra.mxu2 %v12227_v9  ;;  %12565 = vmatpush.msrb.mxu1 %v12564_v42  ;;  %v11404_v40 = vpop.f32.mrf.mxu1 }
 0xa91   :  { %12643 = vmatpush.msrb.mxu0 %v12562_v25  ;;  %12302 = vmatpush.msrb.mxu3 %v12301_v34 }
 0xa92   :  { %12612 = vmatpush.msra.mxu1 %v21322_v20  ;;  %12422 = vmatpush.msra.mxu2 %v12233_v8 }
 0xa93   :  { %12308 = vmatpush.msrb.mxu3 %v12307_v19 }
 0xa94   :  { %12614 = vmatpush.msra.mxu1 %v21336_v12  ;;  %12310 = vmatmul.f32.vlgmr.msrb.gmra.mxu3 %v22891_v14 }
 0xa95   :  { %12426 = vmatpush.msra.mxu2 %v12239_v31  ;;  %12477 = vmatpush.msra.mxu3 %v21104_v6  ;;  %v22968_v6 = vand.u32 4294901760, %v21229_v43 }
 0xa96   :  { %12567 = vmatmul.f32.vlgmr.msrb.gmra.mxu1 %v18972_v16  ;;  %12593 = vmatmul.f32.vlgmr.msra.gmra.mxu0 %v22948_v13 }
 0xa97   :  { %12430 = vmatpush.msra.mxu2 %v22966_v62  ;;  %12479 = vmatpush.msra.mxu3 %v21114_v59  ;;  %v22970_v59 = vand.u32 4294901760, %v21250_v35 }
 0xa98   :  { %12664 = vmatpush.msrb.mxu1 %v21322_v20 }
 0xa99   :  { %12434 = vmatpush.msra.mxu2 %v22967_v22  ;;  %12481 = vmatpush.msra.mxu3 %v21122_v28  ;;  %v22971_v28 = vand.u32 4294901760, %v21266_v36  ;;  %v11568_v13 = vpop.f32.mrf.mxu1 }
 0xa9a   :  { %12666 = vmatpush.msrb.mxu1 %v21336_v12 }
 0xa9b   :  { %12438 = vmatpush.msra.mxu2 %v22968_v6  ;;  %12483 = vmatpush.msra.mxu3 %v21140_v5  ;;  %v11365_v5 = vpop.f32.mrf.mxu0 }
 0xa9d   :  { %12442 = vmatpush.msra.mxu2 %v22969_v23  ;;  %12485 = vmatpush.msra.mxu3 %v21154_v29  ;;  %v11311_v29 = vpop.f32.mrf.mxu3 }
 0xa9e   :  { %12618 = vmatmul.f32.vlgmr.msra.gmra.mxu1 %v22956_v11  ;;  %12645 = vmatmul.f32.vlgmr.msrb.gmra.mxu0 %v18972_v16 }
 0xa9f   :  { %12446 = vmatpush.msra.mxu2 %v22970_v59  ;;  %12487 = vmatpush.msra.mxu3 %v21164_v3 }
 0xaa1   :  { %12450 = vmatpush.msra.mxu2 %v22971_v28  ;;  %12489 = vmatpush.msra.mxu3 %v21177_v1 }
 0xaa3   :  { %12454 = vmatpush.msra.mxu2 %v12281_v44  ;;  %12491 = vmatpush.msra.mxu3 %v21195_v53  ;;  %v11537_v3 = vpop.f32.mrf.mxu0 }
 0xaa5   :  { %12458 = vmatpush.msra.mxu2 %v12287_v41  ;;  %12493 = vmatpush.msra.mxu3 %v21206_v63  ;;  %v11619_v63 = vpop.f32.mrf.mxu1 }
 0xaa6   :  { %12668 = vmatmul.f32.vlgmr.msrb.gmra.mxu1 %v18972_v16  ;;  %v11210_v16 = vpop.f32.mrf.mxu2 }
 0xaa7   :  { %12462 = vmatpush.msra.mxu2 %v12293_v50  ;;  %12495 = vmatpush.msra.mxu3 %v21223_v0  ;;  %v11211_v39 = vadd.f32 %v11210_v16, %v22922_v52 }
 0xaa9   :  { %12466 = vmatpush.msra.mxu2 %v12299_v21  ;;  %12497 = vmatpush.msra.mxu3 %v21236_v37  ;;  %v11312_v46 = vadd.f32 %v11311_v29, %v11211_v39 }
 0xaab   :  { %12470 = vmatpush.msra.mxu2 %v12305_v10  ;;  %12499 = vmatpush.msra.mxu3 %v21262_v51  ;;  %v11366_v55 = vadd.f32 %v11365_v5, %v11312_v46  ;;  %v11594_v48 = vpop.f32.mrf.mxu0 }
 0xaac   :  { %12472 = vmatmul.f32.vlgmr.msra.gmra.mxu2 %v22891_v14 }
 0xaad   :  { %12501 = vmatpush.msra.mxu3 %v21278_v7  ;;  %v11405_v1 = vadd.f32 %v11404_v40, %v11366_v55 }
 0xaaf   :  { %12503 = vmatpush.msra.mxu3 %v21291_v15 }
 0xab1   :  { %12505 = vmatpush.msra.mxu3 %v21314_v60 }
 0xab3   :  { %12507 = vmatpush.msra.mxu3 %v21331_v61  ;;  %v11646_v31 = vpop.f32.mrf.mxu0 }
 0xab4   :  { %12509 = vmatmul.f32.vlgmr.msra.gmra.mxu3 %v22891_v14  ;;  %v12833_v14 = vld [vmem:[%s21477_s0 + $0x20] sm:$0xff] }
 0xab6   :  { %v11473_v17 = vpop.f32.mrf.mxu2 }
 0xab7   :  { %v11474_v9 = vadd.f32 %v11473_v17, %v11405_v1 }
 0xabb   :  { %v11710_v36 = vpop.f32.mrf.mxu0 }
 0xabc   :  { %v11669_v32 = vpop.f32.mrf.mxu1  ;;  %v11711_v7 = vadd.f32 %v11710_v36, %v22922_v52 }
 0xabf   :  { %v11510_v53 = vpop.f32.mrf.mxu3 }
 0xac0   :  { %v11511_v8 = vadd.f32 %v11510_v53, %v11474_v9 }
 0xac2   :  { %v11538_v49 = vadd.f32 %v11537_v3, %v11511_v8 }
 0xac4   :  { %v11569_v11 = vadd.f32 %v11568_v13, %v11538_v49 }
 0xac5   :  { %v11811_v18 = vpop.f32.mrf.mxu1 }
 0xac6   :  { %v11595_v0 = vadd.f32 %v11594_v48, %v11569_v11  ;;  %v11812_v15 = vadd.f32 %v11811_v18, %v11711_v7 }
 0xac8   :  { %v11620_v43 = vadd.f32 %v11619_v63, %v11595_v0 }
 0xaca   :  { %v11647_v37 = vadd.f32 %v11646_v31, %v11620_v43 }
 0xacc   :  { %v11670_v35 = vadd.f32 %v11669_v32, %v11647_v37 }
 0xace   :  { %v12676_v51 = vadd.f32 %v12833_v14, %v11670_v35 }
 0xad0   :  { %12683 = vst [vmem:[%s21486_s9 + $0x20] sm:$0xff] %v12676_v51 }
 0xad9   :  { %v11865_v41 = vpop.f32.mrf.mxu2 }
 0xada   :  { %v11866_v54 = vadd.f32 %v11865_v41, %v11812_v15 }
 0xae1   :  { %v11904_v57 = vpop.f32.mrf.mxu3 }
 0xae2   :  { %v11905_v60 = vadd.f32 %v11904_v57, %v11866_v54  ;;  %v12037_v61 = vpop.f32.mrf.mxu2 }
 0xae4   :  { %v11973_v20 = vpop.f32.mrf.mxu0 }
 0xae5   :  { %v11974_v2 = vadd.f32 %v11973_v20, %v11905_v60 }
 0xae8   :  { %v12010_v12 = vpop.f32.mrf.mxu1 }
 0xae9   :  { %v12011_v30 = vadd.f32 %v12010_v12, %v11974_v2  ;;  %v12068_v44 = vpop.f32.mrf.mxu3 }
 0xaeb   :  { %v12038_v4 = vadd.f32 %v12037_v61, %v12011_v30  ;;  %v12094_v50 = vpop.f32.mrf.mxu2 }
 0xaed   :  { %v12069_v25 = vadd.f32 %v12068_v44, %v12038_v4 }
 0xaef   :  { %v12095_v21 = vadd.f32 %v12094_v50, %v12069_v25 }
 0xaf2   :  { %v12119_v45 = vpop.f32.mrf.mxu3 }
 0xaf3   :  { %v12120_v26 = vadd.f32 %v12119_v45, %v12095_v21 }
 0xaf6   :  { %v12146_v56 = vpop.f32.mrf.mxu2 }
 0xaf7   :  { %v12147_v33 = vadd.f32 %v12146_v56, %v12120_v26 }
 0xafc   :  { %v12169_v10 = vpop.f32.mrf.mxu3 }
 0xafd   :  { %v12170_v47 = vadd.f32 %v12169_v10, %v12147_v33 }
 0xaff   :  { %v12677_v58 = vadd.f32 %v12834_v38, %v12170_v47 }
 0xb01   :  { %12684 = vst [vmem:[%s21486_s9 + $0x28] sm:$0xff] %v12677_v58  ;;  %v12365_v24 = vpop.f32.mrf.mxu0 }
 0xb0a   :  { %v12404_v27 = vpop.f32.mrf.mxu1  ;;  %v12537_v62 = vpop.f32.mrf.mxu0 }
 0xb0d   :  { %v12210_v42 = vpop.f32.mrf.mxu2 }
 0xb0e   :  { %v12211_v19 = vadd.f32 %v12210_v42, %v22922_v52  ;;  %v12835_v52 = vld [vmem:[%s21477_s0 + $0x30] sm:$0xff] }
 0xb13   :  { %v12568_v6 = vpop.f32.mrf.mxu1  ;;  %v12594_v5 = vpop.f32.mrf.mxu0 }
 0xb17   :  { %v12311_v34 = vpop.f32.mrf.mxu3 }
 0xb18   :  { %v12312_v22 = vadd.f32 %v12311_v34, %v12211_v19 }
 0xb1a   :  { %v12366_v23 = vadd.f32 %v12365_v24, %v12312_v22 }
 0xb1b   :  { %v12619_v29 = vpop.f32.mrf.mxu1  ;;  %v12646_v55 = vpop.f32.mrf.mxu0 }
 0xb1c   :  { %v12405_v28 = vadd.f32 %v12404_v27, %v12366_v23 }
 0xb23   :  { %v12669_v1 = vpop.f32.mrf.mxu1 }
 0xb2f   :  { %v12473_v59 = vpop.f32.mrf.mxu2 }
 0xb30   :  { %v12474_v40 = vadd.f32 %v12473_v59, %v12405_v28 }
 0xb37   :  { %v12510_v16 = vpop.f32.mrf.mxu3 }
 0xb38   :  { %v12511_v39 = vadd.f32 %v12510_v16, %v12474_v40 }
 0xb3a   :  { %v12538_v46 = vadd.f32 %v12537_v62, %v12511_v39 }
 0xb3c   :  { %v12569_v3 = vadd.f32 %v12568_v6, %v12538_v46 }
 0xb3e   :  { %v12595_v13 = vadd.f32 %v12594_v5, %v12569_v3 }
 0xb40   :  { %v12620_v17 = vadd.f32 %v12619_v29, %v12595_v13 }
 0xb42   :  { %v12647_v9 = vadd.f32 %v12646_v55, %v12620_v17 }
 0xb44   :  { %v12670_v48 = vadd.f32 %v12669_v1, %v12647_v9 }
 0xb46   :  { %v12678_v53 = vadd.f32 %v12835_v52, %v12670_v48 }
 0xb48   :  { %12685 = vst [vmem:[%s21486_s9 + $0x30] sm:$0xff] %v12678_v53 }

</bundles_post_ra>
